<compile_context>
chip_gen: v7x
topology: tpu7x:2x2x1
jax: 0.10.0
libtpu: 0.0.40
codegen_flags: <defaults>
</compile_context>

<pallas_src>
import jax
import jax.numpy as jnp
from jax.experimental import pallas as pl
from jax.experimental.pallas import tpu as pltpu


# ------------------------------ Pallas kernel ------------------------------ #

def _inception_kernel(x_ref, wa_ref, wb_ref, w34_ref, w4b_ref,
                      b1b_ref, b2b_ref, bib_ref, b34b_ref, b4b_ref,
                      o_ref, pad2_ref, pad34_ref, pad4_ref):
    # x_ref/o_ref: (BN, H, W, 128).  pad*_ref: (BN, H+2, W+2, C) halo scratch.
    BN, H, W, _ = x_ref.shape
    M = BN * H * W
    f32 = jnp.float32
    odt = o_ref.dtype

    # Zero only the 1-pixel halo borders; the interiors are fully overwritten
    # every grid step, so no full-buffer clears.
    for ref in (pad2_ref, pad34_ref, pad4_ref):
        bn_, hp2, wp2, c = ref.shape
        zrow = jnp.zeros((bn_, 1, wp2, c), ref.dtype)
        zcol = jnp.zeros((bn_, hp2, 1, c), ref.dtype)
        ref[:, 0:1, :, :] = zrow
        ref[:, hp2 - 1:hp2, :, :] = zrow
        ref[:, :, 0:1, :] = zcol
        ref[:, :, wp2 - 1:wp2, :] = zcol

    xv = x_ref[...].reshape(M, 128)

    # ---- Stage 1a: branch1 + branch2(pre-pool) 1x1 convs (scales folded) ----
    ya = jnp.dot(xv, wa_ref[...], preferred_element_type=f32)          # (M, 64)
    b1 = jnp.maximum(ya[:, 0:32] + b1b_ref[...], 0.0)                  # branch 1 done
    # Branch-2 pre-pool values (BN scale and 1/9 already folded into weights).
    pad2_ref[:, 1:H + 1, 1:W + 1, :] = ya[:, 32:64].reshape(BN, H, W, 32)

    # ---- Stage 1b: branch3/branch4 leading 1x1 convs (48 tight channels) ----
    yb = jnp.dot(xv, wb_ref[...], preferred_element_type=f32)          # (M, 48)
    yi = jnp.maximum(yb + bib_ref[...], 0.0)
    pad34_ref[:, 1:H + 1, 1:W + 1, :] = (
        yi.reshape(BN, H, W, 48).astype(pad34_ref.dtype))

    # ---- Branch 2: 3x3 avg-pool as separable shifted sums ----
    row = (pad2_ref[:, :, 0:W, :] + pad2_ref[:, :, 1:W + 1, :]
           + pad2_ref[:, :, 2:W + 2, :])                               # (BN, H+2, W, 32)
    pooled = (row[:, 0:H] + row[:, 1:H + 1] + row[:, 2:H + 2]).reshape(M, 32)
    b2 = jnp.maximum(pooled + b2b_ref[...], 0.0)

    # ---- Branch 3's 3x3 + branch 4's first 3x3, fused: 9 per-tap matmuls ----
    acc34 = jnp.zeros((M, 64), f32)
    for t in range(9):
        dy, dx = t // 3, t % 3
        tap = pad34_ref[:, dy:dy + H, dx:dx + W, :].reshape(M, 48)
        acc34 = acc34 + jnp.dot(tap, w34_ref[t], preferred_element_type=f32)
    y34 = jnp.maximum(acc34 + b34b_ref[...], 0.0)
    b3 = y34[:, 0:32]

    # ---- Branch 4 second 3x3: intermediate never leaves VMEM ----
    pad4_ref[:, 1:H + 1, 1:W + 1, :] = (
        y34[:, 32:64].reshape(BN, H, W, 32).astype(pad4_ref.dtype))
    acc4 = jnp.zeros((M, 32), f32)
    for t in range(9):
        dy, dx = t // 3, t % 3
        tap = pad4_ref[:, dy:dy + H, dx:dx + W, :].reshape(M, 32)
        acc4 = acc4 + jnp.dot(tap, w4b_ref[t], preferred_element_type=f32)
    b4 = jnp.maximum(acc4 + b4b_ref[...], 0.0)

    # ---- Single lane-dense 128-channel output store ----
    out = jnp.concatenate([b1, b2, b3, b4], axis=-1)                   # (M, 128)
    o_ref[...] = out.reshape(BN, H, W, 128).astype(odt)


# ----------------------------- Parameter packing ---------------------------- #

def pack_inception_params(p, compute_dtype=jnp.float32):
    """Fold BN scales into conv weights; lay out weights for the kernel."""
    f32 = jnp.float32

    def fold(w, s):  # fold per-output-channel BN scale into the conv weight
        return w * s[None, :] if w.ndim == 2 else w * s[None, None, None, :]

    # Stage-1a columns: [branch1 (32) | branch2 pre-pool (32, 1/9 folded)].
    wa = jnp.concatenate([fold(p['b1_w'], p['b1_s']),
                          fold(p['b2_w'], p['b2_s'] / 9.0)], axis=1)     # (128, 64)
    # Stage-1b columns: [branch3 1x1 (24) | branch4 1x1 (24)] -- tight, no pad.
    wb = jnp.concatenate([fold(p['b3_w1'], p['b3_s1']),
                          fold(p['b4_w1'], p['b4_s1'])], axis=1)         # (128, 48)

    # Per-tap block-diagonal fused 3x3 weights for branch3 + branch4 (first).
    w34 = jnp.zeros((3, 3, 48, 64), f32)
    w34 = w34.at[:, :, 0:24, 0:32].set(fold(p['b3_w2'], p['b3_s2']))
    w34 = w34.at[:, :, 24:48, 32:64].set(fold(p['b4_w2'], p['b4_s2']))
    w34 = w34.reshape(9, 48, 64)
    # Per-tap weights for branch4's second 3x3.
    w4b = fold(p['b4_w3'], p['b4_s3']).reshape(9, 32, 32)

    return dict(
        wa=wa.astype(compute_dtype), wb=wb.astype(compute_dtype),
        w34=w34.astype(compute_dtype), w4b=w4b.astype(compute_dtype),
        b1b=p['b1_b'][None, :].astype(f32),
        b2b=p['b2_b'][None, :].astype(f32),
        bib=jnp.concatenate([p['b3_b1'], p['b4_b1']])[None, :].astype(f32),
        b34b=jnp.concatenate([p['b3_b2'], p['b4_b2']])[None, :].astype(f32),
        b4bb=p['b4_b3'][None, :].astype(f32),
    )


# ------------------------------ Forward wrapper ----------------------------- #

def _pick_batch_block(n, h, w, itemsize):
    # Batch-block small feature maps so M = bn*H*W >= ~2048, but keep the x
    # block under ~2 MiB so the per-step footprint (double-buffered in/out +
    # scratch) stays small even on v7x's 64 MiB VMEM.
    bn = 1
    for cand in range(1, n + 1):
        if n % cand:
            continue
        if cand * h * w * 128 * itemsize > 2 * 1024 * 1024:
            break
        bn = cand
        if cand * h * w >= 2048:
            break
    return bn


def inception_forward_nhwc(params, x_nhwc, compute_dtype=jnp.float32):
    """Preferred entry point: NHWC in / NHWC out, no layout transposes."""
    fused = pack_inception_params(params, compute_dtype)
    x = x_nhwc.astype(compute_dtype)
    N, H, W, Cin = x.shape
    assert Cin == 128, "Inception expects 128 input channels"

    itemsize = jnp.dtype(compute_dtype).itemsize
    bn = _pick_batch_block(N, H, W, itemsize)

    # Rough VMEM footprint estimate; only raise the scoped limit if needed.
    block_bytes = bn * H * W * 128 * itemsize
    scratch_bytes = bn * (H + 2) * (W + 2) * (32 * 4 + (48 + 32) * itemsize)
    work_bytes = bn * H * W * (64 + 48 + 64 + 32 + 128) * 4
    est = 4 * block_bytes + scratch_bytes + work_bytes + (2 << 20)
    vmem_limit = None
    if est > 32 * 1024 * 1024:
        # TODO(synk): beyond ~64 MiB (v7x VMEM) switch to row-halo tiling
        #             inside an image instead of raising the limit further.
        vmem_limit = int(min(2 * est, 100 * 1024 * 1024))

    out = pl.pallas_call(
        _inception_kernel,
        out_shape=jax.ShapeDtypeStruct((N, H, W, 128), compute_dtype),
        grid=(N // bn,),
        in_specs=[
            pl.BlockSpec((bn, H, W, 128), lambda n: (n, 0, 0, 0)),    # x
            pl.BlockSpec((128, 64), lambda n: (0, 0)),                # wa
            pl.BlockSpec((128, 48), lambda n: (0, 0)),                # wb
            pl.BlockSpec((9, 48, 64), lambda n: (0, 0, 0)),           # w34
            pl.BlockSpec((9, 32, 32), lambda n: (0, 0, 0)),           # w4b
            pl.BlockSpec((1, 32), lambda n: (0, 0)),                  # b1 bias
            pl.BlockSpec((1, 32), lambda n: (0, 0)),                  # b2 bias
            pl.BlockSpec((1, 48), lambda n: (0, 0)),                  # b3/b4 1x1 bias
            pl.BlockSpec((1, 64), lambda n: (0, 0)),                  # fused 3x3 bias
            pl.BlockSpec((1, 32), lambda n: (0, 0)),                  # b4 2nd 3x3 bias
        ],
        out_specs=pl.BlockSpec((bn, H, W, 128), lambda n: (n, 0, 0, 0)),
        scratch_shapes=[
            pltpu.VMEM((bn, H + 2, W + 2, 32), jnp.float32),   # branch-2 pre-pool (f32)
            pltpu.VMEM((bn, H + 2, W + 2, 48), compute_dtype), # b3/b4 1x1 halo
            pltpu.VMEM((bn, H + 2, W + 2, 32), compute_dtype), # b4 first-3x3 halo
        ],
        compiler_params=pltpu.CompilerParams(
            dimension_semantics=("parallel",),
            vmem_limit_bytes=vmem_limit),
    )(x, fused['wa'], fused['wb'], fused['w34'], fused['w4b'],
      fused['b1b'], fused['b2b'], fused['bib'], fused['b34b'], fused['b4bb'])
    return out


def inception_forward(params, x_nchw, compute_dtype=jnp.float32):
    # NCHW compatibility wrapper (matches the PyTorch module interface).
    # NOTE: prefer inception_forward_nhwc in an NHWC model to avoid these
    # layout transposes around the kernel.
    x = jnp.transpose(x_nchw, (0, 2, 3, 1))
    out = inception_forward_nhwc(params, x, compute_dtype)
    return jnp.transpose(out, (0, 3, 1, 2)).astype(x_nchw.dtype)


# ------------------------- Parameters (deterministic) ----------------------- #

def _bn_fold(key, c):
    k1, k2, k3, k4 = jax.random.split(key, 4)
    gamma = 1.0 + 0.1 * jax.random.normal(k1, (c,), jnp.float32)
    beta = 0.1 * jax.random.normal(k2, (c,), jnp.float32)
    mean = 0.1 * jax.random.normal(k3, (c,), jnp.float32)
    var = 1.0 + 0.1 * jnp.abs(jax.random.normal(k4, (c,), jnp.float32))
    scale = gamma * jax.lax.rsqrt(var + 1e-5)
    bias = beta - mean * scale
    return scale, bias


def init_params(key):
    ks = jax.random.split(key, 14)

    def conv_w(k, kh, kw, cin, cout):
        fan_in = kh * kw * cin
        return (jax.random.normal(k, (kh, kw, cin, cout), jnp.float32)
                * (2.0 / fan_in) ** 0.5)

    p = {}
    p['b1_w'] = conv_w(ks[0], 1, 1, 128, 32).reshape(128, 32)
    p['b1_s'], p['b1_b'] = _bn_fold(ks[1], 32)
    p['b2_w'] = conv_w(ks[2], 1, 1, 128, 32).reshape(128, 32)
    p['b2_s'], p['b2_b'] = _bn_fold(ks[3], 32)
    p['b3_w1'] = conv_w(ks[4], 1, 1, 128, 24).reshape(128, 24)
    p['b3_s1'], p['b3_b1'] = _bn_fold(ks[5], 24)
    p['b3_w2'] = conv_w(ks[6], 3, 3, 24, 32)
    p['b3_s2'], p['b3_b2'] = _bn_fold(ks[7], 32)
    p['b4_w1'] = conv_w(ks[8], 1, 1, 128, 24).reshape(128, 24)
    p['b4_s1'], p['b4_b1'] = _bn_fold(ks[9], 24)
    p['b4_w2'] = conv_w(ks[10], 3, 3, 24, 32)
    p['b4_s2'], p['b4_b2'] = _bn_fold(ks[11], 32)
    p['b4_w3'] = conv_w(ks[12], 3, 3, 32, 32)
    p['b4_s3'], p['b4_b3'] = _bn_fold(ks[13], 32)
    return p


# ------------------------ Pure-JAX reference (check) ------------------------ #

def _ref_conv_bn_relu(x, w_hwio, scale, bias, padding):
    y = jax.lax.conv_general_dilated(
        x, w_hwio, window_strides=(1, 1), padding=padding,
        dimension_numbers=('NHWC', 'HWIO', 'NHWC'),
        precision=jax.lax.Precision.HIGHEST)
    return jnp.maximum(y * scale + bias, 0.0)


def inception_reference(params, x_nchw):
    x = jnp.transpose(x_nchw, (0, 2, 3, 1))
    x1 = _ref_conv_bn_relu(x, params['b1_w'].reshape(1, 1, 128, 32),
                           params['b1_s'], params['b1_b'], 'VALID')
    xp = jax.lax.reduce_window(x, 0.0, jax.lax.add, (1, 3, 3, 1), (1, 1, 1, 1),
                               [(0, 0), (1, 1), (1, 1), (0, 0)]) / 9.0
    x2 = _ref_conv_bn_relu(xp, params['b2_w'].reshape(1, 1, 128, 32),
                           params['b2_s'], params['b2_b'], 'VALID')
    x3 = _ref_conv_bn_relu(x, params['b3_w1'].reshape(1, 1, 128, 24),
                           params['b3_s1'], params['b3_b1'], 'VALID')
    x3 = _ref_conv_bn_relu(x3, params['b3_w2'], params['b3_s2'], params['b3_b2'], 'SAME')
    x4 = _ref_conv_bn_relu(x, params['b4_w1'].reshape(1, 1, 128, 24),
                           params['b4_s1'], params['b4_b1'], 'VALID')
    x4 = _ref_conv_bn_relu(x4, params['b4_w2'], params['b4_s2'], params['b4_b2'], 'SAME')
    x4 = _ref_conv_bn_relu(x4, params['b4_w3'], params['b4_s3'], params['b4_b3'], 'SAME')
    out = jnp.concatenate([x1, x2, x3, x4], axis=-1)
    return jnp.transpose(out, (0, 3, 1, 2))


# ---------------------------------- main ------------------------------------ #

if __name__ == "__main__":
    key = jax.random.PRNGKey(0)
    kx, kp = jax.random.split(key)
    # Small but shape-consistent: the Inception block requires 128 input channels.
    x = jax.random.normal(kx, (2, 128, 16, 16), jnp.float32)  # NCHW, like PyTorch
    params = init_params(kp)

    ref = inception_reference(params, x)

    # f32 path (strict check).
    out = jax.block_until_ready(jax.jit(inception_forward)(params, x))
    assert out.shape == (2, 128, 16, 16), out.shape
    max_err = float(jnp.max(jnp.abs(out - ref)))
    assert jnp.allclose(out, ref, atol=1e-3, rtol=1e-3), max_err

    # bf16 activation/weight path (f32 accumulation) -- fast path on v6e/v7x.
    fwd_bf16 = jax.jit(
        lambda p, v: inception_forward(p, v, compute_dtype=jnp.bfloat16))
    out_bf16 = jax.block_until_ready(fwd_bf16(params, x))
    max_err_bf16 = float(jnp.max(jnp.abs(out_bf16 - ref)))
    assert jnp.allclose(out_bf16, ref, atol=2e-1, rtol=1e-1), max_err_bf16

    print("KERNEL_OK")
</pallas_src>

<mosaic_0001>
module attributes {stable_mosaic.version = 11 : i64} {
  func.func @_inception_kernel(%arg0: i32, %arg1: memref<2x16x16x128xf32, #tpu.memory_space<vmem>>, %arg2: memref<128x64xf32, #tpu.memory_space<vmem>>, %arg3: memref<128x48xf32, #tpu.memory_space<vmem>>, %arg4: memref<9x48x64xf32, #tpu.memory_space<vmem>>, %arg5: memref<9x32x32xf32, #tpu.memory_space<vmem>>, %arg6: memref<1x32xf32, #tpu.memory_space<vmem>>, %arg7: memref<1x32xf32, #tpu.memory_space<vmem>>, %arg8: memref<1x48xf32, #tpu.memory_space<vmem>>, %arg9: memref<1x64xf32, #tpu.memory_space<vmem>>, %arg10: memref<1x32xf32, #tpu.memory_space<vmem>>, %arg11: memref<2x16x16x128xf32, #tpu.memory_space<vmem>>, %arg12: memref<2x18x18x32xf32, #tpu.memory_space<vmem>>, %arg13: memref<2x18x18x48xf32, #tpu.memory_space<vmem>>, %arg14: memref<2x18x18x32xf32, #tpu.memory_space<vmem>>) attributes {dimension_semantics = [#tpu.dimension_semantics<parallel>], iteration_bounds = array<i64: 1>, scalar_prefetch = 0 : i64, scratch_operands = 3 : i64, tpu.core_type = #tpu.core_type<tc>, window_params = [{transform_indices = @transform_0, window_bounds = array<i64: 2, 16, 16, 128>}, {pipeline_mode = #tpu.pipeline_mode<synchronous>, transform_indices = @transform_1, window_bounds = array<i64: 128, 64>}, {pipeline_mode = #tpu.pipeline_mode<synchronous>, transform_indices = @transform_2, window_bounds = array<i64: 128, 48>}, {pipeline_mode = #tpu.pipeline_mode<synchronous>, transform_indices = @transform_3, window_bounds = array<i64: 9, 48, 64>}, {pipeline_mode = #tpu.pipeline_mode<synchronous>, transform_indices = @transform_4, window_bounds = array<i64: 9, 32, 32>}, {pipeline_mode = #tpu.pipeline_mode<synchronous>, transform_indices = @transform_5, window_bounds = array<i64: 1, 32>}, {pipeline_mode = #tpu.pipeline_mode<synchronous>, transform_indices = @transform_6, window_bounds = array<i64: 1, 32>}, {pipeline_mode = #tpu.pipeline_mode<synchronous>, transform_indices = @transform_7, window_bounds = array<i64: 1, 48>}, {pipeline_mode = #tpu.pipeline_mode<synchronous>, transform_indices = @transform_8, window_bounds = array<i64: 1, 64>}, {pipeline_mode = #tpu.pipeline_mode<synchronous>, transform_indices = @transform_9, window_bounds = array<i64: 1, 32>}, {transform_indices = @transform_10, window_bounds = array<i64: 2, 16, 16, 128>}]} {
    %cst = arith.constant 0.000000e+00 : f32
    %0 = vector.broadcast %cst : f32 to vector<2x1x18x32xf32>
    %cst_0 = arith.constant 0.000000e+00 : f32
    %1 = vector.broadcast %cst_0 : f32 to vector<2x18x1x32xf32>
    %c0 = arith.constant 0 : index
    %c0_1 = arith.constant 0 : index
    %c0_2 = arith.constant 0 : index
    %c0_3 = arith.constant 0 : index
    %2 = vector.load %arg12[%c0, %c0_1, %c0_2, %c0_3] : memref<2x18x18x32xf32, #tpu.memory_space<vmem>>, vector<2x1x18x32xf32>
    tpu.vector_store %arg12[%c0, %c0_1, %c0_2, %c0_3], %0 {strides = array<i32>} : memref<2x18x18x32xf32, #tpu.memory_space<vmem>>, vector<2x1x18x32xf32>,
    %c0_4 = arith.constant 0 : index
    %c17 = arith.constant 17 : index
    %c0_5 = arith.constant 0 : index
    %c0_6 = arith.constant 0 : index
    %3 = vector.load %arg12[%c0_4, %c17, %c0_5, %c0_6] : memref<2x18x18x32xf32, #tpu.memory_space<vmem>>, vector<2x1x18x32xf32>
    tpu.vector_store %arg12[%c0_4, %c17, %c0_5, %c0_6], %0 {strides = array<i32>} : memref<2x18x18x32xf32, #tpu.memory_space<vmem>>, vector<2x1x18x32xf32>,
    %c0_7 = arith.constant 0 : index
    %c0_8 = arith.constant 0 : index
    %c0_9 = arith.constant 0 : index
    %c0_10 = arith.constant 0 : index
    %4 = vector.load %arg12[%c0_7, %c0_8, %c0_9, %c0_10] : memref<2x18x18x32xf32, #tpu.memory_space<vmem>>, vector<2x18x1x32xf32>
    tpu.vector_store %arg12[%c0_7, %c0_8, %c0_9, %c0_10], %1 {strides = array<i32>} : memref<2x18x18x32xf32, #tpu.memory_space<vmem>>, vector<2x18x1x32xf32>,
    %c0_11 = arith.constant 0 : index
    %c0_12 = arith.constant 0 : index
    %c17_13 = arith.constant 17 : index
    %c0_14 = arith.constant 0 : index
    %5 = vector.load %arg12[%c0_11, %c0_12, %c17_13, %c0_14] : memref<2x18x18x32xf32, #tpu.memory_space<vmem>>, vector<2x18x1x32xf32>
    tpu.vector_store %arg12[%c0_11, %c0_12, %c17_13, %c0_14], %1 {strides = array<i32>} : memref<2x18x18x32xf32, #tpu.memory_space<vmem>>, vector<2x18x1x32xf32>,
    %cst_15 = arith.constant 0.000000e+00 : f32
    %6 = vector.broadcast %cst_15 : f32 to vector<2x1x18x48xf32>
    %cst_16 = arith.constant 0.000000e+00 : f32
    %7 = vector.broadcast %cst_16 : f32 to vector<2x18x1x48xf32>
    %c0_17 = arith.constant 0 : index
    %c0_18 = arith.constant 0 : index
    %c0_19 = arith.constant 0 : index
    %c0_20 = arith.constant 0 : index
    %8 = vector.load %arg13[%c0_17, %c0_18, %c0_19, %c0_20] : memref<2x18x18x48xf32, #tpu.memory_space<vmem>>, vector<2x1x18x48xf32>
    tpu.vector_store %arg13[%c0_17, %c0_18, %c0_19, %c0_20], %6 {strides = array<i32>} : memref<2x18x18x48xf32, #tpu.memory_space<vmem>>, vector<2x1x18x48xf32>,
    %c0_21 = arith.constant 0 : index
    %c17_22 = arith.constant 17 : index
    %c0_23 = arith.constant 0 : index
    %c0_24 = arith.constant 0 : index
    %9 = vector.load %arg13[%c0_21, %c17_22, %c0_23, %c0_24] : memref<2x18x18x48xf32, #tpu.memory_space<vmem>>, vector<2x1x18x48xf32>
    tpu.vector_store %arg13[%c0_21, %c17_22, %c0_23, %c0_24], %6 {strides = array<i32>} : memref<2x18x18x48xf32, #tpu.memory_space<vmem>>, vector<2x1x18x48xf32>,
    %c0_25 = arith.constant 0 : index
    %c0_26 = arith.constant 0 : index
    %c0_27 = arith.constant 0 : index
    %c0_28 = arith.constant 0 : index
    %10 = vector.load %arg13[%c0_25, %c0_26, %c0_27, %c0_28] : memref<2x18x18x48xf32, #tpu.memory_space<vmem>>, vector<2x18x1x48xf32>
    tpu.vector_store %arg13[%c0_25, %c0_26, %c0_27, %c0_28], %7 {strides = array<i32>} : memref<2x18x18x48xf32, #tpu.memory_space<vmem>>, vector<2x18x1x48xf32>,
    %c0_29 = arith.constant 0 : index
    %c0_30 = arith.constant 0 : index
    %c17_31 = arith.constant 17 : index
    %c0_32 = arith.constant 0 : index
    %11 = vector.load %arg13[%c0_29, %c0_30, %c17_31, %c0_32] : memref<2x18x18x48xf32, #tpu.memory_space<vmem>>, vector<2x18x1x48xf32>
    tpu.vector_store %arg13[%c0_29, %c0_30, %c17_31, %c0_32], %7 {strides = array<i32>} : memref<2x18x18x48xf32, #tpu.memory_space<vmem>>, vector<2x18x1x48xf32>,
    %cst_33 = arith.constant 0.000000e+00 : f32
    %12 = vector.broadcast %cst_33 : f32 to vector<2x1x18x32xf32>
    %cst_34 = arith.constant 0.000000e+00 : f32
    %13 = vector.broadcast %cst_34 : f32 to vector<2x18x1x32xf32>
    %c0_35 = arith.constant 0 : index
    %c0_36 = arith.constant 0 : index
    %c0_37 = arith.constant 0 : index
    %c0_38 = arith.constant 0 : index
    %14 = vector.load %arg14[%c0_35, %c0_36, %c0_37, %c0_38] : memref<2x18x18x32xf32, #tpu.memory_space<vmem>>, vector<2x1x18x32xf32>
    tpu.vector_store %arg14[%c0_35, %c0_36, %c0_37, %c0_38], %12 {strides = array<i32>} : memref<2x18x18x32xf32, #tpu.memory_space<vmem>>, vector<2x1x18x32xf32>,
    %c0_39 = arith.constant 0 : index
    %c17_40 = arith.constant 17 : index
    %c0_41 = arith.constant 0 : index
    %c0_42 = arith.constant 0 : index
    %15 = vector.load %arg14[%c0_39, %c17_40, %c0_41, %c0_42] : memref<2x18x18x32xf32, #tpu.memory_space<vmem>>, vector<2x1x18x32xf32>
    tpu.vector_store %arg14[%c0_39, %c17_40, %c0_41, %c0_42], %12 {strides = array<i32>} : memref<2x18x18x32xf32, #tpu.memory_space<vmem>>, vector<2x1x18x32xf32>,
    %c0_43 = arith.constant 0 : index
    %c0_44 = arith.constant 0 : index
    %c0_45 = arith.constant 0 : index
    %c0_46 = arith.constant 0 : index
    %16 = vector.load %arg14[%c0_43, %c0_44, %c0_45, %c0_46] : memref<2x18x18x32xf32, #tpu.memory_space<vmem>>, vector<2x18x1x32xf32>
    tpu.vector_store %arg14[%c0_43, %c0_44, %c0_45, %c0_46], %13 {strides = array<i32>} : memref<2x18x18x32xf32, #tpu.memory_space<vmem>>, vector<2x18x1x32xf32>,
    %c0_47 = arith.constant 0 : index
    %c0_48 = arith.constant 0 : index
    %c17_49 = arith.constant 17 : index
    %c0_50 = arith.constant 0 : index
    %17 = vector.load %arg14[%c0_47, %c0_48, %c17_49, %c0_50] : memref<2x18x18x32xf32, #tpu.memory_space<vmem>>, vector<2x18x1x32xf32>
    tpu.vector_store %arg14[%c0_47, %c0_48, %c17_49, %c0_50], %13 {strides = array<i32>} : memref<2x18x18x32xf32, #tpu.memory_space<vmem>>, vector<2x18x1x32xf32>,
    %c0_51 = arith.constant 0 : index
    %c0_52 = arith.constant 0 : index
    %c0_53 = arith.constant 0 : index
    %c0_54 = arith.constant 0 : index
    %18 = vector.load %arg1[%c0_51, %c0_52, %c0_53, %c0_54] : memref<2x16x16x128xf32, #tpu.memory_space<vmem>>, vector<2x16x16x128xf32>
    %19 = vector.shape_cast %18 : vector<2x16x16x128xf32> to vector<512x128xf32>
    %c0_55 = arith.constant 0 : index
    %c0_56 = arith.constant 0 : index
    %20 = vector.load %arg2[%c0_55, %c0_56] : memref<128x64xf32, #tpu.memory_space<vmem>>, vector<128x64xf32>
    %cst_57 = arith.constant dense<0.000000e+00> : vector<512x64xf32>
    %21 = tpu.matmul %19, %20, %cst_57 {dimension_numbers = #tpu.dot_dimension_numbers<[1], [0], [0], [1], [0, 0, 1, 1], [], []>} : vector<512x128xf32>, vector<128x64xf32>, vector<512x64xf32> -> vector<512x64xf32>
    %22 = vector.extract_strided_slice %21 {offsets = [0, 0], sizes = [512, 32], strides = [1, 1]} : vector<512x64xf32> to vector<512x32xf32>
    %c0_58 = arith.constant 0 : index
    %c0_59 = arith.constant 0 : index
    %23 = vector.load %arg6[%c0_58, %c0_59] : memref<1x32xf32, #tpu.memory_space<vmem>>, vector<1x32xf32>
    %24 = vector.broadcast %23 : vector<1x32xf32> to vector<512x32xf32>
    %25 = arith.addf %22, %24 : vector<512x32xf32>
    %cst_60 = arith.constant 0.000000e+00 : f32
    %26 = vector.broadcast %cst_60 : f32 to vector<512x32xf32>
    %27 = arith.maximumf %25, %26 : vector<512x32xf32>
    %28 = vector.extract_strided_slice %21 {offsets = [0, 32], sizes = [512, 32], strides = [1, 1]} : vector<512x64xf32> to vector<512x32xf32>
    %29 = vector.shape_cast %28 : vector<512x32xf32> to vector<2x16x16x32xf32>
    %c0_61 = arith.constant 0 : index
    %c1 = arith.constant 1 : index
    %c1_62 = arith.constant 1 : index
    %c0_63 = arith.constant 0 : index
    %30 = vector.load %arg12[%c0_61, %c1, %c1_62, %c0_63] : memref<2x18x18x32xf32, #tpu.memory_space<vmem>>, vector<2x16x16x32xf32>
    tpu.vector_store %arg12[%c0_61, %c1, %c1_62, %c0_63], %29 {strides = array<i32>} : memref<2x18x18x32xf32, #tpu.memory_space<vmem>>, vector<2x16x16x32xf32>,
    %c0_64 = arith.constant 0 : index
    %c0_65 = arith.constant 0 : index
    %31 = vector.load %arg3[%c0_64, %c0_65] : memref<128x48xf32, #tpu.memory_space<vmem>>, vector<128x48xf32>
    %cst_66 = arith.constant dense<0.000000e+00> : vector<512x48xf32>
    %32 = tpu.matmul %19, %31, %cst_66 {dimension_numbers = #tpu.dot_dimension_numbers<[1], [0], [0], [1], [0, 0, 1, 1], [], []>} : vector<512x128xf32>, vector<128x48xf32>, vector<512x48xf32> -> vector<512x48xf32>
    %c0_67 = arith.constant 0 : index
    %c0_68 = arith.constant 0 : index
    %33 = vector.load %arg8[%c0_67, %c0_68] : memref<1x48xf32, #tpu.memory_space<vmem>>, vector<1x48xf32>
    %34 = vector.broadcast %33 : vector<1x48xf32> to vector<512x48xf32>
    %35 = arith.addf %32, %34 : vector<512x48xf32>
    %cst_69 = arith.constant 0.000000e+00 : f32
    %36 = vector.broadcast %cst_69 : f32 to vector<512x48xf32>
    %37 = arith.maximumf %35, %36 : vector<512x48xf32>
    %38 = vector.shape_cast %37 : vector<512x48xf32> to vector<2x16x16x48xf32>
    %c0_70 = arith.constant 0 : index
    %c1_71 = arith.constant 1 : index
    %c1_72 = arith.constant 1 : index
    %c0_73 = arith.constant 0 : index
    %39 = vector.load %arg13[%c0_70, %c1_71, %c1_72, %c0_73] : memref<2x18x18x48xf32, #tpu.memory_space<vmem>>, vector<2x16x16x48xf32>
    tpu.vector_store %arg13[%c0_70, %c1_71, %c1_72, %c0_73], %38 {strides = array<i32>} : memref<2x18x18x48xf32, #tpu.memory_space<vmem>>, vector<2x16x16x48xf32>,
    %c0_74 = arith.constant 0 : index
    %c0_75 = arith.constant 0 : index
    %c0_76 = arith.constant 0 : index
    %c0_77 = arith.constant 0 : index
    %40 = vector.load %arg12[%c0_74, %c0_75, %c0_76, %c0_77] : memref<2x18x18x32xf32, #tpu.memory_space<vmem>>, vector<2x18x16x32xf32>
    %c0_78 = arith.constant 0 : index
    %c0_79 = arith.constant 0 : index
    %c1_80 = arith.constant 1 : index
    %c0_81 = arith.constant 0 : index
    %41 = vector.load %arg12[%c0_78, %c0_79, %c1_80, %c0_81] : memref<2x18x18x32xf32, #tpu.memory_space<vmem>>, vector<2x18x16x32xf32>
    %42 = arith.addf %40, %41 : vector<2x18x16x32xf32>
    %c0_82 = arith.constant 0 : index
    %c0_83 = arith.constant 0 : index
    %c2 = arith.constant 2 : index
    %c0_84 = arith.constant 0 : index
    %43 = vector.load %arg12[%c0_82, %c0_83, %c2, %c0_84] : memref<2x18x18x32xf32, #tpu.memory_space<vmem>>, vector<2x18x16x32xf32>
    %44 = arith.addf %42, %43 : vector<2x18x16x32xf32>
    %45 = vector.extract_strided_slice %44 {offsets = [0, 0, 0, 0], sizes = [2, 16, 16, 32], strides = [1, 1, 1, 1]} : vector<2x18x16x32xf32> to vector<2x16x16x32xf32>
    %46 = vector.extract_strided_slice %44 {offsets = [0, 1, 0, 0], sizes = [2, 16, 16, 32], strides = [1, 1, 1, 1]} : vector<2x18x16x32xf32> to vector<2x16x16x32xf32>
    %47 = arith.addf %45, %46 : vector<2x16x16x32xf32>
    %48 = vector.extract_strided_slice %44 {offsets = [0, 2, 0, 0], sizes = [2, 16, 16, 32], strides = [1, 1, 1, 1]} : vector<2x18x16x32xf32> to vector<2x16x16x32xf32>
    %49 = arith.addf %47, %48 : vector<2x16x16x32xf32>
    %50 = vector.shape_cast %49 : vector<2x16x16x32xf32> to vector<512x32xf32>
    %c0_85 = arith.constant 0 : index
    %c0_86 = arith.constant 0 : index
    %51 = vector.load %arg7[%c0_85, %c0_86] : memref<1x32xf32, #tpu.memory_space<vmem>>, vector<1x32xf32>
    %52 = vector.broadcast %51 : vector<1x32xf32> to vector<512x32xf32>
    %53 = arith.addf %50, %52 : vector<512x32xf32>
    %cst_87 = arith.constant 0.000000e+00 : f32
    %54 = vector.broadcast %cst_87 : f32 to vector<512x32xf32>
    %55 = arith.maximumf %53, %54 : vector<512x32xf32>
    %cst_88 = arith.constant 0.000000e+00 : f32
    %56 = vector.broadcast %cst_88 : f32 to vector<512x64xf32>
    %c0_89 = arith.constant 0 : index
    %c0_90 = arith.constant 0 : index
    %c0_91 = arith.constant 0 : index
    %c0_92 = arith.constant 0 : index
    %57 = vector.load %arg13[%c0_89, %c0_90, %c0_91, %c0_92] : memref<2x18x18x48xf32, #tpu.memory_space<vmem>>, vector<2x16x16x48xf32>
    %58 = vector.shape_cast %57 : vector<2x16x16x48xf32> to vector<512x48xf32>
    %c0_93 = arith.constant 0 : index
    %c0_94 = arith.constant 0 : index
    %c0_95 = arith.constant 0 : index
    %59 = vector.load %arg4[%c0_93, %c0_94, %c0_95] : memref<9x48x64xf32, #tpu.memory_space<vmem>>, vector<1x48x64xf32>
    %60 = vector.shape_cast %59 : vector<1x48x64xf32> to vector<48x64xf32>
    %cst_96 = arith.constant dense<0.000000e+00> : vector<512x64xf32>
    %61 = tpu.matmul %58, %60, %cst_96 {dimension_numbers = #tpu.dot_dimension_numbers<[1], [0], [0], [1], [0, 0, 1, 1], [], []>} : vector<512x48xf32>, vector<48x64xf32>, vector<512x64xf32> -> vector<512x64xf32>
    %62 = arith.addf %56, %61 : vector<512x64xf32>
    %c0_97 = arith.constant 0 : index
    %c0_98 = arith.constant 0 : index
    %c1_99 = arith.constant 1 : index
    %c0_100 = arith.constant 0 : index
    %63 = vector.load %arg13[%c0_97, %c0_98, %c1_99, %c0_100] : memref<2x18x18x48xf32, #tpu.memory_space<vmem>>, vector<2x16x16x48xf32>
    %64 = vector.shape_cast %63 : vector<2x16x16x48xf32> to vector<512x48xf32>
    %c1_101 = arith.constant 1 : index
    %c0_102 = arith.constant 0 : index
    %c0_103 = arith.constant 0 : index
    %65 = vector.load %arg4[%c1_101, %c0_102, %c0_103] : memref<9x48x64xf32, #tpu.memory_space<vmem>>, vector<1x48x64xf32>
    %66 = vector.shape_cast %65 : vector<1x48x64xf32> to vector<48x64xf32>
    %cst_104 = arith.constant dense<0.000000e+00> : vector<512x64xf32>
    %67 = tpu.matmul %64, %66, %cst_104 {dimension_numbers = #tpu.dot_dimension_numbers<[1], [0], [0], [1], [0, 0, 1, 1], [], []>} : vector<512x48xf32>, vector<48x64xf32>, vector<512x64xf32> -> vector<512x64xf32>
    %68 = arith.addf %62, %67 : vector<512x64xf32>
    %c0_105 = arith.constant 0 : index
    %c0_106 = arith.constant 0 : index
    %c2_107 = arith.constant 2 : index
    %c0_108 = arith.constant 0 : index
    %69 = vector.load %arg13[%c0_105, %c0_106, %c2_107, %c0_108] : memref<2x18x18x48xf32, #tpu.memory_space<vmem>>, vector<2x16x16x48xf32>
    %70 = vector.shape_cast %69 : vector<2x16x16x48xf32> to vector<512x48xf32>
    %c2_109 = arith.constant 2 : index
    %c0_110 = arith.constant 0 : index
    %c0_111 = arith.constant 0 : index
    %71 = vector.load %arg4[%c2_109, %c0_110, %c0_111] : memref<9x48x64xf32, #tpu.memory_space<vmem>>, vector<1x48x64xf32>
    %72 = vector.shape_cast %71 : vector<1x48x64xf32> to vector<48x64xf32>
    %cst_112 = arith.constant dense<0.000000e+00> : vector<512x64xf32>
    %73 = tpu.matmul %70, %72, %cst_112 {dimension_numbers = #tpu.dot_dimension_numbers<[1], [0], [0], [1], [0, 0, 1, 1], [], []>} : vector<512x48xf32>, vector<48x64xf32>, vector<512x64xf32> -> vector<512x64xf32>
    %74 = arith.addf %68, %73 : vector<512x64xf32>
    %c0_113 = arith.constant 0 : index
    %c1_114 = arith.constant 1 : index
    %c0_115 = arith.constant 0 : index
    %c0_116 = arith.constant 0 : index
    %75 = vector.load %arg13[%c0_113, %c1_114, %c0_115, %c0_116] : memref<2x18x18x48xf32, #tpu.memory_space<vmem>>, vector<2x16x16x48xf32>
    %76 = vector.shape_cast %75 : vector<2x16x16x48xf32> to vector<512x48xf32>
    %c3 = arith.constant 3 : index
    %c0_117 = arith.constant 0 : index
    %c0_118 = arith.constant 0 : index
    %77 = vector.load %arg4[%c3, %c0_117, %c0_118] : memref<9x48x64xf32, #tpu.memory_space<vmem>>, vector<1x48x64xf32>
    %78 = vector.shape_cast %77 : vector<1x48x64xf32> to vector<48x64xf32>
    %cst_119 = arith.constant dense<0.000000e+00> : vector<512x64xf32>
    %79 = tpu.matmul %76, %78, %cst_119 {dimension_numbers = #tpu.dot_dimension_numbers<[1], [0], [0], [1], [0, 0, 1, 1], [], []>} : vector<512x48xf32>, vector<48x64xf32>, vector<512x64xf32> -> vector<512x64xf32>
    %80 = arith.addf %74, %79 : vector<512x64xf32>
    %c0_120 = arith.constant 0 : index
    %c1_121 = arith.constant 1 : index
    %c1_122 = arith.constant 1 : index
    %c0_123 = arith.constant 0 : index
    %81 = vector.load %arg13[%c0_120, %c1_121, %c1_122, %c0_123] : memref<2x18x18x48xf32, #tpu.memory_space<vmem>>, vector<2x16x16x48xf32>
    %82 = vector.shape_cast %81 : vector<2x16x16x48xf32> to vector<512x48xf32>
    %c4 = arith.constant 4 : index
    %c0_124 = arith.constant 0 : index
    %c0_125 = arith.constant 0 : index
    %83 = vector.load %arg4[%c4, %c0_124, %c0_125] : memref<9x48x64xf32, #tpu.memory_space<vmem>>, vector<1x48x64xf32>
    %84 = vector.shape_cast %83 : vector<1x48x64xf32> to vector<48x64xf32>
    %cst_126 = arith.constant dense<0.000000e+00> : vector<512x64xf32>
    %85 = tpu.matmul %82, %84, %cst_126 {dimension_numbers = #tpu.dot_dimension_numbers<[1], [0], [0], [1], [0, 0, 1, 1], [], []>} : vector<512x48xf32>, vector<48x64xf32>, vector<512x64xf32> -> vector<512x64xf32>
    %86 = arith.addf %80, %85 : vector<512x64xf32>
    %c0_127 = arith.constant 0 : index
    %c1_128 = arith.constant 1 : index
    %c2_129 = arith.constant 2 : index
    %c0_130 = arith.constant 0 : index
    %87 = vector.load %arg13[%c0_127, %c1_128, %c2_129, %c0_130] : memref<2x18x18x48xf32, #tpu.memory_space<vmem>>, vector<2x16x16x48xf32>
    %88 = vector.shape_cast %87 : vector<2x16x16x48xf32> to vector<512x48xf32>
    %c5 = arith.constant 5 : index
    %c0_131 = arith.constant 0 : index
    %c0_132 = arith.constant 0 : index
    %89 = vector.load %arg4[%c5, %c0_131, %c0_132] : memref<9x48x64xf32, #tpu.memory_space<vmem>>, vector<1x48x64xf32>
    %90 = vector.shape_cast %89 : vector<1x48x64xf32> to vector<48x64xf32>
    %cst_133 = arith.constant dense<0.000000e+00> : vector<512x64xf32>
    %91 = tpu.matmul %88, %90, %cst_133 {dimension_numbers = #tpu.dot_dimension_numbers<[1], [0], [0], [1], [0, 0, 1, 1], [], []>} : vector<512x48xf32>, vector<48x64xf32>, vector<512x64xf32> -> vector<512x64xf32>
    %92 = arith.addf %86, %91 : vector<512x64xf32>
    %c0_134 = arith.constant 0 : index
    %c2_135 = arith.constant 2 : index
    %c0_136 = arith.constant 0 : index
    %c0_137 = arith.constant 0 : index
    %93 = vector.load %arg13[%c0_134, %c2_135, %c0_136, %c0_137] : memref<2x18x18x48xf32, #tpu.memory_space<vmem>>, vector<2x16x16x48xf32>
    %94 = vector.shape_cast %93 : vector<2x16x16x48xf32> to vector<512x48xf32>
    %c6 = arith.constant 6 : index
    %c0_138 = arith.constant 0 : index
    %c0_139 = arith.constant 0 : index
    %95 = vector.load %arg4[%c6, %c0_138, %c0_139] : memref<9x48x64xf32, #tpu.memory_space<vmem>>, vector<1x48x64xf32>
    %96 = vector.shape_cast %95 : vector<1x48x64xf32> to vector<48x64xf32>
    %cst_140 = arith.constant dense<0.000000e+00> : vector<512x64xf32>
    %97 = tpu.matmul %94, %96, %cst_140 {dimension_numbers = #tpu.dot_dimension_numbers<[1], [0], [0], [1], [0, 0, 1, 1], [], []>} : vector<512x48xf32>, vector<48x64xf32>, vector<512x64xf32> -> vector<512x64xf32>
    %98 = arith.addf %92, %97 : vector<512x64xf32>
    %c0_141 = arith.constant 0 : index
    %c2_142 = arith.constant 2 : index
    %c1_143 = arith.constant 1 : index
    %c0_144 = arith.constant 0 : index
    %99 = vector.load %arg13[%c0_141, %c2_142, %c1_143, %c0_144] : memref<2x18x18x48xf32, #tpu.memory_space<vmem>>, vector<2x16x16x48xf32>
    %100 = vector.shape_cast %99 : vector<2x16x16x48xf32> to vector<512x48xf32>
    %c7 = arith.constant 7 : index
    %c0_145 = arith.constant 0 : index
    %c0_146 = arith.constant 0 : index
    %101 = vector.load %arg4[%c7, %c0_145, %c0_146] : memref<9x48x64xf32, #tpu.memory_space<vmem>>, vector<1x48x64xf32>
    %102 = vector.shape_cast %101 : vector<1x48x64xf32> to vector<48x64xf32>
    %cst_147 = arith.constant dense<0.000000e+00> : vector<512x64xf32>
    %103 = tpu.matmul %100, %102, %cst_147 {dimension_numbers = #tpu.dot_dimension_numbers<[1], [0], [0], [1], [0, 0, 1, 1], [], []>} : vector<512x48xf32>, vector<48x64xf32>, vector<512x64xf32> -> vector<512x64xf32>
    %104 = arith.addf %98, %103 : vector<512x64xf32>
    %c0_148 = arith.constant 0 : index
    %c2_149 = arith.constant 2 : index
    %c2_150 = arith.constant 2 : index
    %c0_151 = arith.constant 0 : index
    %105 = vector.load %arg13[%c0_148, %c2_149, %c2_150, %c0_151] : memref<2x18x18x48xf32, #tpu.memory_space<vmem>>, vector<2x16x16x48xf32>
    %106 = vector.shape_cast %105 : vector<2x16x16x48xf32> to vector<512x48xf32>
    %c8 = arith.constant 8 : index
    %c0_152 = arith.constant 0 : index
    %c0_153 = arith.constant 0 : index
    %107 = vector.load %arg4[%c8, %c0_152, %c0_153] : memref<9x48x64xf32, #tpu.memory_space<vmem>>, vector<1x48x64xf32>
    %108 = vector.shape_cast %107 : vector<1x48x64xf32> to vector<48x64xf32>
    %cst_154 = arith.constant dense<0.000000e+00> : vector<512x64xf32>
    %109 = tpu.matmul %106, %108, %cst_154 {dimension_numbers = #tpu.dot_dimension_numbers<[1], [0], [0], [1], [0, 0, 1, 1], [], []>} : vector<512x48xf32>, vector<48x64xf32>, vector<512x64xf32> -> vector<512x64xf32>
    %110 = arith.addf %104, %109 : vector<512x64xf32>
    %c0_155 = arith.constant 0 : index
    %c0_156 = arith.constant 0 : index
    %111 = vector.load %arg9[%c0_155, %c0_156] : memref<1x64xf32, #tpu.memory_space<vmem>>, vector<1x64xf32>
    %112 = vector.broadcast %111 : vector<1x64xf32> to vector<512x64xf32>
    %113 = arith.addf %110, %112 : vector<512x64xf32>
    %cst_157 = arith.constant 0.000000e+00 : f32
    %114 = vector.broadcast %cst_157 : f32 to vector<512x64xf32>
    %115 = arith.maximumf %113, %114 : vector<512x64xf32>
    %116 = vector.extract_strided_slice %115 {offsets = [0, 0], sizes = [512, 32], strides = [1, 1]} : vector<512x64xf32> to vector<512x32xf32>
    %117 = vector.extract_strided_slice %115 {offsets = [0, 32], sizes = [512, 32], strides = [1, 1]} : vector<512x64xf32> to vector<512x32xf32>
    %118 = vector.shape_cast %117 : vector<512x32xf32> to vector<2x16x16x32xf32>
    %c0_158 = arith.constant 0 : index
    %c1_159 = arith.constant 1 : index
    %c1_160 = arith.constant 1 : index
    %c0_161 = arith.constant 0 : index
    %119 = vector.load %arg14[%c0_158, %c1_159, %c1_160, %c0_161] : memref<2x18x18x32xf32, #tpu.memory_space<vmem>>, vector<2x16x16x32xf32>
    tpu.vector_store %arg14[%c0_158, %c1_159, %c1_160, %c0_161], %118 {strides = array<i32>} : memref<2x18x18x32xf32, #tpu.memory_space<vmem>>, vector<2x16x16x32xf32>,
    %cst_162 = arith.constant 0.000000e+00 : f32
    %120 = vector.broadcast %cst_162 : f32 to vector<512x32xf32>
    %c0_163 = arith.constant 0 : index
    %c0_164 = arith.constant 0 : index
    %c0_165 = arith.constant 0 : index
    %c0_166 = arith.constant 0 : index
    %121 = vector.load %arg14[%c0_163, %c0_164, %c0_165, %c0_166] : memref<2x18x18x32xf32, #tpu.memory_space<vmem>>, vector<2x16x16x32xf32>
    %122 = vector.shape_cast %121 : vector<2x16x16x32xf32> to vector<512x32xf32>
    %c0_167 = arith.constant 0 : index
    %c0_168 = arith.constant 0 : index
    %c0_169 = arith.constant 0 : index
    %123 = vector.load %arg5[%c0_167, %c0_168, %c0_169] : memref<9x32x32xf32, #tpu.memory_space<vmem>>, vector<1x32x32xf32>
    %124 = vector.shape_cast %123 : vector<1x32x32xf32> to vector<32x32xf32>
    %cst_170 = arith.constant dense<0.000000e+00> : vector<512x32xf32>
    %125 = tpu.matmul %122, %124, %cst_170 {dimension_numbers = #tpu.dot_dimension_numbers<[1], [0], [0], [1], [0, 0, 1, 1], [], []>} : vector<512x32xf32>, vector<32x32xf32>, vector<512x32xf32> -> vector<512x32xf32>
    %126 = arith.addf %120, %125 : vector<512x32xf32>
    %c0_171 = arith.constant 0 : index
    %c0_172 = arith.constant 0 : index
    %c1_173 = arith.constant 1 : index
    %c0_174 = arith.constant 0 : index
    %127 = vector.load %arg14[%c0_171, %c0_172, %c1_173, %c0_174] : memref<2x18x18x32xf32, #tpu.memory_space<vmem>>, vector<2x16x16x32xf32>
    %128 = vector.shape_cast %127 : vector<2x16x16x32xf32> to vector<512x32xf32>
    %c1_175 = arith.constant 1 : index
    %c0_176 = arith.constant 0 : index
    %c0_177 = arith.constant 0 : index
    %129 = vector.load %arg5[%c1_175, %c0_176, %c0_177] : memref<9x32x32xf32, #tpu.memory_space<vmem>>, vector<1x32x32xf32>
    %130 = vector.shape_cast %129 : vector<1x32x32xf32> to vector<32x32xf32>
    %cst_178 = arith.constant dense<0.000000e+00> : vector<512x32xf32>
    %131 = tpu.matmul %128, %130, %cst_178 {dimension_numbers = #tpu.dot_dimension_numbers<[1], [0], [0], [1], [0, 0, 1, 1], [], []>} : vector<512x32xf32>, vector<32x32xf32>, vector<512x32xf32> -> vector<512x32xf32>
    %132 = arith.addf %126, %131 : vector<512x32xf32>
    %c0_179 = arith.constant 0 : index
    %c0_180 = arith.constant 0 : index
    %c2_181 = arith.constant 2 : index
    %c0_182 = arith.constant 0 : index
    %133 = vector.load %arg14[%c0_179, %c0_180, %c2_181, %c0_182] : memref<2x18x18x32xf32, #tpu.memory_space<vmem>>, vector<2x16x16x32xf32>
    %134 = vector.shape_cast %133 : vector<2x16x16x32xf32> to vector<512x32xf32>
    %c2_183 = arith.constant 2 : index
    %c0_184 = arith.constant 0 : index
    %c0_185 = arith.constant 0 : index
    %135 = vector.load %arg5[%c2_183, %c0_184, %c0_185] : memref<9x32x32xf32, #tpu.memory_space<vmem>>, vector<1x32x32xf32>
    %136 = vector.shape_cast %135 : vector<1x32x32xf32> to vector<32x32xf32>
    %cst_186 = arith.constant dense<0.000000e+00> : vector<512x32xf32>
    %137 = tpu.matmul %134, %136, %cst_186 {dimension_numbers = #tpu.dot_dimension_numbers<[1], [0], [0], [1], [0, 0, 1, 1], [], []>} : vector<512x32xf32>, vector<32x32xf32>, vector<512x32xf32> -> vector<512x32xf32>
    %138 = arith.addf %132, %137 : vector<512x32xf32>
    %c0_187 = arith.constant 0 : index
    %c1_188 = arith.constant 1 : index
    %c0_189 = arith.constant 0 : index
    %c0_190 = arith.constant 0 : index
    %139 = vector.load %arg14[%c0_187, %c1_188, %c0_189, %c0_190] : memref<2x18x18x32xf32, #tpu.memory_space<vmem>>, vector<2x16x16x32xf32>
    %140 = vector.shape_cast %139 : vector<2x16x16x32xf32> to vector<512x32xf32>
    %c3_191 = arith.constant 3 : index
    %c0_192 = arith.constant 0 : index
    %c0_193 = arith.constant 0 : index
    %141 = vector.load %arg5[%c3_191, %c0_192, %c0_193] : memref<9x32x32xf32, #tpu.memory_space<vmem>>, vector<1x32x32xf32>
    %142 = vector.shape_cast %141 : vector<1x32x32xf32> to vector<32x32xf32>
    %cst_194 = arith.constant dense<0.000000e+00> : vector<512x32xf32>
    %143 = tpu.matmul %140, %142, %cst_194 {dimension_numbers = #tpu.dot_dimension_numbers<[1], [0], [0], [1], [0, 0, 1, 1], [], []>} : vector<512x32xf32>, vector<32x32xf32>, vector<512x32xf32> -> vector<512x32xf32>
    %144 = arith.addf %138, %143 : vector<512x32xf32>
    %c0_195 = arith.constant 0 : index
    %c1_196 = arith.constant 1 : index
    %c1_197 = arith.constant 1 : index
    %c0_198 = arith.constant 0 : index
    %145 = vector.load %arg14[%c0_195, %c1_196, %c1_197, %c0_198] : memref<2x18x18x32xf32, #tpu.memory_space<vmem>>, vector<2x16x16x32xf32>
    %146 = vector.shape_cast %145 : vector<2x16x16x32xf32> to vector<512x32xf32>
    %c4_199 = arith.constant 4 : index
    %c0_200 = arith.constant 0 : index
    %c0_201 = arith.constant 0 : index
    %147 = vector.load %arg5[%c4_199, %c0_200, %c0_201] : memref<9x32x32xf32, #tpu.memory_space<vmem>>, vector<1x32x32xf32>
    %148 = vector.shape_cast %147 : vector<1x32x32xf32> to vector<32x32xf32>
    %cst_202 = arith.constant dense<0.000000e+00> : vector<512x32xf32>
    %149 = tpu.matmul %146, %148, %cst_202 {dimension_numbers = #tpu.dot_dimension_numbers<[1], [0], [0], [1], [0, 0, 1, 1], [], []>} : vector<512x32xf32>, vector<32x32xf32>, vector<512x32xf32> -> vector<512x32xf32>
    %150 = arith.addf %144, %149 : vector<512x32xf32>
    %c0_203 = arith.constant 0 : index
    %c1_204 = arith.constant 1 : index
    %c2_205 = arith.constant 2 : index
    %c0_206 = arith.constant 0 : index
    %151 = vector.load %arg14[%c0_203, %c1_204, %c2_205, %c0_206] : memref<2x18x18x32xf32, #tpu.memory_space<vmem>>, vector<2x16x16x32xf32>
    %152 = vector.shape_cast %151 : vector<2x16x16x32xf32> to vector<512x32xf32>
    %c5_207 = arith.constant 5 : index
    %c0_208 = arith.constant 0 : index
    %c0_209 = arith.constant 0 : index
    %153 = vector.load %arg5[%c5_207, %c0_208, %c0_209] : memref<9x32x32xf32, #tpu.memory_space<vmem>>, vector<1x32x32xf32>
    %154 = vector.shape_cast %153 : vector<1x32x32xf32> to vector<32x32xf32>
    %cst_210 = arith.constant dense<0.000000e+00> : vector<512x32xf32>
    %155 = tpu.matmul %152, %154, %cst_210 {dimension_numbers = #tpu.dot_dimension_numbers<[1], [0], [0], [1], [0, 0, 1, 1], [], []>} : vector<512x32xf32>, vector<32x32xf32>, vector<512x32xf32> -> vector<512x32xf32>
    %156 = arith.addf %150, %155 : vector<512x32xf32>
    %c0_211 = arith.constant 0 : index
    %c2_212 = arith.constant 2 : index
    %c0_213 = arith.constant 0 : index
    %c0_214 = arith.constant 0 : index
    %157 = vector.load %arg14[%c0_211, %c2_212, %c0_213, %c0_214] : memref<2x18x18x32xf32, #tpu.memory_space<vmem>>, vector<2x16x16x32xf32>
    %158 = vector.shape_cast %157 : vector<2x16x16x32xf32> to vector<512x32xf32>
    %c6_215 = arith.constant 6 : index
    %c0_216 = arith.constant 0 : index
    %c0_217 = arith.constant 0 : index
    %159 = vector.load %arg5[%c6_215, %c0_216, %c0_217] : memref<9x32x32xf32, #tpu.memory_space<vmem>>, vector<1x32x32xf32>
    %160 = vector.shape_cast %159 : vector<1x32x32xf32> to vector<32x32xf32>
    %cst_218 = arith.constant dense<0.000000e+00> : vector<512x32xf32>
    %161 = tpu.matmul %158, %160, %cst_218 {dimension_numbers = #tpu.dot_dimension_numbers<[1], [0], [0], [1], [0, 0, 1, 1], [], []>} : vector<512x32xf32>, vector<32x32xf32>, vector<512x32xf32> -> vector<512x32xf32>
    %162 = arith.addf %156, %161 : vector<512x32xf32>
    %c0_219 = arith.constant 0 : index
    %c2_220 = arith.constant 2 : index
    %c1_221 = arith.constant 1 : index
    %c0_222 = arith.constant 0 : index
    %163 = vector.load %arg14[%c0_219, %c2_220, %c1_221, %c0_222] : memref<2x18x18x32xf32, #tpu.memory_space<vmem>>, vector<2x16x16x32xf32>
    %164 = vector.shape_cast %163 : vector<2x16x16x32xf32> to vector<512x32xf32>
    %c7_223 = arith.constant 7 : index
    %c0_224 = arith.constant 0 : index
    %c0_225 = arith.constant 0 : index
    %165 = vector.load %arg5[%c7_223, %c0_224, %c0_225] : memref<9x32x32xf32, #tpu.memory_space<vmem>>, vector<1x32x32xf32>
    %166 = vector.shape_cast %165 : vector<1x32x32xf32> to vector<32x32xf32>
    %cst_226 = arith.constant dense<0.000000e+00> : vector<512x32xf32>
    %167 = tpu.matmul %164, %166, %cst_226 {dimension_numbers = #tpu.dot_dimension_numbers<[1], [0], [0], [1], [0, 0, 1, 1], [], []>} : vector<512x32xf32>, vector<32x32xf32>, vector<512x32xf32> -> vector<512x32xf32>
    %168 = arith.addf %162, %167 : vector<512x32xf32>
    %c0_227 = arith.constant 0 : index
    %c2_228 = arith.constant 2 : index
    %c2_229 = arith.constant 2 : index
    %c0_230 = arith.constant 0 : index
    %169 = vector.load %arg14[%c0_227, %c2_228, %c2_229, %c0_230] : memref<2x18x18x32xf32, #tpu.memory_space<vmem>>, vector<2x16x16x32xf32>
    %170 = vector.shape_cast %169 : vector<2x16x16x32xf32> to vector<512x32xf32>
    %c8_231 = arith.constant 8 : index
    %c0_232 = arith.constant 0 : index
    %c0_233 = arith.constant 0 : index
    %171 = vector.load %arg5[%c8_231, %c0_232, %c0_233] : memref<9x32x32xf32, #tpu.memory_space<vmem>>, vector<1x32x32xf32>
    %172 = vector.shape_cast %171 : vector<1x32x32xf32> to vector<32x32xf32>
    %cst_234 = arith.constant dense<0.000000e+00> : vector<512x32xf32>
    %173 = tpu.matmul %170, %172, %cst_234 {dimension_numbers = #tpu.dot_dimension_numbers<[1], [0], [0], [1], [0, 0, 1, 1], [], []>} : vector<512x32xf32>, vector<32x32xf32>, vector<512x32xf32> -> vector<512x32xf32>
    %174 = arith.addf %168, %173 : vector<512x32xf32>
    %c0_235 = arith.constant 0 : index
    %c0_236 = arith.constant 0 : index
    %175 = vector.load %arg10[%c0_235, %c0_236] : memref<1x32xf32, #tpu.memory_space<vmem>>, vector<1x32xf32>
    %176 = vector.broadcast %175 : vector<1x32xf32> to vector<512x32xf32>
    %177 = arith.addf %174, %176 : vector<512x32xf32>
    %cst_237 = arith.constant 0.000000e+00 : f32
    %178 = vector.broadcast %cst_237 : f32 to vector<512x32xf32>
    %179 = arith.maximumf %177, %178 : vector<512x32xf32>
    %180 = tpu.concatenate %27, %55, %116, %179 in 1 : vector<512x32xf32>, vector<512x32xf32>, vector<512x32xf32>, vector<512x32xf32> -> vector<512x128xf32>
    %181 = vector.shape_cast %180 : vector<512x128xf32> to vector<2x16x16x128xf32>
    %c0_238 = arith.constant 0 : index
    %c0_239 = arith.constant 0 : index
    %c0_240 = arith.constant 0 : index
    %c0_241 = arith.constant 0 : index
    %182 = vector.load %arg11[%c0_238, %c0_239, %c0_240, %c0_241] : memref<2x16x16x128xf32, #tpu.memory_space<vmem>>, vector<2x16x16x128xf32>
    tpu.vector_store %arg11[%c0_238, %c0_239, %c0_240, %c0_241], %181 {strides = array<i32>} : memref<2x16x16x128xf32, #tpu.memory_space<vmem>>, vector<2x16x16x128xf32>,
    return
  }
  func.func @transform_0(%arg0: i32) -> (i32, i32, i32, i32) {
    %c0_i32 = arith.constant 0 : i32
    %c0_i32_0 = arith.constant 0 : i32
    %c0_i32_1 = arith.constant 0 : i32
    %c0_i32_2 = arith.constant 0 : i32
    return %arg0, %c0_i32, %c0_i32_0, %c0_i32_1 : i32, i32, i32, i32
  }
  func.func @transform_1(%arg0: i32) -> (i32, i32) {
    %c0_i32 = arith.constant 0 : i32
    %c0_i32_0 = arith.constant 0 : i32
    %c0_i32_1 = arith.constant 0 : i32
    return %c0_i32, %c0_i32_0 : i32, i32
  }
  func.func @transform_2(%arg0: i32) -> (i32, i32) {
    %c0_i32 = arith.constant 0 : i32
    %c0_i32_0 = arith.constant 0 : i32
    %c0_i32_1 = arith.constant 0 : i32
    return %c0_i32, %c0_i32_0 : i32, i32
  }
  func.func @transform_3(%arg0: i32) -> (i32, i32, i32) {
    %c0_i32 = arith.constant 0 : i32
    %c0_i32_0 = arith.constant 0 : i32
    %c0_i32_1 = arith.constant 0 : i32
    %c0_i32_2 = arith.constant 0 : i32
    return %c0_i32, %c0_i32_0, %c0_i32_1 : i32, i32, i32
  }
  func.func @transform_4(%arg0: i32) -> (i32, i32, i32) {
    %c0_i32 = arith.constant 0 : i32
    %c0_i32_0 = arith.constant 0 : i32
    %c0_i32_1 = arith.constant 0 : i32
    %c0_i32_2 = arith.constant 0 : i32
    return %c0_i32, %c0_i32_0, %c0_i32_1 : i32, i32, i32
  }
  func.func @transform_5(%arg0: i32) -> (i32, i32) {
    %c0_i32 = arith.constant 0 : i32
    %c0_i32_0 = arith.constant 0 : i32
    %c0_i32_1 = arith.constant 0 : i32
    return %c0_i32, %c0_i32_0 : i32, i32
  }
  func.func @transform_6(%arg0: i32) -> (i32, i32) {
    %c0_i32 = arith.constant 0 : i32
    %c0_i32_0 = arith.constant 0 : i32
    %c0_i32_1 = arith.constant 0 : i32
    return %c0_i32, %c0_i32_0 : i32, i32
  }
  func.func @transform_7(%arg0: i32) -> (i32, i32) {
    %c0_i32 = arith.constant 0 : i32
    %c0_i32_0 = arith.constant 0 : i32
    %c0_i32_1 = arith.constant 0 : i32
    return %c0_i32, %c0_i32_0 : i32, i32
  }
  func.func @transform_8(%arg0: i32) -> (i32, i32) {
    %c0_i32 = arith.constant 0 : i32
    %c0_i32_0 = arith.constant 0 : i32
    %c0_i32_1 = arith.constant 0 : i32
    return %c0_i32, %c0_i32_0 : i32, i32
  }
  func.func @transform_9(%arg0: i32) -> (i32, i32) {
    %c0_i32 = arith.constant 0 : i32
    %c0_i32_0 = arith.constant 0 : i32
    %c0_i32_1 = arith.constant 0 : i32
    return %c0_i32, %c0_i32_0 : i32, i32
  }
  func.func @transform_10(%arg0: i32) -> (i32, i32, i32, i32) {
    %c0_i32 = arith.constant 0 : i32
    %c0_i32_0 = arith.constant 0 : i32
    %c0_i32_1 = arith.constant 0 : i32
    %c0_i32_2 = arith.constant 0 : i32
    return %arg0, %c0_i32, %c0_i32_0, %c0_i32_1 : i32, i32, i32, i32
  }
}

</mosaic_0001>

<bundles_post_ra>
// kernel: inception_forward.1
= control target key start
LH: loop header
LB: loop body
LE: loop exit
PB: predicated region body
PF: predicated region fallthrough
CT: control target
= control target key end

     0   :  { %s28491_s0 = inlined_call_operand.vmem [shape: f32[2,16,16,128], index: 0, kind: input, shape index: {}]   ;;  %s28492_s1 = inlined_call_operand.vmem [shape: f32[128,64], index: 1, kind: input, shape index: {}]   ;;  %s28493_s2 = inlined_call_operand.vmem [shape: f32[128,48], index: 2, kind: input, shape index: {}]   ;;  %s28494_s3 = inlined_call_operand.vmem [shape: f32[9,48,64], index: 3, kind: input, shape index: {}]   ;;  %s28495_s4 = inlined_call_operand.vmem [shape: f32[9,32,32], index: 4, kind: input, shape index: {}]   ;;  %s28496_s5 = inlined_call_operand.vmem [shape: f32[1,32], index: 5, kind: input, shape index: {}]   ;;  %s28497_s6 = inlined_call_operand.vmem [shape: f32[1,32], index: 6, kind: input, shape index: {}]   ;;  %s28498_s7 = inlined_call_operand.vmem [shape: f32[1,48], index: 7, kind: input, shape index: {}]   ;;  %s28499_s8 = inlined_call_operand.vmem [shape: f32[1,64], index: 8, kind: input, shape index: {}]   ;;  %s28500_s9 = inlined_call_operand.vmem [shape: f32[1,32], index: 9, kind: input, shape index: {}]   ;;  %s28501_s10 = inlined_call_operand.hbm [shape: f32[2,16,16,128], index: 10, kind: output, shape index: {}]  }
   0x1   :  { %v1218_v0 = vld [vmem:[%s28493_s2] sm:$0xff]  ;;  %v1219_v1 = vld [vmem:[%s28493_s2 + $0x8] sm:$0xff]  ;;  %v1220_v2 = vld [vmem:[%s28493_s2 + $0x10] sm:$0xff] }
   0x2   :  { %v21324_v3 = vpack.c.bf16 %v1219_v1, %v1218_v0  ;;  %v1221_v4 = vld [vmem:[%s28493_s2 + $0x18] sm:$0xff]  ;;  %v1222_v6 = vld [vmem:[%s28493_s2 + $0x20] sm:$0xff]  ;;  %v1223_v7 = vld [vmem:[%s28493_s2 + $0x28] sm:$0xff] }
   0x3   :  { %v21328_v5 = vpack.c.bf16 %v1221_v4, %v1220_v2  ;;  %v21332_v8 = vpack.c.bf16 %v1223_v7, %v1222_v6  ;;  %v297_v9 = vld [vmem:[%s28491_s0] sm:$0xff]  ;;  %v1224_v10 = vld [vmem:[%s28493_s2 + $0x30] sm:$0xff]  ;;  %v1225_v11 = vld [vmem:[%s28493_s2 + $0x38] sm:$0xff] }
   0x4   :  { %21325 = vmatprep.subr.bf16.mxu1 %v21324_v3  ;;  %19288 = vmatprep.mubr.f32.mxu1 %v297_v9  ;;  %v21336_v12 = vpack.c.bf16 %v1225_v11, %v1224_v10  ;;  %v1226_v13 = vld [vmem:[%s28493_s2 + $0x40] sm:$0xff]  ;;  %v1227_v14 = vld [vmem:[%s28493_s2 + $0x48] sm:$0xff]  ;;  %v1228_v16 = vld [vmem:[%s28493_s2 + $0x50] sm:$0xff] }
   0x5   :  { %21327 = vmatpush3.bf16.msra.mxu1 %v21324_v3  ;;  %19160 = vmatprep.mubr.f32.mxu0 %v297_v9  ;;  %v21340_v15 = vpack.c.bf16 %v1227_v14, %v1226_v13  ;;  %v1229_v17 = vld [vmem:[%s28493_s2 + $0x58] sm:$0xff]  ;;  %v361_v18 = vld [vmem:[%s28492_s1] sm:$0xff]  ;;  %v362_v19 = vld [vmem:[%s28492_s1 + $0x8] sm:$0xff] }
   0x6   :  { %21329 = vmatprep.subr.bf16.mxu1 %v21328_v5  ;;  %v21344_v20 = vpack.c.bf16 %v1229_v17, %v1228_v16  ;;  %v21292_v21 = vpack.c.bf16 %v362_v19, %v361_v18  ;;  %v363_v22 = vld [vmem:[%s28492_s1 + $0x10] sm:$0xff]  ;;  %v364_v23 = vld [vmem:[%s28492_s1 + $0x18] sm:$0xff]  ;;  %v1230_v24 = vld [vmem:[%s28493_s2 + $0x60] sm:$0xff] }
   0x7   :  { %v1231_v25 = vld [vmem:[%s28493_s2 + $0x68] sm:$0xff]  ;;  %v21296_v26 = vpack.c.bf16 %v364_v23, %v363_v22  ;;  %v365_v27 = vld [vmem:[%s28492_s1 + $0x20] sm:$0xff]  ;;  %v1232_v30 = vld [vmem:[%s28493_s2 + $0x70] sm:$0xff] }
   0x8   :  { %21293 = vmatprep.subr.bf16.mxu0 %v21292_v21  ;;  %v366_v28 = vld [vmem:[%s28492_s1 + $0x28] sm:$0xff]  ;;  %v21348_v29 = vpack.c.bf16 %v1231_v25, %v1230_v24  ;;  %v1233_v32 = vld [vmem:[%s28493_s2 + $0x78] sm:$0xff]  ;;  %v367_v33 = vld [vmem:[%s28492_s1 + $0x30] sm:$0xff] }
   0x9   :  { %21331 = vmatpush3.bf16.msra.mxu1 %v21328_v5  ;;  %21295 = vmatpush3.bf16.msra.mxu0 %v21292_v21  ;;  %v21300_v31 = vpack.c.bf16 %v366_v28, %v365_v27  ;;  %v368_v34 = vld [vmem:[%s28492_s1 + $0x38] sm:$0xff]  ;;  %v21352_v35 = vpack.c.bf16 %v1233_v32, %v1232_v30  ;;  %v369_v37 = vld [vmem:[%s28492_s1 + $0x40] sm:$0xff]  ;;  %v370_v38 = vld [vmem:[%s28492_s1 + $0x48] sm:$0xff] }
   0xa   :  { %21333 = vmatprep.subr.bf16.mxu1 %v21332_v8  ;;  %21297 = vmatprep.subr.bf16.mxu0 %v21296_v26  ;;  %v21304_v36 = vpack.c.bf16 %v368_v34, %v367_v33  ;;  %v21308_v39 = vpack.c.bf16 %v370_v38, %v369_v37  ;;  %v371_v40 = vld [vmem:[%s28492_s1 + $0x50] sm:$0xff]  ;;  %v372_v41 = vld [vmem:[%s28492_s1 + $0x58] sm:$0xff]  ;;  %v298_v42 = vld [vmem:[%s28491_s0 + $0x8] sm:$0xff] }
   0xb   :  { %v299_v43 = vld [vmem:[%s28491_s0 + $0x10] sm:$0xff]  ;;  %v21312_v44 = vpack.c.bf16 %v372_v41, %v371_v40 }
   0xd   :  { %21335 = vmatpush3.bf16.msra.mxu1 %v21332_v8  ;;  %21299 = vmatpush3.bf16.msra.mxu0 %v21296_v26 }
   0xe   :  { %21337 = vmatprep.subr.bf16.mxu1 %v21336_v12  ;;  %21301 = vmatprep.subr.bf16.mxu0 %v21300_v31 }
  0x11   :  { %21339 = vmatpush3.bf16.msra.mxu1 %v21336_v12  ;;  %21303 = vmatpush3.bf16.msra.mxu0 %v21300_v31 }
  0x12   :  { %21341 = vmatprep.subr.bf16.mxu1 %v21340_v15  ;;  %21305 = vmatprep.subr.bf16.mxu0 %v21304_v36 }
  0x15   :  { %21343 = vmatpush3.bf16.msra.mxu1 %v21340_v15  ;;  %21307 = vmatpush3.bf16.msra.mxu0 %v21304_v36 }
  0x16   :  { %21345 = vmatprep.subr.bf16.mxu1 %v21344_v20  ;;  %21309 = vmatprep.subr.bf16.mxu0 %v21308_v39 }
  0x19   :  { %21347 = vmatpush3.bf16.msra.mxu1 %v21344_v20 }
  0x1a   :  { %21349 = vmatprep.subr.bf16.mxu1 %v21348_v29 }
  0x1d   :  { %21351 = vmatpush3.bf16.msra.mxu1 %v21348_v29 }
  0x1e   :  { %21353 = vmatprep.subr.bf16.mxu1 %v21352_v35 }
  0x21   :  { %21355 = vmatpush3.bf16.msra.mxu1 %v21352_v35 }
  0x22   :  { %15 = vsyncpa [#allocation6], 0  ;;  %v373_v45 = vld [vmem:[%s28492_s1 + $0x60] sm:$0xff]  ;;  %v374_v46 = vld [vmem:[%s28492_s1 + $0x68] sm:$0xff]  ;;  %21311 = vmatpush3.bf16.msra.mxu0 %v21308_v39  ;;  %vm124_vm0 = vcmask 392192   ;;  %v28502_v39 = vmov 0.0  }
  0x23   :  { %v300_v47 = vld [vmem:[%s28491_s0 + $0x18] sm:$0xff]  ;;  %v301_v48 = vld [vmem:[%s28491_s0 + $0x20] sm:$0xff]  ;;  %21313 = vmatprep.subr.bf16.mxu0 %v21312_v44  ;;  %v21316_v49 = vpack.c.bf16 %v374_v46, %v373_v45  ;;  %v375_v50 = vld [vmem:[%s28492_s1 + $0x70] sm:$0xff]  ;;  %125 = vst.msk [vmem:[#allocation3] sm:$0xff] %vm124_vm0, %v28502_v39  ;;  %vm127_vm1 = vcmask 386048   ;;  %vm139_vm2 = vcmask 385024  }
  0x24   :  { %19289 = vmatmul.mubr.f32.vlgmr.msra.gmra.mrb[0].mxu1 %v298_v42  ;;  %v376_v51 = vld [vmem:[%s28492_s1 + $0x78] sm:$0xff]  ;;  %v302_v52 = vld [vmem:[%s28491_s0 + $0x28] sm:$0xff]  ;;  %v303_v53 = vld [vmem:[%s28491_s0 + $0x30] sm:$0xff]  ;;  %126 = vst.msk [vmem:[#allocation3 + $0x8] sm:$0xff] %vm124_vm0, %v28502_v39  ;;  %vm36_vm3 = vcmask 261120   ;;  %vm39_vm4 = vcmask 254976  }
  0x25   :  { %19291 = vmatprep.mubr.f32.mxu1 %v299_v43  ;;  %v21320_v54 = vpack.c.bf16 %v376_v51, %v375_v50  ;;  %v16492_v55 = vld [vmem:[%s28494_s3 + $0x30] sm:$0xff]  ;;  %v16493_v56 = vld [vmem:[%s28494_s3 + $0x38] sm:$0xff]  ;;  %v305_v58 = vld [vmem:[%s28491_s0 + $0x40] sm:$0xff]  ;;  %129 = vst.msk [vmem:[#allocation3 + $0x1b0] sm:$0xff] %vm124_vm0, %v28502_v39  ;;  %vm51_vm5 = vcmask 253952   ;;  %s22619_s1 = smov 32  }
  0x26   :  { %21315 = vmatpush3.bf16.msra.mxu0 %v21312_v44  ;;  %v304_v57 = vld [vmem:[%s28491_s0 + $0x38] sm:$0xff]  ;;  %v21356_v59 = vpack.c.bf16 %v16493_v56, %v16492_v55  ;;  %v16494_v60 = vld [vmem:[%s28494_s3 + $0x40] sm:$0xff]  ;;  %v16495_v61 = vld [vmem:[%s28494_s3 + $0x48] sm:$0xff]  ;;  %130 = vst.msk [vmem:[#allocation3 + $0x1b8] sm:$0xff] %vm124_vm0, %v28502_v39  ;;  %vm16279_vm6 = vcmask 523264   ;;  %vm16344_vm7 = vcmask 785408  }
  0x27   :  { %21317 = vmatprep.subr.bf16.mxu0 %v21316_v49  ;;  %v306_v62 = vld [vmem:[%s28491_s0 + $0x48] sm:$0xff]  ;;  %v307_v63 = vld [vmem:[%s28491_s0 + $0x50] sm:$0xff]  ;;  %v21360_v0 = vpack.c.bf16 %v16495_v61, %v16494_v60  ;;  %v16497_v2 = vld [vmem:[%s28494_s3 + $0x58] sm:$0xff]  ;;  %133 = vst.msk [vmem:[#allocation3 + $0x198] sm:$0xff] %vm124_vm0, %v28502_v39 }
  0x28   :  { %19292 = vmatmul.mubr.f32.gmra.mrb[2].mxu1 %v300_v47  ;;  %v16496_v1 = vld [vmem:[%s28494_s3 + $0x50] sm:$0xff]  ;;  %v308_v3 = vld [vmem:[%s28491_s0 + $0x58] sm:$0xff]  ;;  %v309_v4 = vld [vmem:[%s28491_s0 + $0x60] sm:$0xff]  ;;  %134 = vst.msk [vmem:[#allocation3 + $0x1a0] sm:$0xff] %vm124_vm0, %v28502_v39 }
  0x29   :  { %19294 = vmatprep.mubr.f32.mxu1 %v301_v48  ;;  %v21364_v5 = vpack.c.bf16 %v16497_v2, %v16496_v1  ;;  %v310_v6 = vld [vmem:[%s28491_s0 + $0x68] sm:$0xff]  ;;  %v311_v7 = vld [vmem:[%s28491_s0 + $0x70] sm:$0xff]  ;;  %v312_v8 = vld [vmem:[%s28491_s0 + $0x78] sm:$0xff]  ;;  %136 = vst.msk [vmem:[#allocation3 + $0x348] sm:$0xff] %vm124_vm0, %v28502_v39 }
  0x2a   :  { %21319 = vmatpush3.bf16.msra.mxu0 %v21316_v49  ;;  %v313_v9 = vld [vmem:[%s28491_s0 + $0x80] sm:$0xff]  ;;  %v314_v10 = vld [vmem:[%s28491_s0 + $0x88] sm:$0xff]  ;;  %v315_v11 = vld [vmem:[%s28491_s0 + $0x90] sm:$0xff]  ;;  %137 = vst.msk [vmem:[#allocation3 + $0x350] sm:$0xff] %vm124_vm0, %v28502_v39 }
  0x2b   :  { %21321 = vmatprep.subr.bf16.mxu0 %v21320_v54  ;;  %v316_v12 = vld [vmem:[%s28491_s0 + $0x98] sm:$0xff]  ;;  %v317_v13 = vld [vmem:[%s28491_s0 + $0xa0] sm:$0xff]  ;;  %v318_v14 = vld [vmem:[%s28491_s0 + $0xa8] sm:$0xff]  ;;  %128 = vst.msk [vmem:[#allocation3 + $0x10] sm:$0x3] %vm127_vm1, %v28502_v39 }
  0x2c   :  { %19295 = vmatmul.mubr.f32.gmra.mrb[4].mxu1 %v302_v52  ;;  %v319_v15 = vld [vmem:[%s28491_s0 + $0xb0] sm:$0xff]  ;;  %v320_v16 = vld [vmem:[%s28491_s0 + $0xb8] sm:$0xff]  ;;  %v321_v17 = vld [vmem:[%s28491_s0 + $0xc0] sm:$0xff]  ;;  %131 = vst.msk [vmem:[#allocation3 + $0x1c0] sm:$0x3] %vm127_vm1, %v28502_v39 }
  0x2d   :  { %19297 = vmatprep.mubr.f32.mxu1 %v303_v53  ;;  %v322_v18 = vld [vmem:[%s28491_s0 + $0xc8] sm:$0xff]  ;;  %v323_v19 = vld [vmem:[%s28491_s0 + $0xd0] sm:$0xff]  ;;  %v324_v20 = vld [vmem:[%s28491_s0 + $0xd8] sm:$0xff]  ;;  %135 = vst.msk [vmem:[#allocation3 + $0x1a8] sm:$0x3] %vm127_vm1, %v28502_v39 }
  0x2e   :  { %21323 = vmatpush3.bf16.msra.mxu0 %v21320_v54  ;;  %v325_v21 = vld [vmem:[%s28491_s0 + $0xe0] sm:$0xff]  ;;  %v326_v22 = vld [vmem:[%s28491_s0 + $0xe8] sm:$0xff]  ;;  %v327_v23 = vld [vmem:[%s28491_s0 + $0xf0] sm:$0xff]  ;;  %138 = vst.msk [vmem:[#allocation3 + $0x358] sm:$0x3] %vm127_vm1, %v28502_v39 }
  0x2f   :  { %21357 = vmatprep.subr.bf16.mxu0 %v21356_v59  ;;  %v328_v24 = vld [vmem:[%s28491_s0 + $0xf8] sm:$0xff]  ;;  %v329_v25 = vld [vmem:[%s28491_s0 + $0x100] sm:$0xff]  ;;  %v330_v26 = vld [vmem:[%s28491_s0 + $0x108] sm:$0xff]  ;;  %140 = vst.msk [vmem:[#allocation3] sm:$0x1] %vm139_vm2, %v28502_v39 }
  0x30   :  { %19298 = vmatmul.mubr.f32.gmra.mrb[6].mxu1 %v304_v57  ;;  %v331_v27 = vld [vmem:[%s28491_s0 + $0x110] sm:$0xff]  ;;  %v332_v28 = vld [vmem:[%s28491_s0 + $0x118] sm:$0xff]  ;;  %v333_v29 = vld [vmem:[%s28491_s0 + $0x120] sm:$0xff]  ;;  %141 = vst.msk [vmem:[#allocation3 + $0x18] sm:$0x1] %vm139_vm2, %v28502_v39 }
  0x31   :  { %19300 = vmatprep.mubr.f32.mxu1 %v305_v58  ;;  %19161 = vmatmul.mubr.f32.vlgmr.msra.gmra.mrb[0].mxu0 %v298_v42  ;;  %v334_v30 = vld [vmem:[%s28491_s0 + $0x128] sm:$0xff]  ;;  %v22910_v31 = vld [vmem:[%s28491_s0 + $0x130] sm:$0xff]  ;;  %v22916_v32 = vld [vmem:[%s28491_s0 + $0x138] sm:$0xff]  ;;  %142 = vst.msk [vmem:[#allocation3 + $0x30] sm:$0x1] %vm139_vm2, %v28502_v39 }
  0x32   :  { %21359 = vmatpush3.bf16.msra.mxu0 %v21356_v59  ;;  %19163 = vmatprep.mubr.f32.mxu0 %v299_v43  ;;  %v22921_v33 = vld [vmem:[%s28491_s0 + $0x140] sm:$0xff]  ;;  %v22928_v34 = vld [vmem:[%s28491_s0 + $0x148] sm:$0xff]  ;;  %v22933_v35 = vld [vmem:[%s28491_s0 + $0x150] sm:$0xff]  ;;  %143 = vst.msk [vmem:[#allocation3 + $0x48] sm:$0x1] %vm139_vm2, %v28502_v39 }
  0x33   :  { %21361 = vmatprep.subr.bf16.mxu0 %v21360_v0  ;;  %v22940_v36 = vld [vmem:[%s28491_s0 + $0x158] sm:$0xff]  ;;  %v22945_v37 = vld [vmem:[%s28491_s0 + $0x160] sm:$0xff]  ;;  %v22952_v38 = vld [vmem:[%s28491_s0 + $0x168] sm:$0xff]  ;;  %144 = vst.msk [vmem:[#allocation3 + $0x60] sm:$0x1] %vm139_vm2, %v28502_v39 }
  0x34   :  { %19301 = vmatmul.mubr.f32.gmra.mrb[8].mxu1 %v306_v62  ;;  %v22973_v40 = vld [vmem:[%s28491_s0 + $0x170] sm:$0xff]  ;;  %145 = vst.msk [vmem:[#allocation3 + $0x78] sm:$0x1] %vm139_vm2, %v28502_v39  ;;  %146 = vst.msk [vmem:[#allocation3 + $0x90] sm:$0x1] %vm139_vm2, %v28502_v39  ;;  %v344_v41 = vld [vmem:[%s28491_s0 + $0x178] sm:$0xff] }
  0x35   :  { %19303 = vmatprep.mubr.f32.mxu1 %v307_v63  ;;  %19164 = vmatmul.mubr.f32.gmra.mrb[2].mxu0 %v300_v47  ;;  %147 = vst.msk [vmem:[#allocation3 + $0xa8] sm:$0x1] %vm139_vm2, %v28502_v39  ;;  %148 = vst.msk [vmem:[#allocation3 + $0xc0] sm:$0x1] %vm139_vm2, %v28502_v39  ;;  %v345_v42 = vld [vmem:[%s28491_s0 + $0x180] sm:$0xff]  ;;  %v346_v43 = vld [vmem:[%s28491_s0 + $0x188] sm:$0xff] }
  0x36   :  { %19166 = vmatprep.mubr.f32.mxu0 %v301_v48  ;;  %21363 = vmatpush3.bf16.msra.mxu0 %v21360_v0  ;;  %149 = vst.msk [vmem:[#allocation3 + $0xd8] sm:$0x1] %vm139_vm2, %v28502_v39  ;;  %150 = vst.msk [vmem:[#allocation3 + $0xf0] sm:$0x1] %vm139_vm2, %v28502_v39  ;;  %v347_v44 = vld [vmem:[%s28491_s0 + $0x190] sm:$0xff]  ;;  %v348_v45 = vld [vmem:[%s28491_s0 + $0x198] sm:$0xff] }
  0x37   :  { %21365 = vmatprep.subr.bf16.mxu0 %v21364_v5  ;;  %151 = vst.msk [vmem:[#allocation3 + $0x108] sm:$0x1] %vm139_vm2, %v28502_v39  ;;  %152 = vst.msk [vmem:[#allocation3 + $0x120] sm:$0x1] %vm139_vm2, %v28502_v39  ;;  %v2442_v46 = vld [vmem:[%s28494_s3] sm:$0xff]  ;;  %v2443_v47 = vld [vmem:[%s28494_s3 + $0x8] sm:$0xff] }
  0x38   :  { %19304 = vmatmul.mubr.f32.gmra.mrb[10].mxu1 %v308_v3  ;;  %153 = vst.msk [vmem:[#allocation3 + $0x138] sm:$0x1] %vm139_vm2, %v28502_v39  ;;  %154 = vst.msk [vmem:[#allocation3 + $0x150] sm:$0x1] %vm139_vm2, %v28502_v39  ;;  %v349_v48 = vld [vmem:[%s28491_s0 + $0x1a0] sm:$0xff]  ;;  %v21368_v49 = vpack.c.bf16 %v2443_v47, %v2442_v46  ;;  %v350_v50 = vld [vmem:[%s28491_s0 + $0x1a8] sm:$0xff] }
  0x39   :  { %19306 = vmatprep.mubr.f32.mxu1 %v309_v4  ;;  %19167 = vmatmul.mubr.f32.gmra.mrb[4].mxu0 %v302_v52  ;;  %155 = vst.msk [vmem:[#allocation3 + $0x168] sm:$0x1] %vm139_vm2, %v28502_v39  ;;  %156 = vst.msk [vmem:[#allocation3 + $0x180] sm:$0x1] %vm139_vm2, %v28502_v39  ;;  %v351_v51 = vld [vmem:[%s28491_s0 + $0x1b0] sm:$0xff]  ;;  %v352_v52 = vld [vmem:[%s28491_s0 + $0x1b8] sm:$0xff] }
  0x3a   :  { %19169 = vmatprep.mubr.f32.mxu0 %v303_v53  ;;  %21367 = vmatpush3.bf16.msra.mxu0 %v21364_v5  ;;  %157 = vst.msk [vmem:[#allocation3 + $0x198] sm:$0x1] %vm139_vm2, %v28502_v39  ;;  %158 = vst.msk [vmem:[#allocation3 + $0x1b0] sm:$0x1] %vm139_vm2, %v28502_v39  ;;  %v353_v53 = vld [vmem:[%s28491_s0 + $0x1c0] sm:$0xff]  ;;  %v354_v54 = vld [vmem:[%s28491_s0 + $0x1c8] sm:$0xff] }
  0x3b   :  { %159 = vst.msk [vmem:[#allocation3 + $0x1c8] sm:$0x1] %vm139_vm2, %v28502_v39  ;;  %160 = vst.msk [vmem:[#allocation3 + $0x1e0] sm:$0x1] %vm139_vm2, %v28502_v39  ;;  %21369 = vmatprep.subr.bf16.mxu0 %v21368_v49  ;;  %v355_v55 = vld [vmem:[%s28491_s0 + $0x1d0] sm:$0xff]  ;;  %v356_v56 = vld [vmem:[%s28491_s0 + $0x1d8] sm:$0xff] }
  0x3c   :  { %19307 = vmatmul.mubr.f32.gmra.mrb[12].mxu1 %v310_v6  ;;  %161 = vst.msk [vmem:[#allocation3 + $0x1f8] sm:$0x1] %vm139_vm2, %v28502_v39  ;;  %162 = vst.msk [vmem:[#allocation3 + $0x210] sm:$0x1] %vm139_vm2, %v28502_v39  ;;  %v359_v59 = vld [vmem:[%s28491_s0 + $0x1f0] sm:$0xff]  ;;  %v360_v60 = vld [vmem:[%s28491_s0 + $0x1f8] sm:$0xff] }
  0x3d   :  { %19309 = vmatprep.mubr.f32.mxu1 %v311_v7  ;;  %19170 = vmatmul.mubr.f32.gmra.mrb[6].mxu0 %v304_v57  ;;  %163 = vst.msk [vmem:[#allocation3 + $0x228] sm:$0x1] %vm139_vm2, %v28502_v39  ;;  %164 = vst.msk [vmem:[#allocation3 + $0x240] sm:$0x1] %vm139_vm2, %v28502_v39  ;;  %v357_v57 = vld [vmem:[%s28491_s0 + $0x1e0] sm:$0xff]  ;;  %v2445_v0 = vld [vmem:[%s28494_s3 + $0x18] sm:$0xff] }
  0x3e   :  { %19172 = vmatprep.mubr.f32.mxu0 %v305_v58  ;;  %165 = vst.msk [vmem:[#allocation3 + $0x258] sm:$0x1] %vm139_vm2, %v28502_v39  ;;  %166 = vst.msk [vmem:[#allocation3 + $0x270] sm:$0x1] %vm139_vm2, %v28502_v39  ;;  %v358_v58 = vld [vmem:[%s28491_s0 + $0x1e8] sm:$0xff]  ;;  %v2446_v2 = vld [vmem:[%s28494_s3 + $0x20] sm:$0xff] }
  0x3f   :  { %167 = vst.msk [vmem:[#allocation3 + $0x288] sm:$0x1] %vm139_vm2, %v28502_v39  ;;  %168 = vst.msk [vmem:[#allocation3 + $0x2a0] sm:$0x1] %vm139_vm2, %v28502_v39  ;;  %v2448_v61 = vld [vmem:[#allocation3 + $0x1] sm:$0xff] }
  0x40   :  { %19310 = vmatmul.mubr.f32.gmra.mrb[14].mxu1 %v312_v8  ;;  %169 = vst.msk [vmem:[#allocation3 + $0x2b8] sm:$0x1] %vm139_vm2, %v28502_v39  ;;  %170 = vst.msk [vmem:[#allocation3 + $0x2d0] sm:$0x1] %vm139_vm2, %v28502_v39  ;;  %v23208_v5 = vld [vmem:[%s28498_s7] ss:$0 sm:$0xff] }
  0x41   :  { %19312 = vmatprep.mubr.f32.mxu1 %v313_v9  ;;  %19173 = vmatmul.mubr.f32.gmra.mrb[8].mxu0 %v306_v62  ;;  %171 = vst.msk [vmem:[#allocation3 + $0x2e8] sm:$0x1] %vm139_vm2, %v28502_v39  ;;  %172 = vst.msk [vmem:[#allocation3 + $0x300] sm:$0x1] %vm139_vm2, %v28502_v39  ;;  %v2449_v62 = vld [vmem:[#allocation3 + $0x9] sm:$0xff] }
  0x42   :  { %19175 = vmatprep.mubr.f32.mxu0 %v307_v63  ;;  %173 = vst.msk [vmem:[#allocation3 + $0x318] sm:$0x1] %vm139_vm2, %v28502_v39  ;;  %174 = vst.msk [vmem:[#allocation3 + $0x330] sm:$0x1] %vm139_vm2, %v28502_v39  ;;  %v2444_v63 = vld [vmem:[%s28494_s3 + $0x10] sm:$0xff] }
  0x43   :  { %175 = vst.msk [vmem:[#allocation3 + $0x348] sm:$0x1] %vm139_vm2, %v28502_v39  ;;  %176 = vst.msk [vmem:[#allocation3 + $0x11] sm:$0x1] %vm139_vm2, %v28502_v39  ;;  %v21372_v1 = vpack.c.bf16 %v2445_v0, %v2444_v63 }
  0x44   :  { %19313 = vmatmul.mubr.f32.gmra.mrb[16].mxu1 %v314_v10  ;;  %177 = vst.msk [vmem:[#allocation3 + $0x29] sm:$0x1] %vm139_vm2, %v28502_v39  ;;  %178 = vst.msk [vmem:[#allocation3 + $0x41] sm:$0x1] %vm139_vm2, %v28502_v39 }
  0x45   :  { %19315 = vmatprep.mubr.f32.mxu1 %v315_v11  ;;  %19176 = vmatmul.mubr.f32.gmra.mrb[10].mxu0 %v308_v3  ;;  %179 = vst.msk [vmem:[#allocation3 + $0x59] sm:$0x1] %vm139_vm2, %v28502_v39  ;;  %180 = vst.msk [vmem:[#allocation3 + $0x71] sm:$0x1] %vm139_vm2, %v28502_v39  ;;  %v2447_v3 = vld [vmem:[%s28494_s3 + $0x28] sm:$0xff] }
  0x46   :  { %19178 = vmatprep.mubr.f32.mxu0 %v309_v4  ;;  %181 = vst.msk [vmem:[#allocation3 + $0x89] sm:$0x1] %vm139_vm2, %v28502_v39  ;;  %182 = vst.msk [vmem:[#allocation3 + $0xa1] sm:$0x1] %vm139_vm2, %v28502_v39  ;;  %v21376_v4 = vpack.c.bf16 %v2447_v3, %v2446_v2 }
  0x47   :  { %183 = vst.msk [vmem:[#allocation3 + $0xb9] sm:$0x1] %vm139_vm2, %v28502_v39  ;;  %184 = vst.msk [vmem:[#allocation3 + $0xd1] sm:$0x1] %vm139_vm2, %v28502_v39 }
  0x48   :  { %19316 = vmatmul.mubr.f32.gmra.mrb[18].mxu1 %v316_v12  ;;  %185 = vst.msk [vmem:[#allocation3 + $0xe9] sm:$0x1] %vm139_vm2, %v28502_v39  ;;  %186 = vst.msk [vmem:[#allocation3 + $0x101] sm:$0x1] %vm139_vm2, %v28502_v39 }
  0x49   :  { %19318 = vmatprep.mubr.f32.mxu1 %v317_v13  ;;  %19179 = vmatmul.mubr.f32.gmra.mrb[12].mxu0 %v310_v6  ;;  %187 = vst.msk [vmem:[#allocation3 + $0x119] sm:$0x1] %vm139_vm2, %v28502_v39  ;;  %188 = vst.msk [vmem:[#allocation3 + $0x131] sm:$0x1] %vm139_vm2, %v28502_v39 }
  0x4a   :  { %19181 = vmatprep.mubr.f32.mxu0 %v311_v7  ;;  %189 = vst.msk [vmem:[#allocation3 + $0x149] sm:$0x1] %vm139_vm2, %v28502_v39  ;;  %190 = vst.msk [vmem:[#allocation3 + $0x161] sm:$0x1] %vm139_vm2, %v28502_v39 }
  0x4b   :  { %191 = vst.msk [vmem:[#allocation3 + $0x179] sm:$0x1] %vm139_vm2, %v28502_v39  ;;  %192 = vst.msk [vmem:[#allocation3 + $0x191] sm:$0x1] %vm139_vm2, %v28502_v39 }
  0x4c   :  { %19319 = vmatmul.mubr.f32.gmra.mrb[20].mxu1 %v318_v14  ;;  %193 = vst.msk [vmem:[#allocation3 + $0x1a9] sm:$0x1] %vm139_vm2, %v28502_v39  ;;  %194 = vst.msk [vmem:[#allocation3 + $0x1c1] sm:$0x1] %vm139_vm2, %v28502_v39 }
  0x4d   :  { %19321 = vmatprep.mubr.f32.mxu1 %v319_v15  ;;  %19182 = vmatmul.mubr.f32.gmra.mrb[14].mxu0 %v312_v8  ;;  %195 = vst.msk [vmem:[#allocation3 + $0x1d9] sm:$0x1] %vm139_vm2, %v28502_v39  ;;  %196 = vst.msk [vmem:[#allocation3 + $0x1f1] sm:$0x1] %vm139_vm2, %v28502_v39 }
  0x4e   :  { %19184 = vmatprep.mubr.f32.mxu0 %v313_v9  ;;  %197 = vst.msk [vmem:[#allocation3 + $0x209] sm:$0x1] %vm139_vm2, %v28502_v39  ;;  %198 = vst.msk [vmem:[#allocation3 + $0x221] sm:$0x1] %vm139_vm2, %v28502_v39 }
  0x4f   :  { %199 = vst.msk [vmem:[#allocation3 + $0x239] sm:$0x1] %vm139_vm2, %v28502_v39  ;;  %200 = vst.msk [vmem:[#allocation3 + $0x251] sm:$0x1] %vm139_vm2, %v28502_v39 }
  0x50   :  { %19322 = vmatmul.mubr.f32.gmra.mrb[22].mxu1 %v320_v16  ;;  %201 = vst.msk [vmem:[#allocation3 + $0x269] sm:$0x1] %vm139_vm2, %v28502_v39  ;;  %202 = vst.msk [vmem:[#allocation3 + $0x281] sm:$0x1] %vm139_vm2, %v28502_v39 }
  0x51   :  { %19324 = vmatprep.mubr.f32.mxu1 %v321_v17  ;;  %19185 = vmatmul.mubr.f32.gmra.mrb[16].mxu0 %v314_v10  ;;  %203 = vst.msk [vmem:[#allocation3 + $0x299] sm:$0x1] %vm139_vm2, %v28502_v39  ;;  %204 = vst.msk [vmem:[#allocation3 + $0x2b1] sm:$0x1] %vm139_vm2, %v28502_v39 }
  0x52   :  { %19187 = vmatprep.mubr.f32.mxu0 %v315_v11  ;;  %205 = vst.msk [vmem:[#allocation3 + $0x2c9] sm:$0x1] %vm139_vm2, %v28502_v39  ;;  %206 = vst.msk [vmem:[#allocation3 + $0x2e1] sm:$0x1] %vm139_vm2, %v28502_v39 }
  0x53   :  { %207 = vst.msk [vmem:[#allocation3 + $0x2f9] sm:$0x1] %vm139_vm2, %v28502_v39  ;;  %208 = vst.msk [vmem:[#allocation3 + $0x311] sm:$0x1] %vm139_vm2, %v28502_v39 }
  0x54   :  { %19325 = vmatmul.mubr.f32.gmra.mrb[24].mxu1 %v322_v18  ;;  %209 = vst.msk [vmem:[#allocation3 + $0x329] sm:$0x1] %vm139_vm2, %v28502_v39  ;;  %210 = vst.msk [vmem:[#allocation3 + $0x341] sm:$0x1] %vm139_vm2, %v28502_v39 }
  0x55   :  { %19327 = vmatprep.mubr.f32.mxu1 %v323_v19  ;;  %19188 = vmatmul.mubr.f32.gmra.mrb[18].mxu0 %v316_v12  ;;  %211 = vst.msk [vmem:[#allocation3 + $0x359] sm:$0x1] %vm139_vm2, %v28502_v39 }
  0x56   :  { %19190 = vmatprep.mubr.f32.mxu0 %v317_v13 }
  0x58   :  { %19328 = vmatmul.mubr.f32.gmra.mrb[26].mxu1 %v324_v20 }
  0x59   :  { %19330 = vmatprep.mubr.f32.mxu1 %v325_v21  ;;  %19191 = vmatmul.mubr.f32.gmra.mrb[20].mxu0 %v318_v14 }
  0x5a   :  { %19193 = vmatprep.mubr.f32.mxu0 %v319_v15 }
  0x5c   :  { %19331 = vmatmul.mubr.f32.gmra.mrb[28].mxu1 %v326_v22 }
  0x5d   :  { %19333 = vmatprep.mubr.f32.mxu1 %v327_v23  ;;  %19194 = vmatmul.mubr.f32.gmra.mrb[22].mxu0 %v320_v16 }
  0x5e   :  { %19196 = vmatprep.mubr.f32.mxu0 %v321_v17 }
  0x60   :  { %19334 = vmatmul.mubr.f32.gmra.mrb[30].mxu1 %v328_v24 }
  0x61   :  { %19336 = vmatprep.mubr.f32.mxu1 %v329_v25  ;;  %19197 = vmatmul.mubr.f32.gmra.mrb[24].mxu0 %v322_v18 }
  0x62   :  { %19199 = vmatprep.mubr.f32.mxu0 %v323_v19  ;;  %v16626_v19 = vld [vmem:[%s28494_s3 + $0x60] sm:$0xff] }
  0x64   :  { %19337 = vmatmul.mubr.f32.gmra.mrb[32].mxu1 %v330_v26 }
  0x65   :  { %19339 = vmatprep.mubr.f32.mxu1 %v331_v27  ;;  %19200 = vmatmul.mubr.f32.gmra.mrb[26].mxu0 %v324_v20  ;;  %v16627_v20 = vld [vmem:[%s28494_s3 + $0x68] sm:$0xff] }
  0x66   :  { %19202 = vmatprep.mubr.f32.mxu0 %v325_v21 }
  0x68   :  { %19340 = vmatmul.mubr.f32.gmra.mrb[34].mxu1 %v332_v28 }
  0x69   :  { %19342 = vmatprep.mubr.f32.mxu1 %v333_v29  ;;  %19203 = vmatmul.mubr.f32.gmra.mrb[28].mxu0 %v326_v22 }
  0x6a   :  { %19205 = vmatprep.mubr.f32.mxu0 %v327_v23  ;;  %v23224_v23 = vpack.c.bf16 %v16627_v20, %v16626_v19 }
  0x6c   :  { %19343 = vmatmul.mubr.f32.gmra.mrb[36].mxu1 %v334_v30 }
  0x6d   :  { %19345 = vmatprep.mubr.f32.mxu1 %v22910_v31  ;;  %19206 = vmatmul.mubr.f32.gmra.mrb[30].mxu0 %v328_v24 }
  0x6e   :  { %19208 = vmatprep.mubr.f32.mxu0 %v329_v25 }
  0x70   :  { %19346 = vmatmul.mubr.f32.gmra.mrb[38].mxu1 %v22916_v32 }
  0x71   :  { %19348 = vmatprep.mubr.f32.mxu1 %v22921_v33  ;;  %19209 = vmatmul.mubr.f32.gmra.mrb[32].mxu0 %v330_v26 }
  0x72   :  { %19211 = vmatprep.mubr.f32.mxu0 %v331_v27 }
  0x74   :  { %19349 = vmatmul.mubr.f32.gmra.mrb[40].mxu1 %v22928_v34 }
  0x75   :  { %19351 = vmatprep.mubr.f32.mxu1 %v22933_v35  ;;  %19212 = vmatmul.mubr.f32.gmra.mrb[34].mxu0 %v332_v28 }
  0x76   :  { %19214 = vmatprep.mubr.f32.mxu0 %v333_v29 }
  0x78   :  { %19352 = vmatmul.mubr.f32.gmra.mrb[42].mxu1 %v22940_v36 }
  0x79   :  { %19354 = vmatprep.mubr.f32.mxu1 %v22945_v37  ;;  %19215 = vmatmul.mubr.f32.gmra.mrb[36].mxu0 %v334_v30 }
  0x7a   :  { %19217 = vmatprep.mubr.f32.mxu0 %v22910_v31 }
  0x7c   :  { %19355 = vmatmul.mubr.f32.gmra.mrb[44].mxu1 %v22952_v38 }
  0x7d   :  { %19357 = vmatprep.mubr.f32.mxu1 %v22973_v40  ;;  %19218 = vmatmul.mubr.f32.gmra.mrb[38].mxu0 %v22916_v32 }
  0x7e   :  { %19220 = vmatprep.mubr.f32.mxu0 %v22921_v33 }
  0x80   :  { %19358 = vmatmul.mubr.f32.gmra.mrb[46].mxu1 %v344_v41 }
  0x81   :  { %19360 = vmatprep.mubr.f32.mxu1 %v345_v42  ;;  %19221 = vmatmul.mubr.f32.gmra.mrb[40].mxu0 %v22928_v34 }
  0x82   :  { %19223 = vmatprep.mubr.f32.mxu0 %v22933_v35 }
  0x84   :  { %19361 = vmatmul.mubr.f32.gmra.mrb[48].mxu1 %v346_v43 }
  0x85   :  { %19363 = vmatprep.mubr.f32.mxu1 %v347_v44  ;;  %19224 = vmatmul.mubr.f32.gmra.mrb[42].mxu0 %v22940_v36 }
  0x86   :  { %19226 = vmatprep.mubr.f32.mxu0 %v22945_v37 }
  0x88   :  { %19364 = vmatmul.mubr.f32.gmra.mrb[50].mxu1 %v348_v45 }
  0x89   :  { %19366 = vmatprep.mubr.f32.mxu1 %v349_v48  ;;  %19227 = vmatmul.mubr.f32.gmra.mrb[44].mxu0 %v22952_v38 }
  0x8a   :  { %19229 = vmatprep.mubr.f32.mxu0 %v22973_v40 }
  0x8c   :  { %19367 = vmatmul.mubr.f32.gmra.mrb[52].mxu1 %v350_v50 }
  0x8d   :  { %19369 = vmatprep.mubr.f32.mxu1 %v351_v51  ;;  %19230 = vmatmul.mubr.f32.gmra.mrb[46].mxu0 %v344_v41 }
  0x8e   :  { %19232 = vmatprep.mubr.f32.mxu0 %v345_v42 }
  0x90   :  { %19370 = vmatmul.mubr.f32.gmra.mrb[54].mxu1 %v352_v52 }
  0x91   :  { %19372 = vmatprep.mubr.f32.mxu1 %v353_v53  ;;  %19233 = vmatmul.mubr.f32.gmra.mrb[48].mxu0 %v346_v43 }
  0x92   :  { %19235 = vmatprep.mubr.f32.mxu0 %v347_v44 }
  0x94   :  { %19373 = vmatmul.mubr.f32.gmra.mrb[56].mxu1 %v354_v54 }
  0x95   :  { %19375 = vmatprep.mubr.f32.mxu1 %v355_v55  ;;  %19236 = vmatmul.mubr.f32.gmra.mrb[50].mxu0 %v348_v45 }
  0x96   :  { %19238 = vmatprep.mubr.f32.mxu0 %v349_v48 }
  0x98   :  { %19376 = vmatmul.mubr.f32.gmra.mrb[58].mxu1 %v356_v56 }
  0x99   :  { %19378 = vmatprep.mubr.f32.mxu1 %v357_v57  ;;  %19239 = vmatmul.mubr.f32.gmra.mrb[52].mxu0 %v350_v50 }
  0x9a   :  { %19241 = vmatprep.mubr.f32.mxu0 %v351_v51 }
  0x9c   :  { %19379 = vmatmul.mubr.f32.gmra.mrb[60].mxu1 %v358_v58 }
  0x9d   :  { %19381 = vmatprep.mubr.f32.mxu1 %v359_v59  ;;  %19242 = vmatmul.mubr.f32.gmra.mrb[54].mxu0 %v352_v52 }
  0x9e   :  { %19244 = vmatprep.mubr.f32.mxu0 %v353_v53 }
  0xa0   :  { %19382 = vmatmul.mubr.f32.gmra.mrb[62].mxu1 %v360_v60 }
  0xa1   :  { %19245 = vmatmul.mubr.f32.gmra.mrb[56].mxu0 %v354_v54 }
  0xa2   :  { %19247 = vmatprep.mubr.f32.mxu0 %v355_v55 }
  0xa5   :  { %19248 = vmatmul.mubr.f32.gmra.mrb[58].mxu0 %v356_v56 }
  0xa6   :  { %19250 = vmatprep.mubr.f32.mxu0 %v357_v57 }
  0xa9   :  { %19251 = vmatmul.mubr.f32.gmra.mrb[60].mxu0 %v358_v58 }
  0xaa   :  { %19253 = vmatprep.mubr.f32.mxu0 %v359_v59 }
  0xad   :  { %19254 = vmatmul.mubr.f32.gmra.mrb[62].mxu0 %v360_v60 }
  0xae   :  { %19396 = vmatprep.mubr.msk.f32.mxu0 %vm124_vm0, %v2448_v61 }
  0xb1   :  { %19397 = vmatmul.mubr.msk.f32.vlgmr.msra.gmra.mrb[64].mxu0 %vm124_vm0, %v2449_v62 }
  0xb2   :  { %21371 = vmatpush3.bf16.msra.mxu0 %v21368_v49 }
  0xb3   :  { %21373 = vmatprep.subr.bf16.mxu0 %v21372_v1 }
  0xb6   :  { %21375 = vmatpush3.bf16.msra.mxu0 %v21372_v1 }
  0xb7   :  { %21377 = vmatprep.subr.bf16.mxu0 %v21376_v4 }
  0xba   :  { %21379 = vmatpush3.bf16.msra.mxu0 %v21376_v4 }
  0xbb   :  { %21381 = vmatprep.subr.bf16.mxu0 %v23224_v23 }
  0xf7   :  { %v19290_v6 = vpop.f32.mrb[0].mxu1 }
  0xf8   :  { %v1313_v7 = vadd.f32 %v19290_v6, %v23208_v5  ;;  %v1307_v8 = vpop.f32.mrb[1].mxu1 }
  0xf9   :  { %v1308_v9 = vadd.f32 %v23208_v5, %v1307_v8 }
  0xfa   :  { %v1627_v10 = vmax.f32 %v1313_v7, 0.0 }
  0xfb   :  { %v1626_v11 = vmax.f32 %v1308_v9, 0.0  ;;  %v19293_v12 = vpop.f32.mrb[2].mxu1 }
  0xfc   :  { %1692 = vst.msk [vmem:[#allocation3 + $0x21] sm:$0xff] %vm124_vm0, %v1627_v10  ;;  %v1323_v13 = vadd.f32 %v19293_v12, %v23208_v5  ;;  %v1317_v14 = vpop.f32.mrb[3].mxu1 }
  0xfd   :  { %1691 = vst.msk [vmem:[#allocation3 + $0x19] sm:$0xff] %vm124_vm0, %v1626_v11  ;;  %v1318_v15 = vadd.f32 %v23208_v5, %v1317_v14 }
  0xfe   :  { %v1629_v16 = vmax.f32 %v1323_v13, 0.0 }
  0xff   :  { %v1628_v17 = vmax.f32 %v1318_v15, 0.0  ;;  %v19296_v18 = vpop.f32.mrb[4].mxu1 }
 0x100   :  { %1694 = vst.msk [vmem:[#allocation3 + $0x39] sm:$0xff] %vm124_vm0, %v1629_v16  ;;  %v1333_v21 = vadd.f32 %v19296_v18, %v23208_v5  ;;  %v1327_v22 = vpop.f32.mrb[5].mxu1 }
 0x101   :  { %1693 = vst.msk [vmem:[#allocation3 + $0x31] sm:$0xff] %vm124_vm0, %v1628_v17  ;;  %v1328_v24 = vadd.f32 %v23208_v5, %v1327_v22 }
 0x102   :  { %v1631_v25 = vmax.f32 %v1333_v21, 0.0 }
 0x103   :  { %v1630_v26 = vmax.f32 %v1328_v24, 0.0  ;;  %v19299_v27 = vpop.f32.mrb[6].mxu1  ;;  %v2451_v32 = vld [vmem:[#allocation3 + $0x21] sm:$0xff] }
 0x104   :  { %1696 = vst.msk [vmem:[#allocation3 + $0x51] sm:$0xff] %vm124_vm0, %v1631_v25  ;;  %v1343_v28 = vadd.f32 %v19299_v27, %v23208_v5  ;;  %v1337_v29 = vpop.f32.mrb[7].mxu1  ;;  %v2450_v30 = vld [vmem:[#allocation3 + $0x19] sm:$0xff]  ;;  %v23235_v36 = vpop.f32.mrb[0].mxu0 }
 0x105   :  { %1695 = vst.msk [vmem:[#allocation3 + $0x49] sm:$0xff] %vm124_vm0, %v1630_v26  ;;  %v1338_v31 = vadd.f32 %v23208_v5, %v1337_v29  ;;  %19399 = vmatprep.mubr.msk.f32.mxu0 %vm124_vm0, %v2450_v30  ;;  %28834 = vst [vmem:[#allocation8_spill] sm:$0xff] %v23235_v36  ;;  %v23239_v41 = vpop.f32.mrb[1].mxu0  ;;  %v16699_v36 = vld [vmem:[%s28494_s3 + $0xa8] sm:$0xff] }
 0x106   :  { %v1633_v33 = vmax.f32 %v1343_v28, 0.0  ;;  %19400 = vmatmul.mubr.msk.f32.gmra.mrb[66].mxu0 %vm124_vm0, %v2451_v32  ;;  %28835 = vst [vmem:[#allocation9_spill] sm:$0xff] %v23239_v41  ;;  %v16698_v41 = vld [vmem:[%s28494_s3 + $0xa0] sm:$0xff] }
 0x107   :  { %v1632_v34 = vmax.f32 %v1338_v31, 0.0  ;;  %v19302_v35 = vpop.f32.mrb[8].mxu1  ;;  %v2453_v43 = vld [vmem:[#allocation3 + $0x39] sm:$0xff] }
 0x108   :  { %1698 = vst.msk [vmem:[#allocation3 + $0x69] sm:$0xff] %vm124_vm0, %v1633_v33  ;;  %v1353_v37 = vadd.f32 %v19302_v35, %v23208_v5  ;;  %v1347_v38 = vpop.f32.mrb[9].mxu1  ;;  %v2452_v40 = vld [vmem:[#allocation3 + $0x31] sm:$0xff]  ;;  %v23245_v47 = vpop.f32.mrb[2].mxu0 }
 0x109   :  { %1697 = vst.msk [vmem:[#allocation3 + $0x61] sm:$0xff] %vm124_vm0, %v1632_v34  ;;  %v1348_v42 = vadd.f32 %v23208_v5, %v1347_v38  ;;  %19402 = vmatprep.mubr.msk.f32.mxu0 %vm124_vm0, %v2452_v40  ;;  %28836 = vst [vmem:[#allocation10_spill] sm:$0xff] %v23245_v47  ;;  %v23249_v51 = vpop.f32.mrb[3].mxu0 }
 0x10a   :  { %v1635_v44 = vmax.f32 %v1353_v37, 0.0  ;;  %19403 = vmatmul.mubr.msk.f32.gmra.mrb[68].mxu0 %vm124_vm0, %v2453_v43  ;;  %28837 = vst [vmem:[#allocation11_spill] sm:$0xff] %v23249_v51  ;;  %v3673_v51 = vld [vmem:[#allocation3 + $0x2] sm:$0xff] }
 0x10b   :  { %v1634_v45 = vmax.f32 %v1348_v42, 0.0  ;;  %v19305_v46 = vpop.f32.mrb[10].mxu1  ;;  %v2455_v53 = vld [vmem:[#allocation3 + $0x51] sm:$0xff] }
 0x10c   :  { %1700 = vst.msk [vmem:[#allocation3 + $0x81] sm:$0xff] %vm124_vm0, %v1635_v44  ;;  %v1363_v48 = vadd.f32 %v19305_v46, %v23208_v5  ;;  %v1357_v49 = vpop.f32.mrb[11].mxu1  ;;  %v2454_v50 = vld [vmem:[#allocation3 + $0x49] sm:$0xff]  ;;  %v23255_v57 = vpop.f32.mrb[4].mxu0 }
 0x10d   :  { %1699 = vst.msk [vmem:[#allocation3 + $0x79] sm:$0xff] %vm124_vm0, %v1634_v45  ;;  %v1358_v52 = vadd.f32 %v23208_v5, %v1357_v49  ;;  %19405 = vmatprep.mubr.msk.f32.mxu0 %vm124_vm0, %v2454_v50  ;;  %28838 = vst [vmem:[#allocation12_spill] sm:$0xff] %v23255_v57  ;;  %v23259_v61 = vpop.f32.mrb[5].mxu0 }
 0x10e   :  { %v1637_v54 = vmax.f32 %v1363_v48, 0.0  ;;  %19406 = vmatmul.mubr.msk.f32.gmra.mrb[70].mxu0 %vm124_vm0, %v2455_v53  ;;  %28839 = vst [vmem:[#allocation13_spill] sm:$0xff] %v23259_v61 }
 0x10f   :  { %v1636_v55 = vmax.f32 %v1358_v52, 0.0  ;;  %v19308_v56 = vpop.f32.mrb[12].mxu1  ;;  %v2457_v63 = vld [vmem:[#allocation3 + $0x69] sm:$0xff] }
 0x110   :  { %1702 = vst.msk [vmem:[#allocation3 + $0x99] sm:$0xff] %vm124_vm0, %v1637_v54  ;;  %v1373_v58 = vadd.f32 %v19308_v56, %v23208_v5  ;;  %v1367_v59 = vpop.f32.mrb[13].mxu1  ;;  %v2456_v60 = vld [vmem:[#allocation3 + $0x61] sm:$0xff]  ;;  %v23265_v3 = vpop.f32.mrb[6].mxu0 }
 0x111   :  { %1701 = vst.msk [vmem:[#allocation3 + $0x91] sm:$0xff] %vm124_vm0, %v1636_v55  ;;  %v1368_v62 = vadd.f32 %v23208_v5, %v1367_v59  ;;  %19408 = vmatprep.mubr.msk.f32.mxu0 %vm124_vm0, %v2456_v60  ;;  %28840 = vst [vmem:[#allocation14_spill] sm:$0xff] %v23265_v3  ;;  %v23269_v8 = vpop.f32.mrb[7].mxu0 }
 0x112   :  { %v1639_v0 = vmax.f32 %v1373_v58, 0.0  ;;  %19409 = vmatmul.mubr.msk.f32.gmra.mrb[72].mxu0 %vm124_vm0, %v2457_v63  ;;  %28841 = vst [vmem:[#allocation15_spill] sm:$0xff] %v23269_v8 }
 0x113   :  { %v1638_v1 = vmax.f32 %v1368_v62, 0.0  ;;  %v19311_v2 = vpop.f32.mrb[14].mxu1  ;;  %v2459_v10 = vld [vmem:[#allocation3 + $0x81] sm:$0xff] }
 0x114   :  { %1704 = vst.msk [vmem:[#allocation3 + $0xb1] sm:$0xff] %vm124_vm0, %v1639_v0  ;;  %v1383_v4 = vadd.f32 %v19311_v2, %v23208_v5  ;;  %v1377_v6 = vpop.f32.mrb[15].mxu1  ;;  %v2458_v7 = vld [vmem:[#allocation3 + $0x79] sm:$0xff]  ;;  %v23275_v14 = vpop.f32.mrb[8].mxu0 }
 0x115   :  { %1703 = vst.msk [vmem:[#allocation3 + $0xa9] sm:$0xff] %vm124_vm0, %v1638_v1  ;;  %v1378_v9 = vadd.f32 %v23208_v5, %v1377_v6  ;;  %19411 = vmatprep.mubr.msk.f32.mxu0 %vm124_vm0, %v2458_v7  ;;  %28842 = vst [vmem:[#allocation16_spill] sm:$0xff] %v23275_v14  ;;  %v23279_v18 = vpop.f32.mrb[9].mxu0 }
 0x116   :  { %v1641_v11 = vmax.f32 %v1383_v4, 0.0  ;;  %19412 = vmatmul.mubr.msk.f32.gmra.mrb[74].mxu0 %vm124_vm0, %v2459_v10  ;;  %28843 = vst [vmem:[#allocation17_spill] sm:$0xff] %v23279_v18 }
 0x117   :  { %v1640_v12 = vmax.f32 %v1378_v9, 0.0  ;;  %v19314_v13 = vpop.f32.mrb[16].mxu1  ;;  %v2461_v20 = vld [vmem:[#allocation3 + $0x99] sm:$0xff] }
 0x118   :  { %1706 = vst.msk [vmem:[#allocation3 + $0xc9] sm:$0xff] %vm124_vm0, %v1641_v11  ;;  %v1393_v15 = vadd.f32 %v19314_v13, %v23208_v5  ;;  %v1387_v16 = vpop.f32.mrb[17].mxu1  ;;  %v2460_v17 = vld [vmem:[#allocation3 + $0x91] sm:$0xff]  ;;  %v23285_v25 = vpop.f32.mrb[10].mxu0 }
 0x119   :  { %1705 = vst.msk [vmem:[#allocation3 + $0xc1] sm:$0xff] %vm124_vm0, %v1640_v12  ;;  %v1388_v19 = vadd.f32 %v23208_v5, %v1387_v16  ;;  %19414 = vmatprep.mubr.msk.f32.mxu0 %vm124_vm0, %v2460_v17  ;;  %28844 = vst [vmem:[#allocation18_spill] sm:$0xff] %v23285_v25  ;;  %v23289_v29 = vpop.f32.mrb[11].mxu0 }
 0x11a   :  { %v1643_v21 = vmax.f32 %v1393_v15, 0.0  ;;  %19415 = vmatmul.mubr.msk.f32.gmra.mrb[76].mxu0 %vm124_vm0, %v2461_v20  ;;  %28845 = vst [vmem:[#allocation19_spill] sm:$0xff] %v23289_v29 }
 0x11b   :  { %v1642_v22 = vmax.f32 %v1388_v19, 0.0  ;;  %v19317_v24 = vpop.f32.mrb[18].mxu1  ;;  %v2463_v31 = vld [vmem:[#allocation3 + $0xb1] sm:$0xff] }
 0x11c   :  { %1708 = vst.msk [vmem:[#allocation3 + $0xe1] sm:$0xff] %vm124_vm0, %v1643_v21  ;;  %v1403_v26 = vadd.f32 %v19317_v24, %v23208_v5  ;;  %v1397_v27 = vpop.f32.mrb[19].mxu1  ;;  %v2462_v28 = vld [vmem:[#allocation3 + $0xa9] sm:$0xff]  ;;  %v23295_v35 = vpop.f32.mrb[12].mxu0 }
 0x11d   :  { %1707 = vst.msk [vmem:[#allocation3 + $0xd9] sm:$0xff] %vm124_vm0, %v1642_v22  ;;  %v1398_v30 = vadd.f32 %v23208_v5, %v1397_v27  ;;  %19417 = vmatprep.mubr.msk.f32.mxu0 %vm124_vm0, %v2462_v28  ;;  %28846 = vst [vmem:[#allocation20_spill] sm:$0xff] %v23295_v35  ;;  %v23299_v42 = vpop.f32.mrb[13].mxu0 }
 0x11e   :  { %v1645_v32 = vmax.f32 %v1403_v26, 0.0  ;;  %19418 = vmatmul.mubr.msk.f32.gmra.mrb[78].mxu0 %vm124_vm0, %v2463_v31  ;;  %28847 = vst [vmem:[#allocation21_spill] sm:$0xff] %v23299_v42 }
 0x11f   :  { %v1644_v33 = vmax.f32 %v1398_v30, 0.0  ;;  %v19320_v34 = vpop.f32.mrb[20].mxu1  ;;  %v2465_v44 = vld [vmem:[#allocation3 + $0xc9] sm:$0xff] }
 0x120   :  { %1710 = vst.msk [vmem:[#allocation3 + $0xf9] sm:$0xff] %vm124_vm0, %v1645_v32  ;;  %v1413_v37 = vadd.f32 %v19320_v34, %v23208_v5  ;;  %v1407_v38 = vpop.f32.mrb[21].mxu1  ;;  %v2464_v40 = vld [vmem:[#allocation3 + $0xc1] sm:$0xff]  ;;  %v23305_v49 = vpop.f32.mrb[14].mxu0 }
 0x121   :  { %1709 = vst.msk [vmem:[#allocation3 + $0xf1] sm:$0xff] %vm124_vm0, %v1644_v33  ;;  %v1408_v43 = vadd.f32 %v23208_v5, %v1407_v38  ;;  %19420 = vmatprep.mubr.msk.f32.mxu0 %vm124_vm0, %v2464_v40  ;;  %28848 = vst [vmem:[#allocation22_spill] sm:$0xff] %v23305_v49  ;;  %v23309_v54 = vpop.f32.mrb[15].mxu0 }
 0x122   :  { %v1647_v45 = vmax.f32 %v1413_v37, 0.0  ;;  %19421 = vmatmul.mubr.msk.f32.gmra.mrb[80].mxu0 %vm124_vm0, %v2465_v44  ;;  %28849 = vst [vmem:[#allocation23_spill] sm:$0xff] %v23309_v54 }
 0x123   :  { %v1646_v46 = vmax.f32 %v1408_v43, 0.0  ;;  %v19323_v48 = vpop.f32.mrb[22].mxu1  ;;  %v2467_v56 = vld [vmem:[#allocation3 + $0xe1] sm:$0xff] }
 0x124   :  { %1712 = vst.msk [vmem:[#allocation3 + $0x111] sm:$0xff] %vm124_vm0, %v1647_v45  ;;  %v1423_v50 = vadd.f32 %v19323_v48, %v23208_v5  ;;  %v1417_v52 = vpop.f32.mrb[23].mxu1  ;;  %v2466_v53 = vld [vmem:[#allocation3 + $0xd9] sm:$0xff]  ;;  %v23315_v62 = vpop.f32.mrb[16].mxu0 }
 0x125   :  { %1711 = vst.msk [vmem:[#allocation3 + $0x109] sm:$0xff] %vm124_vm0, %v1646_v46  ;;  %v1418_v55 = vadd.f32 %v23208_v5, %v1417_v52  ;;  %19423 = vmatprep.mubr.msk.f32.mxu0 %vm124_vm0, %v2466_v53  ;;  %28850 = vst [vmem:[#allocation24_spill] sm:$0xff] %v23315_v62  ;;  %v23319_v2 = vpop.f32.mrb[17].mxu0 }
 0x126   :  { %v1649_v58 = vmax.f32 %v1423_v50, 0.0  ;;  %19424 = vmatmul.mubr.msk.f32.gmra.mrb[82].mxu0 %vm124_vm0, %v2467_v56  ;;  %28851 = vst [vmem:[#allocation25_spill] sm:$0xff] %v23319_v2 }
 0x127   :  { %v1648_v59 = vmax.f32 %v1418_v55, 0.0  ;;  %v19326_v60 = vpop.f32.mrb[24].mxu1  ;;  %v2469_v6 = vld [vmem:[#allocation3 + $0xf9] sm:$0xff] }
 0x128   :  { %1714 = vst.msk [vmem:[#allocation3 + $0x129] sm:$0xff] %vm124_vm0, %v1649_v58  ;;  %v1433_v63 = vadd.f32 %v19326_v60, %v23208_v5  ;;  %v1427_v0 = vpop.f32.mrb[25].mxu1  ;;  %v2468_v1 = vld [vmem:[#allocation3 + $0xf1] sm:$0xff]  ;;  %v23325_v11 = vpop.f32.mrb[18].mxu0 }
 0x129   :  { %1713 = vst.msk [vmem:[#allocation3 + $0x121] sm:$0xff] %vm124_vm0, %v1648_v59  ;;  %v1428_v4 = vadd.f32 %v23208_v5, %v1427_v0  ;;  %19426 = vmatprep.mubr.msk.f32.mxu0 %vm124_vm0, %v2468_v1  ;;  %28852 = vst [vmem:[#allocation26_spill] sm:$0xff] %v23325_v11  ;;  %v23329_v16 = vpop.f32.mrb[19].mxu0 }
 0x12a   :  { %v1651_v7 = vmax.f32 %v1433_v63, 0.0  ;;  %19427 = vmatmul.mubr.msk.f32.gmra.mrb[84].mxu0 %vm124_vm0, %v2469_v6  ;;  %28853 = vst [vmem:[#allocation27_spill] sm:$0xff] %v23329_v16 }
 0x12b   :  { %v1650_v9 = vmax.f32 %v1428_v4, 0.0  ;;  %v19329_v10 = vpop.f32.mrb[26].mxu1  ;;  %v2471_v19 = vld [vmem:[#allocation3 + $0x111] sm:$0xff] }
 0x12c   :  { %1716 = vst.msk [vmem:[#allocation3 + $0x141] sm:$0xff] %vm124_vm0, %v1651_v7  ;;  %v1443_v12 = vadd.f32 %v19329_v10, %v23208_v5  ;;  %v1437_v13 = vpop.f32.mrb[27].mxu1  ;;  %v2470_v15 = vld [vmem:[#allocation3 + $0x109] sm:$0xff]  ;;  %v23335_v24 = vpop.f32.mrb[20].mxu0 }
 0x12d   :  { %1715 = vst.msk [vmem:[#allocation3 + $0x139] sm:$0xff] %vm124_vm0, %v1650_v9  ;;  %v1438_v17 = vadd.f32 %v23208_v5, %v1437_v13  ;;  %19429 = vmatprep.mubr.msk.f32.mxu0 %vm124_vm0, %v2470_v15  ;;  %28854 = vst [vmem:[#allocation28_spill] sm:$0xff] %v23335_v24  ;;  %v23339_v30 = vpop.f32.mrb[21].mxu0  ;;  %v2480_v13 = vld [vmem:[#allocation3 + $0x1b1] sm:$0xff] }
 0x12e   :  { %v1653_v20 = vmax.f32 %v1443_v12, 0.0  ;;  %19430 = vmatmul.mubr.msk.f32.gmra.mrb[86].mxu0 %vm124_vm0, %v2471_v19  ;;  %28855 = vst [vmem:[#allocation29_spill] sm:$0xff] %v23339_v30 }
 0x12f   :  { %v1652_v21 = vmax.f32 %v1438_v17, 0.0  ;;  %v19332_v22 = vpop.f32.mrb[28].mxu1  ;;  %v2473_v32 = vld [vmem:[#allocation3 + $0x129] sm:$0xff] }
 0x130   :  { %1718 = vst.msk [vmem:[#allocation3 + $0x159] sm:$0xff] %vm124_vm0, %v1653_v20  ;;  %v1453_v26 = vadd.f32 %v19332_v22, %v23208_v5  ;;  %v1447_v27 = vpop.f32.mrb[29].mxu1  ;;  %v2472_v28 = vld [vmem:[#allocation3 + $0x121] sm:$0xff]  ;;  %v23345_v38 = vpop.f32.mrb[22].mxu0 }
 0x131   :  { %1717 = vst.msk [vmem:[#allocation3 + $0x151] sm:$0xff] %vm124_vm0, %v1652_v21  ;;  %v1448_v31 = vadd.f32 %v23208_v5, %v1447_v27  ;;  %19432 = vmatprep.mubr.msk.f32.mxu0 %vm124_vm0, %v2472_v28  ;;  %28856 = vst [vmem:[#allocation30_spill] sm:$0xff] %v23345_v38  ;;  %v23349_v45 = vpop.f32.mrb[23].mxu0 }
 0x132   :  { %v1655_v33 = vmax.f32 %v1453_v26, 0.0  ;;  %19433 = vmatmul.mubr.msk.f32.gmra.mrb[88].mxu0 %vm124_vm0, %v2473_v32  ;;  %28857 = vst [vmem:[#allocation31_spill] sm:$0xff] %v23349_v45  ;;  %v2481_v26 = vld [vmem:[#allocation3 + $0x1b9] sm:$0xff] }
 0x133   :  { %v1654_v34 = vmax.f32 %v1448_v31, 0.0  ;;  %v19335_v37 = vpop.f32.mrb[30].mxu1  ;;  %v2475_v48 = vld [vmem:[#allocation3 + $0x141] sm:$0xff] }
 0x134   :  { %1720 = vst.msk [vmem:[#allocation3 + $0x171] sm:$0xff] %vm124_vm0, %v1655_v33  ;;  %v1463_v40 = vadd.f32 %v19335_v37, %v23208_v5  ;;  %v1457_v43 = vpop.f32.mrb[31].mxu1  ;;  %v2474_v44 = vld [vmem:[#allocation3 + $0x139] sm:$0xff]  ;;  %v23355_v55 = vpop.f32.mrb[24].mxu0 }
 0x135   :  { %1719 = vst.msk [vmem:[#allocation3 + $0x169] sm:$0xff] %vm124_vm0, %v1654_v34  ;;  %v1458_v46 = vadd.f32 %v23208_v5, %v1457_v43  ;;  %19435 = vmatprep.mubr.msk.f32.mxu0 %vm124_vm0, %v2474_v44  ;;  %28858 = vst [vmem:[#allocation32_spill] sm:$0xff] %v23355_v55  ;;  %v23359_v60 = vpop.f32.mrb[25].mxu0 }
 0x136   :  { %v1657_v50 = vmax.f32 %v1463_v40, 0.0  ;;  %19436 = vmatmul.mubr.msk.f32.gmra.mrb[90].mxu0 %vm124_vm0, %v2475_v48  ;;  %28859 = vst [vmem:[#allocation33_spill] sm:$0xff] %v23359_v60 }
 0x137   :  { %v1656_v52 = vmax.f32 %v1458_v46, 0.0  ;;  %v19338_v53 = vpop.f32.mrb[32].mxu1  ;;  %v2477_v0 = vld [vmem:[#allocation3 + $0x159] sm:$0xff] }
 0x138   :  { %1722 = vst.msk [vmem:[#allocation3 + $0x189] sm:$0xff] %vm124_vm0, %v1657_v50  ;;  %v1473_v56 = vadd.f32 %v19338_v53, %v23208_v5  ;;  %v1467_v58 = vpop.f32.mrb[33].mxu1  ;;  %v2476_v59 = vld [vmem:[#allocation3 + $0x151] sm:$0xff]  ;;  %v23365_v7 = vpop.f32.mrb[26].mxu0 }
 0x139   :  { %1721 = vst.msk [vmem:[#allocation3 + $0x181] sm:$0xff] %vm124_vm0, %v1656_v52  ;;  %v1468_v63 = vadd.f32 %v23208_v5, %v1467_v58  ;;  %19438 = vmatprep.mubr.msk.f32.mxu0 %vm124_vm0, %v2476_v59  ;;  %28860 = vst [vmem:[#allocation34_spill] sm:$0xff] %v23365_v7  ;;  %v23369_v15 = vpop.f32.mrb[27].mxu0 }
 0x13a   :  { %v1659_v1 = vmax.f32 %v1473_v56, 0.0  ;;  %19439 = vmatmul.mubr.msk.f32.gmra.mrb[92].mxu0 %vm124_vm0, %v2477_v0  ;;  %28861 = vst [vmem:[#allocation35_spill] sm:$0xff] %v23369_v15 }
 0x13b   :  { %v1658_v4 = vmax.f32 %v1468_v63, 0.0  ;;  %v19341_v6 = vpop.f32.mrb[34].mxu1  ;;  %v2479_v19 = vld [vmem:[#allocation3 + $0x171] sm:$0xff] }
 0x13c   :  { %1724 = vst.msk [vmem:[#allocation3 + $0x1d1] sm:$0xff] %vm124_vm0, %v1659_v1  ;;  %v1483_v9 = vadd.f32 %v19341_v6, %v23208_v5  ;;  %v1477_v10 = vpop.f32.mrb[35].mxu1  ;;  %v2478_v12 = vld [vmem:[#allocation3 + $0x169] sm:$0xff]  ;;  %v23376_v27 = vpop.f32.mrb[28].mxu0 }
 0x13d   :  { %1723 = vst.msk [vmem:[#allocation3 + $0x1c9] sm:$0xff] %vm124_vm0, %v1658_v4  ;;  %v1478_v17 = vadd.f32 %v23208_v5, %v1477_v10  ;;  %19441 = vmatprep.mubr.msk.f32.mxu0 %vm124_vm0, %v2478_v12  ;;  %28862 = vst [vmem:[#allocation36_spill] sm:$0xff] %v23376_v27  ;;  %v23380_v32 = vpop.f32.mrb[29].mxu0 }
 0x13e   :  { %v1661_v20 = vmax.f32 %v1483_v9, 0.0  ;;  %19442 = vmatmul.mubr.msk.f32.gmra.mrb[94].mxu0 %vm124_vm0, %v2479_v19  ;;  %28863 = vst [vmem:[#allocation37_spill] sm:$0xff] %v23380_v32 }
 0x13f   :  { %v1660_v21 = vmax.f32 %v1478_v17, 0.0  ;;  %v19344_v22 = vpop.f32.mrb[36].mxu1  ;;  %19444 = vmatprep.mubr.msk.f32.mxu0 %vm124_vm0, %v2480_v13 }
 0x140   :  { %1726 = vst.msk [vmem:[#allocation3 + $0x1e9] sm:$0xff] %vm124_vm0, %v1661_v20  ;;  %v1493_v28 = vadd.f32 %v19344_v22, %v23208_v5  ;;  %v1487_v31 = vpop.f32.mrb[37].mxu1  ;;  %v23385_v43 = vpop.f32.mrb[30].mxu0 }
 0x141   :  { %1725 = vst.msk [vmem:[#allocation3 + $0x1e1] sm:$0xff] %vm124_vm0, %v1660_v21  ;;  %v1488_v33 = vadd.f32 %v23208_v5, %v1487_v31  ;;  %28864 = vst [vmem:[#allocation38_spill] sm:$0xff] %v23385_v43  ;;  %v23389_v50 = vpop.f32.mrb[31].mxu0 }
 0x142   :  { %v1663_v34 = vmax.f32 %v1493_v28, 0.0  ;;  %19445 = vmatmul.mubr.msk.f32.gmra.mrb[96].mxu0 %vm124_vm0, %v2481_v26  ;;  %28865 = vst [vmem:[#allocation39_spill] sm:$0xff] %v23389_v50  ;;  %v2411_v50 = vld [vmem:[#allocation3 + $0x1b8] sm:$0xff] }
 0x143   :  { %v1662_v37 = vmax.f32 %v1488_v33, 0.0  ;;  %v19347_v40 = vpop.f32.mrb[38].mxu1  ;;  %v2483_v53 = vld [vmem:[#allocation3 + $0x1d1] sm:$0xff] }
 0x144   :  { %1728 = vst.msk [vmem:[#allocation3 + $0x201] sm:$0xff] %vm124_vm0, %v1663_v34  ;;  %v1503_v44 = vadd.f32 %v19347_v40, %v23208_v5  ;;  %v1497_v46 = vpop.f32.mrb[39].mxu1  ;;  %v2482_v48 = vld [vmem:[#allocation3 + $0x1c9] sm:$0xff]  ;;  %v23395_v63 = vpop.f32.mrb[32].mxu0 }
 0x145   :  { %1727 = vst.msk [vmem:[#allocation3 + $0x1f9] sm:$0xff] %vm124_vm0, %v1662_v37  ;;  %v1498_v52 = vadd.f32 %v23208_v5, %v1497_v46  ;;  %19447 = vmatprep.mubr.msk.f32.mxu0 %vm124_vm0, %v2482_v48  ;;  %28866 = vst [vmem:[#allocation40_spill] sm:$0xff] %v23395_v63  ;;  %v23399_v6 = vpop.f32.mrb[33].mxu0  ;;  %v23673_v63 = vld [vmem:[#allocation3 + $0x170] sm:$0xff]  ;;  %v23679_v43 = vld [vmem:[#allocation3 + $0x1c8] sm:$0xff] }
 0x146   :  { %v1665_v56 = vmax.f32 %v1503_v44, 0.0  ;;  %19448 = vmatmul.mubr.msk.f32.gmra.mrb[98].mxu0 %vm124_vm0, %v2483_v53  ;;  %28867 = vst [vmem:[#allocation41_spill] sm:$0xff] %v23399_v6  ;;  %v2410_v6 = vld [vmem:[#allocation3 + $0x1b0] sm:$0xff] }
 0x147   :  { %v1664_v58 = vmax.f32 %v1498_v52, 0.0  ;;  %v19350_v59 = vpop.f32.mrb[40].mxu1  ;;  %v2485_v10 = vld [vmem:[#allocation3 + $0x1e9] sm:$0xff] }
 0x148   :  { %1730 = vst.msk [vmem:[#allocation3 + $0x219] sm:$0xff] %vm124_vm0, %v1665_v56  ;;  %v1513_v0 = vadd.f32 %v19350_v59, %v23208_v5  ;;  %v1507_v1 = vpop.f32.mrb[41].mxu1  ;;  %v2484_v4 = vld [vmem:[#allocation3 + $0x1e1] sm:$0xff]  ;;  %v23405_v19 = vpop.f32.mrb[34].mxu0  ;;  %v23683_v32 = vld [vmem:[#allocation3 + $0x1d0] sm:$0xff] }
 0x149   :  { %1729 = vst.msk [vmem:[#allocation3 + $0x211] sm:$0xff] %vm124_vm0, %v1664_v58  ;;  %v1508_v9 = vadd.f32 %v23208_v5, %v1507_v1  ;;  %19450 = vmatprep.mubr.msk.f32.mxu0 %vm124_vm0, %v2484_v4  ;;  %28868 = vst [vmem:[#allocation42_spill] sm:$0xff] %v23405_v19  ;;  %v23409_v26 = vpop.f32.mrb[35].mxu0  ;;  %v23669_v19 = vld [vmem:[#allocation3 + $0x168] sm:$0xff]  ;;  %v23687_v27 = vld [vmem:[#allocation3 + $0x1e0] sm:$0xff] }
 0x14a   :  { %v1667_v12 = vmax.f32 %v1513_v0, 0.0  ;;  %19451 = vmatmul.mubr.msk.f32.gmra.mrb[100].mxu0 %vm124_vm0, %v2485_v10  ;;  %28869 = vst [vmem:[#allocation43_spill] sm:$0xff] %v23409_v26  ;;  %v23665_v26 = vld [vmem:[#allocation3 + $0x158] sm:$0xff]  ;;  %v23691_v15 = vld [vmem:[#allocation3 + $0x1e8] sm:$0xff] }
 0x14b   :  { %v1666_v13 = vmax.f32 %v1508_v9, 0.0  ;;  %v19353_v17 = vpop.f32.mrb[42].mxu1  ;;  %v2487_v31 = vld [vmem:[#allocation3 + $0x201] sm:$0xff] }
 0x14c   :  { %1732 = vst.msk [vmem:[#allocation3 + $0x231] sm:$0xff] %vm124_vm0, %v1667_v12  ;;  %v1523_v20 = vadd.f32 %v19353_v17, %v23208_v5  ;;  %v1517_v21 = vpop.f32.mrb[43].mxu1  ;;  %v2486_v22 = vld [vmem:[#allocation3 + $0x1f9] sm:$0xff]  ;;  %v23415_v40 = vpop.f32.mrb[36].mxu0 }
 0x14d   :  { %1731 = vst.msk [vmem:[#allocation3 + $0x229] sm:$0xff] %vm124_vm0, %v1666_v13  ;;  %v1518_v28 = vadd.f32 %v23208_v5, %v1517_v21  ;;  %19453 = vmatprep.mubr.msk.f32.mxu0 %vm124_vm0, %v2486_v22  ;;  %28870 = vst [vmem:[#allocation44_spill] sm:$0xff] %v23415_v40  ;;  %v23419_v52 = vpop.f32.mrb[37].mxu0  ;;  %v23661_v40 = vld [vmem:[#allocation3 + $0x150] sm:$0xff] }
 0x14e   :  { %v1669_v33 = vmax.f32 %v1523_v20, 0.0  ;;  %19454 = vmatmul.mubr.msk.f32.gmra.mrb[102].mxu0 %vm124_vm0, %v2487_v31  ;;  %28871 = vst [vmem:[#allocation45_spill] sm:$0xff] %v23419_v52  ;;  %v23657_v52 = vld [vmem:[#allocation3 + $0x140] sm:$0xff] }
 0x14f   :  { %v1668_v34 = vmax.f32 %v1518_v28, 0.0  ;;  %v19356_v37 = vpop.f32.mrb[44].mxu1  ;;  %v2489_v56 = vld [vmem:[#allocation3 + $0x219] sm:$0xff] }
 0x150   :  { %1734 = vst.msk [vmem:[#allocation3 + $0x249] sm:$0xff] %vm124_vm0, %v1669_v33  ;;  %v1533_v44 = vadd.f32 %v19356_v37, %v23208_v5  ;;  %v1527_v46 = vpop.f32.mrb[45].mxu1  ;;  %v2488_v48 = vld [vmem:[#allocation3 + $0x211] sm:$0xff]  ;;  %v23425_v1 = vpop.f32.mrb[38].mxu0 }
 0x151   :  { %1733 = vst.msk [vmem:[#allocation3 + $0x241] sm:$0xff] %vm124_vm0, %v1668_v34  ;;  %v1528_v53 = vadd.f32 %v23208_v5, %v1527_v46  ;;  %19456 = vmatprep.mubr.msk.f32.mxu0 %vm124_vm0, %v2488_v48  ;;  %28872 = vst [vmem:[#allocation46_spill] sm:$0xff] %v23425_v1  ;;  %v23429_v12 = vpop.f32.mrb[39].mxu0  ;;  %v23653_v1 = vld [vmem:[#allocation3 + $0x138] sm:$0xff]  ;;  %v23703_v7 = vld [vmem:[#allocation3 + $0x210] sm:$0xff] }
 0x152   :  { %v1671_v58 = vmax.f32 %v1533_v44, 0.0  ;;  %19457 = vmatmul.mubr.msk.f32.gmra.mrb[104].mxu0 %vm124_vm0, %v2489_v56  ;;  %28873 = vst [vmem:[#allocation47_spill] sm:$0xff] %v23429_v12  ;;  %v23649_v12 = vld [vmem:[#allocation3 + $0x128] sm:$0xff]  ;;  %v23707_v60 = vld [vmem:[#allocation3 + $0x218] sm:$0xff] }
 0x153   :  { %v1670_v59 = vmax.f32 %v1528_v53, 0.0  ;;  %v19359_v0 = vpop.f32.mrb[46].mxu1  ;;  %v2491_v17 = vld [vmem:[#allocation3 + $0x231] sm:$0xff] }
 0x154   :  { %1736 = vst.msk [vmem:[#allocation3 + $0x261] sm:$0xff] %vm124_vm0, %v1671_v58  ;;  %v1543_v4 = vadd.f32 %v19359_v0, %v23208_v5  ;;  %v1537_v9 = vpop.f32.mrb[47].mxu1  ;;  %v2490_v10 = vld [vmem:[#allocation3 + $0x229] sm:$0xff]  ;;  %v23435_v28 = vpop.f32.mrb[40].mxu0 }
 0x155   :  { %1735 = vst.msk [vmem:[#allocation3 + $0x259] sm:$0xff] %vm124_vm0, %v1670_v59  ;;  %v1538_v13 = vadd.f32 %v23208_v5, %v1537_v9  ;;  %19459 = vmatprep.mubr.msk.f32.mxu0 %vm124_vm0, %v2490_v10  ;;  %28874 = vst [vmem:[#allocation48_spill] sm:$0xff] %v23435_v28  ;;  %v23439_v37 = vpop.f32.mrb[41].mxu0  ;;  %v23645_v28 = vld [vmem:[#allocation3 + $0x120] sm:$0xff]  ;;  %v23711_v55 = vld [vmem:[#allocation3 + $0x228] sm:$0xff] }
 0x156   :  { %v1673_v20 = vmax.f32 %v1543_v4, 0.0  ;;  %19460 = vmatmul.mubr.msk.f32.gmra.mrb[106].mxu0 %vm124_vm0, %v2491_v17  ;;  %28875 = vst [vmem:[#allocation49_spill] sm:$0xff] %v23439_v37  ;;  %v23641_v37 = vld [vmem:[#allocation3 + $0x110] sm:$0xff] }
 0x157   :  { %v1672_v21 = vmax.f32 %v1538_v13, 0.0  ;;  %v19362_v22 = vpop.f32.mrb[48].mxu1  ;;  %v2493_v46 = vld [vmem:[#allocation3 + $0x249] sm:$0xff] }
 0x158   :  { %1738 = vst.msk [vmem:[#allocation3 + $0x279] sm:$0xff] %vm124_vm0, %v1673_v20  ;;  %v1553_v31 = vadd.f32 %v19362_v22, %v23208_v5  ;;  %v1547_v33 = vpop.f32.mrb[49].mxu1  ;;  %v2492_v34 = vld [vmem:[#allocation3 + $0x241] sm:$0xff]  ;;  %v23445_v58 = vpop.f32.mrb[42].mxu0  ;;  %v23715_v45 = vld [vmem:[#allocation3 + $0x230] sm:$0xff] }
 0x159   :  { %1737 = vst.msk [vmem:[#allocation3 + $0x271] sm:$0xff] %vm124_vm0, %v1672_v21  ;;  %v1548_v44 = vadd.f32 %v23208_v5, %v1547_v33  ;;  %19462 = vmatprep.mubr.msk.f32.mxu0 %vm124_vm0, %v2492_v34  ;;  %28876 = vst [vmem:[#allocation50_spill] sm:$0xff] %v23445_v58  ;;  %v23449_v9 = vpop.f32.mrb[43].mxu0  ;;  %v23637_v58 = vld [vmem:[#allocation3 + $0x108] sm:$0xff]  ;;  %v23719_v38 = vld [vmem:[#allocation3 + $0x240] sm:$0xff] }
 0x15a   :  { %v1675_v48 = vmax.f32 %v1553_v31, 0.0  ;;  %19463 = vmatmul.mubr.msk.f32.gmra.mrb[108].mxu0 %vm124_vm0, %v2493_v46  ;;  %28877 = vst [vmem:[#allocation51_spill] sm:$0xff] %v23449_v9  ;;  %v23633_v9 = vld [vmem:[#allocation3 + $0xf8] sm:$0xff]  ;;  %v23723_v30 = vld [vmem:[#allocation3 + $0x248] sm:$0xff] }
 0x15b   :  { %v1674_v53 = vmax.f32 %v1548_v44, 0.0  ;;  %v19365_v56 = vpop.f32.mrb[50].mxu1  ;;  %v2495_v13 = vld [vmem:[#allocation3 + $0x261] sm:$0xff] }
 0x15c   :  { %1740 = vst.msk [vmem:[#allocation3 + $0x291] sm:$0xff] %vm124_vm0, %v1675_v48  ;;  %v1563_v59 = vadd.f32 %v19365_v56, %v23208_v5  ;;  %v1557_v0 = vpop.f32.mrb[51].mxu1  ;;  %v2494_v4 = vld [vmem:[#allocation3 + $0x259] sm:$0xff]  ;;  %v23455_v22 = vpop.f32.mrb[44].mxu0 }
 0x15d   :  { %1739 = vst.msk [vmem:[#allocation3 + $0x289] sm:$0xff] %vm124_vm0, %v1674_v53  ;;  %v1558_v10 = vadd.f32 %v23208_v5, %v1557_v0  ;;  %19465 = vmatprep.mubr.msk.f32.mxu0 %vm124_vm0, %v2494_v4  ;;  %28878 = vst [vmem:[#allocation52_spill] sm:$0xff] %v23455_v22  ;;  %v23459_v44 = vpop.f32.mrb[45].mxu0  ;;  %v23629_v22 = vld [vmem:[#allocation3 + $0xf0] sm:$0xff]  ;;  %v23727_v24 = vld [vmem:[#allocation3 + $0x258] sm:$0xff] }
 0x15e   :  { %v1677_v17 = vmax.f32 %v1563_v59, 0.0  ;;  %19466 = vmatmul.mubr.msk.f32.gmra.mrb[110].mxu0 %vm124_vm0, %v2495_v13  ;;  %28879 = vst [vmem:[#allocation53_spill] sm:$0xff] %v23459_v44  ;;  %v23625_v44 = vld [vmem:[#allocation3 + $0xe0] sm:$0xff] }
 0x15f   :  { %v1676_v20 = vmax.f32 %v1558_v10, 0.0  ;;  %v19368_v21 = vpop.f32.mrb[52].mxu1  ;;  %v2497_v48 = vld [vmem:[#allocation3 + $0x279] sm:$0xff] }
 0x160   :  { %1742 = vst.msk [vmem:[#allocation3 + $0x2a9] sm:$0xff] %vm124_vm0, %v1677_v17  ;;  %v1573_v31 = vadd.f32 %v19368_v21, %v23208_v5  ;;  %v1567_v33 = vpop.f32.mrb[53].mxu1  ;;  %v2496_v34 = vld [vmem:[#allocation3 + $0x271] sm:$0xff]  ;;  %v23465_v0 = vpop.f32.mrb[46].mxu0  ;;  %v23731_v16 = vld [vmem:[#allocation3 + $0x260] sm:$0xff] }
 0x161   :  { %1741 = vst.msk [vmem:[#allocation3 + $0x2a1] sm:$0xff] %vm124_vm0, %v1676_v20  ;;  %v1568_v46 = vadd.f32 %v23208_v5, %v1567_v33  ;;  %19468 = vmatprep.mubr.msk.f32.mxu0 %vm124_vm0, %v2496_v34  ;;  %28880 = vst [vmem:[#allocation54_spill] sm:$0xff] %v23465_v0  ;;  %v23469_v17 = vpop.f32.mrb[47].mxu0  ;;  %v23621_v0 = vld [vmem:[#allocation3 + $0xd8] sm:$0xff]  ;;  %v23735_v11 = vld [vmem:[#allocation3 + $0x270] sm:$0xff] }
 0x162   :  { %v1679_v53 = vmax.f32 %v1573_v31, 0.0  ;;  %19469 = vmatmul.mubr.msk.f32.gmra.mrb[112].mxu0 %vm124_vm0, %v2497_v48  ;;  %28881 = vst [vmem:[#allocation55_spill] sm:$0xff] %v23469_v17  ;;  %v23617_v17 = vld [vmem:[#allocation3 + $0xc8] sm:$0xff]  ;;  %v23739_v2 = vld [vmem:[#allocation3 + $0x278] sm:$0xff] }
 0x163   :  { %v1678_v56 = vmax.f32 %v1568_v46, 0.0  ;;  %v19371_v59 = vpop.f32.mrb[54].mxu1  ;;  %v2499_v21 = vld [vmem:[#allocation3 + $0x291] sm:$0xff] }
 0x164   :  { %1744 = vst.msk [vmem:[#allocation3 + $0x2c1] sm:$0xff] %vm124_vm0, %v1679_v53  ;;  %v1583_v4 = vadd.f32 %v19371_v59, %v23208_v5  ;;  %v1577_v10 = vpop.f32.mrb[55].mxu1  ;;  %v2498_v13 = vld [vmem:[#allocation3 + $0x289] sm:$0xff]  ;;  %v23475_v46 = vpop.f32.mrb[48].mxu0 }
 0x165   :  { %1743 = vst.msk [vmem:[#allocation3 + $0x2b9] sm:$0xff] %vm124_vm0, %v1678_v56  ;;  %v1578_v20 = vadd.f32 %v23208_v5, %v1577_v10  ;;  %19471 = vmatprep.mubr.msk.f32.mxu0 %vm124_vm0, %v2498_v13  ;;  %28882 = vst [vmem:[#allocation56_spill] sm:$0xff] %v23475_v46  ;;  %v23479_v39 = vpop.f32.mrb[49].mxu0  ;;  %v23743_v62 = vld [vmem:[#allocation3 + $0x288] sm:$0xff]  ;;  %v23747_v54 = vld [vmem:[#allocation3 + $0x290] sm:$0xff] }
 0x166   :  { %v1681_v31 = vmax.f32 %v1583_v4, 0.0  ;;  %19472 = vmatmul.mubr.msk.f32.gmra.mrb[114].mxu0 %vm124_vm0, %v2499_v21  ;;  %28883 = vst [vmem:[#allocation57_spill] sm:$0xff] %v23479_v39 }
 0x167   :  { %v1680_v33 = vmax.f32 %v1578_v20, 0.0  ;;  %v19374_v34 = vpop.f32.mrb[56].mxu1  ;;  %v2501_v4 = vld [vmem:[#allocation3 + $0x2a9] sm:$0xff] }
 0x168   :  { %1746 = vst.msk [vmem:[#allocation3 + $0x2d9] sm:$0xff] %vm124_vm0, %v1681_v31  ;;  %v1593_v48 = vadd.f32 %v19374_v34, %v23208_v5  ;;  %v1587_v53 = vpop.f32.mrb[57].mxu1  ;;  %v2500_v59 = vld [vmem:[#allocation3 + $0x2a1] sm:$0xff]  ;;  %v23485_v21 = vpop.f32.mrb[50].mxu0 }
 0x169   :  { %1745 = vst.msk [vmem:[#allocation3 + $0x2d1] sm:$0xff] %vm124_vm0, %v1680_v33  ;;  %v1588_v56 = vadd.f32 %v23208_v5, %v1587_v53  ;;  %19474 = vmatprep.mubr.msk.f32.mxu0 %vm124_vm0, %v2500_v59  ;;  %28884 = vst [vmem:[#allocation58_spill] sm:$0xff] %v23485_v21  ;;  %v23489_v46 = vpop.f32.mrb[51].mxu0  ;;  %v23751_v49 = vld [vmem:[#allocation3 + $0x2a0] sm:$0xff]  ;;  %v23755_v42 = vld [vmem:[#allocation3 + $0x2a8] sm:$0xff] }
 0x16a   :  { %v1683_v10 = vmax.f32 %v1593_v48, 0.0  ;;  %19475 = vmatmul.mubr.msk.f32.gmra.mrb[116].mxu0 %vm124_vm0, %v2501_v4  ;;  %28885 = vst [vmem:[#allocation59_spill] sm:$0xff] %v23489_v46 }
 0x16b   :  { %v1682_v13 = vmax.f32 %v1588_v56, 0.0  ;;  %v19377_v20 = vpop.f32.mrb[58].mxu1  ;;  %v2503_v48 = vld [vmem:[#allocation3 + $0x2c1] sm:$0xff] }
 0x16c   :  { %1748 = vst.msk [vmem:[#allocation3 + $0x2f1] sm:$0xff] %vm124_vm0, %v1683_v10  ;;  %v1603_v31 = vadd.f32 %v19377_v20, %v23208_v5  ;;  %v1597_v34 = vpop.f32.mrb[59].mxu1  ;;  %v2502_v39 = vld [vmem:[#allocation3 + $0x2b9] sm:$0xff]  ;;  %v23495_v4 = vpop.f32.mrb[52].mxu0 }
 0x16d   :  { %1747 = vst.msk [vmem:[#allocation3 + $0x2e9] sm:$0xff] %vm124_vm0, %v1682_v13  ;;  %v1598_v33 = vadd.f32 %v23208_v5, %v1597_v34  ;;  %19477 = vmatprep.mubr.msk.f32.mxu0 %vm124_vm0, %v2502_v39  ;;  %28886 = vst [vmem:[#allocation60_spill] sm:$0xff] %v23495_v4  ;;  %v23499_v21 = vpop.f32.mrb[53].mxu0  ;;  %v23613_v4 = vld [vmem:[#allocation3 + $0xc0] sm:$0xff]  ;;  %v23759_v35 = vld [vmem:[#allocation3 + $0x2b8] sm:$0xff] }
 0x16e   :  { %v1685_v53 = vmax.f32 %v1603_v31, 0.0  ;;  %19478 = vmatmul.mubr.msk.f32.gmra.mrb[118].mxu0 %vm124_vm0, %v2503_v48  ;;  %28887 = vst [vmem:[#allocation61_spill] sm:$0xff] %v23499_v21  ;;  %v23609_v21 = vld [vmem:[#allocation3 + $0xb0] sm:$0xff]  ;;  %v23763_v29 = vld [vmem:[#allocation3 + $0x2c0] sm:$0xff] }
 0x16f   :  { %v1684_v59 = vmax.f32 %v1598_v33, 0.0  ;;  %v19380_v56 = vpop.f32.mrb[60].mxu1  ;;  %v2505_v13 = vld [vmem:[#allocation3 + $0x2d9] sm:$0xff] }
 0x170   :  { %1750 = vst.msk [vmem:[#allocation3 + $0x309] sm:$0xff] %vm124_vm0, %v1685_v53  ;;  %v1613_v10 = vadd.f32 %v19380_v56, %v23208_v5  ;;  %v1607_v20 = vpop.f32.mrb[61].mxu1  ;;  %v2504_v46 = vld [vmem:[#allocation3 + $0x2d1] sm:$0xff]  ;;  %v23505_v33 = vpop.f32.mrb[54].mxu0 }
 0x171   :  { %1749 = vst.msk [vmem:[#allocation3 + $0x301] sm:$0xff] %vm124_vm0, %v1684_v59  ;;  %v1608_v39 = vadd.f32 %v23208_v5, %v1607_v20  ;;  %19480 = vmatprep.mubr.msk.f32.mxu0 %vm124_vm0, %v2504_v46  ;;  %28888 = vst [vmem:[#allocation62_spill] sm:$0xff] %v23505_v33  ;;  %v23508_v53 = vpop.f32.mrb[55].mxu0  ;;  %v23605_v33 = vld [vmem:[#allocation3 + $0xa8] sm:$0xff]  ;;  %v23767_v25 = vld [vmem:[#allocation3 + $0x2d0] sm:$0xff] }
 0x172   :  { %v1687_v31 = vmax.f32 %v1613_v10, 0.0  ;;  %19481 = vmatmul.mubr.msk.f32.gmra.mrb[120].mxu0 %vm124_vm0, %v2505_v13  ;;  %28889 = vst [vmem:[#allocation63_spill] sm:$0xff] %v23508_v53  ;;  %v2378_v13 = vld [vmem:[#allocation3] sm:$0xff]  ;;  %v23601_v53 = vld [vmem:[#allocation3 + $0x98] sm:$0xff] }
 0x173   :  { %v1686_v34 = vmax.f32 %v1608_v39, 0.0  ;;  %v2507_v59 = vld [vmem:[#allocation3 + $0x2f1] sm:$0xff] }
 0x174   :  { %1752 = vst.msk [vmem:[#allocation3 + $0x321] sm:$0xff] %vm124_vm0, %v1687_v31  ;;  %v2506_v48 = vld [vmem:[#allocation3 + $0x2e9] sm:$0xff]  ;;  %v23513_v5 = vpop.f32.mrb[56].mxu0  ;;  %v23771_v18 = vld [vmem:[#allocation3 + $0x2d8] sm:$0xff] }
 0x175   :  { %1751 = vst.msk [vmem:[#allocation3 + $0x319] sm:$0xff] %vm124_vm0, %v1686_v34  ;;  %19483 = vmatprep.mubr.msk.f32.mxu0 %vm124_vm0, %v2506_v48  ;;  %28890 = vst [vmem:[#allocation64_spill] sm:$0xff] %v23513_v5  ;;  %v23515_v56 = vpop.f32.mrb[57].mxu0  ;;  %v16628_v48 = vld [vmem:[%s28494_s3 + $0x70] sm:$0xff]  ;;  %v23543_v5 = vld [vmem:[#allocation3 + $0x18] sm:$0xff] }
 0x176   :  { %19484 = vmatmul.mubr.msk.f32.gmra.mrb[122].mxu0 %vm124_vm0, %v2507_v59  ;;  %28891 = vst [vmem:[#allocation65_spill] sm:$0xff] %v23515_v56  ;;  %v16629_v59 = vld [vmem:[%s28494_s3 + $0x78] sm:$0xff]  ;;  %v16631_v56 = vld [vmem:[%s28494_s3 + $0x88] sm:$0xff]  ;;  %28898 = vst [vmem:[#allocation72_spill] sm:$0xff] %v23771_v18 }
 0x177   :  { %v2509_v10 = vld [vmem:[#allocation3 + $0x309] sm:$0xff] }
 0x178   :  { %v2508_v46 = vld [vmem:[#allocation3 + $0x301] sm:$0xff]  ;;  %v23519_v20 = vpop.f32.mrb[58].mxu0  ;;  %v23779_v8 = vld [vmem:[#allocation3 + $0x2f0] sm:$0xff] }
 0x179   :  { %19486 = vmatprep.mubr.msk.f32.mxu0 %vm124_vm0, %v2508_v46  ;;  %28892 = vst [vmem:[#allocation66_spill] sm:$0xff] %v23519_v20  ;;  %v23521_v31 = vpop.f32.mrb[59].mxu0  ;;  %v2379_v46 = vld [vmem:[#allocation3 + $0x8] sm:$0xff]  ;;  %v21384_v20 = vpack.c.bf16 %v16629_v59, %v16628_v48  ;;  %v23552_v59 = vld [vmem:[#allocation3 + $0x20] sm:$0xff]  ;;  %28900 = vst [vmem:[#allocation74_spill] sm:$0xff] %v23779_v8 }
 0x17a   :  { %19487 = vmatmul.mubr.msk.f32.gmra.mrb[124].mxu0 %vm124_vm0, %v2509_v10  ;;  %28893 = vst [vmem:[#allocation67_spill] sm:$0xff] %v23521_v31  ;;  %v23775_v14 = vld [vmem:[#allocation3 + $0x2e8] sm:$0xff]  ;;  %v23783_v3 = vld [vmem:[#allocation3 + $0x300] sm:$0xff] }
 0x17b   :  { %v2511_v34 = vld [vmem:[#allocation3 + $0x321] sm:$0xff]  ;;  %28899 = vst [vmem:[#allocation73_spill] sm:$0xff] %v23775_v14  ;;  %28901 = vst [vmem:[#allocation75_spill] sm:$0xff] %v23783_v3 }
 0x17c   :  { %v2510_v39 = vld [vmem:[#allocation3 + $0x319] sm:$0xff]  ;;  %v23532_v10 = vpop.f32.mrb[60].mxu0  ;;  %v23787_v61 = vld [vmem:[#allocation3 + $0x308] sm:$0xff] }
 0x17d   :  { %19489 = vmatprep.mubr.msk.f32.mxu0 %vm124_vm0, %v2510_v39  ;;  %28894 = vst [vmem:[#allocation68_spill] sm:$0xff] %v23532_v10  ;;  %v23534_v31 = vpop.f32.mrb[61].mxu0  ;;  %v16630_v39 = vld [vmem:[%s28494_s3 + $0x80] sm:$0xff]  ;;  %v23597_v10 = vld [vmem:[#allocation3 + $0x90] sm:$0xff]  ;;  %28902 = vst [vmem:[#allocation76_spill] sm:$0xff] %v23787_v61 }
 0x17e   :  { %19490 = vmatmul.mubr.msk.f32.gmra.mrb[126].mxu0 %vm124_vm0, %v2511_v34  ;;  %28895 = vst [vmem:[#allocation69_spill] sm:$0xff] %v23534_v31  ;;  %v21388_v48 = vpack.c.bf16 %v16631_v56, %v16630_v39  ;;  %v16696_v31 = vld [vmem:[%s28494_s3 + $0x90] sm:$0xff]  ;;  %v23568_v39 = vld [vmem:[#allocation3 + $0x38] sm:$0xff]  ;;  %v23795_v47 = vld [vmem:[#allocation3 + $0x320] sm:$0xff] }
 0x17f   :  { %19504 = vmatprep.mubr.msk.f32.mxu0 %vm124_vm0, %v2378_v13  ;;  %v23791_v57 = vld [vmem:[#allocation3 + $0x318] sm:$0xff]  ;;  %28904 = vst [vmem:[#allocation78_spill] sm:$0xff] %v23795_v47 }
 0x180   :  { %v23548_v13 = vpop.f32.mrb[62].mxu0  ;;  %28903 = vst [vmem:[#allocation77_spill] sm:$0xff] %v23791_v57 }
 0x181   :  { %28896 = vst [vmem:[#allocation70_spill] sm:$0xff] %v23548_v13  ;;  %v23550_v34 = vpop.f32.mrb[63].mxu0  ;;  %v23577_v13 = vld [vmem:[#allocation3 + $0x50] sm:$0xff] }
 0x182   :  { %19505 = vmatmul.mubr.msk.f32.vlgmr.msra.gmra.mrb[64].mxu0 %vm124_vm0, %v2379_v46  ;;  %28897 = vst [vmem:[#allocation71_spill] sm:$0xff] %v23550_v34  ;;  %v16697_v46 = vld [vmem:[%s28494_s3 + $0x98] sm:$0xff]  ;;  %v23572_v34 = vld [vmem:[#allocation3 + $0x48] sm:$0xff] }
 0x183   :  { %21383 = vmatpush3.bf16.msra.mxu0 %v23224_v23  ;;  %19507 = vmatprep.mubr.msk.f32.mxu0 %vm124_vm0, %v23543_v5  ;;  %v23562_v23 = vld [vmem:[#allocation3 + $0x30] sm:$0xff]  ;;  %v23566_v56 = vpack.c.bf16 %v16697_v46, %v16696_v31  ;;  %v23585_v31 = vld [vmem:[#allocation3 + $0x68] sm:$0xff]  ;;  %v23589_v46 = vld [vmem:[#allocation3 + $0x78] sm:$0xff] }
 0x184   :  { %21385 = vmatprep.subr.bf16.mxu0 %v21384_v20 }
 0x186   :  { %19508 = vmatmul.mubr.msk.f32.gmra.mrb[66].mxu0 %vm124_vm0, %v23552_v59 }
 0x187   :  { %19510 = vmatprep.mubr.msk.f32.mxu0 %vm124_vm0, %v23562_v23  ;;  %21387 = vmatpush3.bf16.msra.mxu0 %v21384_v20  ;;  %v23581_v20 = vld [vmem:[#allocation3 + $0x60] sm:$0xff] }
 0x188   :  { %21389 = vmatprep.subr.bf16.mxu0 %v21388_v48 }
 0x18a   :  { %19511 = vmatmul.mubr.msk.f32.gmra.mrb[68].mxu0 %vm124_vm0, %v23568_v39 }
 0x18b   :  { %19513 = vmatprep.mubr.msk.f32.mxu0 %vm124_vm0, %v23572_v34  ;;  %21391 = vmatpush3.bf16.msra.mxu0 %v21388_v48  ;;  %v23593_v48 = vld [vmem:[#allocation3 + $0x80] sm:$0xff] }
 0x18c   :  { %21393 = vmatprep.subr.bf16.mxu0 %v23566_v56 }
 0x18e   :  { %19514 = vmatmul.mubr.msk.f32.gmra.mrb[70].mxu0 %vm124_vm0, %v23577_v13 }
 0x18f   :  { %19516 = vmatprep.mubr.msk.f32.mxu0 %vm124_vm0, %v23581_v20 }
 0x192   :  { %19517 = vmatmul.mubr.msk.f32.gmra.mrb[72].mxu0 %vm124_vm0, %v23585_v31 }
 0x193   :  { %19519 = vmatprep.mubr.msk.f32.mxu0 %vm124_vm0, %v23589_v46 }
 0x196   :  { %19520 = vmatmul.mubr.msk.f32.gmra.mrb[74].mxu0 %vm124_vm0, %v23593_v48 }
 0x197   :  { %19522 = vmatprep.mubr.msk.f32.mxu0 %vm124_vm0, %v23597_v10 }
 0x19a   :  { %19523 = vmatmul.mubr.msk.f32.gmra.mrb[76].mxu0 %vm124_vm0, %v23601_v53 }
 0x19b   :  { %19525 = vmatprep.mubr.msk.f32.mxu0 %vm124_vm0, %v23605_v33 }
 0x19e   :  { %19526 = vmatmul.mubr.msk.f32.gmra.mrb[78].mxu0 %vm124_vm0, %v23609_v21 }
 0x19f   :  { %19528 = vmatprep.mubr.msk.f32.mxu0 %vm124_vm0, %v23613_v4 }
 0x1a2   :  { %19529 = vmatmul.mubr.msk.f32.gmra.mrb[80].mxu0 %vm124_vm0, %v23617_v17 }
 0x1a3   :  { %19531 = vmatprep.mubr.msk.f32.mxu0 %vm124_vm0, %v23621_v0 }
 0x1a6   :  { %19532 = vmatmul.mubr.msk.f32.gmra.mrb[82].mxu0 %vm124_vm0, %v23625_v44 }
 0x1a7   :  { %19534 = vmatprep.mubr.msk.f32.mxu0 %vm124_vm0, %v23629_v22 }
 0x1aa   :  { %19535 = vmatmul.mubr.msk.f32.gmra.mrb[84].mxu0 %vm124_vm0, %v23633_v9 }
 0x1ab   :  { %19537 = vmatprep.mubr.msk.f32.mxu0 %vm124_vm0, %v23637_v58 }
 0x1ae   :  { %19538 = vmatmul.mubr.msk.f32.gmra.mrb[86].mxu0 %vm124_vm0, %v23641_v37 }
 0x1af   :  { %19540 = vmatprep.mubr.msk.f32.mxu0 %vm124_vm0, %v23645_v28 }
 0x1b2   :  { %19541 = vmatmul.mubr.msk.f32.gmra.mrb[88].mxu0 %vm124_vm0, %v23649_v12 }
 0x1b3   :  { %19543 = vmatprep.mubr.msk.f32.mxu0 %vm124_vm0, %v23653_v1 }
 0x1b6   :  { %19544 = vmatmul.mubr.msk.f32.gmra.mrb[90].mxu0 %vm124_vm0, %v23657_v52 }
 0x1b7   :  { %19546 = vmatprep.mubr.msk.f32.mxu0 %vm124_vm0, %v23661_v40 }
 0x1ba   :  { %19547 = vmatmul.mubr.msk.f32.gmra.mrb[92].mxu0 %vm124_vm0, %v23665_v26 }
 0x1bb   :  { %19549 = vmatprep.mubr.msk.f32.mxu0 %vm124_vm0, %v23669_v19 }
 0x1be   :  { %19550 = vmatmul.mubr.msk.f32.gmra.mrb[94].mxu0 %vm124_vm0, %v23673_v63 }
 0x1bf   :  { %19552 = vmatprep.mubr.msk.f32.mxu0 %vm124_vm0, %v2410_v6  ;;  %v23699_v6 = vld [vmem:[#allocation3 + $0x200] sm:$0xff] }
 0x1c2   :  { %19553 = vmatmul.mubr.msk.f32.gmra.mrb[96].mxu0 %vm124_vm0, %v2411_v50  ;;  %v23695_v50 = vld [vmem:[#allocation3 + $0x1f8] sm:$0xff] }
 0x1c3   :  { %19555 = vmatprep.mubr.msk.f32.mxu0 %vm124_vm0, %v23679_v43 }
 0x1c6   :  { %19556 = vmatmul.mubr.msk.f32.gmra.mrb[98].mxu0 %vm124_vm0, %v23683_v32 }
 0x1c7   :  { %19558 = vmatprep.mubr.msk.f32.mxu0 %vm124_vm0, %v23687_v27 }
 0x1ca   :  { %19559 = vmatmul.mubr.msk.f32.gmra.mrb[100].mxu0 %vm124_vm0, %v23691_v15 }
 0x1cb   :  { %19561 = vmatprep.mubr.msk.f32.mxu0 %vm124_vm0, %v23695_v50 }
 0x1ce   :  { %19562 = vmatmul.mubr.msk.f32.gmra.mrb[102].mxu0 %vm124_vm0, %v23699_v6 }
 0x1cf   :  { %19564 = vmatprep.mubr.msk.f32.mxu0 %vm124_vm0, %v23703_v7 }
 0x1d2   :  { %19565 = vmatmul.mubr.msk.f32.gmra.mrb[104].mxu0 %vm124_vm0, %v23707_v60 }
 0x1d3   :  { %19567 = vmatprep.mubr.msk.f32.mxu0 %vm124_vm0, %v23711_v55 }
 0x1d6   :  { %19568 = vmatmul.mubr.msk.f32.gmra.mrb[106].mxu0 %vm124_vm0, %v23715_v45 }
 0x1d7   :  { %19570 = vmatprep.mubr.msk.f32.mxu0 %vm124_vm0, %v23719_v38 }
 0x1da   :  { %19571 = vmatmul.mubr.msk.f32.gmra.mrb[108].mxu0 %vm124_vm0, %v23723_v30 }
 0x1db   :  { %19573 = vmatprep.mubr.msk.f32.mxu0 %vm124_vm0, %v23727_v24 }
 0x1de   :  { %19574 = vmatmul.mubr.msk.f32.gmra.mrb[110].mxu0 %vm124_vm0, %v23731_v16 }
 0x1df   :  { %19576 = vmatprep.mubr.msk.f32.mxu0 %vm124_vm0, %v23735_v11 }
 0x1e2   :  { %19577 = vmatmul.mubr.msk.f32.gmra.mrb[112].mxu0 %vm124_vm0, %v23739_v2 }
 0x1e3   :  { %19579 = vmatprep.mubr.msk.f32.mxu0 %vm124_vm0, %v23743_v62 }
 0x1e6   :  { %19580 = vmatmul.mubr.msk.f32.gmra.mrb[114].mxu0 %vm124_vm0, %v23747_v54 }
 0x1e7   :  { %19582 = vmatprep.mubr.msk.f32.mxu0 %vm124_vm0, %v23751_v49 }
 0x1ea   :  { %19583 = vmatmul.mubr.msk.f32.gmra.mrb[116].mxu0 %vm124_vm0, %v23755_v42 }
 0x1eb   :  { %19585 = vmatprep.mubr.msk.f32.mxu0 %vm124_vm0, %v23759_v35 }
 0x1ee   :  { %19586 = vmatmul.mubr.msk.f32.gmra.mrb[118].mxu0 %vm124_vm0, %v23763_v29 }
 0x1ef   :  { %19588 = vmatprep.mubr.msk.f32.mxu0 %vm124_vm0, %v23767_v25 }
 0x1f2   :  { %19589 = vmatmul.mubr.msk.f32.gmra.mrb[120].mxu0 %vm124_vm0, %v23771_v18 }
 0x1f3   :  { %19591 = vmatprep.mubr.msk.f32.mxu0 %vm124_vm0, %v23775_v14  ;;  %v23813_v14 = vld [vmem:[#allocation3 + $0x1a] sm:$0xff] }
 0x1f4   :  { %28905 = vst [vmem:[#allocation79_spill] sm:$0xff] %v23813_v14 }
 0x1f6   :  { %19592 = vmatmul.mubr.msk.f32.gmra.mrb[122].mxu0 %vm124_vm0, %v23779_v8  ;;  %v16701_v8 = vld [vmem:[%s28494_s3 + $0xb8] sm:$0xff] }
 0x1f7   :  { %19594 = vmatprep.mubr.msk.f32.mxu0 %vm124_vm0, %v23783_v3  ;;  %v21396_v3 = vpack.c.bf16 %v16699_v36, %v16698_v41  ;;  %v23818_v36 = vld [vmem:[#allocation3 + $0x22] sm:$0xff] }
 0x1f8   :  { %28906 = vst [vmem:[#allocation80_spill] sm:$0xff] %v23818_v36  ;;  %v16766_v41 = vld [vmem:[%s28494_s3 + $0xc0] sm:$0xff] }
 0x1fa   :  { %19595 = vmatmul.mubr.msk.f32.gmra.mrb[124].mxu0 %vm124_vm0, %v23787_v61  ;;  %v3674_v61 = vld [vmem:[#allocation3 + $0xa] sm:$0xff] }
 0x1fb   :  { %19597 = vmatprep.mubr.msk.f32.mxu0 %vm124_vm0, %v23791_v57  ;;  %v16700_v57 = vld [vmem:[%s28494_s3 + $0xb0] sm:$0xff] }
 0x1fe   :  { %19598 = vmatmul.mubr.msk.f32.gmra.mrb[126].mxu0 %vm124_vm0, %v23795_v47  ;;  %v16767_v47 = vld [vmem:[%s28494_s3 + $0xc8] sm:$0xff] }
 0x1ff   :  { %19612 = vmatprep.mubr.msk.f32.mxu0 %vm124_vm0, %v3673_v51  ;;  %v21400_v51 = vpack.c.bf16 %v16701_v8, %v16700_v57  ;;  %v23832_v57 = vpack.c.bf16 %v16767_v47, %v16766_v41  ;;  %v23834_v8 = vld [vmem:[#allocation3 + $0x3a] sm:$0xff]  ;;  %v23847_v47 = vld [vmem:[#allocation3 + $0x62] sm:$0xff] }
 0x200   :  { %28908 = vst [vmem:[#allocation82_spill] sm:$0xff] %v23834_v8  ;;  %28911 = vst [vmem:[#allocation85_spill] sm:$0xff] %v23847_v47  ;;  %v23855_v41 = vld [vmem:[#allocation3 + $0x7a] sm:$0xff] }
 0x201   :  { %28913 = vst [vmem:[#allocation87_spill] sm:$0xff] %v23855_v41 }
 0x202   :  { %19613 = vmatmul.mubr.msk.f32.vlgmr.msra.gmra.mrb[64].mxu0 %vm124_vm0, %v3674_v61  ;;  %v23828_v61 = vld [vmem:[#allocation3 + $0x32] sm:$0xff] }
 0x203   :  { %21395 = vmatpush3.bf16.msra.mxu0 %v23566_v56  ;;  %19615 = vmatprep.mubr.msk.f32.mxu0 %vm124_vm0, %v23813_v14  ;;  %28907 = vst [vmem:[#allocation81_spill] sm:$0xff] %v23828_v61  ;;  %v23838_v56 = vld [vmem:[#allocation3 + $0x4a] sm:$0xff] }
 0x204   :  { %21397 = vmatprep.subr.bf16.mxu0 %v21396_v3  ;;  %28909 = vst [vmem:[#allocation83_spill] sm:$0xff] %v23838_v56 }
 0x206   :  { %19616 = vmatmul.mubr.msk.f32.gmra.mrb[66].mxu0 %vm124_vm0, %v23818_v36  ;;  %v23843_v36 = vld [vmem:[#allocation3 + $0x52] sm:$0xff] }
 0x207   :  { %19618 = vmatprep.mubr.msk.f32.mxu0 %vm124_vm0, %v23828_v61  ;;  %21399 = vmatpush3.bf16.msra.mxu0 %v21396_v3  ;;  %28910 = vst [vmem:[#allocation84_spill] sm:$0xff] %v23843_v36  ;;  %v23851_v3 = vld [vmem:[#allocation3 + $0x6a] sm:$0xff] }
 0x208   :  { %21401 = vmatprep.subr.bf16.mxu0 %v21400_v51  ;;  %28912 = vst [vmem:[#allocation86_spill] sm:$0xff] %v23851_v3 }
 0x20a   :  { %19619 = vmatmul.mubr.msk.f32.gmra.mrb[68].mxu0 %vm124_vm0, %v23834_v8  ;;  %v24032_v8 = vld [vmem:[#allocation3 + $0x2c2] sm:$0xff] }
 0x20b   :  { %19621 = vmatprep.mubr.msk.f32.mxu0 %vm124_vm0, %v23838_v56  ;;  %21403 = vmatpush3.bf16.msra.mxu0 %v21400_v51  ;;  %v23859_v51 = vld [vmem:[#allocation3 + $0x82] sm:$0xff]  ;;  %v23939_v56 = vld [vmem:[#allocation3 + $0x172] sm:$0xff] }
 0x20c   :  { %21405 = vmatprep.subr.bf16.mxu0 %v23832_v57  ;;  %28914 = vst [vmem:[#allocation88_spill] sm:$0xff] %v23859_v51  ;;  %28934 = vst [vmem:[#allocation108_spill] sm:$0xff] %v23939_v56 }
 0x20e   :  { %19622 = vmatmul.mubr.msk.f32.gmra.mrb[70].mxu0 %vm124_vm0, %v23843_v36  ;;  %v23863_v36 = vld [vmem:[#allocation3 + $0x92] sm:$0xff] }
 0x20f   :  { %19624 = vmatprep.mubr.msk.f32.mxu0 %vm124_vm0, %v23847_v47  ;;  %28915 = vst [vmem:[#allocation89_spill] sm:$0xff] %v23863_v36  ;;  %v23867_v47 = vld [vmem:[#allocation3 + $0x9a] sm:$0xff] }
 0x210   :  { %28916 = vst [vmem:[#allocation90_spill] sm:$0xff] %v23867_v47 }
 0x212   :  { %19625 = vmatmul.mubr.msk.f32.gmra.mrb[72].mxu0 %vm124_vm0, %v23851_v3  ;;  %v23871_v3 = vld [vmem:[#allocation3 + $0xaa] sm:$0xff] }
 0x213   :  { %19627 = vmatprep.mubr.msk.f32.mxu0 %vm124_vm0, %v23855_v41  ;;  %28917 = vst [vmem:[#allocation91_spill] sm:$0xff] %v23871_v3  ;;  %v23875_v41 = vld [vmem:[#allocation3 + $0xb2] sm:$0xff] }
 0x214   :  { %28918 = vst [vmem:[#allocation92_spill] sm:$0xff] %v23875_v41 }
 0x216   :  { %19628 = vmatmul.mubr.msk.f32.gmra.mrb[74].mxu0 %vm124_vm0, %v23859_v51  ;;  %v23879_v51 = vld [vmem:[#allocation3 + $0xc2] sm:$0xff] }
 0x217   :  { %19630 = vmatprep.mubr.msk.f32.mxu0 %vm124_vm0, %v23863_v36  ;;  %28919 = vst [vmem:[#allocation93_spill] sm:$0xff] %v23879_v51  ;;  %v23883_v36 = vld [vmem:[#allocation3 + $0xca] sm:$0xff] }
 0x218   :  { %28920 = vst [vmem:[#allocation94_spill] sm:$0xff] %v23883_v36 }
 0x21a   :  { %19631 = vmatmul.mubr.msk.f32.gmra.mrb[76].mxu0 %vm124_vm0, %v23867_v47  ;;  %v23887_v47 = vld [vmem:[#allocation3 + $0xda] sm:$0xff] }
 0x21b   :  { %19633 = vmatprep.mubr.msk.f32.mxu0 %vm124_vm0, %v23871_v3  ;;  %28921 = vst [vmem:[#allocation95_spill] sm:$0xff] %v23887_v47  ;;  %v23891_v3 = vld [vmem:[#allocation3 + $0xe2] sm:$0xff] }
 0x21c   :  { %28922 = vst [vmem:[#allocation96_spill] sm:$0xff] %v23891_v3 }
 0x21e   :  { %19634 = vmatmul.mubr.msk.f32.gmra.mrb[78].mxu0 %vm124_vm0, %v23875_v41  ;;  %v23895_v41 = vld [vmem:[#allocation3 + $0xf2] sm:$0xff] }
 0x21f   :  { %19636 = vmatprep.mubr.msk.f32.mxu0 %vm124_vm0, %v23879_v51  ;;  %28923 = vst [vmem:[#allocation97_spill] sm:$0xff] %v23895_v41  ;;  %v23899_v51 = vld [vmem:[#allocation3 + $0xfa] sm:$0xff] }
 0x220   :  { %28924 = vst [vmem:[#allocation98_spill] sm:$0xff] %v23899_v51 }
 0x222   :  { %19637 = vmatmul.mubr.msk.f32.gmra.mrb[80].mxu0 %vm124_vm0, %v23883_v36  ;;  %v23903_v36 = vld [vmem:[#allocation3 + $0x10a] sm:$0xff] }
 0x223   :  { %19639 = vmatprep.mubr.msk.f32.mxu0 %vm124_vm0, %v23887_v47  ;;  %28925 = vst [vmem:[#allocation99_spill] sm:$0xff] %v23903_v36  ;;  %v23907_v47 = vld [vmem:[#allocation3 + $0x112] sm:$0xff] }
 0x224   :  { %28926 = vst [vmem:[#allocation100_spill] sm:$0xff] %v23907_v47 }
 0x226   :  { %19640 = vmatmul.mubr.msk.f32.gmra.mrb[82].mxu0 %vm124_vm0, %v23891_v3  ;;  %v23911_v3 = vld [vmem:[#allocation3 + $0x122] sm:$0xff] }
 0x227   :  { %19642 = vmatprep.mubr.msk.f32.mxu0 %vm124_vm0, %v23895_v41  ;;  %28927 = vst [vmem:[#allocation101_spill] sm:$0xff] %v23911_v3  ;;  %v23915_v41 = vld [vmem:[#allocation3 + $0x12a] sm:$0xff] }
 0x228   :  { %28928 = vst [vmem:[#allocation102_spill] sm:$0xff] %v23915_v41 }
 0x22a   :  { %19643 = vmatmul.mubr.msk.f32.gmra.mrb[84].mxu0 %vm124_vm0, %v23899_v51  ;;  %v23919_v51 = vld [vmem:[#allocation3 + $0x13a] sm:$0xff] }
 0x22b   :  { %19645 = vmatprep.mubr.msk.f32.mxu0 %vm124_vm0, %v23903_v36  ;;  %28929 = vst [vmem:[#allocation103_spill] sm:$0xff] %v23919_v51  ;;  %v23923_v36 = vld [vmem:[#allocation3 + $0x142] sm:$0xff] }
 0x22c   :  { %28930 = vst [vmem:[#allocation104_spill] sm:$0xff] %v23923_v36 }
 0x22e   :  { %19646 = vmatmul.mubr.msk.f32.gmra.mrb[86].mxu0 %vm124_vm0, %v23907_v47  ;;  %v23927_v47 = vld [vmem:[#allocation3 + $0x152] sm:$0xff] }
 0x22f   :  { %19648 = vmatprep.mubr.msk.f32.mxu0 %vm124_vm0, %v23911_v3  ;;  %28931 = vst [vmem:[#allocation105_spill] sm:$0xff] %v23927_v47  ;;  %v23931_v3 = vld [vmem:[#allocation3 + $0x15a] sm:$0xff] }
 0x230   :  { %28932 = vst [vmem:[#allocation106_spill] sm:$0xff] %v23931_v3 }
 0x232   :  { %19649 = vmatmul.mubr.msk.f32.gmra.mrb[88].mxu0 %vm124_vm0, %v23915_v41  ;;  %v23935_v41 = vld [vmem:[#allocation3 + $0x16a] sm:$0xff] }
 0x233   :  { %19651 = vmatprep.mubr.msk.f32.mxu0 %vm124_vm0, %v23919_v51  ;;  %28933 = vst [vmem:[#allocation107_spill] sm:$0xff] %v23935_v41  ;;  %v3705_v51 = vld [vmem:[#allocation3 + $0x1b2] sm:$0xff] }
 0x236   :  { %19652 = vmatmul.mubr.msk.f32.gmra.mrb[90].mxu0 %vm124_vm0, %v23923_v36  ;;  %v3706_v36 = vld [vmem:[#allocation3 + $0x1ba] sm:$0xff] }
 0x237   :  { %19654 = vmatprep.mubr.msk.f32.mxu0 %vm124_vm0, %v23927_v47  ;;  %v23945_v47 = vld [vmem:[#allocation3 + $0x1ca] sm:$0xff] }
 0x238   :  { %28935 = vst [vmem:[#allocation109_spill] sm:$0xff] %v23945_v47 }
 0x23a   :  { %19655 = vmatmul.mubr.msk.f32.gmra.mrb[92].mxu0 %vm124_vm0, %v23931_v3  ;;  %v23949_v3 = vld [vmem:[#allocation3 + $0x1d2] sm:$0xff] }
 0x23b   :  { %19657 = vmatprep.mubr.msk.f32.mxu0 %vm124_vm0, %v23935_v41  ;;  %28936 = vst [vmem:[#allocation110_spill] sm:$0xff] %v23949_v3  ;;  %v23953_v41 = vld [vmem:[#allocation3 + $0x1e2] sm:$0xff] }
 0x23c   :  { %28937 = vst [vmem:[#allocation111_spill] sm:$0xff] %v23953_v41 }
 0x23e   :  { %19658 = vmatmul.mubr.msk.f32.gmra.mrb[94].mxu0 %vm124_vm0, %v23939_v56  ;;  %v23957_v56 = vld [vmem:[#allocation3 + $0x1ea] sm:$0xff] }
 0x23f   :  { %19660 = vmatprep.mubr.msk.f32.mxu0 %vm124_vm0, %v3705_v51  ;;  %28938 = vst [vmem:[#allocation112_spill] sm:$0xff] %v23957_v56  ;;  %v23965_v51 = vld [vmem:[#allocation3 + $0x202] sm:$0xff] }
 0x240   :  { %28940 = vst [vmem:[#allocation114_spill] sm:$0xff] %v23965_v51 }
 0x242   :  { %19661 = vmatmul.mubr.msk.f32.gmra.mrb[96].mxu0 %vm124_vm0, %v3706_v36  ;;  %v23961_v36 = vld [vmem:[#allocation3 + $0x1fa] sm:$0xff] }
 0x243   :  { %19663 = vmatprep.mubr.msk.f32.mxu0 %vm124_vm0, %v23945_v47  ;;  %28939 = vst [vmem:[#allocation113_spill] sm:$0xff] %v23961_v36 }
 0x246   :  { %19664 = vmatmul.mubr.msk.f32.gmra.mrb[98].mxu0 %vm124_vm0, %v23949_v3  ;;  %v23969_v3 = vld [vmem:[#allocation3 + $0x212] sm:$0xff] }
 0x247   :  { %19666 = vmatprep.mubr.msk.f32.mxu0 %vm124_vm0, %v23953_v41  ;;  %28941 = vst [vmem:[#allocation115_spill] sm:$0xff] %v23969_v3  ;;  %v23973_v41 = vld [vmem:[#allocation3 + $0x21a] sm:$0xff] }
 0x248   :  { %28942 = vst [vmem:[#allocation116_spill] sm:$0xff] %v23973_v41 }
 0x24a   :  { %19667 = vmatmul.mubr.msk.f32.gmra.mrb[100].mxu0 %vm124_vm0, %v23957_v56  ;;  %v23977_v56 = vld [vmem:[#allocation3 + $0x22a] sm:$0xff] }
 0x24b   :  { %19669 = vmatprep.mubr.msk.f32.mxu0 %vm124_vm0, %v23961_v36  ;;  %28943 = vst [vmem:[#allocation117_spill] sm:$0xff] %v23977_v56  ;;  %v23981_v36 = vld [vmem:[#allocation3 + $0x232] sm:$0xff] }
 0x24c   :  { %28944 = vst [vmem:[#allocation118_spill] sm:$0xff] %v23981_v36 }
 0x24e   :  { %19670 = vmatmul.mubr.msk.f32.gmra.mrb[102].mxu0 %vm124_vm0, %v23965_v51  ;;  %v23985_v51 = vld [vmem:[#allocation3 + $0x242] sm:$0xff] }
 0x24f   :  { %19672 = vmatprep.mubr.msk.f32.mxu0 %vm124_vm0, %v23969_v3  ;;  %28945 = vst [vmem:[#allocation119_spill] sm:$0xff] %v23985_v51  ;;  %v23989_v3 = vld [vmem:[#allocation3 + $0x24a] sm:$0xff] }
 0x250   :  { %28946 = vst [vmem:[#allocation120_spill] sm:$0xff] %v23989_v3 }
 0x252   :  { %19673 = vmatmul.mubr.msk.f32.gmra.mrb[104].mxu0 %vm124_vm0, %v23973_v41  ;;  %v23993_v41 = vld [vmem:[#allocation3 + $0x25a] sm:$0xff] }
 0x253   :  { %19675 = vmatprep.mubr.msk.f32.mxu0 %vm124_vm0, %v23977_v56  ;;  %28947 = vst [vmem:[#allocation121_spill] sm:$0xff] %v23993_v41  ;;  %v23997_v56 = vld [vmem:[#allocation3 + $0x262] sm:$0xff] }
 0x254   :  { %28948 = vst [vmem:[#allocation122_spill] sm:$0xff] %v23997_v56 }
 0x256   :  { %19676 = vmatmul.mubr.msk.f32.gmra.mrb[106].mxu0 %vm124_vm0, %v23981_v36  ;;  %v24001_v36 = vld [vmem:[#allocation3 + $0x272] sm:$0xff] }
 0x257   :  { %19678 = vmatprep.mubr.msk.f32.mxu0 %vm124_vm0, %v23985_v51  ;;  %28949 = vst [vmem:[#allocation123_spill] sm:$0xff] %v24001_v36  ;;  %v24005_v51 = vld [vmem:[#allocation3 + $0x27a] sm:$0xff] }
 0x258   :  { %28950 = vst [vmem:[#allocation124_spill] sm:$0xff] %v24005_v51 }
 0x25a   :  { %19679 = vmatmul.mubr.msk.f32.gmra.mrb[108].mxu0 %vm124_vm0, %v23989_v3  ;;  %v24009_v3 = vld [vmem:[#allocation3 + $0x28a] sm:$0xff] }
 0x25b   :  { %19681 = vmatprep.mubr.msk.f32.mxu0 %vm124_vm0, %v23993_v41  ;;  %28951 = vst [vmem:[#allocation125_spill] sm:$0xff] %v24009_v3  ;;  %v24013_v41 = vld [vmem:[#allocation3 + $0x292] sm:$0xff] }
 0x25c   :  { %28952 = vst [vmem:[#allocation126_spill] sm:$0xff] %v24013_v41 }
 0x25e   :  { %19682 = vmatmul.mubr.msk.f32.gmra.mrb[110].mxu0 %vm124_vm0, %v23997_v56  ;;  %v24017_v56 = vld [vmem:[#allocation3 + $0x2a2] sm:$0xff] }
 0x25f   :  { %19684 = vmatprep.mubr.msk.f32.mxu0 %vm124_vm0, %v24001_v36  ;;  %28953 = vst [vmem:[#allocation127_spill] sm:$0xff] %v24017_v56  ;;  %v24021_v36 = vld [vmem:[#allocation3 + $0x2aa] sm:$0xff] }
 0x260   :  { %28954 = vst [vmem:[#allocation128_spill] sm:$0xff] %v24021_v36 }
 0x262   :  { %19685 = vmatmul.mubr.msk.f32.gmra.mrb[112].mxu0 %vm124_vm0, %v24005_v51  ;;  %v24025_v51 = vld [vmem:[#allocation3 + $0x2ba] sm:$0xff] }
 0x263   :  { %19687 = vmatprep.mubr.msk.f32.mxu0 %vm124_vm0, %v24009_v3  ;;  %28955 = vst [vmem:[#allocation129_spill] sm:$0xff] %v24025_v51  ;;  %v19383_v3 = vpop.f32.mrb[62].mxu1 }
 0x266   :  { %19688 = vmatmul.mubr.msk.f32.gmra.mrb[114].mxu0 %vm124_vm0, %v24013_v41  ;;  %v22567_v41 = vld [vmem:[%s28498_s7] ss:$0 sm:$0xff]  ;;  %s22620_s7 = smov 64  }
 0x267   :  { %19690 = vmatprep.mubr.msk.f32.mxu0 %vm124_vm0, %v24017_v56  ;;  %v1623_v47 = vadd.f32 %v22567_v41, %v19383_v3  ;;  %v24036_v56 = vld [vmem:[#allocation3 + $0x2d2] sm:$0xff]  ;;  %v24045_v3 = vld [vmem:[#allocation3 + $0x2ea] sm:$0xff] }
 0x269   :  { %v1689_v61 = vmax.f32 %v1623_v47, 0.0  ;;  %v24050_v47 = vld [vmem:[#allocation3 + $0x2f2] sm:$0xff] }
 0x26a   :  { %19691 = vmatmul.mubr.msk.f32.gmra.mrb[116].mxu0 %vm124_vm0, %v24021_v36  ;;  %v1617_v36 = vpop.f32.mrb[63].mxu1  ;;  %28956 = vst [vmem:[#allocation130_spill] sm:$0xff] %v24050_v47 }
 0x26b   :  { %19693 = vmatprep.mubr.msk.f32.mxu0 %vm124_vm0, %v24025_v51  ;;  %v1618_v14 = vadd.f32 %v22567_v41, %v1617_v36  ;;  %1754 = vst.msk [vmem:[#allocation3 + $0x339] sm:$0xff] %vm124_vm0, %v1689_v61  ;;  %v24041_v51 = vld [vmem:[#allocation3 + $0x2da] sm:$0xff]  ;;  %v24054_v41 = vld [vmem:[#allocation3 + $0x302] sm:$0xff]  ;;  %v16768_v36 = vld [vmem:[%s28494_s3 + $0xd0] sm:$0xff] }
 0x26c   :  { %28957 = vst [vmem:[#allocation131_spill] sm:$0xff] %v24054_v41  ;;  %v24062_v61 = vld [vmem:[#allocation3 + $0x31a] sm:$0xff] }
 0x26d   :  { %v1688_v18 = vmax.f32 %v1618_v14, 0.0  ;;  %v24058_v14 = vld [vmem:[#allocation3 + $0x30a] sm:$0xff]  ;;  %28959 = vst [vmem:[#allocation133_spill] sm:$0xff] %v24062_v61 }
 0x26e   :  { %19694 = vmatmul.mubr.msk.f32.gmra.mrb[118].mxu0 %vm124_vm0, %v24032_v8  ;;  %28958 = vst [vmem:[#allocation132_spill] sm:$0xff] %v24058_v14 }
 0x26f   :  { %19696 = vmatprep.mubr.msk.f32.mxu0 %vm124_vm0, %v24036_v56  ;;  %1753 = vst.msk [vmem:[#allocation3 + $0x331] sm:$0xff] %vm124_vm0, %v1688_v18  ;;  %v24066_v18 = vld [vmem:[#allocation3 + $0x322] sm:$0xff] }
 0x270   :  { %28960 = vst [vmem:[#allocation134_spill] sm:$0xff] %v24066_v18 }
 0x272   :  { %19697 = vmatmul.mubr.msk.f32.gmra.mrb[120].mxu0 %vm124_vm0, %v24041_v51 }
 0x273   :  { %19699 = vmatprep.mubr.msk.f32.mxu0 %vm124_vm0, %v24045_v3 }
 0x276   :  { %19700 = vmatmul.mubr.msk.f32.gmra.mrb[122].mxu0 %vm124_vm0, %v24050_v47  ;;  %v16771_v47 = vld [vmem:[%s28494_s3 + $0xe8] sm:$0xff] }
 0x277   :  { %19702 = vmatprep.mubr.msk.f32.mxu0 %vm124_vm0, %v24054_v41  ;;  %v16769_v41 = vld [vmem:[%s28494_s3 + $0xd8] sm:$0xff] }
 0x27a   :  { %19703 = vmatmul.mubr.msk.f32.gmra.mrb[124].mxu0 %vm124_vm0, %v24058_v14  ;;  %v21408_v14 = vpack.c.bf16 %v16769_v41, %v16768_v36  ;;  %v16837_v41 = vld [vmem:[%s28494_s3 + $0xf8] sm:$0xff] }
 0x27b   :  { %19705 = vmatprep.mubr.msk.f32.mxu0 %vm124_vm0, %v24062_v61  ;;  %v16770_v61 = vld [vmem:[%s28494_s3 + $0xe0] sm:$0xff] }
 0x27c   :  { %v24382_v36 = vld [vmem:[#allocation3 + $0x1f9] sm:$0xff] }
 0x27e   :  { %19706 = vmatmul.mubr.msk.f32.gmra.mrb[126].mxu0 %vm124_vm0, %v24066_v18  ;;  %v21412_v18 = vpack.c.bf16 %v16771_v47, %v16770_v61  ;;  %v5129_v47 = vld [vmem:[#allocation3 + $0x1c9] sm:$0xff]  ;;  %v24374_v61 = vld [vmem:[#allocation3 + $0x1e1] sm:$0xff] }
 0x27f   :  { %19720 = vmatprep.mubr.msk.f32.mxu0 %vm124_vm0, %v23543_v5  ;;  %v16836_v5 = vld [vmem:[%s28494_s3 + $0xf0] sm:$0xff] }
 0x282   :  { %19721 = vmatmul.mubr.msk.f32.vlgmr.msra.gmra.mrb[64].mxu0 %vm124_vm0, %v23552_v59  ;;  %v24099_v59 = vpack.c.bf16 %v16837_v41, %v16836_v5  ;;  %v24386_v5 = vld [vmem:[#allocation3 + $0x201] sm:$0xff]  ;;  %v24390_v41 = vld [vmem:[#allocation3 + $0x211] sm:$0xff] }
 0x283   :  { %21407 = vmatpush3.bf16.msra.mxu0 %v23832_v57  ;;  %19723 = vmatprep.mubr.msk.f32.mxu0 %vm124_vm0, %v23562_v23  ;;  %v24336_v23 = vld [vmem:[#allocation3 + $0x129] sm:$0xff] }
 0x284   :  { %21409 = vmatprep.subr.bf16.mxu0 %v21408_v14  ;;  %v24368_v57 = vld [vmem:[#allocation3 + $0x189] sm:$0xff] }
 0x286   :  { %19724 = vmatmul.mubr.msk.f32.gmra.mrb[66].mxu0 %vm124_vm0, %v23568_v39  ;;  %v24340_v39 = vld [vmem:[#allocation3 + $0x139] sm:$0xff] }
 0x287   :  { %19726 = vmatprep.mubr.msk.f32.mxu0 %vm124_vm0, %v23572_v34  ;;  %21411 = vmatpush3.bf16.msra.mxu0 %v21408_v14  ;;  %v24332_v34 = vld [vmem:[#allocation3 + $0x121] sm:$0xff]  ;;  %v5130_v14 = vld [vmem:[#allocation3 + $0x1d1] sm:$0xff] }
 0x288   :  { %21413 = vmatprep.subr.bf16.mxu0 %v21412_v18 }
 0x28a   :  { %19727 = vmatmul.mubr.msk.f32.gmra.mrb[68].mxu0 %vm124_vm0, %v23577_v13  ;;  %v24328_v13 = vld [vmem:[#allocation3 + $0x111] sm:$0xff] }
 0x28b   :  { %19729 = vmatprep.mubr.msk.f32.mxu0 %vm124_vm0, %v23581_v20  ;;  %21415 = vmatpush3.bf16.msra.mxu0 %v21412_v18  ;;  %v24344_v20 = vld [vmem:[#allocation3 + $0x141] sm:$0xff]  ;;  %v24378_v18 = vld [vmem:[#allocation3 + $0x1e9] sm:$0xff] }
 0x28c   :  { %21417 = vmatprep.subr.bf16.mxu0 %v24099_v59 }
 0x28e   :  { %19730 = vmatmul.mubr.msk.f32.gmra.mrb[70].mxu0 %vm124_vm0, %v23585_v31  ;;  %v24348_v31 = vld [vmem:[#allocation3 + $0x151] sm:$0xff] }
 0x28f   :  { %19732 = vmatprep.mubr.msk.f32.mxu0 %vm124_vm0, %v23589_v46  ;;  %v24352_v46 = vld [vmem:[#allocation3 + $0x159] sm:$0xff] }
 0x292   :  { %19733 = vmatmul.mubr.msk.f32.gmra.mrb[72].mxu0 %vm124_vm0, %v23593_v48  ;;  %v24356_v48 = vld [vmem:[#allocation3 + $0x169] sm:$0xff] }
 0x293   :  { %19735 = vmatprep.mubr.msk.f32.mxu0 %vm124_vm0, %v23597_v10  ;;  %v24324_v10 = vld [vmem:[#allocation3 + $0x109] sm:$0xff] }
 0x296   :  { %19736 = vmatmul.mubr.msk.f32.gmra.mrb[74].mxu0 %vm124_vm0, %v23601_v53  ;;  %v24320_v53 = vld [vmem:[#allocation3 + $0xf9] sm:$0xff] }
 0x297   :  { %19738 = vmatprep.mubr.msk.f32.mxu0 %vm124_vm0, %v23605_v33  ;;  %v24316_v33 = vld [vmem:[#allocation3 + $0xf1] sm:$0xff] }
 0x29a   :  { %19739 = vmatmul.mubr.msk.f32.gmra.mrb[76].mxu0 %vm124_vm0, %v23609_v21  ;;  %v24308_v21 = vld [vmem:[#allocation3 + $0xd9] sm:$0xff] }
 0x29b   :  { %19741 = vmatprep.mubr.msk.f32.mxu0 %vm124_vm0, %v23613_v4  ;;  %v24312_v4 = vld [vmem:[#allocation3 + $0xe1] sm:$0xff] }
 0x29e   :  { %19742 = vmatmul.mubr.msk.f32.gmra.mrb[78].mxu0 %vm124_vm0, %v23617_v17  ;;  %v24304_v17 = vld [vmem:[#allocation3 + $0xc9] sm:$0xff] }
 0x29f   :  { %19744 = vmatprep.mubr.msk.f32.mxu0 %vm124_vm0, %v23621_v0  ;;  %v24300_v0 = vld [vmem:[#allocation3 + $0xc1] sm:$0xff] }
 0x2a2   :  { %19745 = vmatmul.mubr.msk.f32.gmra.mrb[80].mxu0 %vm124_vm0, %v23625_v44  ;;  %v24296_v44 = vld [vmem:[#allocation3 + $0xb1] sm:$0xff] }
 0x2a3   :  { %19747 = vmatprep.mubr.msk.f32.mxu0 %vm124_vm0, %v23629_v22  ;;  %v24292_v22 = vld [vmem:[#allocation3 + $0xa9] sm:$0xff] }
 0x2a6   :  { %19748 = vmatmul.mubr.msk.f32.gmra.mrb[82].mxu0 %vm124_vm0, %v23633_v9  ;;  %v24288_v9 = vld [vmem:[#allocation3 + $0x99] sm:$0xff] }
 0x2a7   :  { %19750 = vmatprep.mubr.msk.f32.mxu0 %vm124_vm0, %v23637_v58  ;;  %v24284_v58 = vld [vmem:[#allocation3 + $0x91] sm:$0xff] }
 0x2aa   :  { %19751 = vmatmul.mubr.msk.f32.gmra.mrb[84].mxu0 %vm124_vm0, %v23641_v37  ;;  %v24280_v37 = vld [vmem:[#allocation3 + $0x81] sm:$0xff] }
 0x2ab   :  { %19753 = vmatprep.mubr.msk.f32.mxu0 %vm124_vm0, %v23645_v28  ;;  %v24152_v28 = vld [vmem:[#allocation3 + $0x180] sm:$0xff] }
 0x2ae   :  { %19754 = vmatmul.mubr.msk.f32.gmra.mrb[86].mxu0 %vm124_vm0, %v23649_v12  ;;  %v24276_v12 = vld [vmem:[#allocation3 + $0x79] sm:$0xff] }
 0x2af   :  { %19756 = vmatprep.mubr.msk.f32.mxu0 %vm124_vm0, %v23653_v1  ;;  %v24156_v1 = vld [vmem:[#allocation3 + $0x188] sm:$0xff] }
 0x2b2   :  { %19757 = vmatmul.mubr.msk.f32.gmra.mrb[88].mxu0 %vm124_vm0, %v23657_v52  ;;  %v24272_v52 = vld [vmem:[#allocation3 + $0x69] sm:$0xff] }
 0x2b3   :  { %19759 = vmatprep.mubr.msk.f32.mxu0 %vm124_vm0, %v23661_v40  ;;  %v24267_v40 = vld [vmem:[#allocation3 + $0x61] sm:$0xff] }
 0x2b6   :  { %19760 = vmatmul.mubr.msk.f32.gmra.mrb[90].mxu0 %vm124_vm0, %v23665_v26  ;;  %v24263_v26 = vld [vmem:[#allocation3 + $0x51] sm:$0xff] }
 0x2b7   :  { %19762 = vmatprep.mubr.msk.f32.mxu0 %vm124_vm0, %v23669_v19 }
 0x2ba   :  { %19763 = vmatmul.mubr.msk.f32.gmra.mrb[92].mxu0 %vm124_vm0, %v23673_v63  ;;  %v24257_v63 = vld [vmem:[#allocation3 + $0x49] sm:$0xff] }
 0x2bb   :  { %19765 = vmatprep.mubr.msk.f32.mxu0 %vm124_vm0, %v24152_v28 }
 0x2be   :  { %19766 = vmatmul.mubr.msk.f32.gmra.mrb[94].mxu0 %vm124_vm0, %v24156_v1 }
 0x2bf   :  { %19768 = vmatprep.mubr.msk.f32.mxu0 %vm124_vm0, %v23679_v43  ;;  %v16907_v43 = vld [vmem:[%s28494_s3 + $0x128] sm:$0xff] }
 0x2c2   :  { %19769 = vmatmul.mubr.msk.f32.gmra.mrb[96].mxu0 %vm124_vm0, %v23683_v32  ;;  %v16906_v32 = vld [vmem:[%s28494_s3 + $0x120] sm:$0xff] }
 0x2c3   :  { %19771 = vmatprep.mubr.msk.f32.mxu0 %vm124_vm0, %v23687_v27  ;;  %v24247_v27 = vld [vmem:[#allocation3 + $0x39] sm:$0xff]  ;;  %v24261_v19 = vpack.c.bf16 %v16907_v43, %v16906_v32  ;;  %v24462_v43 = vld [vmem:[#allocation3 + $0x2e9] sm:$0xff] }
 0x2c4   :  { %v24458_v32 = vld [vmem:[#allocation3 + $0x2d9] sm:$0xff]  ;;  %28975 = vst [vmem:[#allocation135_spill] sm:$0xff] %v24462_v43 }
 0x2c6   :  { %19772 = vmatmul.mubr.msk.f32.gmra.mrb[98].mxu0 %vm124_vm0, %v23691_v15 }
 0x2c7   :  { %19774 = vmatprep.mubr.msk.f32.mxu0 %vm124_vm0, %v23695_v50  ;;  %v24360_v50 = vld [vmem:[#allocation3 + $0x171] sm:$0xff] }
 0x2ca   :  { %19775 = vmatmul.mubr.msk.f32.gmra.mrb[100].mxu0 %vm124_vm0, %v23699_v6  ;;  %v24364_v6 = vld [vmem:[#allocation3 + $0x181] sm:$0xff] }
 0x2cb   :  { %19777 = vmatprep.mubr.msk.f32.mxu0 %vm124_vm0, %v23703_v7  ;;  %v24242_v7 = vld [vmem:[#allocation3 + $0x31] sm:$0xff] }
 0x2ce   :  { %19778 = vmatmul.mubr.msk.f32.gmra.mrb[102].mxu0 %vm124_vm0, %v23707_v60  ;;  %v16841_v60 = vld [vmem:[%s28494_s3 + $0x118] sm:$0xff] }
 0x2cf   :  { %19780 = vmatprep.mubr.msk.f32.mxu0 %vm124_vm0, %v23711_v55  ;;  %v16840_v55 = vld [vmem:[%s28494_s3 + $0x110] sm:$0xff] }
 0x2d0   :  { %v21424_v15 = vpack.c.bf16 %v16841_v60, %v16840_v55  ;;  %v24446_v55 = vld [vmem:[#allocation3 + $0x2b9] sm:$0xff]  ;;  %v24450_v60 = vld [vmem:[#allocation3 + $0x2c1] sm:$0xff] }
 0x2d2   :  { %19781 = vmatmul.mubr.msk.f32.gmra.mrb[104].mxu0 %vm124_vm0, %v23715_v45  ;;  %v5098_v45 = vld [vmem:[#allocation3 + $0x21] sm:$0xff] }
 0x2d3   :  { %19783 = vmatprep.mubr.msk.f32.mxu0 %vm124_vm0, %v23719_v38 }
 0x2d6   :  { %19784 = vmatmul.mubr.msk.f32.gmra.mrb[106].mxu0 %vm124_vm0, %v23723_v30  ;;  %v5097_v30 = vld [vmem:[#allocation3 + $0x19] sm:$0xff] }
 0x2d7   :  { %19786 = vmatprep.mubr.msk.f32.mxu0 %vm124_vm0, %v23727_v24  ;;  %v16839_v24 = vld [vmem:[%s28494_s3 + $0x108] sm:$0xff] }
 0x2da   :  { %19787 = vmatmul.mubr.msk.f32.gmra.mrb[108].mxu0 %vm124_vm0, %v23731_v16  ;;  %v16838_v16 = vld [vmem:[%s28494_s3 + $0x100] sm:$0xff] }
 0x2db   :  { %19789 = vmatprep.mubr.msk.f32.mxu0 %vm124_vm0, %v23735_v11  ;;  %v24224_v11 = vld [vmem:[#allocation3 + $0x338] sm:$0xff]  ;;  %v21420_v38 = vpack.c.bf16 %v16839_v24, %v16838_v16  ;;  %v24430_v24 = vld [vmem:[#allocation3 + $0x289] sm:$0xff] }
 0x2dc   :  { %v24426_v16 = vld [vmem:[#allocation3 + $0x279] sm:$0xff] }
 0x2de   :  { %19790 = vmatmul.mubr.msk.f32.gmra.mrb[110].mxu0 %vm124_vm0, %v23739_v2  ;;  %v28961_v2 = vld [vmem:[#allocation72_spill] sm:$0xff] }
 0x2df   :  { %19792 = vmatprep.mubr.msk.f32.mxu0 %vm124_vm0, %v23743_v62  ;;  %v28962_v62 = vld [vmem:[#allocation73_spill] sm:$0xff] }
 0x2e2   :  { %19793 = vmatmul.mubr.msk.f32.gmra.mrb[112].mxu0 %vm124_vm0, %v23747_v54  ;;  %v28963_v54 = vld [vmem:[#allocation74_spill] sm:$0xff] }
 0x2e3   :  { %19795 = vmatprep.mubr.msk.f32.mxu0 %vm124_vm0, %v23751_v49  ;;  %v28964_v49 = vld [vmem:[#allocation75_spill] sm:$0xff] }
 0x2e4   :  { %28971 = vst [vmem:[#allocation75_spill] sm:$0xff] %v24446_v55 }
 0x2e6   :  { %19796 = vmatmul.mubr.msk.f32.gmra.mrb[114].mxu0 %vm124_vm0, %v23755_v42  ;;  %v28965_v42 = vld [vmem:[#allocation76_spill] sm:$0xff] }
 0x2e7   :  { %19798 = vmatprep.mubr.msk.f32.mxu0 %vm124_vm0, %v23759_v35  ;;  %v28966_v35 = vld [vmem:[#allocation77_spill] sm:$0xff]  ;;  %28972 = vst [vmem:[#allocation76_spill] sm:$0xff] %v24450_v60 }
 0x2ea   :  { %19799 = vmatmul.mubr.msk.f32.gmra.mrb[116].mxu0 %vm124_vm0, %v23763_v29  ;;  %v24218_v29 = vld [vmem:[#allocation3 + $0x330] sm:$0xff] }
 0x2eb   :  { %19801 = vmatprep.mubr.msk.f32.mxu0 %vm124_vm0, %v23767_v25  ;;  %v28967_v25 = vld [vmem:[#allocation78_spill] sm:$0xff] }
 0x2ec   :  { %28974 = vst [vmem:[#allocation78_spill] sm:$0xff] %v24458_v32 }
 0x2ee   :  { %19802 = vmatmul.mubr.msk.f32.gmra.mrb[118].mxu0 %vm124_vm0, %v28961_v2  ;;  %v24398_v2 = vld [vmem:[#allocation3 + $0x229] sm:$0xff] }
 0x2ef   :  { %19804 = vmatprep.mubr.msk.f32.mxu0 %vm124_vm0, %v28962_v62  ;;  %v24402_v62 = vld [vmem:[#allocation3 + $0x231] sm:$0xff] }
 0x2f2   :  { %19805 = vmatmul.mubr.msk.f32.gmra.mrb[120].mxu0 %vm124_vm0, %v28963_v54  ;;  %v24406_v54 = vld [vmem:[#allocation3 + $0x241] sm:$0xff] }
 0x2f3   :  { %19807 = vmatprep.mubr.msk.f32.mxu0 %vm124_vm0, %v28964_v49  ;;  %v24410_v49 = vld [vmem:[#allocation3 + $0x249] sm:$0xff] }
 0x2f6   :  { %19808 = vmatmul.mubr.msk.f32.gmra.mrb[122].mxu0 %vm124_vm0, %v28965_v42  ;;  %v24414_v42 = vld [vmem:[#allocation3 + $0x259] sm:$0xff] }
 0x2f7   :  { %19810 = vmatprep.mubr.msk.f32.mxu0 %vm124_vm0, %v28966_v35  ;;  %v24418_v35 = vld [vmem:[#allocation3 + $0x261] sm:$0xff] }
 0x2fa   :  { %19811 = vmatmul.mubr.msk.f32.gmra.mrb[124].mxu0 %vm124_vm0, %v28967_v25  ;;  %v24422_v25 = vld [vmem:[#allocation3 + $0x271] sm:$0xff] }
 0x2fb   :  { %19813 = vmatprep.mubr.msk.f32.mxu0 %vm124_vm0, %v24218_v29 }
 0x2fe   :  { %19814 = vmatmul.mubr.msk.f32.gmra.mrb[126].mxu0 %vm124_vm0, %v24224_v11 }
 0x2ff   :  { %19828 = vmatprep.mubr.msk.f32.mxu0 %vm124_vm0, %v5097_v30  ;;  %v24434_v30 = vld [vmem:[#allocation3 + $0x291] sm:$0xff] }
 0x300   :  { %28968 = vst [vmem:[#allocation72_spill] sm:$0xff] %v24434_v30 }
 0x302   :  { %19829 = vmatmul.mubr.msk.f32.vlgmr.msra.gmra.mrb[64].mxu0 %vm124_vm0, %v5098_v45  ;;  %v24442_v45 = vld [vmem:[#allocation3 + $0x2a9] sm:$0xff] }
 0x303   :  { %21419 = vmatpush3.bf16.msra.mxu0 %v24099_v59  ;;  %19831 = vmatprep.mubr.msk.f32.mxu0 %vm124_vm0, %v24242_v7  ;;  %v24394_v59 = vld [vmem:[#allocation3 + $0x219] sm:$0xff]  ;;  %28970 = vst [vmem:[#allocation74_spill] sm:$0xff] %v24442_v45 }
 0x304   :  { %21421 = vmatprep.subr.bf16.mxu0 %v21420_v38 }
 0x306   :  { %19832 = vmatmul.mubr.msk.f32.gmra.mrb[66].mxu0 %vm124_vm0, %v24247_v27 }
 0x307   :  { %19834 = vmatprep.mubr.msk.f32.mxu0 %vm124_vm0, %v24257_v63  ;;  %21423 = vmatpush3.bf16.msra.mxu0 %v21420_v38  ;;  %v24438_v38 = vld [vmem:[#allocation3 + $0x2a1] sm:$0xff] }
 0x308   :  { %21425 = vmatprep.subr.bf16.mxu0 %v21424_v15  ;;  %28969 = vst [vmem:[#allocation73_spill] sm:$0xff] %v24438_v38 }
 0x30a   :  { %19835 = vmatmul.mubr.msk.f32.gmra.mrb[68].mxu0 %vm124_vm0, %v24263_v26 }
 0x30b   :  { %19837 = vmatprep.mubr.msk.f32.mxu0 %vm124_vm0, %v24267_v40  ;;  %21427 = vmatpush3.bf16.msra.mxu0 %v21424_v15  ;;  %v24454_v15 = vld [vmem:[#allocation3 + $0x2d1] sm:$0xff] }
 0x30c   :  { %21429 = vmatprep.subr.bf16.mxu0 %v24261_v19  ;;  %28973 = vst [vmem:[#allocation77_spill] sm:$0xff] %v24454_v15 }
 0x30e   :  { %19838 = vmatmul.mubr.msk.f32.gmra.mrb[70].mxu0 %vm124_vm0, %v24272_v52 }
 0x30f   :  { %19840 = vmatprep.mubr.msk.f32.mxu0 %vm124_vm0, %v24276_v12 }
 0x312   :  { %19841 = vmatmul.mubr.msk.f32.gmra.mrb[72].mxu0 %vm124_vm0, %v24280_v37 }
 0x313   :  { %19843 = vmatprep.mubr.msk.f32.mxu0 %vm124_vm0, %v24284_v58 }
 0x316   :  { %19844 = vmatmul.mubr.msk.f32.gmra.mrb[74].mxu0 %vm124_vm0, %v24288_v9 }
 0x317   :  { %19846 = vmatprep.mubr.msk.f32.mxu0 %vm124_vm0, %v24292_v22 }
 0x31a   :  { %19847 = vmatmul.mubr.msk.f32.gmra.mrb[76].mxu0 %vm124_vm0, %v24296_v44 }
 0x31b   :  { %19849 = vmatprep.mubr.msk.f32.mxu0 %vm124_vm0, %v24300_v0 }
 0x31e   :  { %19850 = vmatmul.mubr.msk.f32.gmra.mrb[78].mxu0 %vm124_vm0, %v24304_v17 }
 0x31f   :  { %19852 = vmatprep.mubr.msk.f32.mxu0 %vm124_vm0, %v24308_v21 }
 0x322   :  { %19853 = vmatmul.mubr.msk.f32.gmra.mrb[80].mxu0 %vm124_vm0, %v24312_v4 }
 0x323   :  { %19855 = vmatprep.mubr.msk.f32.mxu0 %vm124_vm0, %v24316_v33 }
 0x326   :  { %19856 = vmatmul.mubr.msk.f32.gmra.mrb[82].mxu0 %vm124_vm0, %v24320_v53 }
 0x327   :  { %19858 = vmatprep.mubr.msk.f32.mxu0 %vm124_vm0, %v24324_v10 }
 0x32a   :  { %19859 = vmatmul.mubr.msk.f32.gmra.mrb[84].mxu0 %vm124_vm0, %v24328_v13 }
 0x32b   :  { %19861 = vmatprep.mubr.msk.f32.mxu0 %vm124_vm0, %v24332_v34 }
 0x32e   :  { %19862 = vmatmul.mubr.msk.f32.gmra.mrb[86].mxu0 %vm124_vm0, %v24336_v23 }
 0x32f   :  { %19864 = vmatprep.mubr.msk.f32.mxu0 %vm124_vm0, %v24340_v39 }
 0x332   :  { %19865 = vmatmul.mubr.msk.f32.gmra.mrb[88].mxu0 %vm124_vm0, %v24344_v20 }
 0x333   :  { %19867 = vmatprep.mubr.msk.f32.mxu0 %vm124_vm0, %v24348_v31 }
 0x336   :  { %19868 = vmatmul.mubr.msk.f32.gmra.mrb[90].mxu0 %vm124_vm0, %v24352_v46 }
 0x337   :  { %19870 = vmatprep.mubr.msk.f32.mxu0 %vm124_vm0, %v24356_v48 }
 0x33a   :  { %19871 = vmatmul.mubr.msk.f32.gmra.mrb[92].mxu0 %vm124_vm0, %v24360_v50 }
 0x33b   :  { %19873 = vmatprep.mubr.msk.f32.mxu0 %vm124_vm0, %v24364_v6 }
 0x33e   :  { %19874 = vmatmul.mubr.msk.f32.gmra.mrb[94].mxu0 %vm124_vm0, %v24368_v57 }
 0x33f   :  { %19876 = vmatprep.mubr.msk.f32.mxu0 %vm124_vm0, %v5129_v47  ;;  %v24466_v47 = vld [vmem:[#allocation3 + $0x2f1] sm:$0xff] }
 0x340   :  { %28976 = vst [vmem:[#allocation136_spill] sm:$0xff] %v24466_v47 }
 0x342   :  { %19877 = vmatmul.mubr.msk.f32.gmra.mrb[96].mxu0 %vm124_vm0, %v5130_v14  ;;  %v24470_v14 = vld [vmem:[#allocation3 + $0x301] sm:$0xff] }
 0x343   :  { %19879 = vmatprep.mubr.msk.f32.mxu0 %vm124_vm0, %v24374_v61  ;;  %28977 = vst [vmem:[#allocation137_spill] sm:$0xff] %v24470_v14 }
 0x346   :  { %19880 = vmatmul.mubr.msk.f32.gmra.mrb[98].mxu0 %vm124_vm0, %v24378_v18 }
 0x347   :  { %19882 = vmatprep.mubr.msk.f32.mxu0 %vm124_vm0, %v24382_v36 }
 0x34a   :  { %19883 = vmatmul.mubr.msk.f32.gmra.mrb[100].mxu0 %vm124_vm0, %v24386_v5 }
 0x34b   :  { %19885 = vmatprep.mubr.msk.f32.mxu0 %vm124_vm0, %v24390_v41 }
 0x34e   :  { %19886 = vmatmul.mubr.msk.f32.gmra.mrb[102].mxu0 %vm124_vm0, %v24394_v59 }
 0x34f   :  { %19888 = vmatprep.mubr.msk.f32.mxu0 %vm124_vm0, %v24398_v2 }
 0x352   :  { %19889 = vmatmul.mubr.msk.f32.gmra.mrb[104].mxu0 %vm124_vm0, %v24402_v62 }
 0x353   :  { %19891 = vmatprep.mubr.msk.f32.mxu0 %vm124_vm0, %v24406_v54 }
 0x356   :  { %19892 = vmatmul.mubr.msk.f32.gmra.mrb[106].mxu0 %vm124_vm0, %v24410_v49 }
 0x357   :  { %19894 = vmatprep.mubr.msk.f32.mxu0 %vm124_vm0, %v24414_v42 }
 0x35a   :  { %19895 = vmatmul.mubr.msk.f32.gmra.mrb[108].mxu0 %vm124_vm0, %v24418_v35 }
 0x35b   :  { %19897 = vmatprep.mubr.msk.f32.mxu0 %vm124_vm0, %v24422_v25 }
 0x35e   :  { %19898 = vmatmul.mubr.msk.f32.gmra.mrb[110].mxu0 %vm124_vm0, %v24426_v16 }
 0x35f   :  { %19900 = vmatprep.mubr.msk.f32.mxu0 %vm124_vm0, %v24430_v24 }
 0x362   :  { %19901 = vmatmul.mubr.msk.f32.gmra.mrb[112].mxu0 %vm124_vm0, %v24434_v30  ;;  %v28987_v30 = vld [vmem:[#allocation83_spill] sm:$0xff] }
 0x363   :  { %19903 = vmatprep.mubr.msk.f32.mxu0 %vm124_vm0, %v24438_v38  ;;  %v28985_v38 = vld [vmem:[#allocation81_spill] sm:$0xff] }
 0x366   :  { %19904 = vmatmul.mubr.msk.f32.gmra.mrb[114].mxu0 %vm124_vm0, %v24442_v45  ;;  %v28984_v45 = vld [vmem:[#allocation80_spill] sm:$0xff] }
 0x367   :  { %19906 = vmatprep.mubr.msk.f32.mxu0 %vm124_vm0, %v24446_v55  ;;  %v16911_v55 = vld [vmem:[%s28494_s3 + $0x148] sm:$0xff] }
 0x36a   :  { %19907 = vmatmul.mubr.msk.f32.gmra.mrb[116].mxu0 %vm124_vm0, %v24450_v60  ;;  %v28983_v60 = vld [vmem:[#allocation79_spill] sm:$0xff] }
 0x36b   :  { %19909 = vmatprep.mubr.msk.f32.mxu0 %vm124_vm0, %v24454_v15  ;;  %v24474_v15 = vld [vmem:[#allocation3 + $0x309] sm:$0xff] }
 0x36c   :  { %28978 = vst [vmem:[#allocation138_spill] sm:$0xff] %v24474_v15 }
 0x36e   :  { %19910 = vmatmul.mubr.msk.f32.gmra.mrb[118].mxu0 %vm124_vm0, %v24458_v32  ;;  %v24478_v32 = vld [vmem:[#allocation3 + $0x319] sm:$0xff] }
 0x36f   :  { %19912 = vmatprep.mubr.msk.f32.mxu0 %vm124_vm0, %v24462_v43  ;;  %28979 = vst [vmem:[#allocation139_spill] sm:$0xff] %v24478_v32  ;;  %v24482_v43 = vld [vmem:[#allocation3 + $0x321] sm:$0xff] }
 0x370   :  { %28980 = vst [vmem:[#allocation140_spill] sm:$0xff] %v24482_v43 }
 0x372   :  { %19913 = vmatmul.mubr.msk.f32.gmra.mrb[120].mxu0 %vm124_vm0, %v24466_v47  ;;  %v24486_v47 = vld [vmem:[#allocation3 + $0x331] sm:$0xff] }
 0x373   :  { %19915 = vmatprep.mubr.msk.f32.mxu0 %vm124_vm0, %v24470_v14  ;;  %28981 = vst [vmem:[#allocation141_spill] sm:$0xff] %v24486_v47  ;;  %v24490_v14 = vld [vmem:[#allocation3 + $0x339] sm:$0xff] }
 0x374   :  { %28982 = vst [vmem:[#allocation142_spill] sm:$0xff] %v24490_v14 }
 0x376   :  { %19916 = vmatmul.mubr.msk.f32.gmra.mrb[122].mxu0 %vm124_vm0, %v24474_v15  ;;  %v16908_v15 = vld [vmem:[%s28494_s3 + $0x130] sm:$0xff] }
 0x377   :  { %19918 = vmatprep.mubr.msk.f32.mxu0 %vm124_vm0, %v24478_v32  ;;  %v16909_v32 = vld [vmem:[%s28494_s3 + $0x138] sm:$0xff] }
 0x37a   :  { %19919 = vmatmul.mubr.msk.f32.gmra.mrb[124].mxu0 %vm124_vm0, %v24482_v43  ;;  %v21432_v43 = vpack.c.bf16 %v16909_v32, %v16908_v15  ;;  %v16977_v15 = vld [vmem:[%s28494_s3 + $0x158] sm:$0xff]  ;;  %v28986_v32 = vld [vmem:[#allocation82_spill] sm:$0xff] }
 0x37b   :  { %19921 = vmatprep.mubr.msk.f32.mxu0 %vm124_vm0, %v24486_v47  ;;  %v16910_v47 = vld [vmem:[%s28494_s3 + $0x140] sm:$0xff] }
 0x37e   :  { %19922 = vmatmul.mubr.msk.f32.gmra.mrb[126].mxu0 %vm124_vm0, %v24490_v14  ;;  %v21436_v14 = vpack.c.bf16 %v16911_v55, %v16910_v47  ;;  %v28990_v55 = vld [vmem:[#allocation86_spill] sm:$0xff]  ;;  %v28991_v47 = vld [vmem:[#allocation87_spill] sm:$0xff] }
 0x37f   :  { %19936 = vmatprep.mubr.msk.f32.mxu0 %vm124_vm0, %v28983_v60  ;;  %v16976_v60 = vld [vmem:[%s28494_s3 + $0x150] sm:$0xff] }
 0x382   :  { %19937 = vmatmul.mubr.msk.f32.vlgmr.msra.gmra.mrb[64].mxu0 %vm124_vm0, %v28984_v45  ;;  %v28989_v45 = vld [vmem:[#allocation85_spill] sm:$0xff] }
 0x383   :  { %21431 = vmatpush3.bf16.msra.mxu0 %v24261_v19  ;;  %19939 = vmatprep.mubr.msk.f32.mxu0 %vm124_vm0, %v28985_v38  ;;  %v24523_v19 = vpack.c.bf16 %v16977_v15, %v16976_v60  ;;  %v28988_v38 = vld [vmem:[#allocation84_spill] sm:$0xff]  ;;  %v28994_v60 = vld [vmem:[#allocation90_spill] sm:$0xff]  ;;  %v28995_v15 = vld [vmem:[#allocation91_spill] sm:$0xff] }
 0x384   :  { %21433 = vmatprep.subr.bf16.mxu0 %v21432_v43 }
 0x386   :  { %19940 = vmatmul.mubr.msk.f32.gmra.mrb[66].mxu0 %vm124_vm0, %v28986_v32  ;;  %v28997_v32 = vld [vmem:[#allocation93_spill] sm:$0xff] }
 0x387   :  { %19942 = vmatprep.mubr.msk.f32.mxu0 %vm124_vm0, %v28987_v30  ;;  %21435 = vmatpush3.bf16.msra.mxu0 %v21432_v43  ;;  %v28992_v30 = vld [vmem:[#allocation88_spill] sm:$0xff]  ;;  %v28993_v43 = vld [vmem:[#allocation89_spill] sm:$0xff] }
 0x388   :  { %21437 = vmatprep.subr.bf16.mxu0 %v21436_v14 }
 0x38a   :  { %19943 = vmatmul.mubr.msk.f32.gmra.mrb[68].mxu0 %vm124_vm0, %v28988_v38  ;;  %v28998_v38 = vld [vmem:[#allocation94_spill] sm:$0xff] }
 0x38b   :  { %19945 = vmatprep.mubr.msk.f32.mxu0 %vm124_vm0, %v28989_v45  ;;  %21439 = vmatpush3.bf16.msra.mxu0 %v21436_v14  ;;  %v28996_v14 = vld [vmem:[#allocation92_spill] sm:$0xff]  ;;  %v28999_v45 = vld [vmem:[#allocation95_spill] sm:$0xff] }
 0x38c   :  { %21441 = vmatprep.subr.bf16.mxu0 %v24523_v19 }
 0x38e   :  { %19946 = vmatmul.mubr.msk.f32.gmra.mrb[70].mxu0 %vm124_vm0, %v28990_v55  ;;  %v29000_v55 = vld [vmem:[#allocation96_spill] sm:$0xff] }
 0x38f   :  { %19948 = vmatprep.mubr.msk.f32.mxu0 %vm124_vm0, %v28991_v47  ;;  %v29001_v47 = vld [vmem:[#allocation97_spill] sm:$0xff] }
 0x392   :  { %19949 = vmatmul.mubr.msk.f32.gmra.mrb[72].mxu0 %vm124_vm0, %v28992_v30  ;;  %v29002_v30 = vld [vmem:[#allocation98_spill] sm:$0xff] }
 0x393   :  { %19951 = vmatprep.mubr.msk.f32.mxu0 %vm124_vm0, %v28993_v43  ;;  %v29003_v43 = vld [vmem:[#allocation99_spill] sm:$0xff] }
 0x396   :  { %19952 = vmatmul.mubr.msk.f32.gmra.mrb[74].mxu0 %vm124_vm0, %v28994_v60  ;;  %v29004_v60 = vld [vmem:[#allocation100_spill] sm:$0xff] }
 0x397   :  { %19954 = vmatprep.mubr.msk.f32.mxu0 %vm124_vm0, %v28995_v15  ;;  %v29005_v15 = vld [vmem:[#allocation101_spill] sm:$0xff] }
 0x39a   :  { %19955 = vmatmul.mubr.msk.f32.gmra.mrb[76].mxu0 %vm124_vm0, %v28996_v14  ;;  %v29006_v14 = vld [vmem:[#allocation102_spill] sm:$0xff] }
 0x39b   :  { %19957 = vmatprep.mubr.msk.f32.mxu0 %vm124_vm0, %v28997_v32  ;;  %v29007_v32 = vld [vmem:[#allocation103_spill] sm:$0xff] }
 0x39e   :  { %19958 = vmatmul.mubr.msk.f32.gmra.mrb[78].mxu0 %vm124_vm0, %v28998_v38  ;;  %v29008_v38 = vld [vmem:[#allocation104_spill] sm:$0xff] }
 0x39f   :  { %19960 = vmatprep.mubr.msk.f32.mxu0 %vm124_vm0, %v28999_v45  ;;  %v29009_v45 = vld [vmem:[#allocation105_spill] sm:$0xff] }
 0x3a2   :  { %19961 = vmatmul.mubr.msk.f32.gmra.mrb[80].mxu0 %vm124_vm0, %v29000_v55  ;;  %v29010_v55 = vld [vmem:[#allocation106_spill] sm:$0xff] }
 0x3a3   :  { %19963 = vmatprep.mubr.msk.f32.mxu0 %vm124_vm0, %v29001_v47  ;;  %v29011_v47 = vld [vmem:[#allocation107_spill] sm:$0xff] }
 0x3a6   :  { %19964 = vmatmul.mubr.msk.f32.gmra.mrb[82].mxu0 %vm124_vm0, %v29002_v30  ;;  %v29012_v30 = vld [vmem:[#allocation108_spill] sm:$0xff] }
 0x3a7   :  { %19966 = vmatprep.mubr.msk.f32.mxu0 %vm124_vm0, %v29003_v43  ;;  %v24576_v43 = vld [vmem:[#allocation3 + $0x182] sm:$0xff] }
 0x3aa   :  { %19967 = vmatmul.mubr.msk.f32.gmra.mrb[84].mxu0 %vm124_vm0, %v29004_v60  ;;  %v24580_v60 = vld [vmem:[#allocation3 + $0x18a] sm:$0xff] }
 0x3ab   :  { %19969 = vmatprep.mubr.msk.f32.mxu0 %vm124_vm0, %v29005_v15  ;;  %v29013_v15 = vld [vmem:[#allocation109_spill] sm:$0xff] }
 0x3ae   :  { %19970 = vmatmul.mubr.msk.f32.gmra.mrb[86].mxu0 %vm124_vm0, %v29006_v14  ;;  %v29014_v14 = vld [vmem:[#allocation110_spill] sm:$0xff] }
 0x3af   :  { %19972 = vmatprep.mubr.msk.f32.mxu0 %vm124_vm0, %v29007_v32  ;;  %v29015_v32 = vld [vmem:[#allocation111_spill] sm:$0xff] }
 0x3b2   :  { %19973 = vmatmul.mubr.msk.f32.gmra.mrb[88].mxu0 %vm124_vm0, %v29008_v38  ;;  %v29016_v38 = vld [vmem:[#allocation112_spill] sm:$0xff] }
 0x3b3   :  { %19975 = vmatprep.mubr.msk.f32.mxu0 %vm124_vm0, %v29009_v45  ;;  %v29017_v45 = vld [vmem:[#allocation113_spill] sm:$0xff] }
 0x3b6   :  { %19976 = vmatmul.mubr.msk.f32.gmra.mrb[90].mxu0 %vm124_vm0, %v29010_v55  ;;  %v29018_v55 = vld [vmem:[#allocation114_spill] sm:$0xff] }
 0x3b7   :  { %19978 = vmatprep.mubr.msk.f32.mxu0 %vm124_vm0, %v29011_v47  ;;  %v29019_v47 = vld [vmem:[#allocation115_spill] sm:$0xff] }
 0x3ba   :  { %19979 = vmatmul.mubr.msk.f32.gmra.mrb[92].mxu0 %vm124_vm0, %v29012_v30  ;;  %v29020_v30 = vld [vmem:[#allocation116_spill] sm:$0xff] }
 0x3bb   :  { %19981 = vmatprep.mubr.msk.f32.mxu0 %vm124_vm0, %v24576_v43 }
 0x3be   :  { %19982 = vmatmul.mubr.msk.f32.gmra.mrb[94].mxu0 %vm124_vm0, %v24580_v60 }
 0x3bf   :  { %19984 = vmatprep.mubr.msk.f32.mxu0 %vm124_vm0, %v29013_v15  ;;  %v29021_v15 = vld [vmem:[#allocation117_spill] sm:$0xff] }
 0x3c2   :  { %19985 = vmatmul.mubr.msk.f32.gmra.mrb[96].mxu0 %vm124_vm0, %v29014_v14  ;;  %v29022_v14 = vld [vmem:[#allocation118_spill] sm:$0xff] }
 0x3c3   :  { %19987 = vmatprep.mubr.msk.f32.mxu0 %vm124_vm0, %v29015_v32  ;;  %v29023_v32 = vld [vmem:[#allocation119_spill] sm:$0xff] }
 0x3c6   :  { %19988 = vmatmul.mubr.msk.f32.gmra.mrb[98].mxu0 %vm124_vm0, %v29016_v38  ;;  %v29024_v38 = vld [vmem:[#allocation120_spill] sm:$0xff] }
 0x3c7   :  { %19990 = vmatprep.mubr.msk.f32.mxu0 %vm124_vm0, %v29017_v45  ;;  %v29025_v45 = vld [vmem:[#allocation121_spill] sm:$0xff] }
 0x3ca   :  { %19991 = vmatmul.mubr.msk.f32.gmra.mrb[100].mxu0 %vm124_vm0, %v29018_v55  ;;  %v29026_v55 = vld [vmem:[#allocation122_spill] sm:$0xff] }
 0x3cb   :  { %19993 = vmatprep.mubr.msk.f32.mxu0 %vm124_vm0, %v29019_v47  ;;  %v29027_v47 = vld [vmem:[#allocation123_spill] sm:$0xff] }
 0x3ce   :  { %19994 = vmatmul.mubr.msk.f32.gmra.mrb[102].mxu0 %vm124_vm0, %v29020_v30  ;;  %v29028_v30 = vld [vmem:[#allocation124_spill] sm:$0xff] }
 0x3cf   :  { %19996 = vmatprep.mubr.msk.f32.mxu0 %vm124_vm0, %v29021_v15  ;;  %v29029_v15 = vld [vmem:[#allocation125_spill] sm:$0xff] }
 0x3d2   :  { %19997 = vmatmul.mubr.msk.f32.gmra.mrb[104].mxu0 %vm124_vm0, %v29022_v14  ;;  %v29030_v14 = vld [vmem:[#allocation126_spill] sm:$0xff] }
 0x3d3   :  { %19999 = vmatprep.mubr.msk.f32.mxu0 %vm124_vm0, %v29023_v32  ;;  %v29031_v32 = vld [vmem:[#allocation127_spill] sm:$0xff] }
 0x3d6   :  { %20000 = vmatmul.mubr.msk.f32.gmra.mrb[106].mxu0 %vm124_vm0, %v29024_v38  ;;  %v29032_v38 = vld [vmem:[#allocation128_spill] sm:$0xff] }
 0x3d7   :  { %20002 = vmatprep.mubr.msk.f32.mxu0 %vm124_vm0, %v29025_v45  ;;  %v29033_v45 = vld [vmem:[#allocation129_spill] sm:$0xff] }
 0x3da   :  { %20003 = vmatmul.mubr.msk.f32.gmra.mrb[108].mxu0 %vm124_vm0, %v29026_v55  ;;  %v29034_v55 = vld [vmem:[#allocation130_spill] sm:$0xff] }
 0x3db   :  { %20005 = vmatprep.mubr.msk.f32.mxu0 %vm124_vm0, %v29027_v47  ;;  %v29035_v47 = vld [vmem:[#allocation131_spill] sm:$0xff] }
 0x3de   :  { %20006 = vmatmul.mubr.msk.f32.gmra.mrb[110].mxu0 %vm124_vm0, %v29028_v30  ;;  %v29036_v30 = vld [vmem:[#allocation132_spill] sm:$0xff] }
 0x3df   :  { %20008 = vmatprep.mubr.msk.f32.mxu0 %vm124_vm0, %v29029_v15  ;;  %v29037_v15 = vld [vmem:[#allocation133_spill] sm:$0xff] }
 0x3e2   :  { %20009 = vmatmul.mubr.msk.f32.gmra.mrb[112].mxu0 %vm124_vm0, %v29030_v14  ;;  %v16979_v14 = vld [vmem:[%s28494_s3 + $0x168] sm:$0xff] }
 0x3e3   :  { %20011 = vmatprep.mubr.msk.f32.mxu0 %vm124_vm0, %v29031_v32  ;;  %v6522_v32 = vld [vmem:[#allocation3 + $0x30] sm:$0xff] }
 0x3e6   :  { %20012 = vmatmul.mubr.msk.f32.gmra.mrb[114].mxu0 %vm124_vm0, %v29032_v38 }
 0x3e7   :  { %20014 = vmatprep.mubr.msk.f32.mxu0 %vm124_vm0, %v29033_v45  ;;  %v6523_v45 = vld [vmem:[#allocation3 + $0x38] sm:$0xff] }
 0x3ea   :  { %20015 = vmatmul.mubr.msk.f32.gmra.mrb[116].mxu0 %vm124_vm0, %v24032_v8  ;;  %v29038_v8 = vld [vmem:[#allocation134_spill] sm:$0xff] }
 0x3eb   :  { %20017 = vmatprep.mubr.msk.f32.mxu0 %vm124_vm0, %v24036_v56  ;;  %v24644_v56 = vld [vmem:[#allocation3 + $0x332] sm:$0xff] }
 0x3ee   :  { %20018 = vmatmul.mubr.msk.f32.gmra.mrb[118].mxu0 %vm124_vm0, %v24041_v51  ;;  %v24648_v51 = vld [vmem:[#allocation3 + $0x33a] sm:$0xff] }
 0x3ef   :  { %20020 = vmatprep.mubr.msk.f32.mxu0 %vm124_vm0, %v24045_v3  ;;  %v16978_v3 = vld [vmem:[%s28494_s3 + $0x160] sm:$0xff] }
 0x3f0   :  { %v21444_v38 = vpack.c.bf16 %v16979_v14, %v16978_v3  ;;  %v17046_v3 = vld [vmem:[%s28494_s3 + $0x180] sm:$0xff]  ;;  %v17047_v14 = vld [vmem:[%s28494_s3 + $0x188] sm:$0xff] }
 0x3f2   :  { %20021 = vmatmul.mubr.msk.f32.gmra.mrb[120].mxu0 %vm124_vm0, %v29034_v55  ;;  %v16980_v55 = vld [vmem:[%s28494_s3 + $0x170] sm:$0xff] }
 0x3f3   :  { %20023 = vmatprep.mubr.msk.f32.mxu0 %vm124_vm0, %v29035_v47  ;;  %v16981_v47 = vld [vmem:[%s28494_s3 + $0x178] sm:$0xff] }
 0x3f6   :  { %20024 = vmatmul.mubr.msk.f32.gmra.mrb[122].mxu0 %vm124_vm0, %v29036_v30  ;;  %v6524_v30 = vld [vmem:[#allocation3 + $0x48] sm:$0xff] }
 0x3f7   :  { %20026 = vmatprep.mubr.msk.f32.mxu0 %vm124_vm0, %v29037_v15  ;;  %v21448_v15 = vpack.c.bf16 %v16981_v47, %v16980_v55  ;;  %v6528_v55 = vld [vmem:[#allocation3 + $0x78] sm:$0xff]  ;;  %v6529_v47 = vld [vmem:[#allocation3 + $0x80] sm:$0xff] }
 0x3fa   :  { %20027 = vmatmul.mubr.msk.f32.gmra.mrb[124].mxu0 %vm124_vm0, %v29038_v8  ;;  %v6525_v8 = vld [vmem:[#allocation3 + $0x50] sm:$0xff] }
 0x3fb   :  { %20029 = vmatprep.mubr.msk.f32.mxu0 %vm124_vm0, %v24644_v56 }
 0x3fe   :  { %20030 = vmatmul.mubr.msk.f32.gmra.mrb[126].mxu0 %vm124_vm0, %v24648_v51 }
 0x3ff   :  { %20044 = vmatprep.mubr.msk.f32.mxu0 %vm124_vm0, %v6522_v32  ;;  %v6526_v32 = vld [vmem:[#allocation3 + $0x60] sm:$0xff] }
 0x402   :  { %20045 = vmatmul.mubr.msk.f32.vlgmr.msra.gmra.mrb[64].mxu0 %vm124_vm0, %v6523_v45  ;;  %v6527_v45 = vld [vmem:[#allocation3 + $0x68] sm:$0xff] }
 0x403   :  { %21443 = vmatpush3.bf16.msra.mxu0 %v24523_v19  ;;  %20047 = vmatprep.mubr.msk.f32.mxu0 %vm124_vm0, %v6524_v30  ;;  %v24676_v19 = vpack.c.bf16 %v17047_v14, %v17046_v3  ;;  %v6530_v30 = vld [vmem:[#allocation3 + $0x90] sm:$0xff]  ;;  %v6534_v14 = vld [vmem:[#allocation3 + $0xc0] sm:$0xff] }
 0x404   :  { %21445 = vmatprep.subr.bf16.mxu0 %v21444_v38  ;;  %v6533_v3 = vld [vmem:[#allocation3 + $0xb0] sm:$0xff] }
 0x406   :  { %20048 = vmatmul.mubr.msk.f32.gmra.mrb[66].mxu0 %vm124_vm0, %v6525_v8  ;;  %v6531_v8 = vld [vmem:[#allocation3 + $0x98] sm:$0xff] }
 0x407   :  { %20050 = vmatprep.mubr.msk.f32.mxu0 %vm124_vm0, %v6526_v32  ;;  %21447 = vmatpush3.bf16.msra.mxu0 %v21444_v38  ;;  %v6532_v38 = vld [vmem:[#allocation3 + $0xa8] sm:$0xff]  ;;  %v6536_v32 = vld [vmem:[#allocation3 + $0xd8] sm:$0xff] }
 0x408   :  { %21449 = vmatprep.subr.bf16.mxu0 %v21448_v15 }
 0x40a   :  { %20051 = vmatmul.mubr.msk.f32.gmra.mrb[68].mxu0 %vm124_vm0, %v6527_v45  ;;  %v6537_v45 = vld [vmem:[#allocation3 + $0xe0] sm:$0xff] }
 0x40b   :  { %20053 = vmatprep.mubr.msk.f32.mxu0 %vm124_vm0, %v6528_v55  ;;  %21451 = vmatpush3.bf16.msra.mxu0 %v21448_v15  ;;  %v6535_v15 = vld [vmem:[#allocation3 + $0xc8] sm:$0xff]  ;;  %v6538_v55 = vld [vmem:[#allocation3 + $0xf0] sm:$0xff] }
 0x40c   :  { %21453 = vmatprep.subr.bf16.mxu0 %v24676_v19 }
 0x40e   :  { %20054 = vmatmul.mubr.msk.f32.gmra.mrb[70].mxu0 %vm124_vm0, %v6529_v47  ;;  %v6539_v47 = vld [vmem:[#allocation3 + $0xf8] sm:$0xff] }
 0x40f   :  { %20056 = vmatprep.mubr.msk.f32.mxu0 %vm124_vm0, %v6530_v30  ;;  %v6540_v30 = vld [vmem:[#allocation3 + $0x108] sm:$0xff] }
 0x412   :  { %20057 = vmatmul.mubr.msk.f32.gmra.mrb[72].mxu0 %vm124_vm0, %v6531_v8  ;;  %v6541_v8 = vld [vmem:[#allocation3 + $0x110] sm:$0xff] }
 0x413   :  { %20059 = vmatprep.mubr.msk.f32.mxu0 %vm124_vm0, %v6532_v38  ;;  %v6542_v38 = vld [vmem:[#allocation3 + $0x120] sm:$0xff] }
 0x416   :  { %20060 = vmatmul.mubr.msk.f32.gmra.mrb[74].mxu0 %vm124_vm0, %v6533_v3  ;;  %v6543_v3 = vld [vmem:[#allocation3 + $0x128] sm:$0xff] }
 0x417   :  { %20062 = vmatprep.mubr.msk.f32.mxu0 %vm124_vm0, %v6534_v14  ;;  %v6544_v14 = vld [vmem:[#allocation3 + $0x138] sm:$0xff] }
 0x41a   :  { %20063 = vmatmul.mubr.msk.f32.gmra.mrb[76].mxu0 %vm124_vm0, %v6535_v15  ;;  %v6545_v15 = vld [vmem:[#allocation3 + $0x140] sm:$0xff] }
 0x41b   :  { %20065 = vmatprep.mubr.msk.f32.mxu0 %vm124_vm0, %v6536_v32  ;;  %v6546_v32 = vld [vmem:[#allocation3 + $0x150] sm:$0xff] }
 0x41e   :  { %20066 = vmatmul.mubr.msk.f32.gmra.mrb[78].mxu0 %vm124_vm0, %v6537_v45  ;;  %v6547_v45 = vld [vmem:[#allocation3 + $0x158] sm:$0xff] }
 0x41f   :  { %20068 = vmatprep.mubr.msk.f32.mxu0 %vm124_vm0, %v6538_v55  ;;  %v6548_v55 = vld [vmem:[#allocation3 + $0x168] sm:$0xff] }
 0x422   :  { %20069 = vmatmul.mubr.msk.f32.gmra.mrb[80].mxu0 %vm124_vm0, %v6539_v47  ;;  %v6549_v47 = vld [vmem:[#allocation3 + $0x170] sm:$0xff] }
 0x423   :  { %20071 = vmatprep.mubr.msk.f32.mxu0 %vm124_vm0, %v6540_v30  ;;  %v6552_v30 = vld [vmem:[#allocation3 + $0x198] sm:$0xff] }
 0x426   :  { %20072 = vmatmul.mubr.msk.f32.gmra.mrb[82].mxu0 %vm124_vm0, %v6541_v8  ;;  %v6553_v8 = vld [vmem:[#allocation3 + $0x1a0] sm:$0xff] }
 0x427   :  { %20074 = vmatprep.mubr.msk.f32.mxu0 %vm124_vm0, %v6542_v38  ;;  %v6554_v38 = vld [vmem:[#allocation3 + $0x1e0] sm:$0xff] }
 0x42a   :  { %20075 = vmatmul.mubr.msk.f32.gmra.mrb[84].mxu0 %vm124_vm0, %v6543_v3  ;;  %v6555_v3 = vld [vmem:[#allocation3 + $0x1e8] sm:$0xff] }
 0x42b   :  { %20077 = vmatprep.mubr.msk.f32.mxu0 %vm124_vm0, %v6544_v14  ;;  %v6556_v14 = vld [vmem:[#allocation3 + $0x1f8] sm:$0xff] }
 0x42e   :  { %20078 = vmatmul.mubr.msk.f32.gmra.mrb[86].mxu0 %vm124_vm0, %v6545_v15  ;;  %v6557_v15 = vld [vmem:[#allocation3 + $0x200] sm:$0xff] }
 0x42f   :  { %20080 = vmatprep.mubr.msk.f32.mxu0 %vm124_vm0, %v6546_v32  ;;  %v6560_v32 = vld [vmem:[#allocation3 + $0x228] sm:$0xff] }
 0x432   :  { %20081 = vmatmul.mubr.msk.f32.gmra.mrb[88].mxu0 %vm124_vm0, %v6547_v45  ;;  %v6561_v45 = vld [vmem:[#allocation3 + $0x230] sm:$0xff] }
 0x433   :  { %20083 = vmatprep.mubr.msk.f32.mxu0 %vm124_vm0, %v6548_v55  ;;  %v6562_v55 = vld [vmem:[#allocation3 + $0x240] sm:$0xff] }
 0x436   :  { %20084 = vmatmul.mubr.msk.f32.gmra.mrb[90].mxu0 %vm124_vm0, %v6549_v47  ;;  %v6563_v47 = vld [vmem:[#allocation3 + $0x248] sm:$0xff] }
 0x437   :  { %20086 = vmatprep.mubr.msk.f32.mxu0 %vm124_vm0, %v24152_v28  ;;  %v6558_v28 = vld [vmem:[#allocation3 + $0x210] sm:$0xff] }
 0x43a   :  { %20087 = vmatmul.mubr.msk.f32.gmra.mrb[92].mxu0 %vm124_vm0, %v24156_v1  ;;  %v6559_v1 = vld [vmem:[#allocation3 + $0x218] sm:$0xff] }
 0x43b   :  { %20089 = vmatprep.mubr.msk.f32.mxu0 %vm124_vm0, %v6552_v30  ;;  %v6564_v30 = vld [vmem:[#allocation3 + $0x258] sm:$0xff] }
 0x43e   :  { %20090 = vmatmul.mubr.msk.f32.gmra.mrb[94].mxu0 %vm124_vm0, %v6553_v8  ;;  %v6565_v8 = vld [vmem:[#allocation3 + $0x260] sm:$0xff] }
 0x43f   :  { %20092 = vmatprep.mubr.msk.f32.mxu0 %vm124_vm0, %v6554_v38  ;;  %v6566_v38 = vld [vmem:[#allocation3 + $0x270] sm:$0xff] }
 0x442   :  { %20093 = vmatmul.mubr.msk.f32.gmra.mrb[96].mxu0 %vm124_vm0, %v6555_v3  ;;  %v6567_v3 = vld [vmem:[#allocation3 + $0x278] sm:$0xff] }
 0x443   :  { %20095 = vmatprep.mubr.msk.f32.mxu0 %vm124_vm0, %v6556_v14  ;;  %v6568_v14 = vld [vmem:[#allocation3 + $0x288] sm:$0xff] }
 0x446   :  { %20096 = vmatmul.mubr.msk.f32.gmra.mrb[98].mxu0 %vm124_vm0, %v6557_v15  ;;  %v6569_v15 = vld [vmem:[#allocation3 + $0x290] sm:$0xff] }
 0x447   :  { %20098 = vmatprep.mubr.msk.f32.mxu0 %vm124_vm0, %v6558_v28  ;;  %v6570_v28 = vld [vmem:[#allocation3 + $0x2a0] sm:$0xff] }
 0x44a   :  { %20099 = vmatmul.mubr.msk.f32.gmra.mrb[100].mxu0 %vm124_vm0, %v6559_v1  ;;  %v6571_v1 = vld [vmem:[#allocation3 + $0x2a8] sm:$0xff] }
 0x44b   :  { %20101 = vmatprep.mubr.msk.f32.mxu0 %vm124_vm0, %v6560_v32  ;;  %v6572_v32 = vld [vmem:[#allocation3 + $0x2b8] sm:$0xff] }
 0x44e   :  { %20102 = vmatmul.mubr.msk.f32.gmra.mrb[102].mxu0 %vm124_vm0, %v6561_v45  ;;  %v6573_v45 = vld [vmem:[#allocation3 + $0x2c0] sm:$0xff] }
 0x44f   :  { %20104 = vmatprep.mubr.msk.f32.mxu0 %vm124_vm0, %v6562_v55  ;;  %v6574_v55 = vld [vmem:[#allocation3 + $0x2d0] sm:$0xff] }
 0x452   :  { %20105 = vmatmul.mubr.msk.f32.gmra.mrb[104].mxu0 %vm124_vm0, %v6563_v47  ;;  %v6575_v47 = vld [vmem:[#allocation3 + $0x2d8] sm:$0xff] }
 0x453   :  { %20107 = vmatprep.mubr.msk.f32.mxu0 %vm124_vm0, %v6564_v30  ;;  %v6576_v30 = vld [vmem:[#allocation3 + $0x2e8] sm:$0xff] }
 0x456   :  { %20108 = vmatmul.mubr.msk.f32.gmra.mrb[106].mxu0 %vm124_vm0, %v6565_v8  ;;  %v6577_v8 = vld [vmem:[#allocation3 + $0x2f0] sm:$0xff] }
 0x457   :  { %20110 = vmatprep.mubr.msk.f32.mxu0 %vm124_vm0, %v6566_v38  ;;  %v6578_v38 = vld [vmem:[#allocation3 + $0x300] sm:$0xff] }
 0x45a   :  { %20111 = vmatmul.mubr.msk.f32.gmra.mrb[108].mxu0 %vm124_vm0, %v6567_v3  ;;  %v6579_v3 = vld [vmem:[#allocation3 + $0x308] sm:$0xff] }
 0x45b   :  { %20113 = vmatprep.mubr.msk.f32.mxu0 %vm124_vm0, %v6568_v14  ;;  %v6580_v14 = vld [vmem:[#allocation3 + $0x318] sm:$0xff] }
 0x45e   :  { %20114 = vmatmul.mubr.msk.f32.gmra.mrb[110].mxu0 %vm124_vm0, %v6569_v15  ;;  %v6581_v15 = vld [vmem:[#allocation3 + $0x320] sm:$0xff] }
 0x45f   :  { %20116 = vmatprep.mubr.msk.f32.mxu0 %vm124_vm0, %v6570_v28  ;;  %v6584_v28 = vld [vmem:[#allocation3 + $0x348] sm:$0xff] }
 0x462   :  { %20117 = vmatmul.mubr.msk.f32.gmra.mrb[112].mxu0 %vm124_vm0, %v6571_v1  ;;  %v6585_v1 = vld [vmem:[#allocation3 + $0x350] sm:$0xff] }
 0x463   :  { %20119 = vmatprep.mubr.msk.f32.mxu0 %vm124_vm0, %v6572_v32  ;;  %v17048_v32 = vld [vmem:[%s28494_s3 + $0x190] sm:$0xff] }
 0x466   :  { %20120 = vmatmul.mubr.msk.f32.gmra.mrb[114].mxu0 %vm124_vm0, %v6573_v45  ;;  %v17049_v45 = vld [vmem:[%s28494_s3 + $0x198] sm:$0xff] }
 0x467   :  { %20122 = vmatprep.mubr.msk.f32.mxu0 %vm124_vm0, %v6574_v55  ;;  %v17051_v55 = vld [vmem:[%s28494_s3 + $0x1a8] sm:$0xff] }
 0x46a   :  { %20123 = vmatmul.mubr.msk.f32.gmra.mrb[116].mxu0 %vm124_vm0, %v6575_v47 }
 0x46b   :  { %20125 = vmatprep.mubr.msk.f32.mxu0 %vm124_vm0, %v6576_v30  ;;  %v7973_v30 = vld [vmem:[#allocation3 + $0x172] sm:$0xff] }
 0x46e   :  { %20126 = vmatmul.mubr.msk.f32.gmra.mrb[118].mxu0 %vm124_vm0, %v6577_v8  ;;  %v7976_v8 = vld [vmem:[#allocation3 + $0x19a] sm:$0xff] }
 0x46f   :  { %20128 = vmatprep.mubr.msk.f32.mxu0 %vm124_vm0, %v6578_v38  ;;  %v7977_v38 = vld [vmem:[#allocation3 + $0x1a2] sm:$0xff] }
 0x472   :  { %20129 = vmatmul.mubr.msk.f32.gmra.mrb[120].mxu0 %vm124_vm0, %v6579_v3  ;;  %v7978_v3 = vld [vmem:[#allocation3 + $0x1e2] sm:$0xff] }
 0x473   :  { %20131 = vmatprep.mubr.msk.f32.mxu0 %vm124_vm0, %v6580_v14  ;;  %v7979_v14 = vld [vmem:[#allocation3 + $0x1ea] sm:$0xff] }
 0x476   :  { %20132 = vmatmul.mubr.msk.f32.gmra.mrb[122].mxu0 %vm124_vm0, %v6581_v15  ;;  %v7980_v15 = vld [vmem:[#allocation3 + $0x1fa] sm:$0xff] }
 0x477   :  { %20134 = vmatprep.mubr.msk.f32.mxu0 %vm124_vm0, %v24218_v29  ;;  %v21456_v29 = vpack.c.bf16 %v17049_v45, %v17048_v32  ;;  %v7985_v32 = vld [vmem:[#allocation3 + $0x232] sm:$0xff]  ;;  %v7986_v45 = vld [vmem:[#allocation3 + $0x242] sm:$0xff] }
 0x47a   :  { %20135 = vmatmul.mubr.msk.f32.gmra.mrb[124].mxu0 %vm124_vm0, %v24224_v11  ;;  %v17050_v11 = vld [vmem:[%s28494_s3 + $0x1a0] sm:$0xff] }
 0x47b   :  { %20137 = vmatprep.mubr.msk.f32.mxu0 %vm124_vm0, %v6584_v28  ;;  %v21460_v47 = vpack.c.bf16 %v17051_v55, %v17050_v11  ;;  %v7981_v28 = vld [vmem:[#allocation3 + $0x202] sm:$0xff]  ;;  %v7988_v11 = vld [vmem:[#allocation3 + $0x25a] sm:$0xff] }
 0x47c   :  { %v7989_v55 = vld [vmem:[#allocation3 + $0x262] sm:$0xff] }
 0x47e   :  { %20138 = vmatmul.mubr.msk.f32.gmra.mrb[126].mxu0 %vm124_vm0, %v6585_v1  ;;  %v7984_v1 = vld [vmem:[#allocation3 + $0x22a] sm:$0xff] }
 0x47f   :  { %20152 = vmatprep.mubr.msk.f32.mxu0 %vm124_vm0, %v24242_v7  ;;  %v7264_v7 = vld [vmem:[#allocation3 + $0x199] sm:$0xff] }
 0x482   :  { %20153 = vmatmul.mubr.msk.f32.vlgmr.msra.gmra.mrb[64].mxu0 %vm124_vm0, %v24247_v27  ;;  %v7265_v27 = vld [vmem:[#allocation3 + $0x1a1] sm:$0xff] }
 0x483   :  { %21455 = vmatpush3.bf16.msra.mxu0 %v24676_v19  ;;  %20155 = vmatprep.mubr.msk.f32.mxu0 %vm124_vm0, %v24257_v63  ;;  %v29039_v63 = vld [vmem:[#allocation72_spill] sm:$0xff]  ;;  %v7972_v19 = vld [vmem:[#allocation3 + $0x16a] sm:$0xff] }
 0x484   :  { %21457 = vmatprep.subr.bf16.mxu0 %v21456_v29 }
 0x486   :  { %20156 = vmatmul.mubr.msk.f32.gmra.mrb[66].mxu0 %vm124_vm0, %v24263_v26  ;;  %v29040_v26 = vld [vmem:[#allocation73_spill] sm:$0xff] }
 0x487   :  { %20158 = vmatprep.mubr.msk.f32.mxu0 %vm124_vm0, %v24267_v40  ;;  %21459 = vmatpush3.bf16.msra.mxu0 %v21456_v29  ;;  %v29041_v40 = vld [vmem:[#allocation74_spill] sm:$0xff] }
 0x488   :  { %21461 = vmatprep.subr.bf16.mxu0 %v21460_v47  ;;  %v7987_v29 = vld [vmem:[#allocation3 + $0x24a] sm:$0xff] }
 0x48a   :  { %20159 = vmatmul.mubr.msk.f32.gmra.mrb[68].mxu0 %vm124_vm0, %v24272_v52  ;;  %v29042_v52 = vld [vmem:[#allocation75_spill] sm:$0xff] }
 0x48b   :  { %20161 = vmatprep.mubr.msk.f32.mxu0 %vm124_vm0, %v24276_v12  ;;  %21463 = vmatpush3.bf16.msra.mxu0 %v21460_v47  ;;  %v29043_v12 = vld [vmem:[#allocation76_spill] sm:$0xff]  ;;  %v7990_v47 = vld [vmem:[#allocation3 + $0x272] sm:$0xff] }
 0x48e   :  { %20162 = vmatmul.mubr.msk.f32.gmra.mrb[70].mxu0 %vm124_vm0, %v24280_v37  ;;  %v29044_v37 = vld [vmem:[#allocation77_spill] sm:$0xff] }
 0x48f   :  { %20164 = vmatprep.mubr.msk.f32.mxu0 %vm124_vm0, %v24284_v58  ;;  %v29045_v58 = vld [vmem:[#allocation78_spill] sm:$0xff] }
 0x492   :  { %20165 = vmatmul.mubr.msk.f32.gmra.mrb[72].mxu0 %vm124_vm0, %v24288_v9  ;;  %v29046_v9 = vld [vmem:[#allocation135_spill] sm:$0xff] }
 0x493   :  { %20167 = vmatprep.mubr.msk.f32.mxu0 %vm124_vm0, %v24292_v22  ;;  %v29047_v22 = vld [vmem:[#allocation136_spill] sm:$0xff] }
 0x496   :  { %20168 = vmatmul.mubr.msk.f32.gmra.mrb[74].mxu0 %vm124_vm0, %v24296_v44  ;;  %v29048_v44 = vld [vmem:[#allocation137_spill] sm:$0xff] }
 0x497   :  { %20170 = vmatprep.mubr.msk.f32.mxu0 %vm124_vm0, %v24300_v0  ;;  %v29049_v0 = vld [vmem:[#allocation138_spill] sm:$0xff] }
 0x49a   :  { %20171 = vmatmul.mubr.msk.f32.gmra.mrb[76].mxu0 %vm124_vm0, %v24304_v17  ;;  %v29050_v17 = vld [vmem:[#allocation139_spill] sm:$0xff] }
 0x49b   :  { %20173 = vmatprep.mubr.msk.f32.mxu0 %vm124_vm0, %v24308_v21  ;;  %v29051_v21 = vld [vmem:[#allocation140_spill] sm:$0xff] }
 0x49e   :  { %20174 = vmatmul.mubr.msk.f32.gmra.mrb[78].mxu0 %vm124_vm0, %v24312_v4  ;;  %v29052_v4 = vld [vmem:[#allocation141_spill] sm:$0xff] }
 0x49f   :  { %20176 = vmatprep.mubr.msk.f32.mxu0 %vm124_vm0, %v24316_v33  ;;  %v7296_v33 = vld [vmem:[#allocation3 + $0x349] sm:$0xff] }
 0x4a2   :  { %20177 = vmatmul.mubr.msk.f32.gmra.mrb[80].mxu0 %vm124_vm0, %v24320_v53  ;;  %v29053_v53 = vld [vmem:[#allocation142_spill] sm:$0xff] }
 0x4a3   :  { %20179 = vmatprep.mubr.msk.f32.mxu0 %vm124_vm0, %v24324_v10  ;;  %v7297_v10 = vld [vmem:[#allocation3 + $0x351] sm:$0xff] }
 0x4a6   :  { %20180 = vmatmul.mubr.msk.f32.gmra.mrb[82].mxu0 %vm124_vm0, %v24328_v13  ;;  %v7946_v13 = vld [vmem:[#allocation3 + $0x32] sm:$0xff] }
 0x4a7   :  { %20182 = vmatprep.mubr.msk.f32.mxu0 %vm124_vm0, %v24332_v34  ;;  %v7947_v34 = vld [vmem:[#allocation3 + $0x3a] sm:$0xff] }
 0x4aa   :  { %20183 = vmatmul.mubr.msk.f32.gmra.mrb[84].mxu0 %vm124_vm0, %v24336_v23  ;;  %v7948_v23 = vld [vmem:[#allocation3 + $0x4a] sm:$0xff] }
 0x4ab   :  { %20185 = vmatprep.mubr.msk.f32.mxu0 %vm124_vm0, %v24340_v39  ;;  %v7949_v39 = vld [vmem:[#allocation3 + $0x52] sm:$0xff] }
 0x4ae   :  { %20186 = vmatmul.mubr.msk.f32.gmra.mrb[86].mxu0 %vm124_vm0, %v24344_v20  ;;  %v7950_v20 = vld [vmem:[#allocation3 + $0x62] sm:$0xff] }
 0x4af   :  { %20188 = vmatprep.mubr.msk.f32.mxu0 %vm124_vm0, %v24348_v31  ;;  %v7951_v31 = vld [vmem:[#allocation3 + $0x6a] sm:$0xff] }
 0x4b2   :  { %20189 = vmatmul.mubr.msk.f32.gmra.mrb[88].mxu0 %vm124_vm0, %v24352_v46  ;;  %v7952_v46 = vld [vmem:[#allocation3 + $0x7a] sm:$0xff] }
 0x4b3   :  { %20191 = vmatprep.mubr.msk.f32.mxu0 %vm124_vm0, %v24356_v48  ;;  %v7953_v48 = vld [vmem:[#allocation3 + $0x82] sm:$0xff] }
 0x4b6   :  { %20192 = vmatmul.mubr.msk.f32.gmra.mrb[90].mxu0 %vm124_vm0, %v24360_v50  ;;  %v7954_v50 = vld [vmem:[#allocation3 + $0x92] sm:$0xff] }
 0x4b7   :  { %20194 = vmatprep.mubr.msk.f32.mxu0 %vm124_vm0, %v24364_v6  ;;  %v7955_v6 = vld [vmem:[#allocation3 + $0x9a] sm:$0xff] }
 0x4ba   :  { %20195 = vmatmul.mubr.msk.f32.gmra.mrb[92].mxu0 %vm124_vm0, %v24368_v57  ;;  %v7956_v57 = vld [vmem:[#allocation3 + $0xaa] sm:$0xff] }
 0x4bb   :  { %20197 = vmatprep.mubr.msk.f32.mxu0 %vm124_vm0, %v7264_v7  ;;  %v17117_v7 = vld [vmem:[%s28495_s4 + $0x20] sm:$0xff] }
 0x4be   :  { %20198 = vmatmul.mubr.msk.f32.gmra.mrb[94].mxu0 %vm124_vm0, %v7265_v27  ;;  %v17118_v27 = vld [vmem:[%s28495_s4 + $0x28] sm:$0xff] }
 0x4bf   :  { %20200 = vmatprep.mubr.msk.f32.mxu0 %vm124_vm0, %v24374_v61  ;;  %v7957_v61 = vld [vmem:[#allocation3 + $0xb2] sm:$0xff] }
 0x4c2   :  { %20201 = vmatmul.mubr.msk.f32.gmra.mrb[96].mxu0 %vm124_vm0, %v24378_v18  ;;  %v7958_v18 = vld [vmem:[#allocation3 + $0xc2] sm:$0xff] }
 0x4c3   :  { %20203 = vmatprep.mubr.msk.f32.mxu0 %vm124_vm0, %v24382_v36  ;;  %v7959_v36 = vld [vmem:[#allocation3 + $0xca] sm:$0xff] }
 0x4c6   :  { %20204 = vmatmul.mubr.msk.f32.gmra.mrb[98].mxu0 %vm124_vm0, %v24386_v5  ;;  %v7960_v5 = vld [vmem:[#allocation3 + $0xda] sm:$0xff] }
 0x4c7   :  { %20206 = vmatprep.mubr.msk.f32.mxu0 %vm124_vm0, %v24390_v41  ;;  %v7961_v41 = vld [vmem:[#allocation3 + $0xe2] sm:$0xff] }
 0x4ca   :  { %20207 = vmatmul.mubr.msk.f32.gmra.mrb[100].mxu0 %vm124_vm0, %v24394_v59  ;;  %v7962_v59 = vld [vmem:[#allocation3 + $0xf2] sm:$0xff] }
 0x4cb   :  { %20209 = vmatprep.mubr.msk.f32.mxu0 %vm124_vm0, %v24398_v2  ;;  %v7963_v2 = vld [vmem:[#allocation3 + $0xfa] sm:$0xff] }
 0x4ce   :  { %20210 = vmatmul.mubr.msk.f32.gmra.mrb[102].mxu0 %vm124_vm0, %v24402_v62  ;;  %v7964_v62 = vld [vmem:[#allocation3 + $0x10a] sm:$0xff] }
 0x4cf   :  { %20212 = vmatprep.mubr.msk.f32.mxu0 %vm124_vm0, %v24406_v54  ;;  %v7965_v54 = vld [vmem:[#allocation3 + $0x112] sm:$0xff] }
 0x4d2   :  { %20213 = vmatmul.mubr.msk.f32.gmra.mrb[104].mxu0 %vm124_vm0, %v24410_v49  ;;  %v7966_v49 = vld [vmem:[#allocation3 + $0x122] sm:$0xff] }
 0x4d3   :  { %20215 = vmatprep.mubr.msk.f32.mxu0 %vm124_vm0, %v24414_v42  ;;  %v7967_v42 = vld [vmem:[#allocation3 + $0x12a] sm:$0xff] }
 0x4d6   :  { %20216 = vmatmul.mubr.msk.f32.gmra.mrb[106].mxu0 %vm124_vm0, %v24418_v35  ;;  %v7968_v35 = vld [vmem:[#allocation3 + $0x13a] sm:$0xff] }
 0x4d7   :  { %20218 = vmatprep.mubr.msk.f32.mxu0 %vm124_vm0, %v24422_v25  ;;  %v7969_v25 = vld [vmem:[#allocation3 + $0x142] sm:$0xff] }
 0x4da   :  { %20219 = vmatmul.mubr.msk.f32.gmra.mrb[108].mxu0 %vm124_vm0, %v24426_v16  ;;  %v7970_v16 = vld [vmem:[#allocation3 + $0x152] sm:$0xff] }
 0x4db   :  { %20221 = vmatprep.mubr.msk.f32.mxu0 %vm124_vm0, %v24430_v24  ;;  %v7971_v24 = vld [vmem:[#allocation3 + $0x15a] sm:$0xff] }
 0x4de   :  { %20222 = vmatmul.mubr.msk.f32.gmra.mrb[110].mxu0 %vm124_vm0, %v29039_v63  ;;  %v7991_v63 = vld [vmem:[#allocation3 + $0x27a] sm:$0xff] }
 0x4df   :  { %20224 = vmatprep.mubr.msk.f32.mxu0 %vm124_vm0, %v29040_v26  ;;  %v21464_v26 = vpack.c.bf16 %v17118_v27, %v17117_v7 }
 0x4e1   :  { %21465 = vmatprep.subr.bf16.mxu1 %v21464_v26 }
 0x4e2   :  { %20225 = vmatmul.mubr.msk.f32.gmra.mrb[112].mxu0 %vm124_vm0, %v29041_v40  ;;  %v7992_v40 = vld [vmem:[#allocation3 + $0x28a] sm:$0xff]  ;;  %21467 = vmatpush3.bf16.msra.mxu1 %v21464_v26 }
 0x4e3   :  { %20227 = vmatprep.mubr.msk.f32.mxu0 %vm124_vm0, %v29042_v52  ;;  %v7993_v52 = vld [vmem:[#allocation3 + $0x292] sm:$0xff] }
 0x4e6   :  { %20228 = vmatmul.mubr.msk.f32.gmra.mrb[114].mxu0 %vm124_vm0, %v29043_v12  ;;  %v7994_v12 = vld [vmem:[#allocation3 + $0x2a2] sm:$0xff] }
 0x4e7   :  { %20230 = vmatprep.mubr.msk.f32.mxu0 %vm124_vm0, %v29044_v37  ;;  %v7995_v37 = vld [vmem:[#allocation3 + $0x2aa] sm:$0xff] }
 0x4ea   :  { %20231 = vmatmul.mubr.msk.f32.gmra.mrb[116].mxu0 %vm124_vm0, %v29045_v58  ;;  %v7996_v58 = vld [vmem:[#allocation3 + $0x2ba] sm:$0xff] }
 0x4eb   :  { %20233 = vmatprep.mubr.msk.f32.mxu0 %vm124_vm0, %v29046_v9  ;;  %v7997_v9 = vld [vmem:[#allocation3 + $0x2c2] sm:$0xff] }
 0x4ee   :  { %20234 = vmatmul.mubr.msk.f32.gmra.mrb[118].mxu0 %vm124_vm0, %v29047_v22  ;;  %v7998_v22 = vld [vmem:[#allocation3 + $0x2d2] sm:$0xff] }
 0x4ef   :  { %20236 = vmatprep.mubr.msk.f32.mxu0 %vm124_vm0, %v29048_v44  ;;  %v7999_v44 = vld [vmem:[#allocation3 + $0x2da] sm:$0xff] }
 0x4f2   :  { %20237 = vmatmul.mubr.msk.f32.gmra.mrb[120].mxu0 %vm124_vm0, %v29049_v0  ;;  %v8000_v0 = vld [vmem:[#allocation3 + $0x2ea] sm:$0xff] }
 0x4f3   :  { %20239 = vmatprep.mubr.msk.f32.mxu0 %vm124_vm0, %v29050_v17  ;;  %v8001_v17 = vld [vmem:[#allocation3 + $0x2f2] sm:$0xff] }
 0x4f6   :  { %20240 = vmatmul.mubr.msk.f32.gmra.mrb[122].mxu0 %vm124_vm0, %v29051_v21  ;;  %v8002_v21 = vld [vmem:[#allocation3 + $0x302] sm:$0xff] }
 0x4f7   :  { %20242 = vmatprep.mubr.msk.f32.mxu0 %vm124_vm0, %v29052_v4  ;;  %v8003_v4 = vld [vmem:[#allocation3 + $0x30a] sm:$0xff] }
 0x4fa   :  { %20243 = vmatmul.mubr.msk.f32.gmra.mrb[124].mxu0 %vm124_vm0, %v29053_v53  ;;  %v8005_v53 = vld [vmem:[#allocation3 + $0x322] sm:$0xff] }
 0x4fb   :  { %20245 = vmatprep.mubr.msk.f32.mxu0 %vm124_vm0, %v7296_v33  ;;  %v8004_v33 = vld [vmem:[#allocation3 + $0x31a] sm:$0xff] }
 0x4fe   :  { %20246 = vmatmul.mubr.msk.f32.gmra.mrb[126].mxu0 %vm124_vm0, %v7297_v10  ;;  %v8008_v10 = vld [vmem:[#allocation3 + $0x34a] sm:$0xff] }
 0x4ff   :  { %20260 = vmatprep.mubr.msk.f32.mxu0 %vm124_vm0, %v7946_v13  ;;  %v8009_v13 = vld [vmem:[#allocation3 + $0x352] sm:$0xff] }
 0x502   :  { %20261 = vmatmul.mubr.msk.f32.vlgmr.msra.gmra.mrb[64].mxu0 %vm124_vm0, %v7947_v34  ;;  %v17119_v34 = vld [vmem:[%s28495_s4 + $0x30] sm:$0xff] }
 0x503   :  { %20263 = vmatprep.mubr.msk.f32.mxu0 %vm124_vm0, %v7948_v23  ;;  %v17120_v23 = vld [vmem:[%s28495_s4 + $0x38] sm:$0xff] }
 0x506   :  { %20264 = vmatmul.mubr.msk.f32.gmra.mrb[66].mxu0 %vm124_vm0, %v7949_v39  ;;  %v21468_v39 = vpack.c.bf16 %v17120_v23, %v17119_v34 }
 0x507   :  { %20266 = vmatprep.mubr.msk.f32.mxu0 %vm124_vm0, %v7950_v20 }
 0x508   :  { %21469 = vmatprep.subr.bf16.mxu1 %v21468_v39 }
 0x509   :  { %21471 = vmatpush3.bf16.msra.mxu1 %v21468_v39 }
 0x50a   :  { %20267 = vmatmul.mubr.msk.f32.gmra.mrb[68].mxu0 %vm124_vm0, %v7951_v31 }
 0x50b   :  { %20269 = vmatprep.mubr.msk.f32.mxu0 %vm124_vm0, %v7952_v46 }
 0x50e   :  { %20270 = vmatmul.mubr.msk.f32.gmra.mrb[70].mxu0 %vm124_vm0, %v7953_v48  ;;  %v9178_v48 = vld [vmem:[%s28495_s4] sm:$0xff] }
 0x50f   :  { %20272 = vmatprep.mubr.msk.f32.mxu0 %vm124_vm0, %v7954_v50  ;;  %v9179_v50 = vld [vmem:[%s28495_s4 + $0x8] sm:$0xff] }
 0x512   :  { %20273 = vmatmul.mubr.msk.f32.gmra.mrb[72].mxu0 %vm124_vm0, %v7955_v6 }
 0x513   :  { %20275 = vmatprep.mubr.msk.f32.mxu0 %vm124_vm0, %v7956_v57  ;;  %v21472_v57 = vpack.c.bf16 %v9179_v50, %v9178_v48 }
 0x515   :  { %21473 = vmatprep.subr.bf16.mxu1 %v21472_v57 }
 0x516   :  { %20276 = vmatmul.mubr.msk.f32.gmra.mrb[74].mxu0 %vm124_vm0, %v7957_v61 }
 0x517   :  { %20278 = vmatprep.mubr.msk.f32.mxu0 %vm124_vm0, %v7958_v18 }
 0x51a   :  { %20279 = vmatmul.mubr.msk.f32.gmra.mrb[76].mxu0 %vm124_vm0, %v7959_v36 }
 0x51b   :  { %20281 = vmatprep.mubr.msk.f32.mxu0 %vm124_vm0, %v7960_v5 }
 0x51e   :  { %20282 = vmatmul.mubr.msk.f32.gmra.mrb[78].mxu0 %vm124_vm0, %v7961_v41 }
 0x51f   :  { %20284 = vmatprep.mubr.msk.f32.mxu0 %vm124_vm0, %v7962_v59 }
 0x522   :  { %20285 = vmatmul.mubr.msk.f32.gmra.mrb[80].mxu0 %vm124_vm0, %v7963_v2 }
 0x523   :  { %20287 = vmatprep.mubr.msk.f32.mxu0 %vm124_vm0, %v7964_v62 }
 0x526   :  { %20288 = vmatmul.mubr.msk.f32.gmra.mrb[82].mxu0 %vm124_vm0, %v7965_v54 }
 0x527   :  { %20290 = vmatprep.mubr.msk.f32.mxu0 %vm124_vm0, %v7966_v49 }
 0x52a   :  { %20291 = vmatmul.mubr.msk.f32.gmra.mrb[84].mxu0 %vm124_vm0, %v7967_v42 }
 0x52b   :  { %20293 = vmatprep.mubr.msk.f32.mxu0 %vm124_vm0, %v7968_v35 }
 0x52e   :  { %20294 = vmatmul.mubr.msk.f32.gmra.mrb[86].mxu0 %vm124_vm0, %v7969_v25 }
 0x52f   :  { %20296 = vmatprep.mubr.msk.f32.mxu0 %vm124_vm0, %v7970_v16 }
 0x532   :  { %20297 = vmatmul.mubr.msk.f32.gmra.mrb[88].mxu0 %vm124_vm0, %v7971_v24 }
 0x533   :  { %20299 = vmatprep.mubr.msk.f32.mxu0 %vm124_vm0, %v7972_v19 }
 0x536   :  { %20300 = vmatmul.mubr.msk.f32.gmra.mrb[90].mxu0 %vm124_vm0, %v7973_v30 }
 0x537   :  { %20302 = vmatprep.mubr.msk.f32.mxu0 %vm124_vm0, %v24576_v43  ;;  %v7982_v43 = vld [vmem:[#allocation3 + $0x212] sm:$0xff] }
 0x53a   :  { %20303 = vmatmul.mubr.msk.f32.gmra.mrb[92].mxu0 %vm124_vm0, %v24580_v60  ;;  %v7983_v60 = vld [vmem:[#allocation3 + $0x21a] sm:$0xff] }
 0x53b   :  { %20305 = vmatprep.mubr.msk.f32.mxu0 %vm124_vm0, %v7976_v8 }
 0x53e   :  { %20306 = vmatmul.mubr.msk.f32.gmra.mrb[94].mxu0 %vm124_vm0, %v7977_v38 }
 0x53f   :  { %20308 = vmatprep.mubr.msk.f32.mxu0 %vm124_vm0, %v7978_v3 }
 0x542   :  { %20309 = vmatmul.mubr.msk.f32.gmra.mrb[96].mxu0 %vm124_vm0, %v7979_v14 }
 0x543   :  { %20311 = vmatprep.mubr.msk.f32.mxu0 %vm124_vm0, %v7980_v15 }
 0x546   :  { %20312 = vmatmul.mubr.msk.f32.gmra.mrb[98].mxu0 %vm124_vm0, %v7981_v28 }
 0x547   :  { %20314 = vmatprep.mubr.msk.f32.mxu0 %vm124_vm0, %v7982_v43 }
 0x54a   :  { %20315 = vmatmul.mubr.msk.f32.gmra.mrb[100].mxu0 %vm124_vm0, %v7983_v60 }
 0x54b   :  { %20317 = vmatprep.mubr.msk.f32.mxu0 %vm124_vm0, %v7984_v1 }
 0x54e   :  { %20318 = vmatmul.mubr.msk.f32.gmra.mrb[102].mxu0 %vm124_vm0, %v7985_v32 }
 0x54f   :  { %20320 = vmatprep.mubr.msk.f32.mxu0 %vm124_vm0, %v7986_v45 }
 0x552   :  { %20321 = vmatmul.mubr.msk.f32.gmra.mrb[104].mxu0 %vm124_vm0, %v7987_v29 }
 0x553   :  { %20323 = vmatprep.mubr.msk.f32.mxu0 %vm124_vm0, %v7988_v11 }
 0x556   :  { %20324 = vmatmul.mubr.msk.f32.gmra.mrb[106].mxu0 %vm124_vm0, %v7989_v55 }
 0x557   :  { %20326 = vmatprep.mubr.msk.f32.mxu0 %vm124_vm0, %v7990_v47 }
 0x55a   :  { %20327 = vmatmul.mubr.msk.f32.gmra.mrb[108].mxu0 %vm124_vm0, %v7991_v63 }
 0x55b   :  { %20329 = vmatprep.mubr.msk.f32.mxu0 %vm124_vm0, %v7992_v40 }
 0x55e   :  { %20330 = vmatmul.mubr.msk.f32.gmra.mrb[110].mxu0 %vm124_vm0, %v7993_v52 }
 0x55f   :  { %20332 = vmatprep.mubr.msk.f32.mxu0 %vm124_vm0, %v7994_v12 }
 0x562   :  { %20333 = vmatmul.mubr.msk.f32.gmra.mrb[112].mxu0 %vm124_vm0, %v7995_v37 }
 0x563   :  { %20335 = vmatprep.mubr.msk.f32.mxu0 %vm124_vm0, %v7996_v58 }
 0x566   :  { %20336 = vmatmul.mubr.msk.f32.gmra.mrb[114].mxu0 %vm124_vm0, %v7997_v9 }
 0x567   :  { %20338 = vmatprep.mubr.msk.f32.mxu0 %vm124_vm0, %v7998_v22 }
 0x56a   :  { %20339 = vmatmul.mubr.msk.f32.gmra.mrb[116].mxu0 %vm124_vm0, %v7999_v44 }
 0x56b   :  { %20341 = vmatprep.mubr.msk.f32.mxu0 %vm124_vm0, %v8000_v0 }
 0x56e   :  { %20342 = vmatmul.mubr.msk.f32.gmra.mrb[118].mxu0 %vm124_vm0, %v8001_v17 }
 0x56f   :  { %20344 = vmatprep.mubr.msk.f32.mxu0 %vm124_vm0, %v8002_v21 }
 0x572   :  { %20345 = vmatmul.mubr.msk.f32.gmra.mrb[120].mxu0 %vm124_vm0, %v8003_v4 }
 0x573   :  { %20347 = vmatprep.mubr.msk.f32.mxu0 %vm124_vm0, %v8004_v33 }
 0x576   :  { %20348 = vmatmul.mubr.msk.f32.gmra.mrb[122].mxu0 %vm124_vm0, %v8005_v53 }
 0x577   :  { %20350 = vmatprep.mubr.msk.f32.mxu0 %vm124_vm0, %v24644_v56  ;;  %v29054_v56 = vmov 0.0  }
 0x578   :  { %37 = vst.msk [vmem:[#allocation2] sm:$0xff] %vm36_vm3, %v29054_v56  ;;  %38 = vst.msk [vmem:[#allocation2 + $0x8] sm:$0xff] %vm36_vm3, %v29054_v56 }
 0x579   :  { %41 = vst.msk [vmem:[#allocation2 + $0x1b0] sm:$0xff] %vm36_vm3, %v29054_v56  ;;  %42 = vst.msk [vmem:[#allocation2 + $0x1b8] sm:$0xff] %vm36_vm3, %v29054_v56 }
 0x57a   :  { %20351 = vmatmul.mubr.msk.f32.gmra.mrb[124].mxu0 %vm124_vm0, %v24648_v51  ;;  %45 = vst.msk [vmem:[#allocation2 + $0x198] sm:$0xff] %vm36_vm3, %v29054_v56  ;;  %46 = vst.msk [vmem:[#allocation2 + $0x1a0] sm:$0xff] %vm36_vm3, %v29054_v56  ;;  %v24994_v51 = vld [vmem:[%s28499_s8] ss:$0 sm:$0xff]  ;;  %s22618_s8 = smov 96  }
 0x57b   :  { %20353 = vmatprep.mubr.msk.f32.mxu0 %vm124_vm0, %v8008_v10  ;;  %48 = vst.msk [vmem:[#allocation2 + $0x348] sm:$0xff] %vm36_vm3, %v29054_v56  ;;  %49 = vst.msk [vmem:[#allocation2 + $0x350] sm:$0xff] %vm36_vm3, %v29054_v56 }
 0x57c   :  { %212 = vst.msk [vmem:[#allocation4] sm:$0xff] %vm36_vm3, %v29054_v56  ;;  %213 = vst.msk [vmem:[#allocation4 + $0x8] sm:$0xff] %vm36_vm3, %v29054_v56 }
 0x57d   :  { %215 = vst.msk [vmem:[#allocation4 + $0x1b0] sm:$0xff] %vm36_vm3, %v29054_v56  ;;  %216 = vst.msk [vmem:[#allocation4 + $0x1b8] sm:$0xff] %vm36_vm3, %v29054_v56 }
 0x57e   :  { %20354 = vmatmul.mubr.msk.f32.gmra.mrb[126].mxu0 %vm124_vm0, %v8009_v13  ;;  %219 = vst.msk [vmem:[#allocation4 + $0x198] sm:$0xff] %vm36_vm3, %v29054_v56  ;;  %220 = vst.msk [vmem:[#allocation4 + $0x1a0] sm:$0xff] %vm36_vm3, %v29054_v56 }
 0x57f   :  { %222 = vst.msk [vmem:[#allocation4 + $0x348] sm:$0xff] %vm36_vm3, %v29054_v56  ;;  %223 = vst.msk [vmem:[#allocation4 + $0x350] sm:$0xff] %vm36_vm3, %v29054_v56 }
 0x580   :  { %214 = vst.msk [vmem:[#allocation4 + $0x10] sm:$0x3] %vm39_vm4, %v29054_v56  ;;  %40 = vst.msk [vmem:[#allocation2 + $0x10] sm:$0x3] %vm39_vm4, %v29054_v56 }
 0x581   :  { %43 = vst.msk [vmem:[#allocation2 + $0x1c0] sm:$0x3] %vm39_vm4, %v29054_v56  ;;  %47 = vst.msk [vmem:[#allocation2 + $0x1a8] sm:$0x3] %vm39_vm4, %v29054_v56 }
 0x582   :  { %50 = vst.msk [vmem:[#allocation2 + $0x358] sm:$0x3] %vm39_vm4, %v29054_v56  ;;  %217 = vst.msk [vmem:[#allocation4 + $0x1c0] sm:$0x3] %vm39_vm4, %v29054_v56 }
 0x583   :  { %v9182_v46 = vld [vmem:[#allocation4 + $0x1] sm:$0xff]  ;;  %221 = vst.msk [vmem:[#allocation4 + $0x1a8] sm:$0x3] %vm39_vm4, %v29054_v56  ;;  %224 = vst.msk [vmem:[#allocation4 + $0x358] sm:$0x3] %vm39_vm4, %v29054_v56 }
 0x584   :  { %20364 = vmatprep.mubr.msk.f32.mxu1 %vm36_vm3, %v9182_v46  ;;  %225 = vst.msk [vmem:[#allocation4] sm:$0x1] %vm51_vm5, %v29054_v56  ;;  %52 = vst.msk [vmem:[#allocation2] sm:$0x1] %vm51_vm5, %v29054_v56 }
 0x585   :  { %53 = vst.msk [vmem:[#allocation2 + $0x18] sm:$0x1] %vm51_vm5, %v29054_v56  ;;  %54 = vst.msk [vmem:[#allocation2 + $0x30] sm:$0x1] %vm51_vm5, %v29054_v56 }
 0x586   :  { %55 = vst.msk [vmem:[#allocation2 + $0x48] sm:$0x1] %vm51_vm5, %v29054_v56  ;;  %56 = vst.msk [vmem:[#allocation2 + $0x60] sm:$0x1] %vm51_vm5, %v29054_v56 }
 0x587   :  { %v9183_v42 = vld [vmem:[#allocation4 + $0x9] sm:$0xff]  ;;  %57 = vst.msk [vmem:[#allocation2 + $0x78] sm:$0x1] %vm51_vm5, %v29054_v56  ;;  %58 = vst.msk [vmem:[#allocation2 + $0x90] sm:$0x1] %vm51_vm5, %v29054_v56 }
 0x588   :  { %20365 = vmatmul.mubr.msk.f32.vlgmr.msra.gmra.mrb[64].mxu1 %vm36_vm3, %v9183_v42  ;;  %59 = vst.msk [vmem:[#allocation2 + $0xa8] sm:$0x1] %vm51_vm5, %v29054_v56  ;;  %60 = vst.msk [vmem:[#allocation2 + $0xc0] sm:$0x1] %vm51_vm5, %v29054_v56 }
 0x589   :  { %21475 = vmatpush3.bf16.msra.mxu1 %v21472_v57  ;;  %61 = vst.msk [vmem:[#allocation2 + $0xd8] sm:$0x1] %vm51_vm5, %v29054_v56  ;;  %62 = vst.msk [vmem:[#allocation2 + $0xf0] sm:$0x1] %vm51_vm5, %v29054_v56 }
 0x58a   :  { %63 = vst.msk [vmem:[#allocation2 + $0x108] sm:$0x1] %vm51_vm5, %v29054_v56  ;;  %64 = vst.msk [vmem:[#allocation2 + $0x120] sm:$0x1] %vm51_vm5, %v29054_v56 }
 0x58b   :  { %65 = vst.msk [vmem:[#allocation2 + $0x138] sm:$0x1] %vm51_vm5, %v29054_v56  ;;  %66 = vst.msk [vmem:[#allocation2 + $0x150] sm:$0x1] %vm51_vm5, %v29054_v56 }
 0x58c   :  { %67 = vst.msk [vmem:[#allocation2 + $0x168] sm:$0x1] %vm51_vm5, %v29054_v56  ;;  %68 = vst.msk [vmem:[#allocation2 + $0x180] sm:$0x1] %vm51_vm5, %v29054_v56 }
 0x58d   :  { %69 = vst.msk [vmem:[#allocation2 + $0x198] sm:$0x1] %vm51_vm5, %v29054_v56  ;;  %70 = vst.msk [vmem:[#allocation2 + $0x1b0] sm:$0x1] %vm51_vm5, %v29054_v56 }
 0x58e   :  { %71 = vst.msk [vmem:[#allocation2 + $0x1c8] sm:$0x1] %vm51_vm5, %v29054_v56  ;;  %72 = vst.msk [vmem:[#allocation2 + $0x1e0] sm:$0x1] %vm51_vm5, %v29054_v56 }
 0x58f   :  { %73 = vst.msk [vmem:[#allocation2 + $0x1f8] sm:$0x1] %vm51_vm5, %v29054_v56  ;;  %74 = vst.msk [vmem:[#allocation2 + $0x210] sm:$0x1] %vm51_vm5, %v29054_v56 }
 0x590   :  { %75 = vst.msk [vmem:[#allocation2 + $0x228] sm:$0x1] %vm51_vm5, %v29054_v56  ;;  %76 = vst.msk [vmem:[#allocation2 + $0x240] sm:$0x1] %vm51_vm5, %v29054_v56 }
 0x591   :  { %77 = vst.msk [vmem:[#allocation2 + $0x258] sm:$0x1] %vm51_vm5, %v29054_v56  ;;  %78 = vst.msk [vmem:[#allocation2 + $0x270] sm:$0x1] %vm51_vm5, %v29054_v56 }
 0x592   :  { %79 = vst.msk [vmem:[#allocation2 + $0x288] sm:$0x1] %vm51_vm5, %v29054_v56  ;;  %80 = vst.msk [vmem:[#allocation2 + $0x2a0] sm:$0x1] %vm51_vm5, %v29054_v56 }
 0x593   :  { %81 = vst.msk [vmem:[#allocation2 + $0x2b8] sm:$0x1] %vm51_vm5, %v29054_v56  ;;  %82 = vst.msk [vmem:[#allocation2 + $0x2d0] sm:$0x1] %vm51_vm5, %v29054_v56 }
 0x594   :  { %83 = vst.msk [vmem:[#allocation2 + $0x2e8] sm:$0x1] %vm51_vm5, %v29054_v56  ;;  %84 = vst.msk [vmem:[#allocation2 + $0x300] sm:$0x1] %vm51_vm5, %v29054_v56 }
 0x595   :  { %85 = vst.msk [vmem:[#allocation2 + $0x318] sm:$0x1] %vm51_vm5, %v29054_v56  ;;  %86 = vst.msk [vmem:[#allocation2 + $0x330] sm:$0x1] %vm51_vm5, %v29054_v56 }
 0x596   :  { %87 = vst.msk [vmem:[#allocation2 + $0x348] sm:$0x1] %vm51_vm5, %v29054_v56  ;;  %88 = vst.msk [vmem:[#allocation2 + $0x11] sm:$0x1] %vm51_vm5, %v29054_v56 }
 0x597   :  { %89 = vst.msk [vmem:[#allocation2 + $0x29] sm:$0x1] %vm51_vm5, %v29054_v56  ;;  %90 = vst.msk [vmem:[#allocation2 + $0x41] sm:$0x1] %vm51_vm5, %v29054_v56 }
 0x598   :  { %91 = vst.msk [vmem:[#allocation2 + $0x59] sm:$0x1] %vm51_vm5, %v29054_v56  ;;  %92 = vst.msk [vmem:[#allocation2 + $0x71] sm:$0x1] %vm51_vm5, %v29054_v56 }
 0x599   :  { %93 = vst.msk [vmem:[#allocation2 + $0x89] sm:$0x1] %vm51_vm5, %v29054_v56  ;;  %94 = vst.msk [vmem:[#allocation2 + $0xa1] sm:$0x1] %vm51_vm5, %v29054_v56 }
 0x59a   :  { %95 = vst.msk [vmem:[#allocation2 + $0xb9] sm:$0x1] %vm51_vm5, %v29054_v56  ;;  %96 = vst.msk [vmem:[#allocation2 + $0xd1] sm:$0x1] %vm51_vm5, %v29054_v56 }
 0x59b   :  { %97 = vst.msk [vmem:[#allocation2 + $0xe9] sm:$0x1] %vm51_vm5, %v29054_v56  ;;  %98 = vst.msk [vmem:[#allocation2 + $0x101] sm:$0x1] %vm51_vm5, %v29054_v56 }
 0x59c   :  { %99 = vst.msk [vmem:[#allocation2 + $0x119] sm:$0x1] %vm51_vm5, %v29054_v56  ;;  %100 = vst.msk [vmem:[#allocation2 + $0x131] sm:$0x1] %vm51_vm5, %v29054_v56 }
 0x59d   :  { %101 = vst.msk [vmem:[#allocation2 + $0x149] sm:$0x1] %vm51_vm5, %v29054_v56  ;;  %102 = vst.msk [vmem:[#allocation2 + $0x161] sm:$0x1] %vm51_vm5, %v29054_v56 }
 0x59e   :  { %103 = vst.msk [vmem:[#allocation2 + $0x179] sm:$0x1] %vm51_vm5, %v29054_v56  ;;  %104 = vst.msk [vmem:[#allocation2 + $0x191] sm:$0x1] %vm51_vm5, %v29054_v56 }
 0x59f   :  { %105 = vst.msk [vmem:[#allocation2 + $0x1a9] sm:$0x1] %vm51_vm5, %v29054_v56  ;;  %106 = vst.msk [vmem:[#allocation2 + $0x1c1] sm:$0x1] %vm51_vm5, %v29054_v56 }
 0x5a0   :  { %107 = vst.msk [vmem:[#allocation2 + $0x1d9] sm:$0x1] %vm51_vm5, %v29054_v56  ;;  %108 = vst.msk [vmem:[#allocation2 + $0x1f1] sm:$0x1] %vm51_vm5, %v29054_v56 }
 0x5a1   :  { %109 = vst.msk [vmem:[#allocation2 + $0x209] sm:$0x1] %vm51_vm5, %v29054_v56  ;;  %110 = vst.msk [vmem:[#allocation2 + $0x221] sm:$0x1] %vm51_vm5, %v29054_v56 }
 0x5a2   :  { %111 = vst.msk [vmem:[#allocation2 + $0x239] sm:$0x1] %vm51_vm5, %v29054_v56  ;;  %112 = vst.msk [vmem:[#allocation2 + $0x251] sm:$0x1] %vm51_vm5, %v29054_v56 }
 0x5a3   :  { %113 = vst.msk [vmem:[#allocation2 + $0x269] sm:$0x1] %vm51_vm5, %v29054_v56  ;;  %114 = vst.msk [vmem:[#allocation2 + $0x281] sm:$0x1] %vm51_vm5, %v29054_v56 }
 0x5a4   :  { %115 = vst.msk [vmem:[#allocation2 + $0x299] sm:$0x1] %vm51_vm5, %v29054_v56  ;;  %116 = vst.msk [vmem:[#allocation2 + $0x2b1] sm:$0x1] %vm51_vm5, %v29054_v56 }
 0x5a5   :  { %117 = vst.msk [vmem:[#allocation2 + $0x2c9] sm:$0x1] %vm51_vm5, %v29054_v56  ;;  %118 = vst.msk [vmem:[#allocation2 + $0x2e1] sm:$0x1] %vm51_vm5, %v29054_v56 }
 0x5a6   :  { %119 = vst.msk [vmem:[#allocation2 + $0x2f9] sm:$0x1] %vm51_vm5, %v29054_v56  ;;  %120 = vst.msk [vmem:[#allocation2 + $0x311] sm:$0x1] %vm51_vm5, %v29054_v56 }
 0x5a7   :  { %121 = vst.msk [vmem:[#allocation2 + $0x329] sm:$0x1] %vm51_vm5, %v29054_v56  ;;  %122 = vst.msk [vmem:[#allocation2 + $0x341] sm:$0x1] %vm51_vm5, %v29054_v56 }
 0x5a8   :  { %123 = vst.msk [vmem:[#allocation2 + $0x359] sm:$0x1] %vm51_vm5, %v29054_v56  ;;  %226 = vst.msk [vmem:[#allocation4 + $0x18] sm:$0x1] %vm51_vm5, %v29054_v56 }
 0x5a9   :  { %227 = vst.msk [vmem:[#allocation4 + $0x30] sm:$0x1] %vm51_vm5, %v29054_v56  ;;  %228 = vst.msk [vmem:[#allocation4 + $0x48] sm:$0x1] %vm51_vm5, %v29054_v56 }
 0x5aa   :  { %229 = vst.msk [vmem:[#allocation4 + $0x60] sm:$0x1] %vm51_vm5, %v29054_v56  ;;  %230 = vst.msk [vmem:[#allocation4 + $0x78] sm:$0x1] %vm51_vm5, %v29054_v56 }
 0x5ab   :  { %231 = vst.msk [vmem:[#allocation4 + $0x90] sm:$0x1] %vm51_vm5, %v29054_v56  ;;  %232 = vst.msk [vmem:[#allocation4 + $0xa8] sm:$0x1] %vm51_vm5, %v29054_v56 }
 0x5ac   :  { %233 = vst.msk [vmem:[#allocation4 + $0xc0] sm:$0x1] %vm51_vm5, %v29054_v56  ;;  %234 = vst.msk [vmem:[#allocation4 + $0xd8] sm:$0x1] %vm51_vm5, %v29054_v56 }
 0x5ad   :  { %235 = vst.msk [vmem:[#allocation4 + $0xf0] sm:$0x1] %vm51_vm5, %v29054_v56  ;;  %236 = vst.msk [vmem:[#allocation4 + $0x108] sm:$0x1] %vm51_vm5, %v29054_v56 }
 0x5ae   :  { %237 = vst.msk [vmem:[#allocation4 + $0x120] sm:$0x1] %vm51_vm5, %v29054_v56  ;;  %238 = vst.msk [vmem:[#allocation4 + $0x138] sm:$0x1] %vm51_vm5, %v29054_v56 }
 0x5af   :  { %239 = vst.msk [vmem:[#allocation4 + $0x150] sm:$0x1] %vm51_vm5, %v29054_v56  ;;  %240 = vst.msk [vmem:[#allocation4 + $0x168] sm:$0x1] %vm51_vm5, %v29054_v56 }
 0x5b0   :  { %241 = vst.msk [vmem:[#allocation4 + $0x180] sm:$0x1] %vm51_vm5, %v29054_v56  ;;  %242 = vst.msk [vmem:[#allocation4 + $0x198] sm:$0x1] %vm51_vm5, %v29054_v56 }
 0x5b1   :  { %243 = vst.msk [vmem:[#allocation4 + $0x1b0] sm:$0x1] %vm51_vm5, %v29054_v56  ;;  %244 = vst.msk [vmem:[#allocation4 + $0x1c8] sm:$0x1] %vm51_vm5, %v29054_v56 }
 0x5b2   :  { %245 = vst.msk [vmem:[#allocation4 + $0x1e0] sm:$0x1] %vm51_vm5, %v29054_v56  ;;  %246 = vst.msk [vmem:[#allocation4 + $0x1f8] sm:$0x1] %vm51_vm5, %v29054_v56 }
 0x5b3   :  { %247 = vst.msk [vmem:[#allocation4 + $0x210] sm:$0x1] %vm51_vm5, %v29054_v56  ;;  %248 = vst.msk [vmem:[#allocation4 + $0x228] sm:$0x1] %vm51_vm5, %v29054_v56 }
 0x5b4   :  { %249 = vst.msk [vmem:[#allocation4 + $0x240] sm:$0x1] %vm51_vm5, %v29054_v56  ;;  %250 = vst.msk [vmem:[#allocation4 + $0x258] sm:$0x1] %vm51_vm5, %v29054_v56 }
 0x5b5   :  { %251 = vst.msk [vmem:[#allocation4 + $0x270] sm:$0x1] %vm51_vm5, %v29054_v56  ;;  %252 = vst.msk [vmem:[#allocation4 + $0x288] sm:$0x1] %vm51_vm5, %v29054_v56 }
 0x5b6   :  { %253 = vst.msk [vmem:[#allocation4 + $0x2a0] sm:$0x1] %vm51_vm5, %v29054_v56  ;;  %254 = vst.msk [vmem:[#allocation4 + $0x2b8] sm:$0x1] %vm51_vm5, %v29054_v56 }
 0x5b7   :  { %255 = vst.msk [vmem:[#allocation4 + $0x2d0] sm:$0x1] %vm51_vm5, %v29054_v56  ;;  %256 = vst.msk [vmem:[#allocation4 + $0x2e8] sm:$0x1] %vm51_vm5, %v29054_v56 }
 0x5b8   :  { %257 = vst.msk [vmem:[#allocation4 + $0x300] sm:$0x1] %vm51_vm5, %v29054_v56  ;;  %258 = vst.msk [vmem:[#allocation4 + $0x318] sm:$0x1] %vm51_vm5, %v29054_v56 }
 0x5b9   :  { %259 = vst.msk [vmem:[#allocation4 + $0x330] sm:$0x1] %vm51_vm5, %v29054_v56  ;;  %260 = vst.msk [vmem:[#allocation4 + $0x348] sm:$0x1] %vm51_vm5, %v29054_v56 }
 0x5ba   :  { %261 = vst.msk [vmem:[#allocation4 + $0x11] sm:$0x1] %vm51_vm5, %v29054_v56  ;;  %262 = vst.msk [vmem:[#allocation4 + $0x29] sm:$0x1] %vm51_vm5, %v29054_v56 }
 0x5bb   :  { %263 = vst.msk [vmem:[#allocation4 + $0x41] sm:$0x1] %vm51_vm5, %v29054_v56  ;;  %264 = vst.msk [vmem:[#allocation4 + $0x59] sm:$0x1] %vm51_vm5, %v29054_v56 }
 0x5bc   :  { %265 = vst.msk [vmem:[#allocation4 + $0x71] sm:$0x1] %vm51_vm5, %v29054_v56  ;;  %266 = vst.msk [vmem:[#allocation4 + $0x89] sm:$0x1] %vm51_vm5, %v29054_v56 }
 0x5bd   :  { %267 = vst.msk [vmem:[#allocation4 + $0xa1] sm:$0x1] %vm51_vm5, %v29054_v56  ;;  %268 = vst.msk [vmem:[#allocation4 + $0xb9] sm:$0x1] %vm51_vm5, %v29054_v56 }
 0x5be   :  { %269 = vst.msk [vmem:[#allocation4 + $0xd1] sm:$0x1] %vm51_vm5, %v29054_v56  ;;  %270 = vst.msk [vmem:[#allocation4 + $0xe9] sm:$0x1] %vm51_vm5, %v29054_v56 }
 0x5bf   :  { %271 = vst.msk [vmem:[#allocation4 + $0x101] sm:$0x1] %vm51_vm5, %v29054_v56  ;;  %272 = vst.msk [vmem:[#allocation4 + $0x119] sm:$0x1] %vm51_vm5, %v29054_v56 }
 0x5c0   :  { %273 = vst.msk [vmem:[#allocation4 + $0x131] sm:$0x1] %vm51_vm5, %v29054_v56  ;;  %274 = vst.msk [vmem:[#allocation4 + $0x149] sm:$0x1] %vm51_vm5, %v29054_v56 }
 0x5c1   :  { %275 = vst.msk [vmem:[#allocation4 + $0x161] sm:$0x1] %vm51_vm5, %v29054_v56  ;;  %276 = vst.msk [vmem:[#allocation4 + $0x179] sm:$0x1] %vm51_vm5, %v29054_v56 }
 0x5c2   :  { %277 = vst.msk [vmem:[#allocation4 + $0x191] sm:$0x1] %vm51_vm5, %v29054_v56  ;;  %278 = vst.msk [vmem:[#allocation4 + $0x1a9] sm:$0x1] %vm51_vm5, %v29054_v56 }
 0x5c3   :  { %279 = vst.msk [vmem:[#allocation4 + $0x1c1] sm:$0x1] %vm51_vm5, %v29054_v56  ;;  %280 = vst.msk [vmem:[#allocation4 + $0x1d9] sm:$0x1] %vm51_vm5, %v29054_v56 }
 0x5c4   :  { %281 = vst.msk [vmem:[#allocation4 + $0x1f1] sm:$0x1] %vm51_vm5, %v29054_v56  ;;  %282 = vst.msk [vmem:[#allocation4 + $0x209] sm:$0x1] %vm51_vm5, %v29054_v56 }
 0x5c5   :  { %283 = vst.msk [vmem:[#allocation4 + $0x221] sm:$0x1] %vm51_vm5, %v29054_v56  ;;  %284 = vst.msk [vmem:[#allocation4 + $0x239] sm:$0x1] %vm51_vm5, %v29054_v56 }
 0x5c6   :  { %285 = vst.msk [vmem:[#allocation4 + $0x251] sm:$0x1] %vm51_vm5, %v29054_v56  ;;  %286 = vst.msk [vmem:[#allocation4 + $0x269] sm:$0x1] %vm51_vm5, %v29054_v56 }
 0x5c7   :  { %287 = vst.msk [vmem:[#allocation4 + $0x281] sm:$0x1] %vm51_vm5, %v29054_v56  ;;  %288 = vst.msk [vmem:[#allocation4 + $0x299] sm:$0x1] %vm51_vm5, %v29054_v56 }
 0x5c8   :  { %289 = vst.msk [vmem:[#allocation4 + $0x2b1] sm:$0x1] %vm51_vm5, %v29054_v56  ;;  %290 = vst.msk [vmem:[#allocation4 + $0x2c9] sm:$0x1] %vm51_vm5, %v29054_v56 }
 0x5c9   :  { %291 = vst.msk [vmem:[#allocation4 + $0x2e1] sm:$0x1] %vm51_vm5, %v29054_v56  ;;  %292 = vst.msk [vmem:[#allocation4 + $0x2f9] sm:$0x1] %vm51_vm5, %v29054_v56 }
 0x5ca   :  { %293 = vst.msk [vmem:[#allocation4 + $0x311] sm:$0x1] %vm51_vm5, %v29054_v56  ;;  %294 = vst.msk [vmem:[#allocation4 + $0x329] sm:$0x1] %vm51_vm5, %v29054_v56 }
 0x5cb   :  { %295 = vst.msk [vmem:[#allocation4 + $0x341] sm:$0x1] %vm51_vm5, %v29054_v56  ;;  %296 = vst.msk [vmem:[#allocation4 + $0x359] sm:$0x1] %vm51_vm5, %v29054_v56 }
 0x5d5   :  { %v20262_v20 = vpop.f32.mrb[64].mxu0 }
 0x5d6   :  { %v8275_v31 = vpop.f32.mrb[65].mxu0  ;;  %v25015_v61 = vadd.f32 %v20262_v20, %v24994_v51 }
 0x5d7   :  { %v25003_v6 = vadd.f32 %v24994_v51, %v8275_v31 }
 0x5d8   :  { %v28695_v59 = vmax.f32 %v25015_v61, 0.0 }
 0x5d9   :  { %v28692_v18 = vmax.f32 %v25003_v6, 0.0  ;;  %v20265_v36 = vpop.f32.mrb[66].mxu0 }
 0x5da   :  { %v8285_v5 = vpop.f32.mrb[67].mxu0  ;;  %v25026_v2 = vadd.f32 %v20265_v36, %v24994_v51 }
 0x5db   :  { %v25019_v41 = vadd.f32 %v24994_v51, %v8285_v5  ;;  %8857 = vrot.lane.b32.xlu0 %v28692_v18, %s22618_s8 }
 0x5dc   :  { %v28691_v25 = vmax.f32 %v25026_v2, 0.0 }
 0x5dd   :  { %v28688_v62 = vmax.f32 %v25019_v41, 0.0  ;;  %v20268_v54 = vpop.f32.mrb[68].mxu0 }
 0x5de   :  { %v8295_v49 = vpop.f32.mrb[69].mxu0  ;;  %v25041_v16 = vadd.f32 %v20268_v54, %v24994_v51 }
 0x5df   :  { %v25030_v35 = vadd.f32 %v24994_v51, %v8295_v49  ;;  %8859 = vrot.lane.b32.xlu0 %v28695_v59, %s22618_s8  ;;  %8861 = vrot.lane.b32.xlu1 %v28688_v62, %s22618_s8 }
 0x5e0   :  { %v28687_v38 = vmax.f32 %v25041_v16, 0.0 }
 0x5e1   :  { %v28684_v24 = vmax.f32 %v25030_v35, 0.0  ;;  %v20271_v19 = vpop.f32.mrb[70].mxu0 }
 0x5e2   :  { %v8305_v30 = vpop.f32.mrb[71].mxu0  ;;  %v25055_v3 = vadd.f32 %v20271_v19, %v24994_v51 }
 0x5e3   :  { %v25045_v8 = vadd.f32 %v24994_v51, %v8305_v30  ;;  %8863 = vrot.lane.b32.xlu1 %v28691_v25, %s22618_s8  ;;  %8865 = vrot.lane.b32.xlu0 %v28684_v24, %s22618_s8 }
 0x5e4   :  { %v28683_v60 = vmax.f32 %v25055_v3, 0.0 }
 0x5e5   :  { %v28680_v14 = vmax.f32 %v25045_v8, 0.0  ;;  %v20274_v15 = vpop.f32.mrb[72].mxu0 }
 0x5e6   :  { %v8315_v28 = vpop.f32.mrb[73].mxu0  ;;  %v25069_v1 = vadd.f32 %v20274_v15, %v24994_v51 }
 0x5e7   :  { %v25059_v43 = vadd.f32 %v24994_v51, %v8315_v28  ;;  %8867 = vrot.lane.b32.xlu1 %v28687_v38, %s22618_s8  ;;  %8869 = vrot.lane.b32.xlu0 %v28680_v14, %s22618_s8 }
 0x5e8   :  { %v28679_v55 = vmax.f32 %v25069_v1, 0.0 }
 0x5e9   :  { %v28676_v32 = vmax.f32 %v25059_v43, 0.0  ;;  %v20277_v45 = vpop.f32.mrb[74].mxu0 }
 0x5ea   :  { %v8325_v29 = vpop.f32.mrb[75].mxu0  ;;  %v25083_v47 = vadd.f32 %v20277_v45, %v24994_v51 }
 0x5eb   :  { %v25073_v11 = vadd.f32 %v24994_v51, %v8325_v29  ;;  %8871 = vrot.lane.b32.xlu1 %v28683_v60, %s22618_s8  ;;  %8873 = vrot.lane.b32.xlu0 %v28676_v32, %s22618_s8 }
 0x5ec   :  { %v28675_v40 = vmax.f32 %v25083_v47, 0.0 }
 0x5ed   :  { %v28672_v7 = vmax.f32 %v25073_v11, 0.0  ;;  %v20280_v27 = vpop.f32.mrb[76].mxu0 }
 0x5ee   :  { %v8335_v63 = vpop.f32.mrb[77].mxu0  ;;  %v25097_v52 = vadd.f32 %v20280_v27, %v24994_v51 }
 0x5ef   :  { %v25087_v26 = vadd.f32 %v24994_v51, %v8335_v63  ;;  %8875 = vrot.lane.b32.xlu1 %v28679_v55, %s22618_s8  ;;  %8877 = vrot.lane.b32.xlu0 %v28672_v7, %s22618_s8 }
 0x5f0   :  { %v28671_v22 = vmax.f32 %v25097_v52, 0.0 }
 0x5f1   :  { %v28668_v12 = vmax.f32 %v25087_v26, 0.0  ;;  %v20283_v37 = vpop.f32.mrb[78].mxu0 }
 0x5f2   :  { %v8345_v58 = vpop.f32.mrb[79].mxu0  ;;  %v25111_v44 = vadd.f32 %v20283_v37, %v24994_v51 }
 0x5f3   :  { %v25101_v9 = vadd.f32 %v24994_v51, %v8345_v58  ;;  %8879 = vrot.lane.b32.xlu1 %v28675_v40, %s22618_s8  ;;  %8881 = vrot.lane.b32.xlu0 %v28668_v12, %s22618_s8 }
 0x5f4   :  { %v28667_v33 = vmax.f32 %v25111_v44, 0.0 }
 0x5f5   :  { %v28664_v0 = vmax.f32 %v25101_v9, 0.0  ;;  %v20286_v17 = vpop.f32.mrb[80].mxu0 }
 0x5f6   :  { %v8355_v21 = vpop.f32.mrb[81].mxu0  ;;  %v25125_v53 = vadd.f32 %v20286_v17, %v24994_v51 }
 0x5f7   :  { %v25115_v4 = vadd.f32 %v24994_v51, %v8355_v21  ;;  %8883 = vrot.lane.b32.xlu1 %v28671_v22, %s22618_s8  ;;  %8885 = vrot.lane.b32.xlu0 %v28664_v0, %s22618_s8 }
 0x5f8   :  { %v28663_v39 = vmax.f32 %v25125_v53, 0.0 }
 0x5f9   :  { %v28660_v10 = vmax.f32 %v25115_v4, 0.0  ;;  %v20289_v13 = vpop.f32.mrb[82].mxu0 }
 0x5fa   :  { %v8365_v34 = vpop.f32.mrb[83].mxu0  ;;  %v25139_v20 = vadd.f32 %v20289_v13, %v24994_v51 }
 0x5fb   :  { %v25129_v23 = vadd.f32 %v24994_v51, %v8365_v34  ;;  %8887 = vrot.lane.b32.xlu1 %v28667_v33, %s22618_s8  ;;  %8889 = vrot.lane.b32.xlu0 %v28660_v10, %s22618_s8 }
 0x5fc   :  { %v28656_v57 = vmax.f32 %v25139_v20, 0.0 }
 0x5fd   :  { %v28655_v31 = vmax.f32 %v25129_v23, 0.0  ;;  %v20292_v46 = vpop.f32.mrb[84].mxu0 }
 0x5fe   :  { %v8375_v48 = vpop.f32.mrb[85].mxu0  ;;  %v25153_v36 = vadd.f32 %v20292_v46, %v24994_v51 }
 0x5ff   :  { %v25143_v50 = vadd.f32 %v24994_v51, %v8375_v48  ;;  %8891 = vrot.lane.b32.xlu1 %v28663_v39, %s22618_s8  ;;  %8893 = vrot.lane.b32.xlu0 %v28655_v31, %s22618_s8 }
 0x600   :  { %v28654_v19 = vmax.f32 %v25153_v36, 0.0 }
 0x601   :  { %v28653_v5 = vmax.f32 %v25143_v50, 0.0  ;;  %v20295_v54 = vpop.f32.mrb[86].mxu0 }
 0x602   :  { %v8385_v49 = vpop.f32.mrb[87].mxu0  ;;  %v25167_v30 = vadd.f32 %v20295_v54, %v24994_v51 }
 0x603   :  { %v25157_v42 = vadd.f32 %v24994_v51, %v8385_v49  ;;  %8895 = vrot.lane.b32.xlu1 %v28656_v57, %s22618_s8  ;;  %8897 = vrot.lane.b32.xlu0 %v28653_v5, %s22618_s8 }
 0x604   :  { %v28652_v27 = vmax.f32 %v25167_v30, 0.0 }
 0x605   :  { %v28649_v15 = vmax.f32 %v25157_v42, 0.0  ;;  %v25170_v28 = vpop.f32.mrb[88].mxu0 }
 0x606   :  { %v8395_v45 = vpop.f32.mrb[89].mxu0  ;;  %v25472_v63 = vadd.f32 %v25170_v28, %v24994_v51 }
 0x607   :  { %v25461_v29 = vadd.f32 %v24994_v51, %v8395_v45  ;;  %8899 = vrot.lane.b32.xlu1 %v28654_v19, %s22618_s8  ;;  %8901 = vrot.lane.b32.xlu0 %v28649_v15, %s22618_s8  ;;  %v9181_v15 = vld [vmem:[%s28495_s4 + $0x18] sm:$0xff] }
 0x608   :  { %v28648_v21 = vmax.f32 %v25472_v63, 0.0 }
 0x609   :  { %v28647_v56 = vmax.f32 %v25461_v29, 0.0  ;;  %v20301_v37 = vpop.f32.mrb[90].mxu0 }
 0x60a   :  { %v8405_v58 = vpop.f32.mrb[91].mxu0  ;;  %v25486_v13 = vadd.f32 %v20301_v37, %v24994_v51 }
 0x60b   :  { %v25476_v17 = vadd.f32 %v24994_v51, %v8405_v58  ;;  %8903 = vrot.lane.b32.xlu1 %v28652_v27, %s22618_s8  ;;  %8905 = vrot.lane.b32.xlu0 %v28647_v56, %s22618_s8 }
 0x60c   :  { %v28650_v49 = vmax.f32 %v25486_v13, 0.0 }
 0x60d   :  { %v28646_v34 = vmax.f32 %v25476_v17, 0.0  ;;  %v20304_v46 = vpop.f32.mrb[92].mxu0 }
 0x60e   :  { %v8415_v48 = vpop.f32.mrb[93].mxu0  ;;  %v25500_v28 = vadd.f32 %v20304_v46, %v24994_v51 }
 0x60f   :  { %v25490_v54 = vadd.f32 %v24994_v51, %v8415_v48  ;;  %8907 = vrot.lane.b32.xlu1 %v28648_v21, %s22618_s8  ;;  %8909 = vrot.lane.b32.xlu0 %v28646_v34, %s22618_s8  ;;  %v9180_v21 = vld [vmem:[%s28495_s4 + $0x10] sm:$0xff] }
 0x610   :  { %v28659_v48 = vmax.f32 %v25500_v28, 0.0 }
 0x611   :  { %29055 = vst [vmem:[#allocation79_spill] sm:$0xff] %v25490_v54  ;;  %v28651_v45 = vmax.f32 %v25490_v54, 0.0  ;;  %v25503_v37 = vpop.f32.mrb[94].mxu0 }
 0x612   :  { %v25505_v58 = vpop.f32.mrb[95].mxu0 }
 0x613   :  { %8911 = vrot.lane.b32.xlu1 %v28650_v49, %s22618_s8  ;;  %8913 = vrot.lane.b32.xlu0 %v28651_v45, %s22618_s8  ;;  %v21476_v45 = vpack.c.bf16 %v9181_v15, %v9180_v21 }
 0x615   :  { %v20310_v34 = vpop.f32.mrb[96].mxu0  ;;  %21477 = vmatprep.subr.bf16.mxu1 %v21476_v45 }
 0x616   :  { %v25515_v46 = vadd.f32 %v20310_v34, %v24994_v51  ;;  %v8435_v56 = vpop.f32.mrb[97].mxu0  ;;  %21479 = vmatpush3.bf16.msra.mxu1 %v21476_v45 }
 0x617   :  { %v25524_v49 = vadd.f32 %v24994_v51, %v8435_v56  ;;  %8915 = vrot.lane.b32.xlu1 %v28659_v48, %s22618_s8 }
 0x618   :  { %29056 = vst [vmem:[#allocation80_spill] sm:$0xff] %v25515_v46  ;;  %v28658_v34 = vmax.f32 %v25515_v46, 0.0 }
 0x619   :  { %29057 = vst [vmem:[#allocation81_spill] sm:$0xff] %v25524_v49  ;;  %v28657_v27 = vmax.f32 %v25524_v49, 0.0  ;;  %v20313_v5 = vpop.f32.mrb[98].mxu0 }
 0x61a   :  { %v25532_v19 = vadd.f32 %v20313_v5, %v24994_v51  ;;  %v8445_v31 = vpop.f32.mrb[99].mxu0 }
 0x61b   :  { %v25535_v57 = vadd.f32 %v24994_v51, %v8445_v31  ;;  %8923 = vrot.lane.b32.xlu1 %v28658_v34, %s22618_s8  ;;  %8921 = vrot.lane.b32.xlu0 %v28657_v27, %s22618_s8 }
 0x61c   :  { %29058 = vst [vmem:[#allocation82_spill] sm:$0xff] %v25532_v19  ;;  %v28662_v15 = vmax.f32 %v25532_v19, 0.0 }
 0x61d   :  { %29059 = vst [vmem:[#allocation83_spill] sm:$0xff] %v25535_v57  ;;  %v28661_v56 = vmax.f32 %v25535_v57, 0.0  ;;  %v20316_v21 = vpop.f32.mrb[100].mxu0 }
 0x61e   :  { %v25546_v5 = vadd.f32 %v20316_v21, %v24994_v51  ;;  %v8455_v45 = vpop.f32.mrb[101].mxu0 }
 0x61f   :  { %v25549_v31 = vadd.f32 %v24994_v51, %v8455_v45  ;;  %8927 = vrot.lane.b32.xlu1 %v28662_v15, %s22618_s8  ;;  %8925 = vrot.lane.b32.xlu0 %v28661_v56, %s22618_s8 }
 0x620   :  { %29060 = vst [vmem:[#allocation84_spill] sm:$0xff] %v25546_v5  ;;  %v28666_v27 = vmax.f32 %v25546_v5, 0.0 }
 0x621   :  { %29061 = vst [vmem:[#allocation85_spill] sm:$0xff] %v25549_v31  ;;  %v28665_v34 = vmax.f32 %v25549_v31, 0.0  ;;  %v20319_v48 = vpop.f32.mrb[102].mxu0 }
 0x622   :  { %v25560_v21 = vadd.f32 %v20319_v48, %v24994_v51  ;;  %v8465_v10 = vpop.f32.mrb[103].mxu0 }
 0x623   :  { %v25563_v45 = vadd.f32 %v24994_v51, %v8465_v10  ;;  %8931 = vrot.lane.b32.xlu1 %v28666_v27, %s22618_s8  ;;  %8929 = vrot.lane.b32.xlu0 %v28665_v34, %s22618_s8 }
 0x624   :  { %29062 = vst [vmem:[#allocation86_spill] sm:$0xff] %v25560_v21  ;;  %v28670_v56 = vmax.f32 %v25560_v21, 0.0 }
 0x625   :  { %29063 = vst [vmem:[#allocation87_spill] sm:$0xff] %v25563_v45  ;;  %v28669_v15 = vmax.f32 %v25563_v45, 0.0  ;;  %v20322_v39 = vpop.f32.mrb[104].mxu0 }
 0x626   :  { %v25574_v48 = vadd.f32 %v20322_v39, %v24994_v51  ;;  %v8475_v0 = vpop.f32.mrb[105].mxu0 }
 0x627   :  { %v25577_v10 = vadd.f32 %v24994_v51, %v8475_v0  ;;  %8935 = vrot.lane.b32.xlu1 %v28670_v56, %s22618_s8  ;;  %8933 = vrot.lane.b32.xlu0 %v28669_v15, %s22618_s8 }
 0x628   :  { %29064 = vst [vmem:[#allocation88_spill] sm:$0xff] %v25574_v48  ;;  %v28674_v34 = vmax.f32 %v25574_v48, 0.0 }
 0x629   :  { %29065 = vst [vmem:[#allocation89_spill] sm:$0xff] %v25577_v10  ;;  %v28673_v27 = vmax.f32 %v25577_v10, 0.0  ;;  %v20325_v33 = vpop.f32.mrb[106].mxu0 }
 0x62a   :  { %v25588_v39 = vadd.f32 %v20325_v33, %v24994_v51  ;;  %v8485_v12 = vpop.f32.mrb[107].mxu0 }
 0x62b   :  { %v25591_v0 = vadd.f32 %v24994_v51, %v8485_v12  ;;  %8939 = vrot.lane.b32.xlu1 %v28674_v34, %s22618_s8  ;;  %8937 = vrot.lane.b32.xlu0 %v28673_v27, %s22618_s8 }
 0x62c   :  { %29066 = vst [vmem:[#allocation90_spill] sm:$0xff] %v25588_v39  ;;  %v28678_v15 = vmax.f32 %v25588_v39, 0.0 }
 0x62d   :  { %29067 = vst [vmem:[#allocation91_spill] sm:$0xff] %v25591_v0  ;;  %v28677_v56 = vmax.f32 %v25591_v0, 0.0  ;;  %v20328_v22 = vpop.f32.mrb[108].mxu0  ;;  %v1971_v0 = vld [vmem:[#allocation2 + $0x2] sm:$0xff] }
 0x62e   :  { %v25602_v33 = vadd.f32 %v20328_v22, %v24994_v51  ;;  %v8495_v7 = vpop.f32.mrb[109].mxu0 }
 0x62f   :  { %v25605_v12 = vadd.f32 %v24994_v51, %v8495_v7  ;;  %8943 = vrot.lane.b32.xlu1 %v28678_v15, %s22618_s8  ;;  %8941 = vrot.lane.b32.xlu0 %v28677_v56, %s22618_s8 }
 0x630   :  { %29068 = vst [vmem:[#allocation92_spill] sm:$0xff] %v25602_v33  ;;  %v28682_v27 = vmax.f32 %v25602_v33, 0.0 }
 0x631   :  { %29069 = vst [vmem:[#allocation93_spill] sm:$0xff] %v25605_v12  ;;  %v28681_v34 = vmax.f32 %v25605_v12, 0.0  ;;  %v20331_v40 = vpop.f32.mrb[110].mxu0  ;;  %v1972_v12 = vld [vmem:[#allocation2 + $0xa] sm:$0xff] }
 0x632   :  { %v25616_v22 = vadd.f32 %v20331_v40, %v24994_v51  ;;  %v8505_v32 = vpop.f32.mrb[111].mxu0 }
 0x633   :  { %v25619_v7 = vadd.f32 %v24994_v51, %v8505_v32  ;;  %8947 = vrot.lane.b32.xlu1 %v28682_v27, %s22618_s8  ;;  %8945 = vrot.lane.b32.xlu0 %v28681_v34, %s22618_s8 }
 0x634   :  { %29070 = vst [vmem:[#allocation94_spill] sm:$0xff] %v25616_v22  ;;  %v28686_v56 = vmax.f32 %v25616_v22, 0.0 }
 0x635   :  { %29071 = vst [vmem:[#allocation95_spill] sm:$0xff] %v25619_v7  ;;  %v28685_v15 = vmax.f32 %v25619_v7, 0.0  ;;  %v20334_v55 = vpop.f32.mrb[112].mxu0 }
 0x636   :  { %v25630_v40 = vadd.f32 %v20334_v55, %v24994_v51  ;;  %v8515_v14 = vpop.f32.mrb[113].mxu0 }
 0x637   :  { %v25633_v32 = vadd.f32 %v24994_v51, %v8515_v14  ;;  %8951 = vrot.lane.b32.xlu1 %v28686_v56, %s22618_s8  ;;  %8949 = vrot.lane.b32.xlu0 %v28685_v15, %s22618_s8 }
 0x638   :  { %29072 = vst [vmem:[#allocation96_spill] sm:$0xff] %v25630_v40  ;;  %v28690_v34 = vmax.f32 %v25630_v40, 0.0 }
 0x639   :  { %29073 = vst [vmem:[#allocation97_spill] sm:$0xff] %v25633_v32  ;;  %v28689_v27 = vmax.f32 %v25633_v32, 0.0  ;;  %v20337_v60 = vpop.f32.mrb[114].mxu0 }
 0x63a   :  { %v25644_v55 = vadd.f32 %v20337_v60, %v24994_v51  ;;  %v8525_v24 = vpop.f32.mrb[115].mxu0 }
 0x63b   :  { %v25647_v14 = vadd.f32 %v24994_v51, %v8525_v24  ;;  %8955 = vrot.lane.b32.xlu1 %v28690_v34, %s22618_s8  ;;  %8953 = vrot.lane.b32.xlu0 %v28689_v27, %s22618_s8 }
 0x63c   :  { %29074 = vst [vmem:[#allocation98_spill] sm:$0xff] %v25644_v55  ;;  %v28694_v15 = vmax.f32 %v25644_v55, 0.0 }
 0x63d   :  { %29075 = vst [vmem:[#allocation99_spill] sm:$0xff] %v25647_v14  ;;  %v28693_v56 = vmax.f32 %v25647_v14, 0.0  ;;  %v20340_v38 = vpop.f32.mrb[116].mxu0 }
 0x63e   :  { %v25658_v60 = vadd.f32 %v20340_v38, %v24994_v51  ;;  %v8535_v62 = vpop.f32.mrb[117].mxu0 }
 0x63f   :  { %v25661_v24 = vadd.f32 %v24994_v51, %v8535_v62  ;;  %8959 = vrot.lane.b32.xlu1 %v28694_v15, %s22618_s8  ;;  %8957 = vrot.lane.b32.xlu0 %v28693_v56, %s22618_s8 }
 0x640   :  { %29076 = vst [vmem:[#allocation100_spill] sm:$0xff] %v25658_v60  ;;  %v28698_v27 = vmax.f32 %v25658_v60, 0.0 }
 0x641   :  { %29077 = vst [vmem:[#allocation101_spill] sm:$0xff] %v25661_v24  ;;  %v28697_v34 = vmax.f32 %v25661_v24, 0.0  ;;  %v20343_v25 = vpop.f32.mrb[118].mxu0 }
 0x642   :  { %v25672_v38 = vadd.f32 %v20343_v25, %v24994_v51  ;;  %v8545_v18 = vpop.f32.mrb[119].mxu0 }
 0x643   :  { %v25675_v62 = vadd.f32 %v24994_v51, %v8545_v18  ;;  %8963 = vrot.lane.b32.xlu1 %v28698_v27, %s22618_s8  ;;  %8961 = vrot.lane.b32.xlu0 %v28697_v34, %s22618_s8 }
 0x644   :  { %29078 = vst [vmem:[#allocation102_spill] sm:$0xff] %v25672_v38  ;;  %v28702_v56 = vmax.f32 %v25672_v38, 0.0 }
 0x645   :  { %29079 = vst [vmem:[#allocation103_spill] sm:$0xff] %v25675_v62  ;;  %v28701_v15 = vmax.f32 %v25675_v62, 0.0  ;;  %v20346_v59 = vpop.f32.mrb[120].mxu0 }
 0x646   :  { %v25686_v25 = vadd.f32 %v20346_v59, %v24994_v51  ;;  %v8555_v14 = vpop.f32.mrb[121].mxu0 }
 0x647   :  { %v25689_v18 = vadd.f32 %v24994_v51, %v8555_v14  ;;  %8967 = vrot.lane.b32.xlu1 %v28702_v56, %s22618_s8  ;;  %8965 = vrot.lane.b32.xlu0 %v28701_v15, %s22618_s8 }
 0x648   :  { %29080 = vst [vmem:[#allocation104_spill] sm:$0xff] %v25686_v25  ;;  %v28707_v34 = vmax.f32 %v25686_v25, 0.0 }
 0x649   :  { %29081 = vst [vmem:[#allocation105_spill] sm:$0xff] %v25689_v18  ;;  %v28706_v27 = vmax.f32 %v25689_v18, 0.0  ;;  %v20349_v24 = vpop.f32.mrb[122].mxu0 }
 0x64a   :  { %v25700_v59 = vadd.f32 %v20349_v24, %v24994_v51  ;;  %v8565_v60 = vpop.f32.mrb[123].mxu0 }
 0x64b   :  { %v25703_v14 = vadd.f32 %v24994_v51, %v8565_v60  ;;  %8971 = vrot.lane.b32.xlu1 %v28707_v34, %s22618_s8  ;;  %8969 = vrot.lane.b32.xlu0 %v28706_v27, %s22618_s8 }
 0x64c   :  { %29082 = vst [vmem:[#allocation106_spill] sm:$0xff] %v25700_v59  ;;  %v28709_v15 = vmax.f32 %v25700_v59, 0.0 }
 0x64d   :  { %29083 = vst [vmem:[#allocation107_spill] sm:$0xff] %v25703_v14  ;;  %v28710_v56 = vmax.f32 %v25703_v14, 0.0  ;;  %v8858_v62 = vpop.permute.xlu0 %8857  ;;  %v20352_v38 = vpop.f32.mrb[124].mxu0 }
 0x64e   :  { %9050 = vst.msk [vmem:[#allocation4 + $0x19] sm:$0xff] %vm36_vm3, %v8858_v62  ;;  %v25715_v24 = vadd.f32 %v20352_v38, %v24994_v51  ;;  %v8575_v60 = vpop.f32.mrb[125].mxu0  ;;  %v25729_v62 = vadd.f32 %v25503_v37, %v24994_v51  ;;  %v25733_v38 = vadd.f32 %v24994_v51, %v25505_v58 }
 0x64f   :  { %v25718_v55 = vadd.f32 %v24994_v51, %v8575_v60  ;;  %8975 = vrot.lane.b32.xlu1 %v28709_v15, %s22618_s8  ;;  %8973 = vrot.lane.b32.xlu0 %v28710_v56, %s22618_s8 }
 0x650   :  { %29084 = vst [vmem:[#allocation108_spill] sm:$0xff] %v25715_v24  ;;  %v28715_v27 = vmax.f32 %v25715_v24, 0.0  ;;  %29086 = vst [vmem:[#allocation110_spill] sm:$0xff] %v25729_v62  ;;  %v28718_v37 = vmax.f32 %v25729_v62, 0.0  ;;  %v28717_v58 = vmax.f32 %v25733_v38, 0.0  ;;  %v1827_v24 = vld [vmem:[#allocation2 + $0x1] sm:$0xff] }
 0x651   :  { %29085 = vst [vmem:[#allocation109_spill] sm:$0xff] %v25718_v55  ;;  %29087 = vst [vmem:[#allocation111_spill] sm:$0xff] %v25733_v38  ;;  %v28714_v60 = vmax.f32 %v25718_v55, 0.0  ;;  %v8860_v34 = vpop.permute.xlu0 %8859  ;;  %v8862_v18 = vpop.permute.xlu1 %8861 }
 0x652   :  { %9051 = vst.msk [vmem:[#allocation4 + $0x21] sm:$0xff] %vm36_vm3, %v8860_v34  ;;  %9052 = vst.msk [vmem:[#allocation4 + $0x31] sm:$0xff] %vm36_vm3, %v8862_v18  ;;  %v20355_v15 = vpop.f32.mrb[126].mxu0 }
 0x653   :  { %v8585_v56 = vpop.f32.mrb[127].mxu0  ;;  %8979 = vrot.lane.b32.xlu1 %v28715_v27, %s22618_s8  ;;  %8977 = vrot.lane.b32.xlu0 %v28714_v60, %s22618_s8  ;;  %v25747_v14 = vadd.f32 %v20355_v15, %v24994_v51  ;;  %v17249_v60 = vld [vmem:[%s28495_s4 + $0x40] sm:$0xff]  ;;  %v17250_v15 = vld [vmem:[%s28495_s4 + $0x48] sm:$0xff] }
 0x654   :  { %v25750_v34 = vadd.f32 %v24994_v51, %v8585_v56  ;;  %v25767_v51 = vpack.c.bf16 %v17250_v15, %v17249_v60 }
 0x655   :  { %29088 = vst [vmem:[#allocation112_spill] sm:$0xff] %v25747_v14  ;;  %v8864_v18 = vpop.permute.xlu1 %8863  ;;  %v8866_v59 = vpop.permute.xlu0 %8865  ;;  %v9184_v25 = vld [vmem:[#allocation4 + $0x19] sm:$0xff]  ;;  %v28720_v56 = vmax.f32 %v25747_v14, 0.0 }
 0x656   :  { %29089 = vst [vmem:[#allocation113_spill] sm:$0xff] %v25750_v34  ;;  %9053 = vst.msk [vmem:[#allocation4 + $0x39] sm:$0xff] %vm36_vm3, %v8864_v18  ;;  %20367 = vmatprep.mubr.msk.f32.mxu1 %vm36_vm3, %v9184_v25  ;;  %v28719_v25 = vmax.f32 %v25750_v34, 0.0  ;;  %21481 = vmatprep.subr.bf16.mxu1 %v25767_v51  ;;  %v1755_v34 = vld [vmem:[#allocation2] sm:$0xff] }
 0x657   :  { %9054 = vst.msk [vmem:[#allocation4 + $0x49] sm:$0xff] %vm36_vm3, %v8866_v59  ;;  %8919 = vrot.lane.b32.xlu1 %v28718_v37, %s22618_s8  ;;  %8917 = vrot.lane.b32.xlu0 %v28717_v58, %s22618_s8  ;;  %v1899_v33 = vadd.f32 %v1827_v24, %v1755_v34  ;;  %v29153_v34 = vld [vmem:[#allocation71_spill] sm:$0xff] }
 0x659   :  { %v8868_v59 = vpop.permute.xlu1 %8867  ;;  %v8870_v18 = vpop.permute.xlu0 %8869  ;;  %v9185_v27 = vld [vmem:[#allocation4 + $0x21] sm:$0xff]  ;;  %v9186_v55 = vld [vmem:[#allocation4 + $0x31] sm:$0xff]  ;;  %v2043_v10 = vadd.f32 %v1971_v0, %v1899_v33 }
 0x65a   :  { %9055 = vst.msk [vmem:[#allocation4 + $0x51] sm:$0xff] %vm36_vm3, %v8868_v59  ;;  %9056 = vst.msk [vmem:[#allocation4 + $0x61] sm:$0xff] %vm36_vm3, %v8870_v18  ;;  %20368 = vmatmul.mubr.msk.f32.gmra.mrb[66].mxu1 %vm36_vm3, %v9185_v27  ;;  %v29090_v27 = vld [vmem:[#allocation8_spill] sm:$0xff]  ;;  %v29091_v59 = vld [vmem:[#allocation9_spill] sm:$0xff] }
 0x65b   :  { %8983 = vrot.lane.b32.xlu1 %v28720_v56, %s22618_s8  ;;  %8981 = vrot.lane.b32.xlu0 %v28719_v25, %s22618_s8 }
 0x65c   :  { %20370 = vmatprep.mubr.msk.f32.mxu1 %vm36_vm3, %v9186_v55 }
 0x65d   :  { %v8872_v60 = vpop.permute.xlu1 %8871  ;;  %v8874_v15 = vpop.permute.xlu0 %8873  ;;  %v9187_v58 = vld [vmem:[#allocation4 + $0x39] sm:$0xff] }
 0x65e   :  { %v9188_v37 = vld [vmem:[#allocation4 + $0x49] sm:$0xff]  ;;  %9057 = vst.msk [vmem:[#allocation4 + $0x69] sm:$0xff] %vm36_vm3, %v8872_v60  ;;  %9058 = vst.msk [vmem:[#allocation4 + $0x79] sm:$0xff] %vm36_vm3, %v8874_v15  ;;  %20371 = vmatmul.mubr.msk.f32.gmra.mrb[68].mxu1 %vm36_vm3, %v9187_v58  ;;  %v29093_v60 = vld [vmem:[#allocation11_spill] sm:$0xff] }
 0x65f   :  { %963 = vrot.lane.b32.xlu1 %v29090_v27, %s22618_s8  ;;  %961 = vrot.lane.b32.xlu0 %v29091_v59, %s22618_s8  ;;  %v29092_v58 = vld [vmem:[#allocation10_spill] sm:$0xff] }
 0x660   :  { %20373 = vmatprep.mubr.msk.f32.mxu1 %vm36_vm3, %v9188_v37 }
 0x661   :  { %v8876_v18 = vpop.permute.xlu1 %8875  ;;  %v8878_v55 = vpop.permute.xlu0 %8877  ;;  %v9189_v25 = vld [vmem:[#allocation4 + $0x51] sm:$0xff]  ;;  %v9190_v56 = vld [vmem:[#allocation4 + $0x61] sm:$0xff] }
 0x662   :  { %9059 = vst.msk [vmem:[#allocation4 + $0x81] sm:$0xff] %vm36_vm3, %v8876_v18  ;;  %9060 = vst.msk [vmem:[#allocation4 + $0x91] sm:$0xff] %vm36_vm3, %v8878_v55  ;;  %20374 = vmatmul.mubr.msk.f32.gmra.mrb[70].mxu1 %vm36_vm3, %v9189_v25  ;;  %v29094_v25 = vld [vmem:[#allocation12_spill] sm:$0xff]  ;;  %v29095_v18 = vld [vmem:[#allocation13_spill] sm:$0xff] }
 0x663   :  { %967 = vrot.lane.b32.xlu1 %v29092_v58, %s22618_s8  ;;  %965 = vrot.lane.b32.xlu0 %v29093_v60, %s22618_s8 }
 0x664   :  { %20376 = vmatprep.mubr.msk.f32.mxu1 %vm36_vm3, %v9190_v56 }
 0x665   :  { %v8880_v15 = vpop.permute.xlu1 %8879  ;;  %v8882_v37 = vpop.permute.xlu0 %8881  ;;  %v9191_v59 = vld [vmem:[#allocation4 + $0x69] sm:$0xff]  ;;  %v9192_v27 = vld [vmem:[#allocation4 + $0x79] sm:$0xff] }
 0x666   :  { %9061 = vst.msk [vmem:[#allocation4 + $0x99] sm:$0xff] %vm36_vm3, %v8880_v15  ;;  %9062 = vst.msk [vmem:[#allocation4 + $0xa9] sm:$0xff] %vm36_vm3, %v8882_v37  ;;  %20377 = vmatmul.mubr.msk.f32.gmra.mrb[72].mxu1 %vm36_vm3, %v9191_v59  ;;  %v29096_v59 = vld [vmem:[#allocation14_spill] sm:$0xff]  ;;  %v29097_v15 = vld [vmem:[#allocation15_spill] sm:$0xff] }
 0x667   :  { %971 = vrot.lane.b32.xlu1 %v29094_v25, %s22618_s8  ;;  %969 = vrot.lane.b32.xlu0 %v29095_v18, %s22618_s8 }
 0x668   :  { %20379 = vmatprep.mubr.msk.f32.mxu1 %vm36_vm3, %v9192_v27 }
 0x669   :  { %v8884_v55 = vpop.permute.xlu1 %8883  ;;  %v8886_v56 = vpop.permute.xlu0 %8885  ;;  %v9193_v60 = vld [vmem:[#allocation4 + $0x81] sm:$0xff]  ;;  %v9194_v58 = vld [vmem:[#allocation4 + $0x91] sm:$0xff] }
 0x66a   :  { %9063 = vst.msk [vmem:[#allocation4 + $0xb1] sm:$0xff] %vm36_vm3, %v8884_v55  ;;  %9064 = vst.msk [vmem:[#allocation4 + $0xc1] sm:$0xff] %vm36_vm3, %v8886_v56  ;;  %20380 = vmatmul.mubr.msk.f32.gmra.mrb[74].mxu1 %vm36_vm3, %v9193_v60  ;;  %v29098_v60 = vld [vmem:[#allocation16_spill] sm:$0xff]  ;;  %v29099_v55 = vld [vmem:[#allocation17_spill] sm:$0xff] }
 0x66b   :  { %975 = vrot.lane.b32.xlu1 %v29096_v59, %s22618_s8  ;;  %973 = vrot.lane.b32.xlu0 %v29097_v15, %s22618_s8 }
 0x66c   :  { %20382 = vmatprep.mubr.msk.f32.mxu1 %vm36_vm3, %v9194_v58 }
 0x66d   :  { %v8888_v37 = vpop.permute.xlu1 %8887  ;;  %v8890_v27 = vpop.permute.xlu0 %8889  ;;  %v9195_v18 = vld [vmem:[#allocation4 + $0x99] sm:$0xff]  ;;  %v9196_v25 = vld [vmem:[#allocation4 + $0xa9] sm:$0xff] }
 0x66e   :  { %9065 = vst.msk [vmem:[#allocation4 + $0xc9] sm:$0xff] %vm36_vm3, %v8888_v37  ;;  %9066 = vst.msk [vmem:[#allocation4 + $0xd9] sm:$0xff] %vm36_vm3, %v8890_v27  ;;  %20383 = vmatmul.mubr.msk.f32.gmra.mrb[76].mxu1 %vm36_vm3, %v9195_v18  ;;  %v29100_v18 = vld [vmem:[#allocation18_spill] sm:$0xff]  ;;  %v29101_v37 = vld [vmem:[#allocation19_spill] sm:$0xff] }
 0x66f   :  { %979 = vrot.lane.b32.xlu1 %v29098_v60, %s22618_s8  ;;  %977 = vrot.lane.b32.xlu0 %v29099_v55, %s22618_s8 }
 0x670   :  { %20385 = vmatprep.mubr.msk.f32.mxu1 %vm36_vm3, %v9196_v25 }
 0x671   :  { %v8892_v56 = vpop.permute.xlu1 %8891  ;;  %v8894_v58 = vpop.permute.xlu0 %8893  ;;  %v9197_v15 = vld [vmem:[#allocation4 + $0xb1] sm:$0xff]  ;;  %v9198_v59 = vld [vmem:[#allocation4 + $0xc1] sm:$0xff] }
 0x672   :  { %9067 = vst.msk [vmem:[#allocation4 + $0xe1] sm:$0xff] %vm36_vm3, %v8892_v56  ;;  %9068 = vst.msk [vmem:[#allocation4 + $0xf1] sm:$0xff] %vm36_vm3, %v8894_v58  ;;  %20386 = vmatmul.mubr.msk.f32.gmra.mrb[78].mxu1 %vm36_vm3, %v9197_v15  ;;  %v29102_v15 = vld [vmem:[#allocation20_spill] sm:$0xff]  ;;  %v29103_v56 = vld [vmem:[#allocation21_spill] sm:$0xff] }
 0x673   :  { %983 = vrot.lane.b32.xlu1 %v29100_v18, %s22618_s8  ;;  %981 = vrot.lane.b32.xlu0 %v29101_v37, %s22618_s8 }
 0x674   :  { %20388 = vmatprep.mubr.msk.f32.mxu1 %vm36_vm3, %v9198_v59 }
 0x675   :  { %v8896_v27 = vpop.permute.xlu1 %8895  ;;  %v8898_v25 = vpop.permute.xlu0 %8897  ;;  %v9199_v55 = vld [vmem:[#allocation4 + $0xc9] sm:$0xff]  ;;  %v9200_v60 = vld [vmem:[#allocation4 + $0xd9] sm:$0xff] }
 0x676   :  { %9069 = vst.msk [vmem:[#allocation4 + $0xf9] sm:$0xff] %vm36_vm3, %v8896_v27  ;;  %9070 = vst.msk [vmem:[#allocation4 + $0x109] sm:$0xff] %vm36_vm3, %v8898_v25  ;;  %20389 = vmatmul.mubr.msk.f32.gmra.mrb[80].mxu1 %vm36_vm3, %v9199_v55  ;;  %v29104_v55 = vld [vmem:[#allocation22_spill] sm:$0xff]  ;;  %v29105_v27 = vld [vmem:[#allocation23_spill] sm:$0xff] }
 0x677   :  { %987 = vrot.lane.b32.xlu1 %v29102_v15, %s22618_s8  ;;  %985 = vrot.lane.b32.xlu0 %v29103_v56, %s22618_s8 }
 0x678   :  { %20391 = vmatprep.mubr.msk.f32.mxu1 %vm36_vm3, %v9200_v60 }
 0x679   :  { %v8900_v58 = vpop.permute.xlu1 %8899  ;;  %v8902_v59 = vpop.permute.xlu0 %8901  ;;  %v9201_v37 = vld [vmem:[#allocation4 + $0xe1] sm:$0xff]  ;;  %v9202_v18 = vld [vmem:[#allocation4 + $0xf1] sm:$0xff] }
 0x67a   :  { %9071 = vst.msk [vmem:[#allocation4 + $0x111] sm:$0xff] %vm36_vm3, %v8900_v58  ;;  %9072 = vst.msk [vmem:[#allocation4 + $0x121] sm:$0xff] %vm36_vm3, %v8902_v59  ;;  %20392 = vmatmul.mubr.msk.f32.gmra.mrb[82].mxu1 %vm36_vm3, %v9201_v37  ;;  %v29106_v37 = vld [vmem:[#allocation24_spill] sm:$0xff]  ;;  %v29107_v58 = vld [vmem:[#allocation25_spill] sm:$0xff] }
 0x67b   :  { %991 = vrot.lane.b32.xlu1 %v29104_v55, %s22618_s8  ;;  %989 = vrot.lane.b32.xlu0 %v29105_v27, %s22618_s8 }
 0x67c   :  { %20394 = vmatprep.mubr.msk.f32.mxu1 %vm36_vm3, %v9202_v18 }
 0x67d   :  { %v8904_v25 = vpop.permute.xlu1 %8903  ;;  %v8906_v60 = vpop.permute.xlu0 %8905  ;;  %v9203_v56 = vld [vmem:[#allocation4 + $0xf9] sm:$0xff]  ;;  %v9204_v15 = vld [vmem:[#allocation4 + $0x109] sm:$0xff] }
 0x67e   :  { %9073 = vst.msk [vmem:[#allocation4 + $0x129] sm:$0xff] %vm36_vm3, %v8904_v25  ;;  %9074 = vst.msk [vmem:[#allocation4 + $0x139] sm:$0xff] %vm36_vm3, %v8906_v60  ;;  %20395 = vmatmul.mubr.msk.f32.gmra.mrb[84].mxu1 %vm36_vm3, %v9203_v56  ;;  %v29108_v56 = vld [vmem:[#allocation26_spill] sm:$0xff]  ;;  %v29109_v25 = vld [vmem:[#allocation27_spill] sm:$0xff] }
 0x67f   :  { %995 = vrot.lane.b32.xlu1 %v29106_v37, %s22618_s8  ;;  %993 = vrot.lane.b32.xlu0 %v29107_v58, %s22618_s8 }
 0x680   :  { %20397 = vmatprep.mubr.msk.f32.mxu1 %vm36_vm3, %v9204_v15 }
 0x681   :  { %v8908_v59 = vpop.permute.xlu1 %8907  ;;  %v8910_v18 = vpop.permute.xlu0 %8909  ;;  %v9205_v27 = vld [vmem:[#allocation4 + $0x111] sm:$0xff]  ;;  %v9206_v55 = vld [vmem:[#allocation4 + $0x121] sm:$0xff] }
 0x682   :  { %9075 = vst.msk [vmem:[#allocation4 + $0x141] sm:$0xff] %vm36_vm3, %v8908_v59  ;;  %9076 = vst.msk [vmem:[#allocation4 + $0x151] sm:$0xff] %vm36_vm3, %v8910_v18  ;;  %20398 = vmatmul.mubr.msk.f32.gmra.mrb[86].mxu1 %vm36_vm3, %v9205_v27  ;;  %v29110_v27 = vld [vmem:[#allocation28_spill] sm:$0xff]  ;;  %v29111_v59 = vld [vmem:[#allocation29_spill] sm:$0xff] }
 0x683   :  { %999 = vrot.lane.b32.xlu1 %v29108_v56, %s22618_s8  ;;  %997 = vrot.lane.b32.xlu0 %v29109_v25, %s22618_s8 }
 0x684   :  { %20400 = vmatprep.mubr.msk.f32.mxu1 %vm36_vm3, %v9206_v55 }
 0x685   :  { %v8912_v60 = vpop.permute.xlu1 %8911  ;;  %v8914_v15 = vpop.permute.xlu0 %8913  ;;  %v9207_v58 = vld [vmem:[#allocation4 + $0x129] sm:$0xff]  ;;  %v9208_v37 = vld [vmem:[#allocation4 + $0x139] sm:$0xff] }
 0x686   :  { %9077 = vst.msk [vmem:[#allocation4 + $0x159] sm:$0xff] %vm36_vm3, %v8912_v60  ;;  %9078 = vst.msk [vmem:[#allocation4 + $0x169] sm:$0xff] %vm36_vm3, %v8914_v15  ;;  %20401 = vmatmul.mubr.msk.f32.gmra.mrb[88].mxu1 %vm36_vm3, %v9207_v58  ;;  %v29112_v60 = vld [vmem:[#allocation30_spill] sm:$0xff]  ;;  %v29113_v58 = vld [vmem:[#allocation31_spill] sm:$0xff] }
 0x687   :  { %1003 = vrot.lane.b32.xlu1 %v29110_v27, %s22618_s8  ;;  %1001 = vrot.lane.b32.xlu0 %v29111_v59, %s22618_s8 }
 0x688   :  { %20403 = vmatprep.mubr.msk.f32.mxu1 %vm36_vm3, %v9208_v37  ;;  %v29114_v37 = vld [vmem:[#allocation32_spill] sm:$0xff] }
 0x689   :  { %v8916_v18 = vpop.permute.xlu1 %8915  ;;  %v9209_v55 = vld [vmem:[#allocation4 + $0x141] sm:$0xff]  ;;  %v9210_v25 = vld [vmem:[#allocation4 + $0x151] sm:$0xff] }
 0x68a   :  { %9079 = vst.msk [vmem:[#allocation4 + $0x171] sm:$0xff] %vm36_vm3, %v8916_v18  ;;  %20404 = vmatmul.mubr.msk.f32.gmra.mrb[90].mxu1 %vm36_vm3, %v9209_v55  ;;  %v29115_v18 = vld [vmem:[#allocation33_spill] sm:$0xff] }
 0x68b   :  { %1007 = vrot.lane.b32.xlu1 %v29112_v60, %s22618_s8  ;;  %1005 = vrot.lane.b32.xlu0 %v29113_v58, %s22618_s8  ;;  %v9214_v60 = vld [vmem:[#allocation4 + $0x1b1] sm:$0xff] }
 0x68c   :  { %20406 = vmatprep.mubr.msk.f32.mxu1 %vm36_vm3, %v9210_v25 }
 0x68d   :  { %v8924_v15 = vpop.permute.xlu1 %8923  ;;  %v8922_v27 = vpop.permute.xlu0 %8921  ;;  %v9211_v59 = vld [vmem:[#allocation4 + $0x159] sm:$0xff]  ;;  %v9212_v56 = vld [vmem:[#allocation4 + $0x169] sm:$0xff] }
 0x68e   :  { %9083 = vst.msk [vmem:[#allocation4 + $0x1d1] sm:$0xff] %vm36_vm3, %v8924_v15  ;;  %9082 = vst.msk [vmem:[#allocation4 + $0x1c9] sm:$0xff] %vm36_vm3, %v8922_v27  ;;  %20407 = vmatmul.mubr.msk.f32.gmra.mrb[92].mxu1 %vm36_vm3, %v9211_v59  ;;  %v29116_v27 = vld [vmem:[#allocation34_spill] sm:$0xff]  ;;  %v29117_v59 = vld [vmem:[#allocation35_spill] sm:$0xff] }
 0x68f   :  { %1011 = vrot.lane.b32.xlu1 %v29114_v37, %s22618_s8  ;;  %1009 = vrot.lane.b32.xlu0 %v29115_v18, %s22618_s8  ;;  %v9215_v15 = vld [vmem:[#allocation4 + $0x1b9] sm:$0xff] }
 0x690   :  { %20409 = vmatprep.mubr.msk.f32.mxu1 %vm36_vm3, %v9212_v56 }
 0x691   :  { %v8928_v55 = vpop.permute.xlu1 %8927  ;;  %v8926_v25 = vpop.permute.xlu0 %8925  ;;  %v9213_v58 = vld [vmem:[#allocation4 + $0x171] sm:$0xff] }
 0x692   :  { %9085 = vst.msk [vmem:[#allocation4 + $0x1e9] sm:$0xff] %vm36_vm3, %v8928_v55  ;;  %9084 = vst.msk [vmem:[#allocation4 + $0x1e1] sm:$0xff] %vm36_vm3, %v8926_v25  ;;  %20410 = vmatmul.mubr.msk.f32.gmra.mrb[94].mxu1 %vm36_vm3, %v9213_v58  ;;  %v29118_v58 = vld [vmem:[#allocation36_spill] sm:$0xff]  ;;  %v29119_v55 = vld [vmem:[#allocation37_spill] sm:$0xff] }
 0x693   :  { %1015 = vrot.lane.b32.xlu1 %v29116_v27, %s22618_s8  ;;  %1013 = vrot.lane.b32.xlu0 %v29117_v59, %s22618_s8 }
 0x694   :  { %20412 = vmatprep.mubr.msk.f32.mxu1 %vm36_vm3, %v9214_v60 }
 0x695   :  { %v8932_v56 = vpop.permute.xlu1 %8931  ;;  %v8930_v18 = vpop.permute.xlu0 %8929  ;;  %v9216_v37 = vld [vmem:[#allocation4 + $0x1c9] sm:$0xff]  ;;  %v9217_v60 = vld [vmem:[#allocation4 + $0x1d1] sm:$0xff] }
 0x696   :  { %9087 = vst.msk [vmem:[#allocation4 + $0x201] sm:$0xff] %vm36_vm3, %v8932_v56  ;;  %9086 = vst.msk [vmem:[#allocation4 + $0x1f9] sm:$0xff] %vm36_vm3, %v8930_v18  ;;  %20413 = vmatmul.mubr.msk.f32.gmra.mrb[96].mxu1 %vm36_vm3, %v9215_v15  ;;  %v29120_v18 = vld [vmem:[#allocation38_spill] sm:$0xff]  ;;  %v29121_v15 = vld [vmem:[#allocation39_spill] sm:$0xff] }
 0x697   :  { %1019 = vrot.lane.b32.xlu1 %v29118_v58, %s22618_s8  ;;  %1017 = vrot.lane.b32.xlu0 %v29119_v55, %s22618_s8 }
 0x698   :  { %20415 = vmatprep.mubr.msk.f32.mxu1 %vm36_vm3, %v9216_v37 }
 0x699   :  { %v8936_v25 = vpop.permute.xlu1 %8935  ;;  %v8934_v59 = vpop.permute.xlu0 %8933  ;;  %v9218_v27 = vld [vmem:[#allocation4 + $0x1e1] sm:$0xff]  ;;  %v9219_v55 = vld [vmem:[#allocation4 + $0x1e9] sm:$0xff] }
 0x69a   :  { %9089 = vst.msk [vmem:[#allocation4 + $0x219] sm:$0xff] %vm36_vm3, %v8936_v25  ;;  %9088 = vst.msk [vmem:[#allocation4 + $0x211] sm:$0xff] %vm36_vm3, %v8934_v59  ;;  %20416 = vmatmul.mubr.msk.f32.gmra.mrb[98].mxu1 %vm36_vm3, %v9217_v60  ;;  %v29122_v59 = vld [vmem:[#allocation40_spill] sm:$0xff]  ;;  %v29123_v25 = vld [vmem:[#allocation41_spill] sm:$0xff] }
 0x69b   :  { %1023 = vrot.lane.b32.xlu1 %v29120_v18, %s22618_s8  ;;  %1021 = vrot.lane.b32.xlu0 %v29121_v15, %s22618_s8 }
 0x69c   :  { %20418 = vmatprep.mubr.msk.f32.mxu1 %vm36_vm3, %v9218_v27 }
 0x69d   :  { %v8940_v56 = vpop.permute.xlu1 %8939  ;;  %v8938_v37 = vpop.permute.xlu0 %8937  ;;  %v9220_v58 = vld [vmem:[#allocation4 + $0x1f9] sm:$0xff]  ;;  %v9221_v15 = vld [vmem:[#allocation4 + $0x201] sm:$0xff] }
 0x69e   :  { %9091 = vst.msk [vmem:[#allocation4 + $0x231] sm:$0xff] %vm36_vm3, %v8940_v56  ;;  %9090 = vst.msk [vmem:[#allocation4 + $0x229] sm:$0xff] %vm36_vm3, %v8938_v37  ;;  %20419 = vmatmul.mubr.msk.f32.gmra.mrb[100].mxu1 %vm36_vm3, %v9219_v55  ;;  %v29124_v55 = vld [vmem:[#allocation42_spill] sm:$0xff]  ;;  %v29125_v56 = vld [vmem:[#allocation43_spill] sm:$0xff] }
 0x69f   :  { %1027 = vrot.lane.b32.xlu1 %v29122_v59, %s22618_s8  ;;  %1025 = vrot.lane.b32.xlu0 %v29123_v25, %s22618_s8 }
 0x6a0   :  { %20421 = vmatprep.mubr.msk.f32.mxu1 %vm36_vm3, %v9220_v58 }
 0x6a1   :  { %v8944_v60 = vpop.permute.xlu1 %8943  ;;  %v8942_v27 = vpop.permute.xlu0 %8941  ;;  %v9222_v18 = vld [vmem:[#allocation4 + $0x211] sm:$0xff]  ;;  %v9223_v25 = vld [vmem:[#allocation4 + $0x219] sm:$0xff] }
 0x6a2   :  { %9093 = vst.msk [vmem:[#allocation4 + $0x249] sm:$0xff] %vm36_vm3, %v8944_v60  ;;  %9092 = vst.msk [vmem:[#allocation4 + $0x241] sm:$0xff] %vm36_vm3, %v8942_v27  ;;  %20422 = vmatmul.mubr.msk.f32.gmra.mrb[102].mxu1 %vm36_vm3, %v9221_v15  ;;  %v29126_v15 = vld [vmem:[#allocation44_spill] sm:$0xff]  ;;  %v29127_v60 = vld [vmem:[#allocation45_spill] sm:$0xff] }
 0x6a3   :  { %1031 = vrot.lane.b32.xlu1 %v29124_v55, %s22618_s8  ;;  %1029 = vrot.lane.b32.xlu0 %v29125_v56, %s22618_s8 }
 0x6a4   :  { %20424 = vmatprep.mubr.msk.f32.mxu1 %vm36_vm3, %v9222_v18 }
 0x6a5   :  { %v8948_v37 = vpop.permute.xlu1 %8947  ;;  %v8946_v58 = vpop.permute.xlu0 %8945  ;;  %v9224_v59 = vld [vmem:[#allocation4 + $0x229] sm:$0xff]  ;;  %v9225_v56 = vld [vmem:[#allocation4 + $0x231] sm:$0xff] }
 0x6a6   :  { %9095 = vst.msk [vmem:[#allocation4 + $0x261] sm:$0xff] %vm36_vm3, %v8948_v37  ;;  %9094 = vst.msk [vmem:[#allocation4 + $0x259] sm:$0xff] %vm36_vm3, %v8946_v58  ;;  %20425 = vmatmul.mubr.msk.f32.gmra.mrb[104].mxu1 %vm36_vm3, %v9223_v25  ;;  %v29128_v25 = vld [vmem:[#allocation46_spill] sm:$0xff]  ;;  %v29129_v37 = vld [vmem:[#allocation47_spill] sm:$0xff] }
 0x6a7   :  { %1035 = vrot.lane.b32.xlu1 %v29126_v15, %s22618_s8  ;;  %1033 = vrot.lane.b32.xlu0 %v29127_v60, %s22618_s8 }
 0x6a8   :  { %20427 = vmatprep.mubr.msk.f32.mxu1 %vm36_vm3, %v9224_v59 }
 0x6a9   :  { %v8952_v27 = vpop.permute.xlu1 %8951  ;;  %v8950_v18 = vpop.permute.xlu0 %8949  ;;  %v9226_v55 = vld [vmem:[#allocation4 + $0x241] sm:$0xff]  ;;  %v9227_v60 = vld [vmem:[#allocation4 + $0x249] sm:$0xff] }
 0x6aa   :  { %9097 = vst.msk [vmem:[#allocation4 + $0x279] sm:$0xff] %vm36_vm3, %v8952_v27  ;;  %9096 = vst.msk [vmem:[#allocation4 + $0x271] sm:$0xff] %vm36_vm3, %v8950_v18  ;;  %20428 = vmatmul.mubr.msk.f32.gmra.mrb[106].mxu1 %vm36_vm3, %v9225_v56  ;;  %v29130_v56 = vld [vmem:[#allocation48_spill] sm:$0xff]  ;;  %v29131_v27 = vld [vmem:[#allocation49_spill] sm:$0xff] }
 0x6ab   :  { %1039 = vrot.lane.b32.xlu1 %v29128_v25, %s22618_s8  ;;  %1037 = vrot.lane.b32.xlu0 %v29129_v37, %s22618_s8 }
 0x6ac   :  { %20430 = vmatprep.mubr.msk.f32.mxu1 %vm36_vm3, %v9226_v55 }
 0x6ad   :  { %v8956_v58 = vpop.permute.xlu1 %8955  ;;  %v8954_v59 = vpop.permute.xlu0 %8953  ;;  %v9228_v15 = vld [vmem:[#allocation4 + $0x259] sm:$0xff]  ;;  %v9229_v37 = vld [vmem:[#allocation4 + $0x261] sm:$0xff] }
 0x6ae   :  { %9099 = vst.msk [vmem:[#allocation4 + $0x291] sm:$0xff] %vm36_vm3, %v8956_v58  ;;  %9098 = vst.msk [vmem:[#allocation4 + $0x289] sm:$0xff] %vm36_vm3, %v8954_v59  ;;  %20431 = vmatmul.mubr.msk.f32.gmra.mrb[108].mxu1 %vm36_vm3, %v9227_v60  ;;  %v29132_v60 = vld [vmem:[#allocation50_spill] sm:$0xff]  ;;  %v29133_v58 = vld [vmem:[#allocation51_spill] sm:$0xff] }
 0x6af   :  { %1043 = vrot.lane.b32.xlu1 %v29130_v56, %s22618_s8  ;;  %1041 = vrot.lane.b32.xlu0 %v29131_v27, %s22618_s8 }
 0x6b0   :  { %20433 = vmatprep.mubr.msk.f32.mxu1 %vm36_vm3, %v9228_v15 }
 0x6b1   :  { %v8960_v18 = vpop.permute.xlu1 %8959  ;;  %v8958_v55 = vpop.permute.xlu0 %8957  ;;  %v9230_v25 = vld [vmem:[#allocation4 + $0x271] sm:$0xff]  ;;  %v9231_v27 = vld [vmem:[#allocation4 + $0x279] sm:$0xff] }
 0x6b2   :  { %9101 = vst.msk [vmem:[#allocation4 + $0x2a9] sm:$0xff] %vm36_vm3, %v8960_v18  ;;  %9100 = vst.msk [vmem:[#allocation4 + $0x2a1] sm:$0xff] %vm36_vm3, %v8958_v55  ;;  %20434 = vmatmul.mubr.msk.f32.gmra.mrb[110].mxu1 %vm36_vm3, %v9229_v37  ;;  %v29134_v37 = vld [vmem:[#allocation52_spill] sm:$0xff]  ;;  %v29135_v18 = vld [vmem:[#allocation53_spill] sm:$0xff] }
 0x6b3   :  { %1047 = vrot.lane.b32.xlu1 %v29132_v60, %s22618_s8  ;;  %1045 = vrot.lane.b32.xlu0 %v29133_v58, %s22618_s8 }
 0x6b4   :  { %20436 = vmatprep.mubr.msk.f32.mxu1 %vm36_vm3, %v9230_v25 }
 0x6b5   :  { %v8964_v59 = vpop.permute.xlu1 %8963  ;;  %v8962_v15 = vpop.permute.xlu0 %8961  ;;  %v9232_v56 = vld [vmem:[#allocation4 + $0x289] sm:$0xff]  ;;  %v9233_v58 = vld [vmem:[#allocation4 + $0x291] sm:$0xff] }
 0x6b6   :  { %9103 = vst.msk [vmem:[#allocation4 + $0x2c1] sm:$0xff] %vm36_vm3, %v8964_v59  ;;  %9102 = vst.msk [vmem:[#allocation4 + $0x2b9] sm:$0xff] %vm36_vm3, %v8962_v15  ;;  %20437 = vmatmul.mubr.msk.f32.gmra.mrb[112].mxu1 %vm36_vm3, %v9231_v27  ;;  %v29136_v27 = vld [vmem:[#allocation54_spill] sm:$0xff]  ;;  %v29137_v59 = vld [vmem:[#allocation55_spill] sm:$0xff] }
 0x6b7   :  { %1051 = vrot.lane.b32.xlu1 %v29134_v37, %s22618_s8  ;;  %1049 = vrot.lane.b32.xlu0 %v29135_v18, %s22618_s8 }
 0x6b8   :  { %20439 = vmatprep.mubr.msk.f32.mxu1 %vm36_vm3, %v9232_v56 }
 0x6b9   :  { %v8968_v55 = vpop.permute.xlu1 %8967  ;;  %v8966_v25 = vpop.permute.xlu0 %8965  ;;  %v9234_v60 = vld [vmem:[#allocation4 + $0x2a1] sm:$0xff]  ;;  %v9235_v18 = vld [vmem:[#allocation4 + $0x2a9] sm:$0xff] }
 0x6ba   :  { %9105 = vst.msk [vmem:[#allocation4 + $0x2d9] sm:$0xff] %vm36_vm3, %v8968_v55  ;;  %9104 = vst.msk [vmem:[#allocation4 + $0x2d1] sm:$0xff] %vm36_vm3, %v8966_v25  ;;  %20440 = vmatmul.mubr.msk.f32.gmra.mrb[114].mxu1 %vm36_vm3, %v9233_v58  ;;  %v29138_v58 = vld [vmem:[#allocation56_spill] sm:$0xff]  ;;  %v29139_v55 = vld [vmem:[#allocation57_spill] sm:$0xff] }
 0x6bb   :  { %1055 = vrot.lane.b32.xlu1 %v29136_v27, %s22618_s8  ;;  %1053 = vrot.lane.b32.xlu0 %v29137_v59, %s22618_s8 }
 0x6bc   :  { %20442 = vmatprep.mubr.msk.f32.mxu1 %vm36_vm3, %v9234_v60 }
 0x6bd   :  { %v8972_v15 = vpop.permute.xlu1 %8971  ;;  %v8970_v56 = vpop.permute.xlu0 %8969  ;;  %v9236_v37 = vld [vmem:[#allocation4 + $0x2b9] sm:$0xff]  ;;  %v9237_v59 = vld [vmem:[#allocation4 + $0x2c1] sm:$0xff] }
 0x6be   :  { %9107 = vst.msk [vmem:[#allocation4 + $0x2f1] sm:$0xff] %vm36_vm3, %v8972_v15  ;;  %9106 = vst.msk [vmem:[#allocation4 + $0x2e9] sm:$0xff] %vm36_vm3, %v8970_v56  ;;  %20443 = vmatmul.mubr.msk.f32.gmra.mrb[116].mxu1 %vm36_vm3, %v9235_v18  ;;  %v29140_v18 = vld [vmem:[#allocation58_spill] sm:$0xff]  ;;  %v29141_v15 = vld [vmem:[#allocation59_spill] sm:$0xff] }
 0x6bf   :  { %1059 = vrot.lane.b32.xlu1 %v29138_v58, %s22618_s8  ;;  %1057 = vrot.lane.b32.xlu0 %v29139_v55, %s22618_s8 }
 0x6c0   :  { %20445 = vmatprep.mubr.msk.f32.mxu1 %vm36_vm3, %v9236_v37 }
 0x6c1   :  { %v8976_v25 = vpop.permute.xlu1 %8975  ;;  %v8974_v60 = vpop.permute.xlu0 %8973  ;;  %v9238_v27 = vld [vmem:[#allocation4 + $0x2d1] sm:$0xff]  ;;  %v9239_v55 = vld [vmem:[#allocation4 + $0x2d9] sm:$0xff] }
 0x6c2   :  { %9109 = vst.msk [vmem:[#allocation4 + $0x309] sm:$0xff] %vm36_vm3, %v8976_v25  ;;  %9108 = vst.msk [vmem:[#allocation4 + $0x301] sm:$0xff] %vm36_vm3, %v8974_v60  ;;  %20446 = vmatmul.mubr.msk.f32.gmra.mrb[118].mxu1 %vm36_vm3, %v9237_v59  ;;  %v29142_v59 = vld [vmem:[#allocation60_spill] sm:$0xff]  ;;  %v29143_v25 = vld [vmem:[#allocation61_spill] sm:$0xff] }
 0x6c3   :  { %1063 = vrot.lane.b32.xlu1 %v29140_v18, %s22618_s8  ;;  %1061 = vrot.lane.b32.xlu0 %v29141_v15, %s22618_s8 }
 0x6c4   :  { %20448 = vmatprep.mubr.msk.f32.mxu1 %vm36_vm3, %v9238_v27 }
 0x6c5   :  { %v8980_v56 = vpop.permute.xlu1 %8979  ;;  %v8978_v37 = vpop.permute.xlu0 %8977  ;;  %v9240_v58 = vld [vmem:[#allocation4 + $0x2e9] sm:$0xff]  ;;  %v9241_v15 = vld [vmem:[#allocation4 + $0x2f1] sm:$0xff] }
 0x6c6   :  { %9111 = vst.msk [vmem:[#allocation4 + $0x321] sm:$0xff] %vm36_vm3, %v8980_v56  ;;  %9110 = vst.msk [vmem:[#allocation4 + $0x319] sm:$0xff] %vm36_vm3, %v8978_v37  ;;  %20449 = vmatmul.mubr.msk.f32.gmra.mrb[120].mxu1 %vm36_vm3, %v9239_v55  ;;  %v29144_v55 = vld [vmem:[#allocation62_spill] sm:$0xff]  ;;  %v29145_v56 = vld [vmem:[#allocation63_spill] sm:$0xff] }
 0x6c7   :  { %1067 = vrot.lane.b32.xlu1 %v29142_v59, %s22618_s8  ;;  %1065 = vrot.lane.b32.xlu0 %v29143_v25, %s22618_s8 }
 0x6c8   :  { %20451 = vmatprep.mubr.msk.f32.mxu1 %vm36_vm3, %v9240_v58 }
 0x6c9   :  { %v8920_v60 = vpop.permute.xlu1 %8919  ;;  %v8918_v27 = vpop.permute.xlu0 %8917  ;;  %v9242_v18 = vld [vmem:[#allocation4 + $0x301] sm:$0xff]  ;;  %v9243_v25 = vld [vmem:[#allocation4 + $0x309] sm:$0xff] }
 0x6ca   :  { %9081 = vst.msk [vmem:[#allocation4 + $0x189] sm:$0xff] %vm36_vm3, %v8920_v60  ;;  %9080 = vst.msk [vmem:[#allocation4 + $0x181] sm:$0xff] %vm36_vm3, %v8918_v27  ;;  %20452 = vmatmul.mubr.msk.f32.gmra.mrb[122].mxu1 %vm36_vm3, %v9241_v15  ;;  %v29146_v15 = vld [vmem:[#allocation64_spill] sm:$0xff]  ;;  %v29147_v60 = vld [vmem:[#allocation65_spill] sm:$0xff] }
 0x6cb   :  { %1071 = vrot.lane.b32.xlu1 %v29144_v55, %s22618_s8  ;;  %1069 = vrot.lane.b32.xlu0 %v29145_v56, %s22618_s8  ;;  %v9114_v55 = vld [vmem:[#allocation4] sm:$0xff] }
 0x6cc   :  { %20454 = vmatprep.mubr.msk.f32.mxu1 %vm36_vm3, %v9242_v18 }
 0x6cd   :  { %v8984_v37 = vpop.permute.xlu1 %8983  ;;  %v8982_v58 = vpop.permute.xlu0 %8981  ;;  %v9244_v59 = vld [vmem:[#allocation4 + $0x319] sm:$0xff]  ;;  %v9245_v56 = vld [vmem:[#allocation4 + $0x321] sm:$0xff] }
 0x6ce   :  { %9113 = vst.msk [vmem:[#allocation4 + $0x339] sm:$0xff] %vm36_vm3, %v8984_v37  ;;  %9112 = vst.msk [vmem:[#allocation4 + $0x331] sm:$0xff] %vm36_vm3, %v8982_v58  ;;  %20455 = vmatmul.mubr.msk.f32.gmra.mrb[124].mxu1 %vm36_vm3, %v9243_v25  ;;  %v17251_v25 = vld [vmem:[%s28495_s4 + $0x50] sm:$0xff]  ;;  %v17252_v37 = vld [vmem:[%s28495_s4 + $0x58] sm:$0xff] }
 0x6cf   :  { %1075 = vrot.lane.b32.xlu1 %v29146_v15, %s22618_s8  ;;  %1073 = vrot.lane.b32.xlu0 %v29147_v60, %s22618_s8  ;;  %v29149_v58 = vld [vmem:[#allocation67_spill] sm:$0xff]  ;;  %v9115_v60 = vld [vmem:[#allocation4 + $0x8] sm:$0xff]  ;;  %v21484_v14 = vpack.c.bf16 %v17252_v37, %v17251_v25 }
 0x6d0   :  { %20457 = vmatprep.mubr.msk.f32.mxu1 %vm36_vm3, %v9244_v59  ;;  %v29148_v59 = vld [vmem:[#allocation66_spill] sm:$0xff]  ;;  %v9116_v25 = vld [vmem:[#allocation4 + $0x18] sm:$0xff]  ;;  %v29151_v37 = vld [vmem:[#allocation69_spill] sm:$0xff] }
 0x6d1   :  { %v964_v27 = vpop.permute.xlu1 %963  ;;  %v962_v18 = vpop.permute.xlu0 %961  ;;  %v1828_v15 = vld [vmem:[#allocation2 + $0x9] sm:$0xff] }
 0x6d2   :  { %1155 = vst.msk [vmem:[#allocation2 + $0x21] sm:$0xff] %vm36_vm3, %v964_v27  ;;  %1154 = vst.msk [vmem:[#allocation2 + $0x19] sm:$0xff] %vm36_vm3, %v962_v18  ;;  %20458 = vmatmul.mubr.msk.f32.gmra.mrb[126].mxu1 %vm36_vm3, %v9245_v56  ;;  %v1756_v56 = vld [vmem:[#allocation2 + $0x8] sm:$0xff] }
 0x6d3   :  { %1079 = vrot.lane.b32.xlu1 %v29148_v59, %s22618_s8  ;;  %1077 = vrot.lane.b32.xlu0 %v29149_v58, %s22618_s8  ;;  %v17317_v58 = vld [vmem:[%s28495_s4 + $0x60] sm:$0xff] }
 0x6d4   :  { %20468 = vmatprep.mubr.msk.f32.mxu1 %vm36_vm3, %v9114_v55  ;;  %v17318_v55 = vld [vmem:[%s28495_s4 + $0x68] sm:$0xff]  ;;  %v29150_v59 = vld [vmem:[#allocation68_spill] sm:$0xff] }
 0x6d5   :  { %v968_v27 = vpop.permute.xlu1 %967  ;;  %v966_v18 = vpop.permute.xlu0 %965 }
 0x6d6   :  { %1157 = vst.msk [vmem:[#allocation2 + $0x39] sm:$0xff] %vm36_vm3, %v968_v27  ;;  %1156 = vst.msk [vmem:[#allocation2 + $0x31] sm:$0xff] %vm36_vm3, %v966_v18  ;;  %20469 = vmatmul.mubr.msk.f32.vlgmr.msra.gmra.mrb[64].mxu1 %vm36_vm3, %v9115_v60  ;;  %v9117_v60 = vld [vmem:[#allocation4 + $0x20] sm:$0xff]  ;;  %v9118_v27 = vld [vmem:[#allocation4 + $0x30] sm:$0xff]  ;;  %v1900_v18 = vadd.f32 %v1828_v15, %v1756_v56 }
 0x6d7   :  { %21483 = vmatpush3.bf16.msra.mxu1 %v25767_v51  ;;  %1083 = vrot.lane.b32.xlu1 %v29150_v59, %s22618_s8  ;;  %v26042_v51 = vpack.c.bf16 %v17318_v55, %v17317_v58  ;;  %v29152_v15 = vld [vmem:[#allocation70_spill] sm:$0xff] }
 0x6d8   :  { %1081 = vrot.lane.b32.xlu0 %v29151_v37, %s22618_s8  ;;  %20471 = vmatprep.mubr.msk.f32.mxu1 %vm36_vm3, %v9116_v25  ;;  %v2044_v58 = vadd.f32 %v1972_v12, %v1900_v18 }
 0x6d9   :  { %v972_v32 = vpop.permute.xlu1 %971  ;;  %v970_v40 = vpop.permute.xlu0 %969  ;;  %v1758_v7 = vld [vmem:[#allocation2 + $0x20] sm:$0xff]  ;;  %21485 = vmatprep.subr.bf16.mxu1 %v21484_v14  ;;  %v1757_v25 = vld [vmem:[#allocation2 + $0x18] sm:$0xff] }
 0x6da   :  { %v1830_v22 = vld [vmem:[#allocation2 + $0x21] sm:$0xff]  ;;  %1159 = vst.msk [vmem:[#allocation2 + $0x51] sm:$0xff] %vm36_vm3, %v972_v32  ;;  %1158 = vst.msk [vmem:[#allocation2 + $0x49] sm:$0xff] %vm36_vm3, %v970_v40  ;;  %20472 = vmatmul.mubr.msk.f32.gmra.mrb[66].mxu1 %vm36_vm3, %v9117_v60  ;;  %v1829_v59 = vld [vmem:[#allocation2 + $0x19] sm:$0xff] }
 0x6db   :  { %v1902_v37 = vadd.f32 %v1830_v22, %v1758_v7  ;;  %1087 = vrot.lane.b32.xlu1 %v29152_v15, %s22618_s8  ;;  %20474 = vmatprep.mubr.msk.f32.mxu1 %vm36_vm3, %v9118_v27  ;;  %v1974_v56 = vld [vmem:[#allocation2 + $0x22] sm:$0xff]  ;;  %v1901_v24 = vadd.f32 %v1829_v59, %v1757_v25  ;;  %v1973_v55 = vld [vmem:[#allocation2 + $0x1a] sm:$0xff]  ;;  %v9121_v25 = vld [vmem:[#allocation4 + $0x50] sm:$0xff] }
 0x6dc   :  { %1085 = vrot.lane.b32.xlu0 %v29153_v34, %s22618_s8  ;;  %21487 = vmatpush3.bf16.msra.mxu1 %v21484_v14  ;;  %v9119_v22 = vld [vmem:[#allocation4 + $0x38] sm:$0xff]  ;;  %v9120_v59 = vld [vmem:[#allocation4 + $0x48] sm:$0xff] }
 0x6dd   :  { %v2046_v32 = vadd.f32 %v1974_v56, %v1902_v37  ;;  %v976_v40 = vpop.permute.xlu1 %975  ;;  %v974_v60 = vpop.permute.xlu0 %973  ;;  %v1760_v7 = vld [vmem:[#allocation2 + $0x38] sm:$0xff]  ;;  %v2045_v48 = vadd.f32 %v1973_v55, %v1901_v24  ;;  %21489 = vmatprep.subr.bf16.mxu1 %v26042_v51  ;;  %v1759_v37 = vld [vmem:[#allocation2 + $0x30] sm:$0xff] }
 0x6de   :  { %v1832_v39 = vld [vmem:[#allocation2 + $0x39] sm:$0xff]  ;;  %1161 = vst.msk [vmem:[#allocation2 + $0x69] sm:$0xff] %vm36_vm3, %v976_v40  ;;  %1160 = vst.msk [vmem:[#allocation2 + $0x61] sm:$0xff] %vm36_vm3, %v974_v60  ;;  %20475 = vmatmul.mubr.msk.f32.gmra.mrb[68].mxu1 %vm36_vm3, %v9119_v22  ;;  %v1831_v27 = vld [vmem:[#allocation2 + $0x31] sm:$0xff] }
 0x6df   :  { %v1904_v12 = vadd.f32 %v1832_v39, %v1760_v7  ;;  %20477 = vmatprep.mubr.msk.f32.mxu1 %vm36_vm3, %v9120_v59  ;;  %v1976_v14 = vld [vmem:[#allocation2 + $0x3a] sm:$0xff]  ;;  %v1903_v18 = vadd.f32 %v1831_v27, %v1759_v37  ;;  %v2116_v0 = vadd.f32 %v2046_v32, %v2044_v58  ;;  %v1975_v33 = vld [vmem:[#allocation2 + $0x32] sm:$0xff]  ;;  %v2115_v22 = vadd.f32 %v2045_v48, %v2043_v10 }
 0x6e0   :  { %v26060_v40 = vld [vmem:[%s28497_s6] ss:$0 sm:$0xff] }
 0x6e1   :  { %v2048_v56 = vadd.f32 %v1976_v14, %v1904_v12  ;;  %v980_v24 = vpop.permute.xlu1 %979  ;;  %v978_v55 = vpop.permute.xlu0 %977  ;;  %v2047_v60 = vadd.f32 %v1975_v33, %v1903_v18  ;;  %v1762_v39 = vld [vmem:[#allocation2 + $0x50] sm:$0xff]  ;;  %v9122_v59 = vld [vmem:[#allocation4 + $0x60] sm:$0xff]  ;;  %v1761_v37 = vld [vmem:[#allocation2 + $0x48] sm:$0xff] }
 0x6e2   :  { %v1834_v7 = vld [vmem:[#allocation2 + $0x51] sm:$0xff]  ;;  %1163 = vst.msk [vmem:[#allocation2 + $0x81] sm:$0xff] %vm36_vm3, %v980_v24  ;;  %1162 = vst.msk [vmem:[#allocation2 + $0x79] sm:$0xff] %vm36_vm3, %v978_v55  ;;  %20478 = vmatmul.mubr.msk.f32.gmra.mrb[70].mxu1 %vm36_vm3, %v9121_v25  ;;  %v1833_v27 = vld [vmem:[#allocation2 + $0x49] sm:$0xff] }
 0x6e3   :  { %v2180_v58 = vadd.f32 %v2116_v0, %v2048_v56  ;;  %v1906_v12 = vadd.f32 %v1834_v7, %v1762_v39  ;;  %20480 = vmatprep.mubr.msk.f32.mxu1 %vm36_vm3, %v9122_v59  ;;  %v2179_v14 = vadd.f32 %v2115_v22, %v2047_v60  ;;  %v1978_v34 = vld [vmem:[#allocation2 + $0x52] sm:$0xff]  ;;  %v1905_v15 = vadd.f32 %v1833_v27, %v1761_v37  ;;  %v1977_v45 = vld [vmem:[#allocation2 + $0x4a] sm:$0xff] }
 0x6e4   :  { %v2118_v33 = vadd.f32 %v2048_v56, %v2046_v32  ;;  %v9123_v55 = vld [vmem:[#allocation4 + $0x68] sm:$0xff]  ;;  %v2117_v0 = vadd.f32 %v2047_v60, %v2045_v48  ;;  %v9124_v22 = vld [vmem:[#allocation4 + $0x78] sm:$0xff] }
 0x6e5   :  { %v2251_v10 = vadd.f32 %v26060_v40, %v2180_v58  ;;  %v2050_v18 = vadd.f32 %v1978_v34, %v1906_v12  ;;  %v984_v24 = vpop.permute.xlu1 %983  ;;  %v982_v21 = vpop.permute.xlu0 %981  ;;  %v2250_v25 = vadd.f32 %v26060_v40, %v2179_v14  ;;  %v2049_v31 = vadd.f32 %v1977_v45, %v1905_v15  ;;  %v1764_v39 = vld [vmem:[#allocation2 + $0x68] sm:$0xff]  ;;  %v1763_v58 = vld [vmem:[#allocation2 + $0x60] sm:$0xff] }
 0x6e6   :  { %v1836_v7 = vld [vmem:[#allocation2 + $0x69] sm:$0xff]  ;;  %1165 = vst.msk [vmem:[#allocation2 + $0x99] sm:$0xff] %vm36_vm3, %v984_v24  ;;  %1164 = vst.msk [vmem:[#allocation2 + $0x91] sm:$0xff] %vm36_vm3, %v982_v21  ;;  %20481 = vmatmul.mubr.msk.f32.gmra.mrb[72].mxu1 %vm36_vm3, %v9123_v55  ;;  %v1835_v12 = vld [vmem:[#allocation2 + $0x61] sm:$0xff] }
 0x6e7   :  { %v2315_v59 = vmax.f32 %v2251_v10, 0.0  ;;  %v2182_v34 = vadd.f32 %v2118_v33, %v2050_v18  ;;  %v1908_v32 = vadd.f32 %v1836_v7, %v1764_v39  ;;  %20483 = vmatprep.mubr.msk.f32.mxu1 %vm36_vm3, %v9124_v22  ;;  %v2314_v37 = vmax.f32 %v2250_v25, 0.0  ;;  %v1980_v45 = vld [vmem:[#allocation2 + $0x6a] sm:$0xff]  ;;  %v1979_v24 = vld [vmem:[#allocation2 + $0x62] sm:$0xff] }
 0x6e8   :  { %v2181_v27 = vadd.f32 %v2117_v0, %v2049_v31  ;;  %v1907_v48 = vadd.f32 %v1835_v12, %v1763_v58  ;;  %v2120_v14 = vadd.f32 %v2050_v18, %v2048_v56  ;;  %v9125_v55 = vld [vmem:[#allocation4 + $0x80] sm:$0xff]  ;;  %v2119_v25 = vadd.f32 %v2049_v31, %v2047_v60 }
 0x6e9   :  { %15577 = vrot.lane.b32.xlu1 %v2315_v59, %s22619_s1  ;;  %v2253_v15 = vadd.f32 %v26060_v40, %v2182_v34  ;;  %v2052_v21 = vadd.f32 %v1980_v45, %v1908_v32  ;;  %15575 = vrot.lane.b32.xlu0 %v2314_v37, %s22619_s1  ;;  %v988_v10 = vpop.permute.xlu1 %987  ;;  %v986_v33 = vpop.permute.xlu0 %985  ;;  %v1766_v0 = vld [vmem:[#allocation2 + $0x80] sm:$0xff]  ;;  %v9126_v59 = vld [vmem:[#allocation4 + $0x90] sm:$0xff]  ;;  %v1765_v58 = vld [vmem:[#allocation2 + $0x78] sm:$0xff] }
 0x6ea   :  { %v2252_v39 = vadd.f32 %v26060_v40, %v2181_v27  ;;  %v2051_v7 = vadd.f32 %v1979_v24, %v1907_v48  ;;  %v1838_v22 = vld [vmem:[#allocation2 + $0x81] sm:$0xff]  ;;  %1167 = vst.msk [vmem:[#allocation2 + $0xb1] sm:$0xff] %vm36_vm3, %v988_v10  ;;  %1166 = vst.msk [vmem:[#allocation2 + $0xa9] sm:$0xff] %vm36_vm3, %v986_v33  ;;  %20484 = vmatmul.mubr.msk.f32.gmra.mrb[74].mxu1 %vm36_vm3, %v9125_v55  ;;  %v1837_v12 = vld [vmem:[#allocation2 + $0x79] sm:$0xff] }
 0x6eb   :  { %v2317_v56 = vmax.f32 %v2253_v15, 0.0  ;;  %v2184_v34 = vadd.f32 %v2120_v14, %v2052_v21  ;;  %v1910_v32 = vadd.f32 %v1838_v22, %v1766_v0  ;;  %20486 = vmatprep.mubr.msk.f32.mxu1 %vm36_vm3, %v9126_v59  ;;  %v1982_v45 = vld [vmem:[#allocation2 + $0x82] sm:$0xff]  ;;  %v1909_v60 = vadd.f32 %v1837_v12, %v1765_v58  ;;  %v1981_v33 = vld [vmem:[#allocation2 + $0x7a] sm:$0xff] }
 0x6ec   :  { %v2316_v37 = vmax.f32 %v2252_v39, 0.0  ;;  %v2183_v27 = vadd.f32 %v2119_v25, %v2051_v7  ;;  %v2122_v10 = vadd.f32 %v2052_v21, %v2050_v18  ;;  %v9127_v55 = vld [vmem:[#allocation4 + $0x98] sm:$0xff]  ;;  %v2121_v59 = vadd.f32 %v2051_v7, %v2049_v31 }
 0x6ed   :  { %15581 = vrot.lane.b32.xlu1 %v2317_v56, %s22619_s1  ;;  %v2255_v48 = vadd.f32 %v26060_v40, %v2184_v34  ;;  %v2054_v24 = vadd.f32 %v1982_v45, %v1910_v32  ;;  %v992_v15 = vpop.permute.xlu1 %991  ;;  %v990_v14 = vpop.permute.xlu0 %989  ;;  %v2053_v22 = vadd.f32 %v1981_v33, %v1909_v60  ;;  %v1768_v39 = vld [vmem:[#allocation2 + $0x98] sm:$0xff]  ;;  %v9128_v56 = vld [vmem:[#allocation4 + $0xa8] sm:$0xff]  ;;  %v1767_v58 = vld [vmem:[#allocation2 + $0x90] sm:$0xff] }
 0x6ee   :  { %15579 = vrot.lane.b32.xlu0 %v2316_v37, %s22619_s1  ;;  %v2254_v0 = vadd.f32 %v26060_v40, %v2183_v27  ;;  %v1840_v25 = vld [vmem:[#allocation2 + $0x99] sm:$0xff]  ;;  %1169 = vst.msk [vmem:[#allocation2 + $0xc9] sm:$0xff] %vm36_vm3, %v992_v15  ;;  %1168 = vst.msk [vmem:[#allocation2 + $0xc1] sm:$0xff] %vm36_vm3, %v990_v14  ;;  %20487 = vmatmul.mubr.msk.f32.gmra.mrb[76].mxu1 %vm36_vm3, %v9127_v55  ;;  %v1839_v12 = vld [vmem:[#allocation2 + $0x91] sm:$0xff] }
 0x6ef   :  { %v2319_v18 = vmax.f32 %v2255_v48, 0.0  ;;  %v2186_v34 = vadd.f32 %v2122_v10, %v2054_v24  ;;  %v1912_v32 = vadd.f32 %v1840_v25, %v1768_v39  ;;  %20489 = vmatprep.mubr.msk.f32.mxu1 %vm36_vm3, %v9128_v56  ;;  %v2185_v27 = vadd.f32 %v2121_v59, %v2053_v22  ;;  %v1984_v45 = vld [vmem:[#allocation2 + $0x9a] sm:$0xff]  ;;  %v1983_v14 = vld [vmem:[#allocation2 + $0x92] sm:$0xff] }
 0x6f0   :  { %v2318_v37 = vmax.f32 %v2254_v0, 0.0  ;;  %v1911_v31 = vadd.f32 %v1839_v12, %v1767_v58  ;;  %v2124_v15 = vadd.f32 %v2054_v24, %v2052_v21  ;;  %v9129_v55 = vld [vmem:[#allocation4 + $0xb0] sm:$0xff]  ;;  %v2123_v56 = vadd.f32 %v2053_v22, %v2051_v7 }
 0x6f1   :  { %15585 = vrot.lane.b32.xlu1 %v2319_v18, %s22619_s1  ;;  %v2257_v60 = vadd.f32 %v26060_v40, %v2186_v34  ;;  %v2056_v33 = vadd.f32 %v1984_v45, %v1912_v32  ;;  %v996_v48 = vpop.permute.xlu1 %995  ;;  %v994_v10 = vpop.permute.xlu0 %993  ;;  %v2256_v39 = vadd.f32 %v26060_v40, %v2185_v27  ;;  %v1770_v0 = vld [vmem:[#allocation2 + $0xb0] sm:$0xff]  ;;  %v9130_v18 = vld [vmem:[#allocation4 + $0xc0] sm:$0xff]  ;;  %v1769_v58 = vld [vmem:[#allocation2 + $0xa8] sm:$0xff] }
 0x6f2   :  { %15583 = vrot.lane.b32.xlu0 %v2318_v37, %s22619_s1  ;;  %v2055_v25 = vadd.f32 %v1983_v14, %v1911_v31  ;;  %v1842_v59 = vld [vmem:[#allocation2 + $0xb1] sm:$0xff]  ;;  %1171 = vst.msk [vmem:[#allocation2 + $0xe1] sm:$0xff] %vm36_vm3, %v996_v48  ;;  %1170 = vst.msk [vmem:[#allocation2 + $0xd9] sm:$0xff] %vm36_vm3, %v994_v10  ;;  %20490 = vmatmul.mubr.msk.f32.gmra.mrb[78].mxu1 %vm36_vm3, %v9129_v55  ;;  %v1841_v12 = vld [vmem:[#allocation2 + $0xa9] sm:$0xff] }
 0x6f3   :  { %v2321_v21 = vmax.f32 %v2257_v60, 0.0  ;;  %v2188_v34 = vadd.f32 %v2124_v15, %v2056_v33  ;;  %v1914_v32 = vadd.f32 %v1842_v59, %v1770_v0  ;;  %20492 = vmatprep.mubr.msk.f32.mxu1 %vm36_vm3, %v9130_v18  ;;  %v2320_v37 = vmax.f32 %v2256_v39, 0.0  ;;  %v1986_v45 = vld [vmem:[#allocation2 + $0xb2] sm:$0xff]  ;;  %v1985_v10 = vld [vmem:[#allocation2 + $0xaa] sm:$0xff] }
 0x6f4   :  { %v2187_v27 = vadd.f32 %v2123_v56, %v2055_v25  ;;  %v1913_v7 = vadd.f32 %v1841_v12, %v1769_v58  ;;  %v2126_v48 = vadd.f32 %v2056_v33, %v2054_v24  ;;  %v9131_v55 = vld [vmem:[#allocation4 + $0xc8] sm:$0xff]  ;;  %v2125_v18 = vadd.f32 %v2055_v25, %v2053_v22 }
 0x6f5   :  { %15589 = vrot.lane.b32.xlu1 %v2321_v21, %s22619_s1  ;;  %v2259_v31 = vadd.f32 %v26060_v40, %v2188_v34  ;;  %v2058_v14 = vadd.f32 %v1986_v45, %v1914_v32  ;;  %v1000_v60 = vpop.permute.xlu1 %999  ;;  %v998_v15 = vpop.permute.xlu0 %997  ;;  %v1772_v39 = vld [vmem:[#allocation2 + $0xc8] sm:$0xff]  ;;  %v9132_v21 = vld [vmem:[#allocation4 + $0xd8] sm:$0xff]  ;;  %v1771_v58 = vld [vmem:[#allocation2 + $0xc0] sm:$0xff] }
 0x6f6   :  { %15587 = vrot.lane.b32.xlu0 %v2320_v37, %s22619_s1  ;;  %v2258_v0 = vadd.f32 %v26060_v40, %v2187_v27  ;;  %v2057_v59 = vadd.f32 %v1985_v10, %v1913_v7  ;;  %v1844_v56 = vld [vmem:[#allocation2 + $0xc9] sm:$0xff]  ;;  %1173 = vst.msk [vmem:[#allocation2 + $0xf9] sm:$0xff] %vm36_vm3, %v1000_v60  ;;  %1172 = vst.msk [vmem:[#allocation2 + $0xf1] sm:$0xff] %vm36_vm3, %v998_v15  ;;  %20493 = vmatmul.mubr.msk.f32.gmra.mrb[80].mxu1 %vm36_vm3, %v9131_v55  ;;  %v1843_v12 = vld [vmem:[#allocation2 + $0xc1] sm:$0xff] }
 0x6f7   :  { %v2323_v24 = vmax.f32 %v2259_v31, 0.0  ;;  %v2190_v34 = vadd.f32 %v2126_v48, %v2058_v14  ;;  %v1916_v32 = vadd.f32 %v1844_v56, %v1772_v39  ;;  %20495 = vmatprep.mubr.msk.f32.mxu1 %vm36_vm3, %v9132_v21  ;;  %v1988_v45 = vld [vmem:[#allocation2 + $0xca] sm:$0xff]  ;;  %v1915_v22 = vadd.f32 %v1843_v12, %v1771_v58  ;;  %v1987_v15 = vld [vmem:[#allocation2 + $0xc2] sm:$0xff] }
 0x6f8   :  { %v2322_v37 = vmax.f32 %v2258_v0, 0.0  ;;  %v2189_v27 = vadd.f32 %v2125_v18, %v2057_v59  ;;  %v2128_v60 = vadd.f32 %v2058_v14, %v2056_v33  ;;  %v9133_v55 = vld [vmem:[#allocation4 + $0xe0] sm:$0xff]  ;;  %v2127_v21 = vadd.f32 %v2057_v59, %v2055_v25 }
 0x6f9   :  { %15593 = vrot.lane.b32.xlu1 %v2323_v24, %s22619_s1  ;;  %v2261_v7 = vadd.f32 %v26060_v40, %v2190_v34  ;;  %v2060_v10 = vadd.f32 %v1988_v45, %v1916_v32  ;;  %v1004_v31 = vpop.permute.xlu1 %1003  ;;  %v1002_v48 = vpop.permute.xlu0 %1001  ;;  %v2059_v56 = vadd.f32 %v1987_v15, %v1915_v22  ;;  %v1774_v0 = vld [vmem:[#allocation2 + $0xe0] sm:$0xff]  ;;  %v9134_v24 = vld [vmem:[#allocation4 + $0xf0] sm:$0xff]  ;;  %v1773_v58 = vld [vmem:[#allocation2 + $0xd8] sm:$0xff] }
 0x6fa   :  { %15591 = vrot.lane.b32.xlu0 %v2322_v37, %s22619_s1  ;;  %v2260_v39 = vadd.f32 %v26060_v40, %v2189_v27  ;;  %v1846_v18 = vld [vmem:[#allocation2 + $0xe1] sm:$0xff]  ;;  %1175 = vst.msk [vmem:[#allocation2 + $0x111] sm:$0xff] %vm36_vm3, %v1004_v31  ;;  %1174 = vst.msk [vmem:[#allocation2 + $0x109] sm:$0xff] %vm36_vm3, %v1002_v48  ;;  %20496 = vmatmul.mubr.msk.f32.gmra.mrb[82].mxu1 %vm36_vm3, %v9133_v55  ;;  %v1845_v12 = vld [vmem:[#allocation2 + $0xd9] sm:$0xff] }
 0x6fb   :  { %v2325_v33 = vmax.f32 %v2261_v7, 0.0  ;;  %v2192_v34 = vadd.f32 %v2128_v60, %v2060_v10  ;;  %v1918_v32 = vadd.f32 %v1846_v18, %v1774_v0  ;;  %20498 = vmatprep.mubr.msk.f32.mxu1 %vm36_vm3, %v9134_v24  ;;  %v2191_v27 = vadd.f32 %v2127_v21, %v2059_v56  ;;  %v1990_v45 = vld [vmem:[#allocation2 + $0xe2] sm:$0xff]  ;;  %v1989_v48 = vld [vmem:[#allocation2 + $0xda] sm:$0xff] }
 0x6fc   :  { %v2324_v37 = vmax.f32 %v2260_v39, 0.0  ;;  %v1917_v25 = vadd.f32 %v1845_v12, %v1773_v58  ;;  %v2130_v31 = vadd.f32 %v2060_v10, %v2058_v14  ;;  %v9135_v55 = vld [vmem:[#allocation4 + $0xf8] sm:$0xff]  ;;  %v2129_v24 = vadd.f32 %v2059_v56, %v2057_v59 }
 0x6fd   :  { %15597 = vrot.lane.b32.xlu1 %v2325_v33, %s22619_s1  ;;  %v2263_v22 = vadd.f32 %v26060_v40, %v2192_v34  ;;  %v2062_v15 = vadd.f32 %v1990_v45, %v1918_v32  ;;  %v1008_v7 = vpop.permute.xlu1 %1007  ;;  %v1006_v60 = vpop.permute.xlu0 %1005  ;;  %v2262_v0 = vadd.f32 %v26060_v40, %v2191_v27  ;;  %v1776_v39 = vld [vmem:[#allocation2 + $0xf8] sm:$0xff]  ;;  %v9136_v33 = vld [vmem:[#allocation4 + $0x108] sm:$0xff]  ;;  %v1775_v58 = vld [vmem:[#allocation2 + $0xf0] sm:$0xff] }
 0x6fe   :  { %15595 = vrot.lane.b32.xlu0 %v2324_v37, %s22619_s1  ;;  %v2061_v18 = vadd.f32 %v1989_v48, %v1917_v25  ;;  %v1848_v21 = vld [vmem:[#allocation2 + $0xf9] sm:$0xff]  ;;  %1177 = vst.msk [vmem:[#allocation2 + $0x129] sm:$0xff] %vm36_vm3, %v1008_v7  ;;  %1176 = vst.msk [vmem:[#allocation2 + $0x121] sm:$0xff] %vm36_vm3, %v1006_v60  ;;  %20499 = vmatmul.mubr.msk.f32.gmra.mrb[84].mxu1 %vm36_vm3, %v9135_v55  ;;  %v1847_v12 = vld [vmem:[#allocation2 + $0xf1] sm:$0xff] }
 0x6ff   :  { %v2327_v14 = vmax.f32 %v2263_v22, 0.0  ;;  %v2194_v34 = vadd.f32 %v2130_v31, %v2062_v15  ;;  %v1920_v32 = vadd.f32 %v1848_v21, %v1776_v39  ;;  %20501 = vmatprep.mubr.msk.f32.mxu1 %vm36_vm3, %v9136_v33  ;;  %v2326_v37 = vmax.f32 %v2262_v0, 0.0  ;;  %v1992_v45 = vld [vmem:[#allocation2 + $0xfa] sm:$0xff]  ;;  %v1991_v60 = vld [vmem:[#allocation2 + $0xf2] sm:$0xff] }
 0x700   :  { %v2193_v27 = vadd.f32 %v2129_v24, %v2061_v18  ;;  %v1919_v59 = vadd.f32 %v1847_v12, %v1775_v58  ;;  %v2132_v7 = vadd.f32 %v2062_v15, %v2060_v10  ;;  %v9137_v55 = vld [vmem:[#allocation4 + $0x110] sm:$0xff]  ;;  %v2131_v33 = vadd.f32 %v2061_v18, %v2059_v56 }
 0x701   :  { %15601 = vrot.lane.b32.xlu1 %v2327_v14, %s22619_s1  ;;  %v2265_v25 = vadd.f32 %v26060_v40, %v2194_v34  ;;  %v2064_v48 = vadd.f32 %v1992_v45, %v1920_v32  ;;  %v1012_v22 = vpop.permute.xlu1 %1011  ;;  %v1010_v31 = vpop.permute.xlu0 %1009  ;;  %v1778_v0 = vld [vmem:[#allocation2 + $0x110] sm:$0xff]  ;;  %v9138_v14 = vld [vmem:[#allocation4 + $0x120] sm:$0xff]  ;;  %v1777_v58 = vld [vmem:[#allocation2 + $0x108] sm:$0xff] }
 0x702   :  { %15599 = vrot.lane.b32.xlu0 %v2326_v37, %s22619_s1  ;;  %v2264_v39 = vadd.f32 %v26060_v40, %v2193_v27  ;;  %v2063_v21 = vadd.f32 %v1991_v60, %v1919_v59  ;;  %v1850_v24 = vld [vmem:[#allocation2 + $0x111] sm:$0xff]  ;;  %1179 = vst.msk [vmem:[#allocation2 + $0x141] sm:$0xff] %vm36_vm3, %v1012_v22  ;;  %1178 = vst.msk [vmem:[#allocation2 + $0x139] sm:$0xff] %vm36_vm3, %v1010_v31  ;;  %20502 = vmatmul.mubr.msk.f32.gmra.mrb[86].mxu1 %vm36_vm3, %v9137_v55  ;;  %v1849_v12 = vld [vmem:[#allocation2 + $0x109] sm:$0xff] }
 0x703   :  { %v2329_v10 = vmax.f32 %v2265_v25, 0.0  ;;  %v2196_v34 = vadd.f32 %v2132_v7, %v2064_v48  ;;  %v1922_v32 = vadd.f32 %v1850_v24, %v1778_v0  ;;  %20504 = vmatprep.mubr.msk.f32.mxu1 %vm36_vm3, %v9138_v14  ;;  %v1994_v45 = vld [vmem:[#allocation2 + $0x112] sm:$0xff]  ;;  %v1921_v56 = vadd.f32 %v1849_v12, %v1777_v58  ;;  %v1993_v31 = vld [vmem:[#allocation2 + $0x10a] sm:$0xff] }
 0x704   :  { %v2328_v37 = vmax.f32 %v2264_v39, 0.0  ;;  %v2195_v27 = vadd.f32 %v2131_v33, %v2063_v21  ;;  %v2134_v22 = vadd.f32 %v2064_v48, %v2062_v15  ;;  %v9139_v55 = vld [vmem:[#allocation4 + $0x128] sm:$0xff]  ;;  %v2133_v14 = vadd.f32 %v2063_v21, %v2061_v18 }
 0x705   :  { %15605 = vrot.lane.b32.xlu1 %v2329_v10, %s22619_s1  ;;  %v2267_v59 = vadd.f32 %v26060_v40, %v2196_v34  ;;  %v2066_v60 = vadd.f32 %v1994_v45, %v1922_v32  ;;  %v1016_v25 = vpop.permute.xlu1 %1015  ;;  %v1014_v7 = vpop.permute.xlu0 %1013  ;;  %v2065_v24 = vadd.f32 %v1993_v31, %v1921_v56  ;;  %v1780_v39 = vld [vmem:[#allocation2 + $0x128] sm:$0xff]  ;;  %v9140_v10 = vld [vmem:[#allocation4 + $0x138] sm:$0xff]  ;;  %v1779_v58 = vld [vmem:[#allocation2 + $0x120] sm:$0xff] }
 0x706   :  { %15603 = vrot.lane.b32.xlu0 %v2328_v37, %s22619_s1  ;;  %v2266_v0 = vadd.f32 %v26060_v40, %v2195_v27  ;;  %v1852_v33 = vld [vmem:[#allocation2 + $0x129] sm:$0xff]  ;;  %1181 = vst.msk [vmem:[#allocation2 + $0x159] sm:$0xff] %vm36_vm3, %v1016_v25  ;;  %1180 = vst.msk [vmem:[#allocation2 + $0x151] sm:$0xff] %vm36_vm3, %v1014_v7  ;;  %20505 = vmatmul.mubr.msk.f32.gmra.mrb[88].mxu1 %vm36_vm3, %v9139_v55  ;;  %v1851_v12 = vld [vmem:[#allocation2 + $0x121] sm:$0xff] }
 0x707   :  { %v2331_v15 = vmax.f32 %v2267_v59, 0.0  ;;  %v2198_v34 = vadd.f32 %v2134_v22, %v2066_v60  ;;  %v1924_v32 = vadd.f32 %v1852_v33, %v1780_v39  ;;  %20507 = vmatprep.mubr.msk.f32.mxu1 %vm36_vm3, %v9140_v10  ;;  %v2197_v27 = vadd.f32 %v2133_v14, %v2065_v24  ;;  %v1996_v45 = vld [vmem:[#allocation2 + $0x12a] sm:$0xff]  ;;  %v1995_v7 = vld [vmem:[#allocation2 + $0x122] sm:$0xff] }
 0x708   :  { %v2330_v37 = vmax.f32 %v2266_v0, 0.0  ;;  %v1923_v18 = vadd.f32 %v1851_v12, %v1779_v58  ;;  %v2136_v25 = vadd.f32 %v2066_v60, %v2064_v48  ;;  %v9141_v55 = vld [vmem:[#allocation4 + $0x140] sm:$0xff]  ;;  %v2135_v10 = vadd.f32 %v2065_v24, %v2063_v21 }
 0x709   :  { %15609 = vrot.lane.b32.xlu1 %v2331_v15, %s22619_s1  ;;  %v2269_v56 = vadd.f32 %v26060_v40, %v2198_v34  ;;  %v2068_v31 = vadd.f32 %v1996_v45, %v1924_v32  ;;  %v1020_v59 = vpop.permute.xlu1 %1019  ;;  %v1018_v22 = vpop.permute.xlu0 %1017  ;;  %v2268_v39 = vadd.f32 %v26060_v40, %v2197_v27  ;;  %v1782_v0 = vld [vmem:[#allocation2 + $0x140] sm:$0xff]  ;;  %v9142_v15 = vld [vmem:[#allocation4 + $0x150] sm:$0xff]  ;;  %v1781_v58 = vld [vmem:[#allocation2 + $0x138] sm:$0xff] }
 0x70a   :  { %15607 = vrot.lane.b32.xlu0 %v2330_v37, %s22619_s1  ;;  %v2067_v33 = vadd.f32 %v1995_v7, %v1923_v18  ;;  %v1854_v14 = vld [vmem:[#allocation2 + $0x141] sm:$0xff]  ;;  %1183 = vst.msk [vmem:[#allocation2 + $0x171] sm:$0xff] %vm36_vm3, %v1020_v59  ;;  %1182 = vst.msk [vmem:[#allocation2 + $0x169] sm:$0xff] %vm36_vm3, %v1018_v22  ;;  %20508 = vmatmul.mubr.msk.f32.gmra.mrb[90].mxu1 %vm36_vm3, %v9141_v55  ;;  %v1853_v12 = vld [vmem:[#allocation2 + $0x139] sm:$0xff] }
 0x70b   :  { %v2333_v48 = vmax.f32 %v2269_v56, 0.0  ;;  %v2200_v34 = vadd.f32 %v2136_v25, %v2068_v31  ;;  %v1926_v32 = vadd.f32 %v1854_v14, %v1782_v0  ;;  %20510 = vmatprep.mubr.msk.f32.mxu1 %vm36_vm3, %v9142_v15  ;;  %v2332_v37 = vmax.f32 %v2268_v39, 0.0  ;;  %v1998_v45 = vld [vmem:[#allocation2 + $0x142] sm:$0xff]  ;;  %v9143_v18 = vld [vmem:[#allocation4 + $0x158] sm:$0xff] }
 0x70c   :  { %v2199_v27 = vadd.f32 %v2135_v10, %v2067_v33  ;;  %v1925_v21 = vadd.f32 %v1853_v12, %v1781_v58  ;;  %v2138_v22 = vadd.f32 %v2068_v31, %v2066_v60  ;;  %v1997_v55 = vld [vmem:[#allocation2 + $0x13a] sm:$0xff]  ;;  %v9144_v0 = vld [vmem:[#allocation4 + $0x168] sm:$0xff]  ;;  %v2137_v10 = vadd.f32 %v2067_v33, %v2065_v24 }
 0x70d   :  { %15613 = vrot.lane.b32.xlu1 %v2333_v48, %s22619_s1  ;;  %v2271_v7 = vadd.f32 %v26060_v40, %v2200_v34  ;;  %v26146_v59 = vadd.f32 %v1998_v45, %v1926_v32  ;;  %v1024_v56 = vpop.permute.xlu1 %1023  ;;  %v1022_v25 = vpop.permute.xlu0 %1021  ;;  %v1784_v15 = vld [vmem:[#allocation2 + $0x158] sm:$0xff]  ;;  %v9146_v34 = vld [vmem:[#allocation4 + $0x1b0] sm:$0xff] }
 0x70e   :  { %15611 = vrot.lane.b32.xlu0 %v2332_v37, %s22619_s1  ;;  %v2270_v14 = vadd.f32 %v26060_v40, %v2199_v27  ;;  %v26150_v39 = vadd.f32 %v1997_v55, %v1925_v21  ;;  %v1856_v58 = vld [vmem:[#allocation2 + $0x159] sm:$0xff]  ;;  %1185 = vst.msk [vmem:[#allocation2 + $0x189] sm:$0xff] %vm36_vm3, %v1024_v56  ;;  %1184 = vst.msk [vmem:[#allocation2 + $0x181] sm:$0xff] %vm36_vm3, %v1022_v25  ;;  %20511 = vmatmul.mubr.msk.f32.gmra.mrb[92].mxu1 %vm36_vm3, %v9143_v18  ;;  %v1783_v12 = vld [vmem:[#allocation2 + $0x150] sm:$0xff] }
 0x70f   :  { %v2335_v60 = vmax.f32 %v2271_v7, 0.0  ;;  %v2202_v48 = vadd.f32 %v2138_v22, %v26146_v59  ;;  %v1928_v32 = vadd.f32 %v1856_v58, %v1784_v15  ;;  %v1855_v37 = vld [vmem:[#allocation2 + $0x151] sm:$0xff]  ;;  %20513 = vmatprep.mubr.msk.f32.mxu1 %vm36_vm3, %v9144_v0  ;;  %v2000_v45 = vld [vmem:[#allocation2 + $0x15a] sm:$0xff]  ;;  %v2140_v22 = vadd.f32 %v26146_v59, %v2068_v31 }
 0x710   :  { %v2334_v27 = vmax.f32 %v2270_v14, 0.0  ;;  %v2201_v24 = vadd.f32 %v2137_v10, %v26150_v39  ;;  %v1927_v21 = vadd.f32 %v1855_v37, %v1783_v12  ;;  %v1790_v55 = vld [vmem:[#allocation2 + $0x1a0] sm:$0xff]  ;;  %v1999_v25 = vld [vmem:[#allocation2 + $0x152] sm:$0xff] }
 0x711   :  { %v1862_v56 = vld [vmem:[#allocation2 + $0x1a1] sm:$0xff]  ;;  %15617 = vrot.lane.b32.xlu1 %v2335_v60, %s22619_s1  ;;  %v2273_v18 = vadd.f32 %v26060_v40, %v2202_v48  ;;  %v26160_v7 = vadd.f32 %v2000_v45, %v1928_v32  ;;  %v1789_v15 = vld [vmem:[#allocation2 + $0x198] sm:$0xff]  ;;  %v1028_v0 = vpop.permute.xlu1 %1027  ;;  %v1026_v14 = vpop.permute.xlu0 %1025  ;;  %v9145_v10 = vld [vmem:[#allocation4 + $0x170] sm:$0xff]  ;;  %v2139_v60 = vadd.f32 %v26150_v39, %v2067_v33 }
 0x712   :  { %v1861_v58 = vld [vmem:[#allocation2 + $0x199] sm:$0xff]  ;;  %15615 = vrot.lane.b32.xlu0 %v2334_v27, %s22619_s1  ;;  %v2272_v12 = vadd.f32 %v26060_v40, %v2201_v24  ;;  %v26165_v37 = vadd.f32 %v1999_v25, %v1927_v21  ;;  %v1786_v5 = vld [vmem:[#allocation2 + $0x170] sm:$0xff]  ;;  %1187 = vst.msk [vmem:[#allocation2 + $0x1d1] sm:$0xff] %vm36_vm3, %v1028_v0  ;;  %1186 = vst.msk [vmem:[#allocation2 + $0x1c9] sm:$0xff] %vm36_vm3, %v1026_v14  ;;  %20514 = vmatmul.mubr.msk.f32.gmra.mrb[94].mxu1 %vm36_vm3, %v9145_v10 }
 0x713   :  { %v1858_v48 = vld [vmem:[#allocation2 + $0x171] sm:$0xff]  ;;  %v2337_v31 = vmax.f32 %v2273_v18, 0.0  ;;  %v2204_v27 = vadd.f32 %v2140_v22, %v26160_v7  ;;  %v1785_v57 = vld [vmem:[#allocation2 + $0x168] sm:$0xff]  ;;  %v1934_v24 = vadd.f32 %v1862_v56, %v1790_v55  ;;  %20516 = vmatprep.mubr.msk.f32.mxu1 %vm36_vm3, %v9146_v34  ;;  %v1933_v46 = vadd.f32 %v1861_v58, %v1789_v15  ;;  %v2005_v14 = vld [vmem:[#allocation2 + $0x19a] sm:$0xff] }
 0x714   :  { %v9147_v32 = vld [vmem:[#allocation4 + $0x1b8] sm:$0xff]  ;;  %v1930_v45 = vadd.f32 %v1858_v48, %v1786_v5  ;;  %v1857_v19 = vld [vmem:[#allocation2 + $0x169] sm:$0xff]  ;;  %v2336_v21 = vmax.f32 %v2272_v12, 0.0  ;;  %v2203_v33 = vadd.f32 %v2139_v60, %v26165_v37  ;;  %v2142_v5 = vadd.f32 %v26160_v7, %v26146_v59 }
 0x715   :  { %v2002_v25 = vld [vmem:[#allocation2 + $0x172] sm:$0xff]  ;;  %v1929_v49 = vadd.f32 %v1857_v19, %v1785_v57  ;;  %v2006_v0 = vld [vmem:[#allocation2 + $0x1a2] sm:$0xff]  ;;  %15621 = vrot.lane.b32.xlu1 %v2337_v31, %s22619_s1  ;;  %v2275_v10 = vadd.f32 %v26060_v40, %v2204_v27  ;;  %v2001_v55 = vld [vmem:[#allocation2 + $0x16a] sm:$0xff]  ;;  %v1032_v34 = vpop.permute.xlu1 %1031  ;;  %v1030_v60 = vpop.permute.xlu0 %1029  ;;  %v2141_v15 = vadd.f32 %v26165_v37, %v26150_v39  ;;  %v2077_v54 = vadd.f32 %v2005_v14, %v1933_v46 }
 0x716   :  { %v9148_v18 = vld [vmem:[#allocation4 + $0x1c8] sm:$0xff]  ;;  %v2074_v22 = vadd.f32 %v2002_v25, %v1930_v45  ;;  %v1792_v56 = vld [vmem:[#allocation2 + $0x1b8] sm:$0xff]  ;;  %15619 = vrot.lane.b32.xlu0 %v2336_v21, %s22619_s1  ;;  %v2274_v57 = vadd.f32 %v26060_v40, %v2203_v33  ;;  %v1791_v31 = vld [vmem:[#allocation2 + $0x1b0] sm:$0xff]  ;;  %1189 = vst.msk [vmem:[#allocation2 + $0x1e9] sm:$0xff] %vm36_vm3, %v1032_v34  ;;  %20517 = vmatmul.mubr.msk.f32.gmra.mrb[96].mxu1 %vm36_vm3, %v9147_v32 }
 0x717   :  { %v1864_v12 = vld [vmem:[#allocation2 + $0x1b9] sm:$0xff]  ;;  %v2073_v19 = vadd.f32 %v2001_v55, %v1929_v49  ;;  %v1788_v58 = vld [vmem:[#allocation2 + $0x188] sm:$0xff]  ;;  %1188 = vst.msk [vmem:[#allocation2 + $0x1e1] sm:$0xff] %vm36_vm3, %v1030_v60  ;;  %v2339_v59 = vmax.f32 %v2275_v10, 0.0  ;;  %v2078_v38 = vadd.f32 %v2006_v0, %v1934_v24  ;;  %v1863_v33 = vld [vmem:[#allocation2 + $0x1b1] sm:$0xff]  ;;  %20519 = vmatprep.mubr.msk.f32.mxu1 %vm36_vm3, %v9148_v18 }
 0x718   :  { %v1860_v48 = vld [vmem:[#allocation2 + $0x189] sm:$0xff]  ;;  %v2206_v27 = vadd.f32 %v2142_v5, %v2074_v22  ;;  %v1787_v21 = vld [vmem:[#allocation2 + $0x180] sm:$0xff]  ;;  %v2338_v49 = vmax.f32 %v2274_v57, 0.0  ;;  %v2144_v5 = vadd.f32 %v2074_v22, %v26160_v7 }
 0x719   :  { %v1932_v45 = vadd.f32 %v1860_v48, %v1788_v58  ;;  %v1859_v25 = vld [vmem:[#allocation2 + $0x181] sm:$0xff]  ;;  %v2205_v39 = vadd.f32 %v2141_v15, %v2073_v19  ;;  %v2004_v55 = vld [vmem:[#allocation2 + $0x18a] sm:$0xff]  ;;  %15625 = vrot.lane.b32.xlu1 %v2339_v59, %s22619_s1  ;;  %v1936_v48 = vadd.f32 %v1864_v12, %v1792_v56  ;;  %v1036_v24 = vpop.permute.xlu1 %1035  ;;  %v1034_v0 = vpop.permute.xlu0 %1033  ;;  %v2143_v46 = vadd.f32 %v2073_v19, %v26165_v37 }
 0x71a   :  { %v1931_v62 = vadd.f32 %v1859_v25, %v1787_v21  ;;  %v9149_v34 = vld [vmem:[#allocation4 + $0x1d0] sm:$0xff]  ;;  %v9150_v60 = vld [vmem:[#allocation4 + $0x1e0] sm:$0xff]  ;;  %v2277_v32 = vadd.f32 %v26060_v40, %v2206_v27  ;;  %15623 = vrot.lane.b32.xlu0 %v2338_v49, %s22619_s1  ;;  %v1935_v21 = vadd.f32 %v1863_v33, %v1791_v31  ;;  %1191 = vst.msk [vmem:[#allocation2 + $0x201] sm:$0xff] %vm36_vm3, %v1036_v24  ;;  %1190 = vst.msk [vmem:[#allocation2 + $0x1f9] sm:$0xff] %vm36_vm3, %v1034_v0 }
 0x71b   :  { %v2076_v10 = vadd.f32 %v2004_v55, %v1932_v45  ;;  %v2003_v58 = vld [vmem:[#allocation2 + $0x182] sm:$0xff]  ;;  %v2276_v18 = vadd.f32 %v26060_v40, %v2205_v39  ;;  %v1794_v14 = vld [vmem:[#allocation2 + $0x1d0] sm:$0xff]  ;;  %v2008_v59 = vld [vmem:[#allocation2 + $0x1ba] sm:$0xff]  ;;  %20520 = vmatmul.mubr.msk.f32.gmra.mrb[98].mxu1 %vm36_vm3, %v9149_v34 }
 0x71c   :  { %v2075_v57 = vadd.f32 %v2003_v58, %v1931_v62  ;;  %v1866_v15 = vld [vmem:[#allocation2 + $0x1d1] sm:$0xff]  ;;  %v2341_v7 = vmax.f32 %v2277_v32, 0.0  ;;  %v1793_v45 = vld [vmem:[#allocation2 + $0x1c8] sm:$0xff]  ;;  %20522 = vmatprep.mubr.msk.f32.mxu1 %vm36_vm3, %v9150_v60  ;;  %v2080_v34 = vadd.f32 %v2008_v59, %v1936_v48 }
 0x71d   :  { %v2208_v56 = vadd.f32 %v2144_v5, %v2076_v10  ;;  %v2146_v12 = vadd.f32 %v2076_v10, %v2074_v22  ;;  %v1938_v27 = vadd.f32 %v1866_v15, %v1794_v14  ;;  %v1865_v25 = vld [vmem:[#allocation2 + $0x1c9] sm:$0xff]  ;;  %v2007_v49 = vld [vmem:[#allocation2 + $0x1b2] sm:$0xff]  ;;  %v2340_v62 = vmax.f32 %v2276_v18, 0.0  ;;  %v1040_v22 = vpop.permute.xlu1 %1039  ;;  %v1038_v10 = vpop.permute.xlu0 %1037 }
 0x71e   :  { %v2207_v37 = vadd.f32 %v2143_v46, %v2075_v57  ;;  %v2145_v39 = vadd.f32 %v2075_v57, %v2073_v19  ;;  %v2010_v55 = vld [vmem:[#allocation2 + $0x1d2] sm:$0xff]  ;;  %v1937_v31 = vadd.f32 %v1865_v25, %v1793_v45  ;;  %15629 = vrot.lane.b32.xlu1 %v2341_v7, %s22619_s1  ;;  %v2009_v5 = vld [vmem:[#allocation2 + $0x1ca] sm:$0xff]  ;;  %v2079_v57 = vadd.f32 %v2007_v49, %v1935_v21  ;;  %v1795_v59 = vld [vmem:[#allocation2 + $0x1e0] sm:$0xff] }
 0x71f   :  { %v2279_v33 = vadd.f32 %v26060_v40, %v2208_v56  ;;  %v2210_v58 = vadd.f32 %v2146_v12, %v2078_v38  ;;  %v2082_v32 = vadd.f32 %v2010_v55, %v1938_v27  ;;  %15627 = vrot.lane.b32.xlu0 %v2340_v62, %s22619_s1  ;;  %v9151_v24 = vld [vmem:[#allocation4 + $0x1e8] sm:$0xff]  ;;  %1193 = vst.msk [vmem:[#allocation2 + $0x219] sm:$0xff] %vm36_vm3, %v1040_v22  ;;  %1192 = vst.msk [vmem:[#allocation2 + $0x211] sm:$0xff] %vm36_vm3, %v1038_v10  ;;  %v9152_v38 = vld [vmem:[#allocation4 + $0x1f8] sm:$0xff] }
 0x720   :  { %v2278_v60 = vadd.f32 %v26060_v40, %v2207_v37  ;;  %v2209_v0 = vadd.f32 %v2145_v39, %v2077_v54  ;;  %v1796_v18 = vld [vmem:[#allocation2 + $0x1e8] sm:$0xff]  ;;  %v2081_v46 = vadd.f32 %v2009_v5, %v1937_v31  ;;  %20523 = vmatmul.mubr.msk.f32.gmra.mrb[100].mxu1 %vm36_vm3, %v9151_v24  ;;  %v9153_v37 = vld [vmem:[#allocation4 + $0x200] sm:$0xff] }
 0x721   :  { %v1868_v19 = vld [vmem:[#allocation2 + $0x1e9] sm:$0xff]  ;;  %v2343_v48 = vmax.f32 %v2279_v33, 0.0  ;;  %v2281_v14 = vadd.f32 %v26060_v40, %v2210_v58  ;;  %v1867_v7 = vld [vmem:[#allocation2 + $0x1e1] sm:$0xff]  ;;  %20525 = vmatprep.mubr.msk.f32.mxu1 %vm36_vm3, %v9152_v38  ;;  %v2148_v45 = vadd.f32 %v2082_v32, %v2080_v34  ;;  %v1044_v49 = vpop.permute.xlu1 %1043  ;;  %v1042_v62 = vpop.permute.xlu0 %1041  ;;  %v1797_v10 = vld [vmem:[#allocation2 + $0x1f8] sm:$0xff] }
 0x722   :  { %v1940_v15 = vadd.f32 %v1868_v19, %v1796_v18  ;;  %v2342_v54 = vmax.f32 %v2278_v60, 0.0  ;;  %v2280_v56 = vadd.f32 %v26060_v40, %v2209_v0  ;;  %v2012_v21 = vld [vmem:[#allocation2 + $0x1ea] sm:$0xff]  ;;  %v1939_v12 = vadd.f32 %v1867_v7, %v1795_v59  ;;  %v2011_v25 = vld [vmem:[#allocation2 + $0x1e2] sm:$0xff]  ;;  %1195 = vst.msk [vmem:[#allocation2 + $0x231] sm:$0xff] %vm36_vm3, %v1044_v49  ;;  %1194 = vst.msk [vmem:[#allocation2 + $0x229] sm:$0xff] %vm36_vm3, %v1042_v62 }
 0x723   :  { %15633 = vrot.lane.b32.xlu1 %v2343_v48, %s22619_s1  ;;  %v2147_v55 = vadd.f32 %v2081_v46, %v2079_v57  ;;  %v1798_v31 = vld [vmem:[#allocation2 + $0x200] sm:$0xff]  ;;  %v9154_v58 = vld [vmem:[#allocation4 + $0x210] sm:$0xff]  ;;  %v2345_v5 = vmax.f32 %v2281_v14, 0.0  ;;  %v9155_v7 = vld [vmem:[#allocation4 + $0x218] sm:$0xff] }
 0x724   :  { %v2084_v27 = vadd.f32 %v2012_v21, %v1940_v15  ;;  %15631 = vrot.lane.b32.xlu0 %v2342_v54, %s22619_s1  ;;  %v2083_v39 = vadd.f32 %v2011_v25, %v1939_v12  ;;  %v1870_v33 = vld [vmem:[#allocation2 + $0x201] sm:$0xff]  ;;  %20526 = vmatmul.mubr.msk.f32.gmra.mrb[102].mxu1 %vm36_vm3, %v9153_v37  ;;  %v1869_v24 = vld [vmem:[#allocation2 + $0x1f9] sm:$0xff]  ;;  %v2344_v60 = vmax.f32 %v2280_v56, 0.0 }
 0x725   :  { %v1942_v34 = vadd.f32 %v1870_v33, %v1798_v31  ;;  %20528 = vmatprep.mubr.msk.f32.mxu1 %vm36_vm3, %v9154_v58  ;;  %v2014_v18 = vld [vmem:[#allocation2 + $0x202] sm:$0xff]  ;;  %v1941_v19 = vadd.f32 %v1869_v24, %v1797_v10  ;;  %v2013_v15 = vld [vmem:[#allocation2 + $0x1fa] sm:$0xff]  ;;  %v1048_v14 = vpop.permute.xlu1 %1047  ;;  %v1046_v59 = vpop.permute.xlu0 %1045 }
 0x726   :  { %v2212_v22 = vadd.f32 %v2148_v45, %v2084_v27  ;;  %v2211_v0 = vadd.f32 %v2147_v55, %v2083_v39  ;;  %v2150_v48 = vadd.f32 %v2084_v27, %v2082_v32  ;;  %v2149_v12 = vadd.f32 %v2083_v39, %v2081_v46  ;;  %v1800_v56 = vld [vmem:[#allocation2 + $0x218] sm:$0xff]  ;;  %1197 = vst.msk [vmem:[#allocation2 + $0x249] sm:$0xff] %vm36_vm3, %v1048_v14  ;;  %v9156_v25 = vld [vmem:[#allocation4 + $0x228] sm:$0xff]  ;;  %v1799_v37 = vld [vmem:[#allocation2 + $0x210] sm:$0xff] }
 0x727   :  { %15637 = vrot.lane.b32.xlu1 %v2345_v5, %s22619_s1  ;;  %v2086_v38 = vadd.f32 %v2014_v18, %v1942_v34  ;;  %v2085_v21 = vadd.f32 %v2013_v15, %v1941_v19  ;;  %v1872_v45 = vld [vmem:[#allocation2 + $0x219] sm:$0xff]  ;;  %1196 = vst.msk [vmem:[#allocation2 + $0x241] sm:$0xff] %vm36_vm3, %v1046_v59  ;;  %v1871_v55 = vld [vmem:[#allocation2 + $0x211] sm:$0xff] }
 0x728   :  { %v2283_v57 = vadd.f32 %v26060_v40, %v2212_v22  ;;  %15635 = vrot.lane.b32.xlu0 %v2344_v60, %s22619_s1  ;;  %v2282_v54 = vadd.f32 %v26060_v40, %v2211_v0  ;;  %20529 = vmatmul.mubr.msk.f32.gmra.mrb[104].mxu1 %vm36_vm3, %v9155_v7  ;;  %v1944_v62 = vadd.f32 %v1872_v45, %v1800_v56  ;;  %v2016_v33 = vld [vmem:[#allocation2 + $0x21a] sm:$0xff]  ;;  %v2015_v10 = vld [vmem:[#allocation2 + $0x212] sm:$0xff] }
 0x729   :  { %v2214_v49 = vadd.f32 %v2150_v48, %v2086_v38  ;;  %20531 = vmatprep.mubr.msk.f32.mxu1 %vm36_vm3, %v9156_v25  ;;  %v2213_v40 = vadd.f32 %v2149_v12, %v2085_v21  ;;  %v1943_v46 = vadd.f32 %v1871_v55, %v1799_v37  ;;  %v26224_v58 = vld [vmem:[%s28497_s6] ss:$0 sm:$0xff]  ;;  %v2152_v34 = vadd.f32 %v2086_v38, %v2084_v27  ;;  %v1052_v24 = vpop.permute.xlu1 %1051  ;;  %v1050_v60 = vpop.permute.xlu0 %1049  ;;  %v9157_v0 = vld [vmem:[#allocation4 + $0x230] sm:$0xff] }
 0x72a   :  { %v2347_v32 = vmax.f32 %v2283_v57, 0.0  ;;  %v2346_v31 = vmax.f32 %v2282_v54, 0.0  ;;  %v2088_v22 = vadd.f32 %v2016_v33, %v1944_v62  ;;  %v2151_v57 = vadd.f32 %v2085_v21, %v2083_v39  ;;  %v1802_v48 = vld [vmem:[#allocation2 + $0x230] sm:$0xff]  ;;  %1199 = vst.msk [vmem:[#allocation2 + $0x261] sm:$0xff] %vm36_vm3, %v1052_v24  ;;  %1198 = vst.msk [vmem:[#allocation2 + $0x259] sm:$0xff] %vm36_vm3, %v1050_v60  ;;  %v9158_v14 = vld [vmem:[#allocation4 + $0x240] sm:$0xff] }
 0x72b   :  { %v2285_v5 = vadd.f32 %v26224_v58, %v2214_v49  ;;  %v2284_v18 = vadd.f32 %v26224_v58, %v2213_v40  ;;  %v2087_v19 = vadd.f32 %v2015_v10, %v1943_v46  ;;  %v1874_v15 = vld [vmem:[#allocation2 + $0x231] sm:$0xff]  ;;  %v1801_v54 = vld [vmem:[#allocation2 + $0x228] sm:$0xff] }
 0x72c   :  { %15641 = vrot.lane.b32.xlu1 %v2347_v32, %s22619_s1  ;;  %15639 = vrot.lane.b32.xlu0 %v2346_v31, %s22619_s1  ;;  %v2216_v59 = vadd.f32 %v2152_v34, %v2088_v22  ;;  %v1946_v7 = vadd.f32 %v1874_v15, %v1802_v48  ;;  %v1873_v12 = vld [vmem:[#allocation2 + $0x229] sm:$0xff]  ;;  %v2018_v25 = vld [vmem:[#allocation2 + $0x232] sm:$0xff]  ;;  %v2154_v62 = vadd.f32 %v2088_v22, %v2086_v38 }
 0x72d   :  { %20532 = vmatmul.mubr.msk.f32.gmra.mrb[106].mxu1 %vm36_vm3, %v9157_v0  ;;  %v2349_v27 = vmax.f32 %v2285_v5, 0.0  ;;  %v2348_v56 = vmax.f32 %v2284_v18, 0.0  ;;  %v2215_v45 = vadd.f32 %v2151_v57, %v2087_v19  ;;  %v1945_v39 = vadd.f32 %v1873_v12, %v1801_v54  ;;  %v2017_v37 = vld [vmem:[#allocation2 + $0x22a] sm:$0xff]  ;;  %v1056_v55 = vpop.permute.xlu1 %1055  ;;  %v1054_v31 = vpop.permute.xlu0 %1053  ;;  %v9160_v24 = vld [vmem:[#allocation4 + $0x258] sm:$0xff] }
 0x72e   :  { %20534 = vmatprep.mubr.msk.f32.mxu1 %vm36_vm3, %v9158_v14  ;;  %v2287_v32 = vadd.f32 %v26224_v58, %v2216_v59  ;;  %v2090_v49 = vadd.f32 %v2018_v25, %v1946_v7  ;;  %v9159_v40 = vld [vmem:[#allocation4 + $0x248] sm:$0xff]  ;;  %v2153_v5 = vadd.f32 %v2087_v19, %v2085_v21  ;;  %1201 = vst.msk [vmem:[#allocation2 + $0x279] sm:$0xff] %vm36_vm3, %v1056_v55  ;;  %1200 = vst.msk [vmem:[#allocation2 + $0x271] sm:$0xff] %vm36_vm3, %v1054_v31  ;;  %v1803_v18 = vld [vmem:[#allocation2 + $0x240] sm:$0xff] }
 0x72f   :  { %v2286_v33 = vadd.f32 %v26224_v58, %v2215_v45  ;;  %v2089_v46 = vadd.f32 %v2017_v37, %v1945_v39  ;;  %v1804_v34 = vld [vmem:[#allocation2 + $0x248] sm:$0xff]  ;;  %v9161_v45 = vld [vmem:[#allocation4 + $0x260] sm:$0xff]  ;;  %v9162_v55 = vld [vmem:[#allocation4 + $0x270] sm:$0xff] }
 0x730   :  { %15645 = vrot.lane.b32.xlu1 %v2349_v27, %s22619_s1  ;;  %15643 = vrot.lane.b32.xlu0 %v2348_v56, %s22619_s1  ;;  %v1876_v10 = vld [vmem:[#allocation2 + $0x249] sm:$0xff]  ;;  %v2351_v38 = vmax.f32 %v2287_v32, 0.0  ;;  %v2218_v60 = vadd.f32 %v2154_v62, %v2090_v49  ;;  %v1875_v57 = vld [vmem:[#allocation2 + $0x241] sm:$0xff]  ;;  %v2156_v7 = vadd.f32 %v2090_v49, %v2088_v22 }
 0x731   :  { %20535 = vmatmul.mubr.msk.f32.gmra.mrb[108].mxu1 %vm36_vm3, %v9159_v40  ;;  %v1948_v0 = vadd.f32 %v1876_v10, %v1804_v34  ;;  %v2350_v48 = vmax.f32 %v2286_v33, 0.0  ;;  %v2217_v15 = vadd.f32 %v2153_v5, %v2089_v46  ;;  %v2020_v14 = vld [vmem:[#allocation2 + $0x24a] sm:$0xff]  ;;  %v1947_v21 = vadd.f32 %v1875_v57, %v1803_v18  ;;  %v2019_v54 = vld [vmem:[#allocation2 + $0x242] sm:$0xff]  ;;  %v1060_v12 = vpop.permute.xlu1 %1059  ;;  %v1058_v56 = vpop.permute.xlu0 %1057  ;;  %v1805_v33 = vld [vmem:[#allocation2 + $0x258] sm:$0xff] }
 0x732   :  { %20537 = vmatprep.mubr.msk.f32.mxu1 %vm36_vm3, %v9160_v24  ;;  %v2289_v27 = vadd.f32 %v26224_v58, %v2218_v60  ;;  %v2155_v32 = vadd.f32 %v2089_v46, %v2087_v19  ;;  %v1806_v62 = vld [vmem:[#allocation2 + $0x260] sm:$0xff]  ;;  %1203 = vst.msk [vmem:[#allocation2 + $0x291] sm:$0xff] %vm36_vm3, %v1060_v12  ;;  %1202 = vst.msk [vmem:[#allocation2 + $0x289] sm:$0xff] %vm36_vm3, %v1058_v56  ;;  %v9164_v12 = vld [vmem:[#allocation4 + $0x288] sm:$0xff] }
 0x733   :  { %v2092_v59 = vadd.f32 %v2020_v14, %v1948_v0  ;;  %v2288_v25 = vadd.f32 %v26224_v58, %v2217_v15  ;;  %v2091_v39 = vadd.f32 %v2019_v54, %v1947_v21  ;;  %v1878_v37 = vld [vmem:[#allocation2 + $0x261] sm:$0xff]  ;;  %v1877_v5 = vld [vmem:[#allocation2 + $0x259] sm:$0xff] }
 0x734   :  { %15649 = vrot.lane.b32.xlu1 %v2351_v38, %s22619_s1  ;;  %15647 = vrot.lane.b32.xlu0 %v2350_v48, %s22619_s1  ;;  %v2353_v22 = vmax.f32 %v2289_v27, 0.0  ;;  %v1950_v40 = vadd.f32 %v1878_v37, %v1806_v62  ;;  %v2022_v24 = vld [vmem:[#allocation2 + $0x262] sm:$0xff]  ;;  %v1949_v19 = vadd.f32 %v1877_v5, %v1805_v33  ;;  %v2021_v18 = vld [vmem:[#allocation2 + $0x25a] sm:$0xff] }
 0x735   :  { %20538 = vmatmul.mubr.msk.f32.gmra.mrb[110].mxu1 %vm36_vm3, %v9161_v45  ;;  %v2220_v31 = vadd.f32 %v2156_v7, %v2092_v59  ;;  %v2352_v34 = vmax.f32 %v2288_v25, 0.0  ;;  %v2219_v10 = vadd.f32 %v2155_v32, %v2091_v39  ;;  %v2158_v0 = vadd.f32 %v2092_v59, %v2090_v49  ;;  %v1064_v57 = vpop.permute.xlu1 %1063  ;;  %v1062_v48 = vpop.permute.xlu0 %1061  ;;  %v9163_v15 = vld [vmem:[#allocation4 + $0x278] sm:$0xff]  ;;  %v1807_v25 = vld [vmem:[#allocation2 + $0x270] sm:$0xff] }
 0x736   :  { %20540 = vmatprep.mubr.msk.f32.mxu1 %vm36_vm3, %v9162_v55  ;;  %v2094_v60 = vadd.f32 %v2022_v24, %v1950_v40  ;;  %v2093_v21 = vadd.f32 %v2021_v18, %v1949_v19  ;;  %v2157_v27 = vadd.f32 %v2091_v39, %v2089_v46  ;;  %v1808_v7 = vld [vmem:[#allocation2 + $0x278] sm:$0xff]  ;;  %1205 = vst.msk [vmem:[#allocation2 + $0x2a9] sm:$0xff] %vm36_vm3, %v1064_v57  ;;  %1204 = vst.msk [vmem:[#allocation2 + $0x2a1] sm:$0xff] %vm36_vm3, %v1062_v48  ;;  %v9166_v57 = vld [vmem:[#allocation4 + $0x2a0] sm:$0xff] }
 0x737   :  { %v2291_v38 = vadd.f32 %v26224_v58, %v2220_v31  ;;  %v2290_v14 = vadd.f32 %v26224_v58, %v2219_v10  ;;  %v1880_v54 = vld [vmem:[#allocation2 + $0x279] sm:$0xff]  ;;  %v1879_v32 = vld [vmem:[#allocation2 + $0x271] sm:$0xff] }
 0x738   :  { %15653 = vrot.lane.b32.xlu1 %v2353_v22, %s22619_s1  ;;  %15651 = vrot.lane.b32.xlu0 %v2352_v34, %s22619_s1  ;;  %v2222_v56 = vadd.f32 %v2158_v0, %v2094_v60  ;;  %v1952_v45 = vadd.f32 %v1880_v54, %v1808_v7  ;;  %v2221_v37 = vadd.f32 %v2157_v27, %v2093_v21  ;;  %v2024_v55 = vld [vmem:[#allocation2 + $0x27a] sm:$0xff]  ;;  %v2023_v33 = vld [vmem:[#allocation2 + $0x272] sm:$0xff] }
 0x739   :  { %20541 = vmatmul.mubr.msk.f32.gmra.mrb[112].mxu1 %vm36_vm3, %v9163_v15  ;;  %v2355_v49 = vmax.f32 %v2291_v38, 0.0  ;;  %v2354_v62 = vmax.f32 %v2290_v14, 0.0  ;;  %v1951_v46 = vadd.f32 %v1879_v32, %v1807_v25  ;;  %v2160_v40 = vadd.f32 %v2094_v60, %v2092_v59  ;;  %v1068_v5 = vpop.permute.xlu1 %1067  ;;  %v1066_v34 = vpop.permute.xlu0 %1065  ;;  %v9165_v10 = vld [vmem:[#allocation4 + $0x290] sm:$0xff]  ;;  %v1809_v14 = vld [vmem:[#allocation2 + $0x288] sm:$0xff] }
 0x73a   :  { %20543 = vmatprep.mubr.msk.f32.mxu1 %vm36_vm3, %v9164_v12  ;;  %v2293_v22 = vadd.f32 %v26224_v58, %v2222_v56  ;;  %v2096_v31 = vadd.f32 %v2024_v55, %v1952_v45  ;;  %v2292_v24 = vadd.f32 %v26224_v58, %v2221_v37  ;;  %v2159_v38 = vadd.f32 %v2093_v21, %v2091_v39  ;;  %v1810_v0 = vld [vmem:[#allocation2 + $0x290] sm:$0xff]  ;;  %v9167_v37 = vld [vmem:[#allocation4 + $0x2a8] sm:$0xff] }
 0x73b   :  { %v2095_v19 = vadd.f32 %v2023_v33, %v1951_v46  ;;  %v1882_v18 = vld [vmem:[#allocation2 + $0x291] sm:$0xff]  ;;  %1207 = vst.msk [vmem:[#allocation2 + $0x2c1] sm:$0xff] %vm36_vm3, %v1068_v5  ;;  %1206 = vst.msk [vmem:[#allocation2 + $0x2b9] sm:$0xff] %vm36_vm3, %v1066_v34  ;;  %v1881_v27 = vld [vmem:[#allocation2 + $0x289] sm:$0xff] }
 0x73c   :  { %15657 = vrot.lane.b32.xlu1 %v2355_v49, %s22619_s1  ;;  %15655 = vrot.lane.b32.xlu0 %v2354_v62, %s22619_s1  ;;  %v2357_v59 = vmax.f32 %v2293_v22, 0.0  ;;  %v2224_v48 = vadd.f32 %v2160_v40, %v2096_v31  ;;  %v1954_v15 = vadd.f32 %v1882_v18, %v1810_v0  ;;  %v2356_v7 = vmax.f32 %v2292_v24, 0.0  ;;  %v2026_v12 = vld [vmem:[#allocation2 + $0x292] sm:$0xff]  ;;  %v2025_v25 = vld [vmem:[#allocation2 + $0x28a] sm:$0xff] }
 0x73d   :  { %20544 = vmatmul.mubr.msk.f32.gmra.mrb[114].mxu1 %vm36_vm3, %v9165_v10  ;;  %v2223_v54 = vadd.f32 %v2159_v38, %v2095_v19  ;;  %v1953_v39 = vadd.f32 %v1881_v27, %v1809_v14  ;;  %v2162_v45 = vadd.f32 %v2096_v31, %v2094_v60  ;;  %v1072_v32 = vpop.permute.xlu1 %1071  ;;  %v1070_v62 = vpop.permute.xlu0 %1069  ;;  %v2161_v22 = vadd.f32 %v2095_v19, %v2093_v21  ;;  %v1812_v40 = vld [vmem:[#allocation2 + $0x2a8] sm:$0xff]  ;;  %v9168_v5 = vld [vmem:[#allocation4 + $0x2b8] sm:$0xff]  ;;  %v1811_v24 = vld [vmem:[#allocation2 + $0x2a0] sm:$0xff] }
 0x73e   :  { %20546 = vmatprep.mubr.msk.f32.mxu1 %vm36_vm3, %v9166_v57  ;;  %v2295_v49 = vadd.f32 %v26224_v58, %v2224_v48  ;;  %v2098_v56 = vadd.f32 %v2026_v12, %v1954_v15  ;;  %v1884_v33 = vld [vmem:[#allocation2 + $0x2a9] sm:$0xff]  ;;  %1209 = vst.msk [vmem:[#allocation2 + $0x2d9] sm:$0xff] %vm36_vm3, %v1072_v32  ;;  %1208 = vst.msk [vmem:[#allocation2 + $0x2d1] sm:$0xff] %vm36_vm3, %v1070_v62  ;;  %v1883_v38 = vld [vmem:[#allocation2 + $0x2a1] sm:$0xff] }
 0x73f   :  { %v2294_v55 = vadd.f32 %v26224_v58, %v2223_v54  ;;  %v2097_v46 = vadd.f32 %v2025_v25, %v1953_v39  ;;  %v1956_v10 = vadd.f32 %v1884_v33, %v1812_v40  ;;  %v2028_v57 = vld [vmem:[#allocation2 + $0x2aa] sm:$0xff]  ;;  %v1955_v21 = vadd.f32 %v1883_v38, %v1811_v24  ;;  %v2027_v14 = vld [vmem:[#allocation2 + $0x2a2] sm:$0xff] }
 0x740   :  { %15661 = vrot.lane.b32.xlu1 %v2357_v59, %s22619_s1  ;;  %15659 = vrot.lane.b32.xlu0 %v2356_v7, %s22619_s1  ;;  %v2359_v60 = vmax.f32 %v2295_v49, 0.0  ;;  %v2226_v34 = vadd.f32 %v2162_v45, %v2098_v56  ;;  %v2164_v15 = vadd.f32 %v2098_v56, %v2096_v31  ;;  %v9169_v54 = vld [vmem:[#allocation4 + $0x2c0] sm:$0xff]  ;;  %v9170_v32 = vld [vmem:[#allocation4 + $0x2d0] sm:$0xff] }
 0x741   :  { %20547 = vmatmul.mubr.msk.f32.gmra.mrb[116].mxu1 %vm36_vm3, %v9167_v37  ;;  %v2358_v0 = vmax.f32 %v2294_v55, 0.0  ;;  %v2225_v18 = vadd.f32 %v2161_v22, %v2097_v46  ;;  %v2100_v48 = vadd.f32 %v2028_v57, %v1956_v10  ;;  %v1076_v27 = vpop.permute.xlu1 %1075  ;;  %v1074_v7 = vpop.permute.xlu0 %1073  ;;  %v2099_v39 = vadd.f32 %v2027_v14, %v1955_v21 }
 0x742   :  { %20549 = vmatprep.mubr.msk.f32.mxu1 %vm36_vm3, %v9168_v5  ;;  %v2297_v59 = vadd.f32 %v26224_v58, %v2226_v34  ;;  %v2163_v49 = vadd.f32 %v2097_v46, %v2095_v19  ;;  %v1814_v45 = vld [vmem:[#allocation2 + $0x2c0] sm:$0xff]  ;;  %1211 = vst.msk [vmem:[#allocation2 + $0x2f1] sm:$0xff] %vm36_vm3, %v1076_v27  ;;  %1210 = vst.msk [vmem:[#allocation2 + $0x2e9] sm:$0xff] %vm36_vm3, %v1074_v7  ;;  %v1813_v55 = vld [vmem:[#allocation2 + $0x2b8] sm:$0xff] }
 0x743   :  { %v2296_v12 = vadd.f32 %v26224_v58, %v2225_v18  ;;  %v1886_v25 = vld [vmem:[#allocation2 + $0x2c1] sm:$0xff]  ;;  %v2228_v62 = vadd.f32 %v2164_v15, %v2100_v48  ;;  %v1885_v22 = vld [vmem:[#allocation2 + $0x2b9] sm:$0xff]  ;;  %v2166_v10 = vadd.f32 %v2100_v48, %v2098_v56 }
 0x744   :  { %15665 = vrot.lane.b32.xlu1 %v2359_v60, %s22619_s1  ;;  %15663 = vrot.lane.b32.xlu0 %v2358_v0, %s22619_s1  ;;  %v2361_v31 = vmax.f32 %v2297_v59, 0.0  ;;  %v1958_v37 = vadd.f32 %v1886_v25, %v1814_v45  ;;  %v2227_v33 = vadd.f32 %v2163_v49, %v2099_v39  ;;  %v2030_v5 = vld [vmem:[#allocation2 + $0x2c2] sm:$0xff]  ;;  %v1957_v19 = vadd.f32 %v1885_v22, %v1813_v55  ;;  %v2029_v24 = vld [vmem:[#allocation2 + $0x2ba] sm:$0xff] }
 0x745   :  { %20550 = vmatmul.mubr.msk.f32.gmra.mrb[118].mxu1 %vm36_vm3, %v9169_v54  ;;  %v2360_v40 = vmax.f32 %v2296_v12, 0.0  ;;  %v2299_v60 = vadd.f32 %v26224_v58, %v2228_v62  ;;  %v1080_v38 = vpop.permute.xlu1 %1079  ;;  %v1078_v0 = vpop.permute.xlu0 %1077  ;;  %v9171_v18 = vld [vmem:[#allocation4 + $0x2d8] sm:$0xff]  ;;  %v2165_v59 = vadd.f32 %v2099_v39, %v2097_v46  ;;  %v9172_v27 = vld [vmem:[#allocation4 + $0x2e8] sm:$0xff]  ;;  %v1815_v12 = vld [vmem:[#allocation2 + $0x2d0] sm:$0xff] }
 0x746   :  { %20552 = vmatprep.mubr.msk.f32.mxu1 %vm36_vm3, %v9170_v32  ;;  %v2102_v34 = vadd.f32 %v2030_v5, %v1958_v37  ;;  %v2298_v57 = vadd.f32 %v26224_v58, %v2227_v33  ;;  %v2101_v21 = vadd.f32 %v2029_v24, %v1957_v19  ;;  %v1816_v15 = vld [vmem:[#allocation2 + $0x2d8] sm:$0xff]  ;;  %1213 = vst.msk [vmem:[#allocation2 + $0x309] sm:$0xff] %vm36_vm3, %v1080_v38  ;;  %1212 = vst.msk [vmem:[#allocation2 + $0x301] sm:$0xff] %vm36_vm3, %v1078_v0  ;;  %v9174_v38 = vld [vmem:[#allocation4 + $0x300] sm:$0xff] }
 0x747   :  { %v1888_v14 = vld [vmem:[#allocation2 + $0x2d9] sm:$0xff]  ;;  %v2363_v56 = vmax.f32 %v2299_v60, 0.0  ;;  %v1887_v49 = vld [vmem:[#allocation2 + $0x2d1] sm:$0xff] }
 0x748   :  { %15669 = vrot.lane.b32.xlu1 %v2361_v31, %s22619_s1  ;;  %15667 = vrot.lane.b32.xlu0 %v2360_v40, %s22619_s1  ;;  %v2230_v7 = vadd.f32 %v2166_v10, %v2102_v34  ;;  %v1960_v54 = vadd.f32 %v1888_v14, %v1816_v15  ;;  %v2362_v45 = vmax.f32 %v2298_v57, 0.0  ;;  %v2229_v25 = vadd.f32 %v2165_v59, %v2101_v21  ;;  %v2032_v32 = vld [vmem:[#allocation2 + $0x2da] sm:$0xff]  ;;  %v2031_v55 = vld [vmem:[#allocation2 + $0x2d2] sm:$0xff] }
 0x749   :  { %20553 = vmatmul.mubr.msk.f32.gmra.mrb[120].mxu1 %vm36_vm3, %v9171_v18  ;;  %v1959_v46 = vadd.f32 %v1887_v49, %v1815_v12  ;;  %v2168_v37 = vadd.f32 %v2102_v34, %v2100_v48  ;;  %v1084_v22 = vpop.permute.xlu1 %1083  ;;  %v9173_v40 = vld [vmem:[#allocation4 + $0x2f0] sm:$0xff]  ;;  %v2167_v19 = vadd.f32 %v2101_v21, %v2099_v39  ;;  %v1817_v57 = vld [vmem:[#allocation2 + $0x2e8] sm:$0xff] }
 0x74a   :  { %20555 = vmatprep.mubr.msk.f32.mxu1 %vm36_vm3, %v9172_v27  ;;  %v2301_v31 = vadd.f32 %v26224_v58, %v2230_v7  ;;  %v2104_v62 = vadd.f32 %v2032_v32, %v1960_v54  ;;  %v2300_v33 = vadd.f32 %v26224_v58, %v2229_v25  ;;  %v1818_v60 = vld [vmem:[#allocation2 + $0x2f0] sm:$0xff]  ;;  %1215 = vst.msk [vmem:[#allocation2 + $0x321] sm:$0xff] %vm36_vm3, %v1084_v22  ;;  %v1082_v24 = vpop.permute.xlu0 %1081  ;;  %v9176_v22 = vld [vmem:[#allocation4 + $0x318] sm:$0xff] }
 0x74b   :  { %v2103_v5 = vadd.f32 %v2031_v55, %v1959_v46  ;;  %v1890_v10 = vld [vmem:[#allocation2 + $0x2f1] sm:$0xff]  ;;  %v1889_v59 = vld [vmem:[#allocation2 + $0x2e9] sm:$0xff]  ;;  %1214 = vst.msk [vmem:[#allocation2 + $0x319] sm:$0xff] %vm36_vm3, %v1082_v24 }
 0x74c   :  { %15673 = vrot.lane.b32.xlu1 %v2363_v56, %s22619_s1  ;;  %15671 = vrot.lane.b32.xlu0 %v2362_v45, %s22619_s1  ;;  %v2365_v0 = vmax.f32 %v2301_v31, 0.0  ;;  %v2232_v18 = vadd.f32 %v2168_v37, %v2104_v62  ;;  %v1962_v48 = vadd.f32 %v1890_v10, %v1818_v60  ;;  %v2364_v15 = vmax.f32 %v2300_v33, 0.0  ;;  %v2034_v39 = vld [vmem:[#allocation2 + $0x2f2] sm:$0xff]  ;;  %v2033_v12 = vld [vmem:[#allocation2 + $0x2ea] sm:$0xff] }
 0x74d   :  { %20556 = vmatmul.mubr.msk.f32.gmra.mrb[122].mxu1 %vm36_vm3, %v9173_v40  ;;  %v2231_v14 = vadd.f32 %v2167_v19, %v2103_v5  ;;  %v1961_v27 = vadd.f32 %v1889_v59, %v1817_v57  ;;  %v2170_v54 = vadd.f32 %v2104_v62, %v2102_v34  ;;  %v1088_v49 = vpop.permute.xlu1 %1087  ;;  %v9175_v45 = vld [vmem:[#allocation4 + $0x308] sm:$0xff]  ;;  %v2169_v46 = vadd.f32 %v2103_v5, %v2101_v21  ;;  %v1819_v19 = vld [vmem:[#allocation2 + $0x300] sm:$0xff] }
 0x74e   :  { %20558 = vmatprep.mubr.msk.f32.mxu1 %vm36_vm3, %v9174_v38  ;;  %v2303_v56 = vadd.f32 %v26224_v58, %v2232_v18  ;;  %v2106_v7 = vadd.f32 %v2034_v39, %v1962_v48  ;;  %v1820_v31 = vld [vmem:[#allocation2 + $0x308] sm:$0xff]  ;;  %1217 = vst.msk [vmem:[#allocation2 + $0x339] sm:$0xff] %vm36_vm3, %v1088_v49  ;;  %v1086_v55 = vpop.permute.xlu0 %1085  ;;  %v17319_v49 = vld [vmem:[%s28495_s4 + $0x70] sm:$0xff] }
 0x74f   :  { %v2302_v25 = vadd.f32 %v26224_v58, %v2231_v14  ;;  %v2105_v32 = vadd.f32 %v2033_v12, %v1961_v27  ;;  %v1892_v37 = vld [vmem:[#allocation2 + $0x309] sm:$0xff]  ;;  %v1891_v60 = vld [vmem:[#allocation2 + $0x301] sm:$0xff]  ;;  %1216 = vst.msk [vmem:[#allocation2 + $0x331] sm:$0xff] %vm36_vm3, %v1086_v55 }
 0x750   :  { %15677 = vrot.lane.b32.xlu1 %v2365_v0, %s22619_s1  ;;  %15675 = vrot.lane.b32.xlu0 %v2364_v15, %s22619_s1  ;;  %v2367_v40 = vmax.f32 %v2303_v56, 0.0  ;;  %v2234_v33 = vadd.f32 %v2170_v54, %v2106_v7  ;;  %v1964_v34 = vadd.f32 %v1892_v37, %v1820_v31  ;;  %v2036_v21 = vld [vmem:[#allocation2 + $0x30a] sm:$0xff]  ;;  %v1963_v38 = vadd.f32 %v1891_v60, %v1819_v19  ;;  %v9177_v0 = vld [vmem:[#allocation4 + $0x320] sm:$0xff] }
 0x751   :  { %20559 = vmatmul.mubr.msk.f32.gmra.mrb[124].mxu1 %vm36_vm3, %v9175_v45  ;;  %v2366_v10 = vmax.f32 %v2302_v25, 0.0  ;;  %v2233_v24 = vadd.f32 %v2169_v46, %v2105_v32  ;;  %v10405_v48 = vld [vmem:[#allocation4 + $0x2] sm:$0xff]  ;;  %v2172_v59 = vadd.f32 %v2106_v7, %v2104_v62  ;;  %v10406_v39 = vld [vmem:[#allocation4 + $0xa] sm:$0xff]  ;;  %v2171_v56 = vadd.f32 %v2105_v32, %v2103_v5  ;;  %v17320_v45 = vld [vmem:[%s28495_s4 + $0x78] sm:$0xff] }
 0x752   :  { %20561 = vmatprep.mubr.msk.f32.mxu1 %vm36_vm3, %v9176_v22  ;;  %v2305_v18 = vadd.f32 %v26224_v58, %v2234_v33  ;;  %v2108_v57 = vadd.f32 %v2036_v21, %v1964_v34  ;;  %v2035_v15 = vld [vmem:[#allocation2 + $0x302] sm:$0xff]  ;;  %v1826_v12 = vld [vmem:[#allocation2 + $0x350] sm:$0xff]  ;;  %v1821_v31 = vld [vmem:[#allocation2 + $0x318] sm:$0xff] }
 0x753   :  { %v2304_v14 = vadd.f32 %v26224_v58, %v2233_v24  ;;  %v26309_v27 = vadd.f32 %v2035_v15, %v1963_v38  ;;  %v1894_v54 = vld [vmem:[#allocation2 + $0x321] sm:$0xff]  ;;  %v1893_v37 = vld [vmem:[#allocation2 + $0x319] sm:$0xff]  ;;  %v1898_v33 = vld [vmem:[#allocation2 + $0x351] sm:$0xff]  ;;  %v21492_v38 = vpack.c.bf16 %v17320_v45, %v17319_v49 }
 0x754   :  { %15681 = vrot.lane.b32.xlu1 %v2367_v40, %s22619_s1  ;;  %15679 = vrot.lane.b32.xlu0 %v2366_v10, %s22619_s1  ;;  %v2369_v62 = vmax.f32 %v2305_v18, 0.0  ;;  %v2236_v25 = vadd.f32 %v2172_v59, %v2108_v57  ;;  %v1822_v46 = vld [vmem:[#allocation2 + $0x320] sm:$0xff]  ;;  %v1965_v40 = vadd.f32 %v1893_v37, %v1821_v31  ;;  %v1825_v34 = vld [vmem:[#allocation2 + $0x348] sm:$0xff]  ;;  %v2174_v24 = vadd.f32 %v2108_v57, %v2106_v7 }
 0x755   :  { %20562 = vmatmul.mubr.msk.f32.gmra.mrb[126].mxu1 %vm36_vm3, %v9177_v0  ;;  %v2368_v55 = vmax.f32 %v2304_v14, 0.0  ;;  %v2235_v5 = vadd.f32 %v2171_v56, %v26309_v27  ;;  %v1966_v22 = vadd.f32 %v1894_v54, %v1822_v46  ;;  %v1897_v19 = vld [vmem:[#allocation2 + $0x349] sm:$0xff]  ;;  %v2037_v21 = vld [vmem:[#allocation2 + $0x31a] sm:$0xff]  ;;  %v2173_v15 = vadd.f32 %v26309_v27, %v2105_v32  ;;  %v2042_v56 = vld [vmem:[#allocation2 + $0x352] sm:$0xff] }
 0x756   :  { %20572 = vmatprep.mubr.msk.f32.mxu1 %vm36_vm3, %v10405_v48  ;;  %v2307_v60 = vadd.f32 %v26224_v58, %v2236_v25  ;;  %v2038_v10 = vld [vmem:[#allocation2 + $0x322] sm:$0xff]  ;;  %v10407_v0 = vld [vmem:[#allocation4 + $0x1a] sm:$0xff]  ;;  %v2109_v59 = vadd.f32 %v2037_v21, %v1965_v40  ;;  %v1823_v25 = vld [vmem:[#allocation2 + $0x330] sm:$0xff]  ;;  %v1970_v7 = vadd.f32 %v1898_v33, %v1826_v12  ;;  %v1969_v31 = vadd.f32 %v1897_v19, %v1825_v34 }
 0x757   :  { %v2306_v18 = vadd.f32 %v26224_v58, %v2235_v5  ;;  %v2110_v48 = vadd.f32 %v2038_v10, %v1966_v22  ;;  %v1896_v14 = vld [vmem:[#allocation2 + $0x339] sm:$0xff]  ;;  %v1895_v46 = vld [vmem:[#allocation2 + $0x331] sm:$0xff]  ;;  %v10408_v40 = vld [vmem:[#allocation4 + $0x22] sm:$0xff] }
 0x758   :  { %15685 = vrot.lane.b32.xlu1 %v2369_v62, %s22619_s1  ;;  %15683 = vrot.lane.b32.xlu0 %v2368_v55, %s22619_s1  ;;  %v2371_v54 = vmax.f32 %v2307_v60, 0.0  ;;  %v1824_v62 = vld [vmem:[#allocation2 + $0x338] sm:$0xff]  ;;  %v2237_v37 = vadd.f32 %v2173_v15, %v2109_v59  ;;  %v2041_v5 = vld [vmem:[#allocation2 + $0x34a] sm:$0xff]  ;;  %v17385_v32 = vld [vmem:[%s28495_s4 + $0x80] sm:$0xff] }
 0x759   :  { %20573 = vmatmul.mubr.msk.f32.vlgmr.msra.gmra.mrb[64].mxu1 %vm36_vm3, %v10406_v39  ;;  %v2370_v49 = vmax.f32 %v2306_v18, 0.0  ;;  %v2238_v45 = vadd.f32 %v2174_v24, %v2110_v48  ;;  %v1968_v55 = vadd.f32 %v1896_v14, %v1824_v62  ;;  %v17386_v39 = vld [vmem:[%s28495_s4 + $0x88] sm:$0xff]  ;;  %v2040_v12 = vld [vmem:[#allocation2 + $0x33a] sm:$0xff]  ;;  %v2176_v22 = vadd.f32 %v2110_v48, %v2108_v57  ;;  %v2039_v60 = vld [vmem:[#allocation2 + $0x332] sm:$0xff] }
 0x75a   :  { %21491 = vmatpush3.bf16.msra.mxu1 %v26042_v51  ;;  %20575 = vmatprep.mubr.msk.f32.mxu1 %vm36_vm3, %v10407_v0  ;;  %v1967_v51 = vadd.f32 %v1895_v46, %v1823_v25  ;;  %v2308_v34 = vadd.f32 %v26224_v58, %v2237_v37  ;;  %v26338_v10 = vpack.c.bf16 %v17386_v39, %v17385_v32  ;;  %v10409_v21 = vld [vmem:[#allocation4 + $0x32] sm:$0xff] }
 0x75b   :  { %21493 = vmatprep.subr.bf16.mxu1 %v21492_v38  ;;  %v2309_v33 = vadd.f32 %v26224_v58, %v2238_v45  ;;  %v2112_v19 = vadd.f32 %v2040_v12, %v1968_v55  ;;  %v26341_v24 = vpop.permute.xlu1 %15577  ;;  %v2175_v57 = vadd.f32 %v2109_v59, %v26309_v27  ;;  %v2114_v18 = vadd.f32 %v2042_v56, %v1970_v7  ;;  %v26344_v14 = vpop.permute.xlu0 %15575  ;;  %v10410_v27 = vld [vmem:[#allocation4 + $0x3a] sm:$0xff]  ;;  %v10412_v12 = vld [vmem:[#allocation4 + $0x52] sm:$0xff] }
 0x75c   :  { %15689 = vrot.lane.b32.xlu1 %v2371_v54, %s22619_s1  ;;  %15687 = vrot.lane.b32.xlu0 %v2370_v49, %s22619_s1  ;;  %29154 = vst [vmem:[#allocation114_spill] sm:$0xff] %v26341_v24  ;;  %v2111_v0 = vadd.f32 %v2039_v60, %v1967_v51  ;;  %v2113_v15 = vadd.f32 %v2041_v5, %v1969_v31  ;;  %29155 = vst [vmem:[#allocation115_spill] sm:$0xff] %v26344_v14  ;;  %v2372_v62 = vmax.f32 %v2308_v34, 0.0  ;;  %v10411_v31 = vld [vmem:[#allocation4 + $0x4a] sm:$0xff]  ;;  %v10413_v51 = vld [vmem:[#allocation4 + $0x62] sm:$0xff] }
 0x75d   :  { %20576 = vmatmul.mubr.msk.f32.gmra.mrb[66].mxu1 %vm36_vm3, %v10408_v40  ;;  %v2373_v54 = vmax.f32 %v2309_v33, 0.0  ;;  %v2240_v25 = vadd.f32 %v2176_v22, %v2112_v19  ;;  %v2178_v49 = vadd.f32 %v2112_v19, %v2110_v48  ;;  %v10414_v19 = vld [vmem:[#allocation4 + $0x6a] sm:$0xff]  ;;  %v10415_v60 = vld [vmem:[#allocation4 + $0x7a] sm:$0xff] }
 0x75e   :  { %20578 = vmatprep.mubr.msk.f32.mxu1 %vm36_vm3, %v10409_v21  ;;  %21495 = vmatpush3.bf16.msra.mxu1 %v21492_v38  ;;  %v2239_v46 = vadd.f32 %v2175_v57, %v2111_v0  ;;  %v2177_v45 = vadd.f32 %v2111_v0, %v2109_v59  ;;  %v29162_v0 = vmax.f32 %v25015_v61, 0.0  ;;  %v10416_v57 = vld [vmem:[#allocation4 + $0x82] sm:$0xff]  ;;  %v10418_v61 = vld [vmem:[#allocation4 + $0x9a] sm:$0xff] }
 0x75f   :  { %21497 = vmatprep.subr.bf16.mxu1 %v26338_v10  ;;  %v2311_v56 = vadd.f32 %v26224_v58, %v2240_v25  ;;  %v26352_v7 = vpop.permute.xlu1 %15581  ;;  %v2242_v38 = vadd.f32 %v2178_v49, %v2114_v18  ;;  %v29163_v18 = vmax.f32 %v25003_v6, 0.0  ;;  %v29166_v25 = vmax.f32 %v25026_v2, 0.0  ;;  %v10419_v49 = vld [vmem:[#allocation4 + $0xaa] sm:$0xff]  ;;  %v10420_v2 = vld [vmem:[#allocation4 + $0xb2] sm:$0xff]  ;;  %v27343_v14 = vld [vmem:[#allocation4 + $0x241] sm:$0xff] }
 0x760   :  { %15693 = vrot.lane.b32.xlu1 %v2373_v54, %s22619_s1  ;;  %15691 = vrot.lane.b32.xlu0 %v2372_v62, %s22619_s1  ;;  %29156 = vst [vmem:[#allocation116_spill] sm:$0xff] %v26352_v7  ;;  %v2310_v37 = vadd.f32 %v26224_v58, %v2239_v46  ;;  %v2241_v55 = vadd.f32 %v2177_v45, %v2113_v15  ;;  %v26355_v48 = vpop.permute.xlu0 %15579  ;;  %v10417_v54 = vld [vmem:[#allocation4 + $0x92] sm:$0xff]  ;;  %v29167_v46 = vmax.f32 %v25019_v41, 0.0  ;;  %v27323_v7 = vld [vmem:[#allocation4 + $0x201] sm:$0xff]  ;;  %v27347_v24 = vld [vmem:[#allocation4 + $0x249] sm:$0xff] }
 0x761   :  { %20579 = vmatmul.mubr.msk.f32.gmra.mrb[68].mxu1 %vm36_vm3, %v10410_v27  ;;  %29157 = vst [vmem:[#allocation117_spill] sm:$0xff] %v26355_v48  ;;  %v2375_v59 = vmax.f32 %v2311_v56, 0.0  ;;  %v2313_v32 = vadd.f32 %v26224_v58, %v2242_v38  ;;  %v29170_v27 = vmax.f32 %v25041_v16, 0.0  ;;  %v29171_v56 = vmax.f32 %v25030_v35, 0.0  ;;  %v10422_v16 = vld [vmem:[#allocation4 + $0xca] sm:$0xff]  ;;  %v27319_v48 = vld [vmem:[#allocation4 + $0x1f9] sm:$0xff] }
 0x762   :  { %20581 = vmatprep.mubr.msk.f32.mxu1 %vm36_vm3, %v10411_v31  ;;  %v2374_v5 = vmax.f32 %v2310_v37, 0.0  ;;  %v2312_v39 = vadd.f32 %v26224_v58, %v2241_v55  ;;  %v10421_v31 = vld [vmem:[#allocation4 + $0xc2] sm:$0xff]  ;;  %v29174_v38 = vmax.f32 %v25055_v3, 0.0  ;;  %v29175_v55 = vmax.f32 %v25045_v8, 0.0 }
 0x763   :  { %v26363_v22 = vpop.permute.xlu1 %15585  ;;  %v2377_v33 = vmax.f32 %v2313_v32, 0.0  ;;  %v29178_v32 = vmax.f32 %v25069_v1, 0.0  ;;  %v10424_v3 = vld [vmem:[#allocation4 + $0xe2] sm:$0xff]  ;;  %v10426_v1 = vld [vmem:[#allocation4 + $0xfa] sm:$0xff] }
 0x764   :  { %15697 = vrot.lane.b32.xlu1 %v2375_v59, %s22619_s1  ;;  %15695 = vrot.lane.b32.xlu0 %v2374_v5, %s22619_s1  ;;  %29158 = vst [vmem:[#allocation118_spill] sm:$0xff] %v26363_v22  ;;  %v26365_v40 = vpop.permute.xlu0 %15583  ;;  %v2376_v34 = vmax.f32 %v2312_v39, 0.0  ;;  %v10423_v59 = vld [vmem:[#allocation4 + $0xda] sm:$0xff]  ;;  %v29179_v39 = vmax.f32 %v25059_v43, 0.0  ;;  %v11858_v22 = vld [vmem:[#allocation4 + $0x1d1] sm:$0xff] }
 0x765   :  { %20582 = vmatmul.mubr.msk.f32.gmra.mrb[70].mxu1 %vm36_vm3, %v10412_v12  ;;  %29159 = vst [vmem:[#allocation119_spill] sm:$0xff] %v26365_v40  ;;  %v10425_v12 = vld [vmem:[#allocation4 + $0xf2] sm:$0xff]  ;;  %v11857_v40 = vld [vmem:[#allocation4 + $0x1c9] sm:$0xff] }
 0x766   :  { %20584 = vmatprep.mubr.msk.f32.mxu1 %vm36_vm3, %v10413_v51 }
 0x767   :  { %v26371_v58 = vpop.permute.xlu1 %15589 }
 0x768   :  { %15701 = vrot.lane.b32.xlu1 %v2377_v33, %s22619_s1  ;;  %15699 = vrot.lane.b32.xlu0 %v2376_v34, %s22619_s1  ;;  %29160 = vst [vmem:[#allocation120_spill] sm:$0xff] %v26371_v58  ;;  %v26373_v21 = vpop.permute.xlu0 %15587  ;;  %v29182_v33 = vmax.f32 %v25083_v47, 0.0  ;;  %v29183_v34 = vmax.f32 %v25073_v11, 0.0  ;;  %v10428_v47 = vld [vmem:[#allocation4 + $0x112] sm:$0xff] }
 0x769   :  { %20585 = vmatmul.mubr.msk.f32.gmra.mrb[72].mxu1 %vm36_vm3, %v10414_v19  ;;  %29161 = vst [vmem:[#allocation121_spill] sm:$0xff] %v26373_v21  ;;  %v10427_v19 = vld [vmem:[#allocation4 + $0x10a] sm:$0xff] }
 0x76a   :  { %20587 = vmatprep.mubr.msk.f32.mxu1 %vm36_vm3, %v10415_v60  ;;  %v27293_v21 = vld [vmem:[#allocation4 + $0x169] sm:$0xff]  ;;  %v27297_v58 = vld [vmem:[#allocation4 + $0x171] sm:$0xff] }
 0x76b   :  { %v26383_v15 = vpop.permute.xlu1 %15593 }
 0x76c   :  { %15769 = vrot.lane.b32.xlu1 %v29162_v0, %s22620_s7  ;;  %15767 = vrot.lane.b32.xlu0 %v29163_v18, %s22620_s7  ;;  %29164 = vst [vmem:[#allocation122_spill] sm:$0xff] %v26383_v15  ;;  %v26385_v62 = vpop.permute.xlu0 %15591  ;;  %v29186_v0 = vmax.f32 %v25097_v52, 0.0  ;;  %v10429_v18 = vld [vmem:[#allocation4 + $0x122] sm:$0xff]  ;;  %v10430_v52 = vld [vmem:[#allocation4 + $0x12a] sm:$0xff] }
 0x76d   :  { %20588 = vmatmul.mubr.msk.f32.gmra.mrb[74].mxu1 %vm36_vm3, %v10416_v57  ;;  %29165 = vst [vmem:[#allocation123_spill] sm:$0xff] %v26385_v62  ;;  %v29187_v57 = vmax.f32 %v25087_v26, 0.0 }
 0x76e   :  { %20590 = vmatprep.mubr.msk.f32.mxu1 %vm36_vm3, %v10417_v54 }
 0x76f   :  { %v26395_v6 = vpop.permute.xlu1 %15597 }
 0x770   :  { %15773 = vrot.lane.b32.xlu1 %v29166_v25, %s22620_s7  ;;  %15771 = vrot.lane.b32.xlu0 %v29167_v46, %s22620_s7  ;;  %29168 = vst [vmem:[#allocation124_spill] sm:$0xff] %v26395_v6  ;;  %v26397_v45 = vpop.permute.xlu0 %15595  ;;  %v29190_v25 = vmax.f32 %v25111_v44, 0.0  ;;  %v10431_v46 = vld [vmem:[#allocation4 + $0x13a] sm:$0xff]  ;;  %v10432_v44 = vld [vmem:[#allocation4 + $0x142] sm:$0xff] }
 0x771   :  { %20591 = vmatmul.mubr.msk.f32.gmra.mrb[76].mxu1 %vm36_vm3, %v10418_v61  ;;  %29169 = vst [vmem:[#allocation125_spill] sm:$0xff] %v26397_v45  ;;  %v29191_v61 = vmax.f32 %v25101_v9, 0.0 }
 0x772   :  { %20593 = vmatprep.mubr.msk.f32.mxu1 %vm36_vm3, %v10419_v49 }
 0x773   :  { %v26407_v41 = vpop.permute.xlu1 %15601 }
 0x774   :  { %15777 = vrot.lane.b32.xlu1 %v29170_v27, %s22620_s7  ;;  %15775 = vrot.lane.b32.xlu0 %v29171_v56, %s22620_s7  ;;  %29172 = vst [vmem:[#allocation126_spill] sm:$0xff] %v26407_v41  ;;  %v26409_v37 = vpop.permute.xlu0 %15599  ;;  %v29194_v27 = vmax.f32 %v25125_v53, 0.0  ;;  %v10433_v56 = vld [vmem:[#allocation4 + $0x152] sm:$0xff]  ;;  %v10434_v53 = vld [vmem:[#allocation4 + $0x15a] sm:$0xff] }
 0x775   :  { %20594 = vmatmul.mubr.msk.f32.gmra.mrb[78].mxu1 %vm36_vm3, %v10420_v2  ;;  %29173 = vst [vmem:[#allocation127_spill] sm:$0xff] %v26409_v37  ;;  %v29195_v2 = vmax.f32 %v25115_v4, 0.0  ;;  %v11132_v41 = vld [vmem:[#allocation4 + $0xe0] sm:$0xff] }
 0x776   :  { %20596 = vmatprep.mubr.msk.f32.mxu1 %vm36_vm3, %v10421_v31 }
 0x777   :  { %v26419_v35 = vpop.permute.xlu1 %15605 }
 0x778   :  { %15781 = vrot.lane.b32.xlu1 %v29174_v38, %s22620_s7  ;;  %15779 = vrot.lane.b32.xlu0 %v29175_v55, %s22620_s7  ;;  %29176 = vst [vmem:[#allocation128_spill] sm:$0xff] %v26419_v35  ;;  %v26421_v5 = vpop.permute.xlu0 %15603  ;;  %v29198_v38 = vmax.f32 %v25139_v20, 0.0  ;;  %v10435_v55 = vld [vmem:[#allocation4 + $0x16a] sm:$0xff]  ;;  %v10436_v20 = vld [vmem:[#allocation4 + $0x172] sm:$0xff] }
 0x779   :  { %20597 = vmatmul.mubr.msk.f32.gmra.mrb[80].mxu1 %vm36_vm3, %v10422_v16  ;;  %29177 = vst [vmem:[#allocation129_spill] sm:$0xff] %v26421_v5  ;;  %v29199_v16 = vmax.f32 %v25129_v23, 0.0  ;;  %v11127_v5 = vld [vmem:[#allocation4 + $0xa8] sm:$0xff] }
 0x77a   :  { %20599 = vmatprep.mubr.msk.f32.mxu1 %vm36_vm3, %v10423_v59  ;;  %v11130_v35 = vld [vmem:[#allocation4 + $0xc8] sm:$0xff] }
 0x77b   :  { %v26431_v8 = vpop.permute.xlu1 %15609 }
 0x77c   :  { %15785 = vrot.lane.b32.xlu1 %v29178_v32, %s22620_s7  ;;  %15783 = vrot.lane.b32.xlu0 %v29179_v39, %s22620_s7  ;;  %29180 = vst [vmem:[#allocation130_spill] sm:$0xff] %v26431_v8  ;;  %v26433_v51 = vpop.permute.xlu0 %15607  ;;  %v10437_v32 = vld [vmem:[#allocation4 + $0x1b2] sm:$0xff]  ;;  %v29203_v39 = vmax.f32 %v25143_v50, 0.0 }
 0x77d   :  { %20600 = vmatmul.mubr.msk.f32.gmra.mrb[82].mxu1 %vm36_vm3, %v10424_v3  ;;  %29181 = vst [vmem:[#allocation131_spill] sm:$0xff] %v26433_v51  ;;  %v29202_v3 = vmax.f32 %v25153_v36, 0.0  ;;  %v29207_v36 = vmax.f32 %v25157_v42, 0.0 }
 0x77e   :  { %20602 = vmatprep.mubr.msk.f32.mxu1 %vm36_vm3, %v10425_v12 }
 0x77f   :  { %v26443_v43 = vpop.permute.xlu1 %15613 }
 0x780   :  { %15789 = vrot.lane.b32.xlu1 %v29182_v33, %s22620_s7  ;;  %15787 = vrot.lane.b32.xlu0 %v29183_v34, %s22620_s7  ;;  %29184 = vst [vmem:[#allocation132_spill] sm:$0xff] %v26443_v43  ;;  %v26445_v60 = vpop.permute.xlu0 %15611  ;;  %v10438_v33 = vld [vmem:[#allocation4 + $0x1ba] sm:$0xff]  ;;  %v10439_v34 = vld [vmem:[#allocation4 + $0x1ca] sm:$0xff] }
 0x781   :  { %20603 = vmatmul.mubr.msk.f32.gmra.mrb[84].mxu1 %vm36_vm3, %v10426_v1  ;;  %29185 = vst [vmem:[#allocation133_spill] sm:$0xff] %v26445_v60  ;;  %v29206_v1 = vmax.f32 %v25167_v30, 0.0  ;;  %v29209_v30 = vmax.f32 %v25461_v29, 0.0 }
 0x782   :  { %20605 = vmatprep.mubr.msk.f32.mxu1 %vm36_vm3, %v10427_v19 }
 0x783   :  { %v26455_v11 = vpop.permute.xlu1 %15617 }
 0x784   :  { %15793 = vrot.lane.b32.xlu1 %v29186_v0, %s22620_s7  ;;  %15791 = vrot.lane.b32.xlu0 %v29187_v57, %s22620_s7  ;;  %29188 = vst [vmem:[#allocation134_spill] sm:$0xff] %v26455_v11  ;;  %v26457_v54 = vpop.permute.xlu0 %15615  ;;  %v29208_v0 = vmax.f32 %v25472_v63, 0.0  ;;  %v10441_v57 = vld [vmem:[#allocation4 + $0x1e2] sm:$0xff]  ;;  %v10442_v63 = vld [vmem:[#allocation4 + $0x1ea] sm:$0xff] }
 0x785   :  { %20606 = vmatmul.mubr.msk.f32.gmra.mrb[86].mxu1 %vm36_vm3, %v10428_v47  ;;  %29189 = vst [vmem:[#allocation72_spill] sm:$0xff] %v26457_v54  ;;  %v10440_v47 = vld [vmem:[#allocation4 + $0x1d2] sm:$0xff]  ;;  %v11116_v54 = vld [vmem:[#allocation4 + $0x20] sm:$0xff] }
 0x786   :  { %20608 = vmatprep.mubr.msk.f32.mxu1 %vm36_vm3, %v10429_v18 }
 0x787   :  { %v26467_v26 = vpop.permute.xlu1 %15621 }
 0x788   :  { %15797 = vrot.lane.b32.xlu1 %v29190_v25, %s22620_s7  ;;  %15795 = vrot.lane.b32.xlu0 %v29191_v61, %s22620_s7  ;;  %29192 = vst [vmem:[#allocation73_spill] sm:$0xff] %v26467_v26  ;;  %v26469_v49 = vpop.permute.xlu0 %15619  ;;  %v29210_v25 = vmax.f32 %v25486_v13, 0.0  ;;  %v10443_v61 = vld [vmem:[#allocation4 + $0x1fa] sm:$0xff]  ;;  %v10444_v13 = vld [vmem:[#allocation4 + $0x202] sm:$0xff] }
 0x789   :  { %20609 = vmatmul.mubr.msk.f32.gmra.mrb[88].mxu1 %vm36_vm3, %v10430_v52  ;;  %29193 = vst [vmem:[#allocation74_spill] sm:$0xff] %v26469_v49  ;;  %v29211_v52 = vmax.f32 %v25476_v17, 0.0  ;;  %v29263_v49 = vld [vmem:[#allocation102_spill] sm:$0xff] }
 0x78a   :  { %20611 = vmatprep.mubr.msk.f32.mxu1 %vm36_vm3, %v10431_v46  ;;  %v29264_v26 = vmax.f32 %v29263_v49, 0.0 }
 0x78b   :  { %v26479_v9 = vpop.permute.xlu1 %15625 }
 0x78c   :  { %15801 = vrot.lane.b32.xlu1 %v29194_v27, %s22620_s7  ;;  %15799 = vrot.lane.b32.xlu0 %v29195_v2, %s22620_s7  ;;  %29196 = vst [vmem:[#allocation75_spill] sm:$0xff] %v26479_v9  ;;  %v26481_v31 = vpop.permute.xlu0 %15623  ;;  %v29212_v27 = vmax.f32 %v25500_v28, 0.0  ;;  %v10446_v28 = vld [vmem:[#allocation4 + $0x21a] sm:$0xff] }
 0x78d   :  { %20612 = vmatmul.mubr.msk.f32.gmra.mrb[90].mxu1 %vm36_vm3, %v10432_v44  ;;  %29197 = vst [vmem:[#allocation76_spill] sm:$0xff] %v26481_v31  ;;  %v29213_v44 = vld [vmem:[#allocation79_spill] sm:$0xff] }
 0x78e   :  { %20614 = vmatprep.mubr.msk.f32.mxu1 %vm36_vm3, %v10433_v56  ;;  %v29214_v2 = vmax.f32 %v29213_v44, 0.0  ;;  %v10445_v56 = vld [vmem:[#allocation4 + $0x212] sm:$0xff]  ;;  %v10451_v44 = vld [vmem:[#allocation4 + $0x25a] sm:$0xff] }
 0x790   :  { %15805 = vrot.lane.b32.xlu1 %v29198_v38, %s22620_s7  ;;  %15803 = vrot.lane.b32.xlu0 %v29199_v16, %s22620_s7  ;;  %v26491_v4 = vpop.permute.xlu1 %15629 }
 0x791   :  { %20615 = vmatmul.mubr.msk.f32.gmra.mrb[92].mxu1 %vm36_vm3, %v10434_v53  ;;  %29200 = vst [vmem:[#allocation77_spill] sm:$0xff] %v26491_v4  ;;  %v26493_v59 = vpop.permute.xlu0 %15627  ;;  %v29215_v53 = vld [vmem:[#allocation110_spill] sm:$0xff] }
 0x792   :  { %29201 = vst [vmem:[#allocation78_spill] sm:$0xff] %v26493_v59  ;;  %20617 = vmatprep.mubr.msk.f32.mxu1 %vm36_vm3, %v10435_v55  ;;  %v29216_v16 = vmax.f32 %v29215_v53, 0.0  ;;  %v29217_v55 = vld [vmem:[#allocation111_spill] sm:$0xff] }
 0x794   :  { %15809 = vrot.lane.b32.xlu1 %v29202_v3, %s22620_s7  ;;  %15807 = vrot.lane.b32.xlu0 %v29203_v39, %s22620_s7 }
 0x795   :  { %20618 = vmatmul.mubr.msk.f32.gmra.mrb[94].mxu1 %vm36_vm3, %v10436_v20  ;;  %v26503_v23 = vpop.permute.xlu1 %15633  ;;  %v10447_v20 = vld [vmem:[#allocation4 + $0x22a] sm:$0xff] }
 0x796   :  { %29204 = vst [vmem:[#allocation135_spill] sm:$0xff] %v26503_v23  ;;  %v26505_v12 = vpop.permute.xlu0 %15631  ;;  %20620 = vmatprep.mubr.msk.f32.mxu1 %vm36_vm3, %v10437_v32  ;;  %v29218_v32 = vmax.f32 %v29217_v55, 0.0 }
 0x797   :  { %29205 = vst [vmem:[#allocation136_spill] sm:$0xff] %v26505_v12 }
 0x798   :  { %15813 = vrot.lane.b32.xlu1 %v29206_v1, %s22620_s7  ;;  %15811 = vrot.lane.b32.xlu0 %v29207_v36, %s22620_s7  ;;  %v10448_v36 = vld [vmem:[#allocation4 + $0x232] sm:$0xff] }
 0x799   :  { %20621 = vmatmul.mubr.msk.f32.gmra.mrb[96].mxu1 %vm36_vm3, %v10438_v33  ;;  %v26515_v50 = vpop.permute.xlu1 %15637  ;;  %v29219_v33 = vld [vmem:[#allocation80_spill] sm:$0xff] }
 0x79a   :  { %v26517_v19 = vpop.permute.xlu0 %15635  ;;  %20623 = vmatprep.mubr.msk.f32.mxu1 %vm36_vm3, %v10439_v34  ;;  %v29220_v1 = vmax.f32 %v29219_v33, 0.0  ;;  %v29221_v34 = vld [vmem:[#allocation81_spill] sm:$0xff] }
 0x79c   :  { %15817 = vrot.lane.b32.xlu1 %v29208_v0, %s22620_s7  ;;  %15815 = vrot.lane.b32.xlu0 %v29209_v30, %s22620_s7  ;;  %v29222_v0 = vmax.f32 %v29221_v34, 0.0  ;;  %v10449_v30 = vld [vmem:[#allocation4 + $0x242] sm:$0xff]  ;;  %v10454_v34 = vld [vmem:[#allocation4 + $0x27a] sm:$0xff] }
 0x79d   :  { %20624 = vmatmul.mubr.msk.f32.gmra.mrb[98].mxu1 %vm36_vm3, %v10440_v47 }
 0x79e   :  { %v26527_v42 = vpop.permute.xlu1 %15641  ;;  %v26529_v18 = vpop.permute.xlu0 %15639  ;;  %20626 = vmatprep.mubr.msk.f32.mxu1 %vm36_vm3, %v10441_v57 }
 0x7a0   :  { %15821 = vrot.lane.b32.xlu1 %v29210_v25, %s22620_s7  ;;  %15819 = vrot.lane.b32.xlu0 %v29211_v52, %s22620_s7  ;;  %v29223_v25 = vld [vmem:[#allocation82_spill] sm:$0xff] }
 0x7a1   :  { %20627 = vmatmul.mubr.msk.f32.gmra.mrb[100].mxu1 %vm36_vm3, %v10442_v63  ;;  %v29224_v63 = vmax.f32 %v29223_v25, 0.0  ;;  %v10450_v52 = vld [vmem:[#allocation4 + $0x24a] sm:$0xff] }
 0x7a2   :  { %v26539_v29 = vpop.permute.xlu1 %15645  ;;  %v26541_v46 = vpop.permute.xlu0 %15643  ;;  %20629 = vmatprep.mubr.msk.f32.mxu1 %vm36_vm3, %v10443_v61  ;;  %v29225_v61 = vld [vmem:[#allocation83_spill] sm:$0xff] }
 0x7a4   :  { %15825 = vrot.lane.b32.xlu1 %v29212_v27, %s22620_s7  ;;  %15823 = vrot.lane.b32.xlu0 %v29214_v2, %s22620_s7  ;;  %v29226_v27 = vmax.f32 %v29225_v61, 0.0  ;;  %v29235_v61 = vld [vmem:[#allocation88_spill] sm:$0xff] }
 0x7a5   :  { %20630 = vmatmul.mubr.msk.f32.gmra.mrb[102].mxu1 %vm36_vm3, %v10444_v13 }
 0x7a6   :  { %v26551_v17 = vpop.permute.xlu1 %15649  ;;  %v26553_v38 = vpop.permute.xlu0 %15647  ;;  %20632 = vmatprep.mubr.msk.f32.mxu1 %vm36_vm3, %v10445_v56  ;;  %v29227_v56 = vld [vmem:[#allocation84_spill] sm:$0xff] }
 0x7a7   :  { %v29228_v53 = vmax.f32 %v29227_v56, 0.0  ;;  %v29237_v56 = vld [vmem:[#allocation89_spill] sm:$0xff] }
 0x7a8   :  { %15829 = vrot.lane.b32.xlu1 %v29216_v16, %s22620_s7  ;;  %15827 = vrot.lane.b32.xlu0 %v29218_v32, %s22620_s7  ;;  %v10452_v16 = vld [vmem:[#allocation4 + $0x262] sm:$0xff] }
 0x7a9   :  { %20633 = vmatmul.mubr.msk.f32.gmra.mrb[104].mxu1 %vm36_vm3, %v10446_v28  ;;  %v29229_v28 = vld [vmem:[#allocation85_spill] sm:$0xff] }
 0x7aa   :  { %v26563_v3 = vpop.permute.xlu1 %15653  ;;  %v26565_v39 = vpop.permute.xlu0 %15651  ;;  %20635 = vmatprep.mubr.msk.f32.mxu1 %vm36_vm3, %v10447_v20  ;;  %v29230_v55 = vmax.f32 %v29229_v28, 0.0  ;;  %v10453_v20 = vld [vmem:[#allocation4 + $0x272] sm:$0xff]  ;;  %v10457_v28 = vld [vmem:[#allocation4 + $0x2a2] sm:$0xff] }
 0x7ac   :  { %15833 = vrot.lane.b32.xlu1 %v29220_v1, %s22620_s7  ;;  %15831 = vrot.lane.b32.xlu0 %v29222_v0, %s22620_s7  ;;  %v29231_v1 = vld [vmem:[#allocation86_spill] sm:$0xff]  ;;  %v29233_v0 = vld [vmem:[#allocation87_spill] sm:$0xff] }
 0x7ad   :  { %20636 = vmatmul.mubr.msk.f32.gmra.mrb[106].mxu1 %vm36_vm3, %v10448_v36  ;;  %v29232_v36 = vmax.f32 %v29231_v1, 0.0 }
 0x7ae   :  { %v26575_v47 = vpop.permute.xlu1 %15657  ;;  %v26577_v57 = vpop.permute.xlu0 %15655  ;;  %20638 = vmatprep.mubr.msk.f32.mxu1 %vm36_vm3, %v10449_v30  ;;  %v29234_v30 = vmax.f32 %v29233_v0, 0.0 }
 0x7b0   :  { %15837 = vrot.lane.b32.xlu1 %v29224_v63, %s22620_s7  ;;  %15835 = vrot.lane.b32.xlu0 %v29226_v27, %s22620_s7  ;;  %v10455_v63 = vld [vmem:[#allocation4 + $0x28a] sm:$0xff]  ;;  %v29236_v27 = vmax.f32 %v29235_v61, 0.0 }
 0x7b1   :  { %20639 = vmatmul.mubr.msk.f32.gmra.mrb[108].mxu1 %vm36_vm3, %v10450_v52 }
 0x7b2   :  { %v26587_v13 = vpop.permute.xlu1 %15661  ;;  %v26589_v2 = vpop.permute.xlu0 %15659  ;;  %20641 = vmatprep.mubr.msk.f32.mxu1 %vm36_vm3, %v10451_v44  ;;  %v10456_v44 = vld [vmem:[#allocation4 + $0x292] sm:$0xff] }
 0x7b4   :  { %15841 = vrot.lane.b32.xlu1 %v29228_v53, %s22620_s7  ;;  %15839 = vrot.lane.b32.xlu0 %v29230_v55, %s22620_s7  ;;  %v29238_v53 = vmax.f32 %v29237_v56, 0.0  ;;  %v10460_v56 = vld [vmem:[#allocation4 + $0x2c2] sm:$0xff] }
 0x7b5   :  { %20642 = vmatmul.mubr.msk.f32.gmra.mrb[110].mxu1 %vm36_vm3, %v10452_v16 }
 0x7b6   :  { %v26599_v32 = vpop.permute.xlu1 %15665  ;;  %v26601_v33 = vpop.permute.xlu0 %15663  ;;  %20644 = vmatprep.mubr.msk.f32.mxu1 %vm36_vm3, %v10453_v20  ;;  %v29239_v20 = vld [vmem:[#allocation90_spill] sm:$0xff] }
 0x7b7   :  { %v29240_v1 = vmax.f32 %v29239_v20, 0.0 }
 0x7b8   :  { %15845 = vrot.lane.b32.xlu1 %v29232_v36, %s22620_s7  ;;  %15843 = vrot.lane.b32.xlu0 %v29234_v30, %s22620_s7  ;;  %v10458_v36 = vld [vmem:[#allocation4 + $0x2aa] sm:$0xff] }
 0x7b9   :  { %20645 = vmatmul.mubr.msk.f32.gmra.mrb[112].mxu1 %vm36_vm3, %v10454_v34  ;;  %v29241_v34 = vld [vmem:[#allocation91_spill] sm:$0xff] }
 0x7ba   :  { %v26611_v25 = vpop.permute.xlu1 %15669  ;;  %v26613_v52 = vpop.permute.xlu0 %15667  ;;  %20647 = vmatprep.mubr.msk.f32.mxu1 %vm36_vm3, %v10455_v63  ;;  %v29242_v0 = vmax.f32 %v29241_v34, 0.0  ;;  %v10459_v63 = vld [vmem:[#allocation4 + $0x2ba] sm:$0xff]  ;;  %v29247_v34 = vld [vmem:[#allocation94_spill] sm:$0xff] }
 0x7bc   :  { %15849 = vrot.lane.b32.xlu1 %v29236_v27, %s22620_s7  ;;  %15847 = vrot.lane.b32.xlu0 %v29238_v53, %s22620_s7  ;;  %v29243_v27 = vld [vmem:[#allocation92_spill] sm:$0xff]  ;;  %v29245_v53 = vld [vmem:[#allocation93_spill] sm:$0xff] }
 0x7bd   :  { %20648 = vmatmul.mubr.msk.f32.gmra.mrb[114].mxu1 %vm36_vm3, %v10456_v44  ;;  %v29244_v44 = vmax.f32 %v29243_v27, 0.0  ;;  %v29249_v27 = vld [vmem:[#allocation95_spill] sm:$0xff] }
 0x7be   :  { %v26623_v16 = vpop.permute.xlu1 %15673  ;;  %v26625_v55 = vpop.permute.xlu0 %15671  ;;  %20650 = vmatprep.mubr.msk.f32.mxu1 %vm36_vm3, %v10457_v28  ;;  %v29246_v28 = vmax.f32 %v29245_v53, 0.0 }
 0x7c0   :  { %15853 = vrot.lane.b32.xlu1 %v29240_v1, %s22620_s7  ;;  %15851 = vrot.lane.b32.xlu0 %v29242_v0, %s22620_s7  ;;  %v10461_v1 = vld [vmem:[#allocation4 + $0x2d2] sm:$0xff]  ;;  %v29248_v0 = vmax.f32 %v29247_v34, 0.0 }
 0x7c1   :  { %20651 = vmatmul.mubr.msk.f32.gmra.mrb[116].mxu1 %vm36_vm3, %v10458_v36  ;;  %v10464_v34 = vld [vmem:[#allocation4 + $0x2f2] sm:$0xff] }
 0x7c2   :  { %v26635_v30 = vpop.permute.xlu1 %15677  ;;  %v26637_v61 = vpop.permute.xlu0 %15675  ;;  %20653 = vmatprep.mubr.msk.f32.mxu1 %vm36_vm3, %v10459_v63  ;;  %v10462_v63 = vld [vmem:[#allocation4 + $0x2da] sm:$0xff] }
 0x7c4   :  { %15857 = vrot.lane.b32.xlu1 %v29244_v44, %s22620_s7  ;;  %15855 = vrot.lane.b32.xlu0 %v29246_v28, %s22620_s7  ;;  %v29250_v44 = vmax.f32 %v29249_v27, 0.0 }
 0x7c5   :  { %20654 = vmatmul.mubr.msk.f32.gmra.mrb[118].mxu1 %vm36_vm3, %v10460_v56  ;;  %v10463_v56 = vld [vmem:[#allocation4 + $0x2ea] sm:$0xff] }
 0x7c6   :  { %v26647_v20 = vpop.permute.xlu1 %15681  ;;  %v26649_v36 = vpop.permute.xlu0 %15679  ;;  %20656 = vmatprep.mubr.msk.f32.mxu1 %vm36_vm3, %v10461_v1  ;;  %v29251_v1 = vld [vmem:[#allocation96_spill] sm:$0xff] }
 0x7c7   :  { %v29252_v12 = vmax.f32 %v29251_v1, 0.0  ;;  %v10466_v1 = vld [vmem:[#allocation4 + $0x30a] sm:$0xff] }
 0x7c8   :  { %15861 = vrot.lane.b32.xlu1 %v29248_v0, %s22620_s7  ;;  %15859 = vrot.lane.b32.xlu0 %v29250_v44, %s22620_s7  ;;  %v29253_v0 = vld [vmem:[#allocation97_spill] sm:$0xff] }
 0x7c9   :  { %20657 = vmatmul.mubr.msk.f32.gmra.mrb[120].mxu1 %vm36_vm3, %v10462_v63  ;;  %v29254_v23 = vmax.f32 %v29253_v0, 0.0  ;;  %v10465_v63 = vld [vmem:[#allocation4 + $0x302] sm:$0xff] }
 0x7ca   :  { %v26659_v53 = vpop.permute.xlu1 %15685  ;;  %v26661_v28 = vpop.permute.xlu0 %15683  ;;  %20659 = vmatprep.mubr.msk.f32.mxu1 %vm36_vm3, %v10463_v56  ;;  %v29255_v56 = vld [vmem:[#allocation98_spill] sm:$0xff] }
 0x7cb   :  { %v29256_v59 = vmax.f32 %v29255_v56, 0.0  ;;  %v10468_v56 = vld [vmem:[#allocation4 + $0x322] sm:$0xff] }
 0x7cc   :  { %15865 = vrot.lane.b32.xlu1 %v29252_v12, %s22620_s7  ;;  %15863 = vrot.lane.b32.xlu0 %v29254_v23, %s22620_s7  ;;  %v29257_v12 = vld [vmem:[#allocation99_spill] sm:$0xff] }
 0x7cd   :  { %20660 = vmatmul.mubr.msk.f32.gmra.mrb[122].mxu1 %vm36_vm3, %v10464_v34  ;;  %v29258_v4 = vmax.f32 %v29257_v12, 0.0  ;;  %v10467_v23 = vld [vmem:[#allocation4 + $0x31a] sm:$0xff] }
 0x7ce   :  { %v26671_v27 = vpop.permute.xlu1 %15689  ;;  %v26673_v44 = vpop.permute.xlu0 %15687  ;;  %20662 = vmatprep.mubr.msk.f32.mxu1 %vm36_vm3, %v10465_v63  ;;  %v29259_v63 = vld [vmem:[#allocation100_spill] sm:$0xff] }
 0x7cf   :  { %v29260_v31 = vmax.f32 %v29259_v63, 0.0 }
 0x7d0   :  { %15869 = vrot.lane.b32.xlu1 %v29256_v59, %s22620_s7  ;;  %15867 = vrot.lane.b32.xlu0 %v29258_v4, %s22620_s7  ;;  %v17387_v59 = vld [vmem:[%s28495_s4 + $0x90] sm:$0xff]  ;;  %v17388_v4 = vld [vmem:[%s28495_s4 + $0x98] sm:$0xff] }
 0x7d1   :  { %20663 = vmatmul.mubr.msk.f32.gmra.mrb[124].mxu1 %vm36_vm3, %v10466_v1  ;;  %v29261_v1 = vld [vmem:[#allocation101_spill] sm:$0xff]  ;;  %v21500_v63 = vpack.c.bf16 %v17388_v4, %v17387_v59  ;;  %v11117_v59 = vld [vmem:[#allocation4 + $0x30] sm:$0xff] }
 0x7d2   :  { %v26683_v34 = vpop.permute.xlu1 %15693  ;;  %v26685_v0 = vpop.permute.xlu0 %15691  ;;  %20665 = vmatprep.mubr.msk.f32.mxu1 %vm36_vm3, %v10467_v23  ;;  %v29262_v12 = vmax.f32 %v29261_v1, 0.0  ;;  %v11115_v23 = vld [vmem:[#allocation4 + $0x18] sm:$0xff]  ;;  %v17453_v1 = vld [vmem:[%s28495_s4 + $0xa0] sm:$0xff] }
 0x7d4   :  { %15873 = vrot.lane.b32.xlu1 %v29260_v31, %s22620_s7  ;;  %15871 = vrot.lane.b32.xlu0 %v29262_v12, %s22620_s7  ;;  %v29265_v12 = vld [vmem:[#allocation103_spill] sm:$0xff] }
 0x7d5   :  { %20666 = vmatmul.mubr.msk.f32.gmra.mrb[126].mxu1 %vm36_vm3, %v10468_v56  ;;  %v17454_v56 = vld [vmem:[%s28495_s4 + $0xa8] sm:$0xff]  ;;  %v29266_v11 = vmax.f32 %v29265_v12, 0.0  ;;  %v11118_v12 = vld [vmem:[#allocation4 + $0x38] sm:$0xff] }
 0x7d6   :  { %v26701_v9 = vpop.permute.xlu1 %15697  ;;  %20676 = vmatprep.mubr.msk.f32.mxu1 %vm36_vm3, %v11115_v23  ;;  %v26704_v31 = vpop.permute.xlu0 %15695  ;;  %v26725_v4 = vpack.c.bf16 %v17454_v56, %v17453_v1  ;;  %v29269_v23 = vld [vmem:[#allocation104_spill] sm:$0xff]  ;;  %v29275_v1 = vld [vmem:[#allocation106_spill] sm:$0xff] }
 0x7d7   :  { %v29270_v60 = vmax.f32 %v29269_v23, 0.0  ;;  %v11120_v56 = vld [vmem:[#allocation4 + $0x50] sm:$0xff]  ;;  %v29277_v23 = vld [vmem:[#allocation107_spill] sm:$0xff] }
 0x7d8   :  { %15877 = vrot.lane.b32.xlu1 %v29264_v26, %s22620_s7  ;;  %15875 = vrot.lane.b32.xlu0 %v29266_v11, %s22620_s7  ;;  %v29271_v11 = vld [vmem:[#allocation105_spill] sm:$0xff] }
 0x7d9   :  { %20677 = vmatmul.mubr.msk.f32.vlgmr.msra.gmra.mrb[64].mxu1 %vm36_vm3, %v11116_v54  ;;  %v29272_v54 = vmax.f32 %v29271_v11, 0.0  ;;  %v29278_v11 = vmax.f32 %v29277_v23, 0.0  ;;  %v11123_v23 = vld [vmem:[#allocation4 + $0x78] sm:$0xff] }
 0x7da   :  { %21499 = vmatpush3.bf16.msra.mxu1 %v26338_v10  ;;  %v26720_v49 = vpop.permute.xlu1 %15701  ;;  %20679 = vmatprep.mubr.msk.f32.mxu1 %vm36_vm3, %v11117_v59  ;;  %v26723_v26 = vpop.permute.xlu0 %15699  ;;  %v11119_v10 = vld [vmem:[#allocation4 + $0x48] sm:$0xff] }
 0x7db   :  { %29267 = vst [vmem:[#allocation137_spill] sm:$0xff] %v26720_v49  ;;  %29268 = vst [vmem:[#allocation138_spill] sm:$0xff] %v26723_v26  ;;  %21501 = vmatprep.subr.bf16.mxu1 %v21500_v63 }
 0x7dc   :  { %15881 = vrot.lane.b32.xlu1 %v29270_v60, %s22620_s7  ;;  %15879 = vrot.lane.b32.xlu0 %v29272_v54, %s22620_s7  ;;  %v29276_v60 = vmax.f32 %v29275_v1, 0.0  ;;  %v11122_v1 = vld [vmem:[#allocation4 + $0x68] sm:$0xff] }
 0x7dd   :  { %20680 = vmatmul.mubr.msk.f32.gmra.mrb[66].mxu1 %vm36_vm3, %v11118_v12  ;;  %v11121_v12 = vld [vmem:[#allocation4 + $0x60] sm:$0xff] }
 0x7de   :  { %v26734_v49 = vpop.permute.xlu1 %15769  ;;  %20682 = vmatprep.mubr.msk.f32.mxu1 %vm36_vm3, %v11119_v10  ;;  %21503 = vmatpush3.bf16.msra.mxu1 %v21500_v63  ;;  %v26737_v59 = vpop.permute.xlu0 %15767  ;;  %v29281_v10 = vld [vmem:[#allocation108_spill] sm:$0xff] }
 0x7df   :  { %29273 = vst [vmem:[#allocation139_spill] sm:$0xff] %v26734_v49  ;;  %29274 = vst [vmem:[#allocation140_spill] sm:$0xff] %v26737_v59  ;;  %21505 = vmatprep.subr.bf16.mxu1 %v26725_v4  ;;  %v29282_v26 = vmax.f32 %v29281_v10, 0.0  ;;  %v11124_v10 = vld [vmem:[#allocation4 + $0x80] sm:$0xff]  ;;  %v27335_v59 = vld [vmem:[#allocation4 + $0x229] sm:$0xff] }
 0x7e0   :  { %15885 = vrot.lane.b32.xlu1 %v29276_v60, %s22620_s7  ;;  %15883 = vrot.lane.b32.xlu0 %v29278_v11, %s22620_s7  ;;  %v29283_v60 = vld [vmem:[#allocation109_spill] sm:$0xff]  ;;  %v27339_v49 = vld [vmem:[#allocation4 + $0x231] sm:$0xff] }
 0x7e1   :  { %20683 = vmatmul.mubr.msk.f32.gmra.mrb[68].mxu1 %vm36_vm3, %v11120_v56  ;;  %v29284_v43 = vmax.f32 %v29283_v60, 0.0 }
 0x7e2   :  { %v26747_v54 = vpop.permute.xlu1 %15773  ;;  %20685 = vmatprep.mubr.msk.f32.mxu1 %vm36_vm3, %v11121_v12  ;;  %v26750_v63 = vpop.permute.xlu0 %15771  ;;  %v29287_v12 = vld [vmem:[#allocation112_spill] sm:$0xff] }
 0x7e3   :  { %29279 = vst [vmem:[#allocation141_spill] sm:$0xff] %v26747_v54  ;;  %29280 = vst [vmem:[#allocation142_spill] sm:$0xff] %v26750_v63  ;;  %v29288_v51 = vmax.f32 %v29287_v12, 0.0  ;;  %v27311_v63 = vld [vmem:[#allocation4 + $0x1e1] sm:$0xff]  ;;  %v27315_v54 = vld [vmem:[#allocation4 + $0x1e9] sm:$0xff] }
 0x7e4   :  { %15889 = vrot.lane.b32.xlu1 %v29282_v26, %s22620_s7  ;;  %15887 = vrot.lane.b32.xlu0 %v29284_v43, %s22620_s7  ;;  %v29289_v26 = vld [vmem:[#allocation113_spill] sm:$0xff]  ;;  %v11125_v43 = vld [vmem:[#allocation4 + $0x90] sm:$0xff] }
 0x7e5   :  { %20686 = vmatmul.mubr.msk.f32.gmra.mrb[70].mxu1 %vm36_vm3, %v11122_v1  ;;  %v29290_v8 = vmax.f32 %v29289_v26, 0.0 }
 0x7e6   :  { %v26759_v56 = vpop.permute.xlu1 %15777  ;;  %20688 = vmatprep.mubr.msk.f32.mxu1 %vm36_vm3, %v11123_v23  ;;  %v26762_v11 = vpop.permute.xlu0 %15775  ;;  %v11126_v23 = vld [vmem:[#allocation4 + $0x98] sm:$0xff] }
 0x7e7   :  { %29285 = vst [vmem:[#allocation79_spill] sm:$0xff] %v26759_v56  ;;  %29286 = vst [vmem:[#allocation110_spill] sm:$0xff] %v26762_v11  ;;  %v27301_v11 = vld [vmem:[#allocation4 + $0x181] sm:$0xff]  ;;  %v27305_v56 = vld [vmem:[#allocation4 + $0x189] sm:$0xff] }
 0x7e8   :  { %15893 = vrot.lane.b32.xlu1 %v29288_v51, %s22620_s7  ;;  %15891 = vrot.lane.b32.xlu0 %v29290_v8, %s22620_s7  ;;  %v11128_v8 = vld [vmem:[#allocation4 + $0xb0] sm:$0xff] }
 0x7e9   :  { %20689 = vmatmul.mubr.msk.f32.gmra.mrb[72].mxu1 %vm36_vm3, %v11124_v10  ;;  %v11129_v10 = vld [vmem:[#allocation4 + $0xc0] sm:$0xff] }
 0x7ea   :  { %v26771_v1 = vpop.permute.xlu1 %15781  ;;  %20691 = vmatprep.mubr.msk.f32.mxu1 %vm36_vm3, %v11125_v43  ;;  %v26774_v60 = vpop.permute.xlu0 %15779 }
 0x7eb   :  { %29291 = vst [vmem:[#allocation111_spill] sm:$0xff] %v26771_v1  ;;  %29292 = vst [vmem:[#allocation80_spill] sm:$0xff] %v26774_v60  ;;  %v11150_v60 = vld [vmem:[#allocation4 + $0x1e8] sm:$0xff] }
 0x7ed   :  { %20692 = vmatmul.mubr.msk.f32.gmra.mrb[74].mxu1 %vm36_vm3, %v11126_v23  ;;  %v11131_v23 = vld [vmem:[#allocation4 + $0xd8] sm:$0xff] }
 0x7ee   :  { %v26777_v12 = vpop.permute.xlu1 %15785  ;;  %20694 = vmatprep.mubr.msk.f32.mxu1 %vm36_vm3, %v11127_v5  ;;  %v26780_v51 = vpop.permute.xlu0 %15783 }
 0x7ef   :  { %29293 = vst [vmem:[#allocation81_spill] sm:$0xff] %v26777_v12  ;;  %29294 = vst [vmem:[#allocation82_spill] sm:$0xff] %v26780_v51  ;;  %v29317_v51 = vld [vmem:[#allocation40_spill] sm:$0xff]  ;;  %v11148_v12 = vld [vmem:[#allocation4 + $0x1d0] sm:$0xff] }
 0x7f1   :  { %20695 = vmatmul.mubr.msk.f32.gmra.mrb[76].mxu1 %vm36_vm3, %v11128_v8  ;;  %v11133_v8 = vld [vmem:[#allocation4 + $0xf0] sm:$0xff] }
 0x7f2   :  { %v26783_v26 = vpop.permute.xlu1 %15789  ;;  %20697 = vmatprep.mubr.msk.f32.mxu1 %vm36_vm3, %v11129_v10  ;;  %v26786_v43 = vpop.permute.xlu0 %15787 }
 0x7f3   :  { %29295 = vst [vmem:[#allocation83_spill] sm:$0xff] %v26783_v26  ;;  %29296 = vst [vmem:[#allocation84_spill] sm:$0xff] %v26786_v43  ;;  %v11134_v43 = vld [vmem:[#allocation4 + $0xf8] sm:$0xff] }
 0x7f5   :  { %20698 = vmatmul.mubr.msk.f32.gmra.mrb[78].mxu1 %vm36_vm3, %v11130_v35  ;;  %v11135_v35 = vld [vmem:[#allocation4 + $0x108] sm:$0xff] }
 0x7f6   :  { %v26789_v37 = vpop.permute.xlu1 %15793  ;;  %20700 = vmatprep.mubr.msk.f32.mxu1 %vm36_vm3, %v11131_v23  ;;  %v26792_v5 = vpop.permute.xlu0 %15791 }
 0x7f7   :  { %29297 = vst [vmem:[#allocation85_spill] sm:$0xff] %v26789_v37  ;;  %29298 = vst [vmem:[#allocation86_spill] sm:$0xff] %v26792_v5  ;;  %v11136_v5 = vld [vmem:[#allocation4 + $0x110] sm:$0xff] }
 0x7f9   :  { %20701 = vmatmul.mubr.msk.f32.gmra.mrb[80].mxu1 %vm36_vm3, %v11132_v41  ;;  %v11137_v41 = vld [vmem:[#allocation4 + $0x120] sm:$0xff] }
 0x7fa   :  { %v26795_v45 = vpop.permute.xlu1 %15797  ;;  %20703 = vmatprep.mubr.msk.f32.mxu1 %vm36_vm3, %v11133_v8  ;;  %v26798_v10 = vpop.permute.xlu0 %15795 }
 0x7fb   :  { %29299 = vst [vmem:[#allocation87_spill] sm:$0xff] %v26795_v45  ;;  %29300 = vst [vmem:[#allocation88_spill] sm:$0xff] %v26798_v10  ;;  %v11138_v10 = vld [vmem:[#allocation4 + $0x128] sm:$0xff] }
 0x7fd   :  { %20704 = vmatmul.mubr.msk.f32.gmra.mrb[82].mxu1 %vm36_vm3, %v11134_v43  ;;  %v11139_v43 = vld [vmem:[#allocation4 + $0x138] sm:$0xff] }
 0x7fe   :  { %v26801_v26 = vpop.permute.xlu1 %15801  ;;  %20706 = vmatprep.mubr.msk.f32.mxu1 %vm36_vm3, %v11135_v35  ;;  %v26804_v23 = vpop.permute.xlu0 %15799 }
 0x7ff   :  { %29301 = vst [vmem:[#allocation89_spill] sm:$0xff] %v26801_v26  ;;  %29302 = vst [vmem:[#allocation90_spill] sm:$0xff] %v26804_v23  ;;  %v11140_v23 = vld [vmem:[#allocation4 + $0x140] sm:$0xff] }
 0x801   :  { %20707 = vmatmul.mubr.msk.f32.gmra.mrb[84].mxu1 %vm36_vm3, %v11136_v5  ;;  %v11141_v5 = vld [vmem:[#allocation4 + $0x150] sm:$0xff] }
 0x802   :  { %v26807_v37 = vpop.permute.xlu1 %15805  ;;  %20709 = vmatprep.mubr.msk.f32.mxu1 %vm36_vm3, %v11137_v41  ;;  %v26810_v8 = vpop.permute.xlu0 %15803 }
 0x803   :  { %29303 = vst [vmem:[#allocation91_spill] sm:$0xff] %v26807_v37  ;;  %29304 = vst [vmem:[#allocation92_spill] sm:$0xff] %v26810_v8  ;;  %v11142_v8 = vld [vmem:[#allocation4 + $0x158] sm:$0xff] }
 0x805   :  { %20710 = vmatmul.mubr.msk.f32.gmra.mrb[86].mxu1 %vm36_vm3, %v11138_v10  ;;  %v11143_v10 = vld [vmem:[#allocation4 + $0x168] sm:$0xff] }
 0x806   :  { %v26813_v45 = vpop.permute.xlu1 %15809  ;;  %20712 = vmatprep.mubr.msk.f32.mxu1 %vm36_vm3, %v11139_v43  ;;  %v26816_v35 = vpop.permute.xlu0 %15807 }
 0x807   :  { %29305 = vst [vmem:[#allocation93_spill] sm:$0xff] %v26813_v45  ;;  %29306 = vst [vmem:[#allocation94_spill] sm:$0xff] %v26816_v35  ;;  %v11144_v35 = vld [vmem:[#allocation4 + $0x170] sm:$0xff] }
 0x809   :  { %20713 = vmatmul.mubr.msk.f32.gmra.mrb[88].mxu1 %vm36_vm3, %v11140_v23  ;;  %v11145_v23 = vld [vmem:[#allocation4 + $0x180] sm:$0xff] }
 0x80a   :  { %v26819_v26 = vpop.permute.xlu1 %15813  ;;  %20715 = vmatprep.mubr.msk.f32.mxu1 %vm36_vm3, %v11141_v5  ;;  %v26822_v41 = vpop.permute.xlu0 %15811  ;;  %v26837_v5 = vld [vmem:[%s28496_s5] ss:$0 sm:$0xff] }
 0x80b   :  { %29307 = vst [vmem:[#allocation95_spill] sm:$0xff] %v26819_v26  ;;  %29308 = vst [vmem:[#allocation96_spill] sm:$0xff] %v26822_v41  ;;  %v11146_v41 = vld [vmem:[#allocation4 + $0x188] sm:$0xff] }
 0x80d   :  { %20716 = vmatmul.mubr.msk.f32.gmra.mrb[90].mxu1 %vm36_vm3, %v11142_v8 }
 0x80e   :  { %v26825_v37 = vpop.permute.xlu1 %15817  ;;  %20718 = vmatprep.mubr.msk.f32.mxu1 %vm36_vm3, %v11143_v10  ;;  %v26828_v43 = vpop.permute.xlu0 %15815 }
 0x80f   :  { %29309 = vst [vmem:[#allocation97_spill] sm:$0xff] %v26825_v37  ;;  %29310 = vst [vmem:[#allocation98_spill] sm:$0xff] %v26828_v43  ;;  %v29313_v37 = vld [vmem:[#allocation38_spill] sm:$0xff]  ;;  %v29314_v43 = vld [vmem:[#allocation39_spill] sm:$0xff] }
 0x810   :  { %v800_v10 = vadd.f32 %v29313_v37, %v26837_v5  ;;  %v799_v26 = vadd.f32 %v26837_v5, %v29314_v43  ;;  %v29318_v37 = vld [vmem:[#allocation41_spill] sm:$0xff]  ;;  %v11149_v43 = vld [vmem:[#allocation4 + $0x1e0] sm:$0xff] }
 0x811   :  { %20719 = vmatmul.mubr.msk.f32.gmra.mrb[92].mxu1 %vm36_vm3, %v11144_v35  ;;  %v11147_v35 = vld [vmem:[#allocation4 + $0x1c8] sm:$0xff]  ;;  %v801_v15 = vadd.f32 %v26837_v5, %v29318_v37  ;;  %v29320_v37 = vld [vmem:[#allocation42_spill] sm:$0xff] }
 0x812   :  { %v26831_v45 = vpop.permute.xlu1 %15821  ;;  %20721 = vmatprep.mubr.msk.f32.mxu1 %vm36_vm3, %v11145_v23  ;;  %v26839_v8 = vpop.permute.xlu0 %15819  ;;  %v864_v6 = vmax.f32 %v800_v10, 0.0  ;;  %v863_v62 = vmax.f32 %v799_v26, 0.0 }
 0x813   :  { %29311 = vst [vmem:[#allocation99_spill] sm:$0xff] %v26831_v45  ;;  %29312 = vst [vmem:[#allocation100_spill] sm:$0xff] %v26839_v8  ;;  %v802_v8 = vadd.f32 %v29317_v51, %v26837_v5 }
 0x814   :  { %v16245_v10 = vsel %vm36_vm3, %v863_v62, %v26517_v19 }
 0x815   :  { %20722 = vmatmul.mubr.msk.f32.gmra.mrb[94].mxu1 %vm36_vm3, %v11146_v41  ;;  %v16246_v41 = vsel %vm36_vm3, %v864_v6, %v26515_v50  ;;  %v865_v6 = vmax.f32 %v801_v15, 0.0  ;;  %v29322_v50 = vld [vmem:[#allocation43_spill] sm:$0xff] }
 0x816   :  { %v26846_v45 = vpop.permute.xlu1 %15825  ;;  %20724 = vmatprep.mubr.msk.f32.mxu1 %vm36_vm3, %v11147_v35  ;;  %v26849_v23 = vpop.permute.xlu0 %15823  ;;  %v866_v35 = vmax.f32 %v802_v8, 0.0  ;;  %v803_v1 = vadd.f32 %v26837_v5, %v29322_v50 }
 0x817   :  { %29315 = vst [vmem:[#allocation101_spill] sm:$0xff] %v26846_v45  ;;  %29316 = vst [vmem:[#allocation102_spill] sm:$0xff] %v26849_v23  ;;  %v804_v23 = vadd.f32 %v29320_v37, %v26837_v5  ;;  %v16247_v19 = vsel %vm36_vm3, %v865_v6, %v26529_v18  ;;  %v11152_v37 = vld [vmem:[#allocation4 + $0x200] sm:$0xff] }
 0x818   :  { %v16248_v62 = vsel %vm36_vm3, %v866_v35, %v26527_v42  ;;  %v867_v50 = vmax.f32 %v803_v1, 0.0  ;;  %v29326_v42 = vld [vmem:[#allocation45_spill] sm:$0xff] }
 0x819   :  { %20725 = vmatmul.mubr.msk.f32.gmra.mrb[96].mxu1 %vm36_vm3, %v11148_v12  ;;  %v868_v15 = vmax.f32 %v804_v23, 0.0  ;;  %v805_v35 = vadd.f32 %v26837_v5, %v29326_v42 }
 0x81a   :  { %v15830_v45 = vpop.permute.xlu1 %15829  ;;  %20727 = vmatprep.mubr.msk.f32.mxu1 %vm36_vm3, %v11149_v43  ;;  %v15828_v26 = vpop.permute.xlu0 %15827  ;;  %v11151_v43 = vld [vmem:[#allocation4 + $0x1f8] sm:$0xff]  ;;  %v16249_v23 = vsel %vm36_vm3, %v867_v50, %v26541_v46 }
 0x81b   :  { %v26862_v51 = vsel %vm16279_vm6, %v16246_v41, %v15830_v45  ;;  %v26867_v12 = vsel %vm16279_vm6, %v16245_v10, %v15828_v26  ;;  %v29324_v10 = vld [vmem:[#allocation44_spill] sm:$0xff]  ;;  %v16250_v18 = vsel %vm36_vm3, %v868_v15, %v26539_v29  ;;  %v869_v42 = vmax.f32 %v805_v35, 0.0  ;;  %v29330_v29 = vld [vmem:[#allocation47_spill] sm:$0xff] }
 0x81c   :  { %29319 = vst [vmem:[#allocation103_spill] sm:$0xff] %v26862_v51  ;;  %29321 = vst [vmem:[#allocation104_spill] sm:$0xff] %v26867_v12  ;;  %v806_v26 = vadd.f32 %v29324_v10, %v26837_v5  ;;  %v807_v15 = vadd.f32 %v26837_v5, %v29330_v29  ;;  %v27285_v12 = vld [vmem:[#allocation4 + $0x151] sm:$0xff]  ;;  %v27289_v51 = vld [vmem:[#allocation4 + $0x159] sm:$0xff] }
 0x81d   :  { %20728 = vmatmul.mubr.msk.f32.gmra.mrb[98].mxu1 %vm36_vm3, %v11150_v60 }
 0x81e   :  { %v15834_v45 = vpop.permute.xlu1 %15833  ;;  %20730 = vmatprep.mubr.msk.f32.mxu1 %vm36_vm3, %v11151_v43  ;;  %v15832_v41 = vpop.permute.xlu0 %15831  ;;  %v11153_v43 = vld [vmem:[#allocation4 + $0x210] sm:$0xff]  ;;  %v870_v1 = vmax.f32 %v806_v26, 0.0  ;;  %v16251_v26 = vsel %vm36_vm3, %v869_v42, %v26553_v38  ;;  %v26923_v38 = vld [vmem:[#allocation4 + $0x240] sm:$0xff] }
 0x81f   :  { %v26878_v8 = vsel %vm16279_vm6, %v16248_v62, %v15834_v45  ;;  %v26883_v60 = vsel %vm16279_vm6, %v16247_v19, %v15832_v41  ;;  %v29328_v19 = vld [vmem:[#allocation46_spill] sm:$0xff] }
 0x820   :  { %29323 = vst [vmem:[#allocation105_spill] sm:$0xff] %v26878_v8  ;;  %29325 = vst [vmem:[#allocation106_spill] sm:$0xff] %v26883_v60  ;;  %v808_v41 = vadd.f32 %v29328_v19, %v26837_v5  ;;  %v16252_v46 = vsel %vm36_vm3, %v870_v1, %v26551_v17  ;;  %v871_v17 = vmax.f32 %v807_v15, 0.0  ;;  %v29334_v1 = vld [vmem:[#allocation49_spill] sm:$0xff]  ;;  %v27277_v60 = vld [vmem:[#allocation4 + $0x139] sm:$0xff] }
 0x821   :  { %20731 = vmatmul.mubr.msk.f32.gmra.mrb[100].mxu1 %vm36_vm3, %v11152_v37  ;;  %v11154_v37 = vld [vmem:[#allocation4 + $0x218] sm:$0xff]  ;;  %v809_v29 = vadd.f32 %v26837_v5, %v29334_v1  ;;  %v26939_v1 = vld [vmem:[#allocation4 + $0x248] sm:$0xff] }
 0x822   :  { %v15838_v6 = vpop.permute.xlu1 %15837  ;;  %20733 = vmatprep.mubr.msk.f32.mxu1 %vm36_vm3, %v11153_v43  ;;  %v15836_v45 = vpop.permute.xlu0 %15835  ;;  %v11155_v43 = vld [vmem:[#allocation4 + $0x228] sm:$0xff]  ;;  %v872_v35 = vmax.f32 %v808_v41, 0.0 }
 0x823   :  { %v26894_v62 = vsel %vm16279_vm6, %v16250_v18, %v15838_v6  ;;  %v26899_v10 = vsel %vm16279_vm6, %v16249_v23, %v15836_v45  ;;  %v29332_v23 = vld [vmem:[#allocation48_spill] sm:$0xff] }
 0x824   :  { %29327 = vst [vmem:[#allocation107_spill] sm:$0xff] %v26894_v62  ;;  %29329 = vst [vmem:[#allocation108_spill] sm:$0xff] %v26899_v10  ;;  %v810_v45 = vadd.f32 %v29332_v23, %v26837_v5  ;;  %v16254_v41 = vsel %vm36_vm3, %v872_v35, %v26563_v3  ;;  %v873_v3 = vmax.f32 %v809_v29, 0.0  ;;  %v29338_v35 = vld [vmem:[#allocation51_spill] sm:$0xff]  ;;  %v27269_v10 = vld [vmem:[#allocation4 + $0x121] sm:$0xff] }
 0x825   :  { %20734 = vmatmul.mubr.msk.f32.gmra.mrb[102].mxu1 %vm36_vm3, %v11154_v37  ;;  %v26917_v37 = vld [vmem:[#allocation4 + $0x230] sm:$0xff]  ;;  %v27281_v8 = vld [vmem:[#allocation4 + $0x141] sm:$0xff] }
 0x826   :  { %v15842_v50 = vpop.permute.xlu1 %15841  ;;  %20736 = vmatprep.mubr.msk.f32.mxu1 %vm36_vm3, %v11155_v43  ;;  %v15840_v6 = vpop.permute.xlu0 %15839  ;;  %v16253_v43 = vsel %vm36_vm3, %v871_v17, %v26565_v39  ;;  %v26945_v39 = vld [vmem:[#allocation4 + $0x258] sm:$0xff]  ;;  %v27273_v62 = vld [vmem:[#allocation4 + $0x129] sm:$0xff] }
 0x827   :  { %v26910_v18 = vsel %vm16279_vm6, %v16252_v46, %v15842_v50  ;;  %v26915_v19 = vsel %vm16279_vm6, %v16251_v26, %v15840_v6  ;;  %v874_v50 = vmax.f32 %v810_v45, 0.0  ;;  %v29336_v26 = vld [vmem:[#allocation50_spill] sm:$0xff] }
 0x828   :  { %29331 = vst [vmem:[#allocation109_spill] sm:$0xff] %v26910_v18  ;;  %29333 = vst [vmem:[#allocation112_spill] sm:$0xff] %v26915_v19  ;;  %v812_v6 = vadd.f32 %v29336_v26, %v26837_v5  ;;  %v811_v19 = vadd.f32 %v26837_v5, %v29338_v35  ;;  %v27265_v18 = vld [vmem:[#allocation4 + $0x111] sm:$0xff] }
 0x829   :  { %20737 = vmatmul.mubr.msk.f32.gmra.mrb[104].mxu1 %vm36_vm3, %v26917_v37  ;;  %v16256_v45 = vsel %vm36_vm3, %v874_v50, %v26575_v47  ;;  %v29342_v50 = vld [vmem:[#allocation53_spill] sm:$0xff] }
 0x82a   :  { %v15846_v42 = vpop.permute.xlu1 %15845  ;;  %20739 = vmatprep.mubr.msk.f32.mxu1 %vm36_vm3, %v26923_v38  ;;  %v15844_v46 = vpop.permute.xlu0 %15843  ;;  %v875_v47 = vmax.f32 %v811_v19, 0.0 }
 0x82b   :  { %v26932_v15 = vsel %vm16279_vm6, %v16254_v41, %v15846_v42  ;;  %v26937_v23 = vsel %vm16279_vm6, %v16253_v43, %v15844_v46  ;;  %v16255_v41 = vsel %vm36_vm3, %v873_v3, %v26577_v57  ;;  %v876_v43 = vmax.f32 %v812_v6, 0.0  ;;  %v29340_v46 = vld [vmem:[#allocation52_spill] sm:$0xff]  ;;  %v26967_v57 = vld [vmem:[#allocation4 + $0x270] sm:$0xff] }
 0x82c   :  { %29335 = vst [vmem:[#allocation113_spill] sm:$0xff] %v26932_v15  ;;  %29337 = vst [vmem:[#allocation38_spill] sm:$0xff] %v26937_v23  ;;  %v814_v26 = vadd.f32 %v29340_v46, %v26837_v5  ;;  %v26961_v23 = vld [vmem:[#allocation4 + $0x260] sm:$0xff]  ;;  %v813_v15 = vadd.f32 %v26837_v5, %v29342_v50 }
 0x82d   :  { %20740 = vmatmul.mubr.msk.f32.gmra.mrb[106].mxu1 %vm36_vm3, %v26939_v1  ;;  %v16258_v6 = vsel %vm36_vm3, %v876_v43, %v26587_v13  ;;  %v29346_v43 = vld [vmem:[#allocation55_spill] sm:$0xff] }
 0x82e   :  { %v15850_v17 = vpop.permute.xlu1 %15849  ;;  %20742 = vmatprep.mubr.msk.f32.mxu1 %vm36_vm3, %v26945_v39  ;;  %v15848_v42 = vpop.permute.xlu0 %15847  ;;  %v877_v13 = vmax.f32 %v813_v15, 0.0 }
 0x82f   :  { %v26954_v29 = vsel %vm16279_vm6, %v16256_v45, %v15850_v17  ;;  %v26959_v35 = vsel %vm16279_vm6, %v16255_v41, %v15848_v42  ;;  %v16257_v45 = vsel %vm36_vm3, %v875_v47, %v26589_v2  ;;  %v878_v41 = vmax.f32 %v814_v26, 0.0  ;;  %v29344_v42 = vld [vmem:[#allocation54_spill] sm:$0xff]  ;;  %v26989_v2 = vld [vmem:[#allocation4 + $0x288] sm:$0xff] }
 0x830   :  { %29339 = vst [vmem:[#allocation39_spill] sm:$0xff] %v26954_v29  ;;  %29341 = vst [vmem:[#allocation40_spill] sm:$0xff] %v26959_v35  ;;  %v816_v46 = vadd.f32 %v29344_v42, %v26837_v5  ;;  %v26983_v35 = vld [vmem:[#allocation4 + $0x278] sm:$0xff]  ;;  %v815_v29 = vadd.f32 %v26837_v5, %v29346_v43 }
 0x831   :  { %20743 = vmatmul.mubr.msk.f32.gmra.mrb[108].mxu1 %vm36_vm3, %v26961_v23  ;;  %v16260_v26 = vsel %vm36_vm3, %v878_v41, %v26599_v32  ;;  %v29350_v41 = vld [vmem:[#allocation57_spill] sm:$0xff] }
 0x832   :  { %v15854_v3 = vpop.permute.xlu1 %15853  ;;  %20745 = vmatprep.mubr.msk.f32.mxu1 %vm36_vm3, %v26967_v57  ;;  %v15852_v17 = vpop.permute.xlu0 %15851  ;;  %v879_v32 = vmax.f32 %v815_v29, 0.0 }
 0x833   :  { %v26976_v19 = vsel %vm16279_vm6, %v16258_v6, %v15854_v3  ;;  %v26981_v50 = vsel %vm16279_vm6, %v16257_v45, %v15852_v17  ;;  %v16259_v6 = vsel %vm36_vm3, %v877_v13, %v26601_v33  ;;  %v880_v45 = vmax.f32 %v816_v46, 0.0  ;;  %v29348_v17 = vld [vmem:[#allocation56_spill] sm:$0xff] }
 0x834   :  { %29343 = vst [vmem:[#allocation41_spill] sm:$0xff] %v26976_v19  ;;  %29345 = vst [vmem:[#allocation42_spill] sm:$0xff] %v26981_v50  ;;  %v818_v42 = vadd.f32 %v29348_v17, %v26837_v5  ;;  %v27005_v50 = vld [vmem:[#allocation4 + $0x290] sm:$0xff]  ;;  %v817_v19 = vadd.f32 %v26837_v5, %v29350_v41  ;;  %v27011_v33 = vld [vmem:[#allocation4 + $0x2a0] sm:$0xff] }
 0x835   :  { %20746 = vmatmul.mubr.msk.f32.gmra.mrb[110].mxu1 %vm36_vm3, %v26983_v35  ;;  %v16262_v46 = vsel %vm36_vm3, %v880_v45, %v26611_v25  ;;  %v29354_v45 = vld [vmem:[#allocation59_spill] sm:$0xff] }
 0x836   :  { %v15858_v47 = vpop.permute.xlu1 %15857  ;;  %20748 = vmatprep.mubr.msk.f32.mxu1 %vm36_vm3, %v26989_v2  ;;  %v15856_v3 = vpop.permute.xlu0 %15855  ;;  %v881_v25 = vmax.f32 %v817_v19, 0.0 }
 0x837   :  { %v26998_v15 = vsel %vm16279_vm6, %v16260_v26, %v15858_v47  ;;  %v27003_v43 = vsel %vm16279_vm6, %v16259_v6, %v15856_v3  ;;  %v16261_v26 = vsel %vm36_vm3, %v879_v32, %v26613_v52  ;;  %v882_v6 = vmax.f32 %v818_v42, 0.0  ;;  %v29352_v3 = vld [vmem:[#allocation58_spill] sm:$0xff]  ;;  %v27033_v52 = vld [vmem:[#allocation4 + $0x2b8] sm:$0xff] }
 0x838   :  { %29347 = vst [vmem:[#allocation43_spill] sm:$0xff] %v26998_v15  ;;  %29349 = vst [vmem:[#allocation44_spill] sm:$0xff] %v27003_v43  ;;  %v820_v17 = vadd.f32 %v29352_v3, %v26837_v5  ;;  %v27027_v43 = vld [vmem:[#allocation4 + $0x2a8] sm:$0xff]  ;;  %v819_v15 = vadd.f32 %v26837_v5, %v29354_v45 }
 0x839   :  { %20749 = vmatmul.mubr.msk.f32.gmra.mrb[112].mxu1 %vm36_vm3, %v27005_v50  ;;  %v16264_v42 = vsel %vm36_vm3, %v882_v6, %v26623_v16  ;;  %v29358_v6 = vld [vmem:[#allocation61_spill] sm:$0xff] }
 0x83a   :  { %v15862_v13 = vpop.permute.xlu1 %15861  ;;  %20751 = vmatprep.mubr.msk.f32.mxu1 %vm36_vm3, %v27011_v33  ;;  %v15860_v47 = vpop.permute.xlu0 %15859  ;;  %v883_v16 = vmax.f32 %v819_v15, 0.0  ;;  %29379 = vst [vmem:[#allocation61_spill] sm:$0xff] %v27315_v54 }
 0x83b   :  { %v27020_v29 = vsel %vm16279_vm6, %v16262_v46, %v15862_v13  ;;  %v27025_v41 = vsel %vm16279_vm6, %v16261_v26, %v15860_v47  ;;  %v16263_v46 = vsel %vm36_vm3, %v881_v25, %v26625_v55  ;;  %v884_v26 = vmax.f32 %v820_v17, 0.0  ;;  %v29356_v47 = vld [vmem:[#allocation60_spill] sm:$0xff]  ;;  %v27055_v55 = vld [vmem:[#allocation4 + $0x2d0] sm:$0xff] }
 0x83c   :  { %29351 = vst [vmem:[#allocation45_spill] sm:$0xff] %v27020_v29  ;;  %29353 = vst [vmem:[#allocation46_spill] sm:$0xff] %v27025_v41  ;;  %v822_v3 = vadd.f32 %v29356_v47, %v26837_v5  ;;  %v27049_v41 = vld [vmem:[#allocation4 + $0x2c0] sm:$0xff]  ;;  %v821_v29 = vadd.f32 %v26837_v5, %v29358_v6 }
 0x83d   :  { %20752 = vmatmul.mubr.msk.f32.gmra.mrb[114].mxu1 %vm36_vm3, %v27027_v43  ;;  %v16266_v17 = vsel %vm36_vm3, %v884_v26, %v26635_v30  ;;  %v29362_v26 = vld [vmem:[#allocation63_spill] sm:$0xff] }
 0x83e   :  { %v15866_v32 = vpop.permute.xlu1 %15865  ;;  %20754 = vmatprep.mubr.msk.f32.mxu1 %vm36_vm3, %v27033_v52  ;;  %v15864_v13 = vpop.permute.xlu0 %15863  ;;  %v885_v30 = vmax.f32 %v821_v29, 0.0  ;;  %29381 = vst [vmem:[#allocation63_spill] sm:$0xff] %v27323_v7 }
 0x83f   :  { %v27042_v19 = vsel %vm16279_vm6, %v16264_v42, %v15866_v32  ;;  %v27047_v45 = vsel %vm16279_vm6, %v16263_v46, %v15864_v13  ;;  %v16265_v42 = vsel %vm36_vm3, %v883_v16, %v26637_v61  ;;  %v886_v46 = vmax.f32 %v822_v3, 0.0  ;;  %v29360_v13 = vld [vmem:[#allocation62_spill] sm:$0xff]  ;;  %v27077_v61 = vld [vmem:[#allocation4 + $0x2e8] sm:$0xff] }
 0x840   :  { %29355 = vst [vmem:[#allocation47_spill] sm:$0xff] %v27042_v19  ;;  %29357 = vst [vmem:[#allocation48_spill] sm:$0xff] %v27047_v45  ;;  %v824_v47 = vadd.f32 %v29360_v13, %v26837_v5  ;;  %v27071_v45 = vld [vmem:[#allocation4 + $0x2d8] sm:$0xff]  ;;  %v823_v19 = vadd.f32 %v26837_v5, %v29362_v26 }
 0x841   :  { %20755 = vmatmul.mubr.msk.f32.gmra.mrb[116].mxu1 %vm36_vm3, %v27049_v41  ;;  %v16268_v3 = vsel %vm36_vm3, %v886_v46, %v26647_v20  ;;  %v29366_v46 = vld [vmem:[#allocation65_spill] sm:$0xff]  ;;  %29380 = vst [vmem:[#allocation62_spill] sm:$0xff] %v27319_v48 }
 0x842   :  { %v15870_v25 = vpop.permute.xlu1 %15869  ;;  %20757 = vmatprep.mubr.msk.f32.mxu1 %vm36_vm3, %v27055_v55  ;;  %v15868_v32 = vpop.permute.xlu0 %15867  ;;  %v887_v20 = vmax.f32 %v823_v19, 0.0 }
 0x843   :  { %v27064_v15 = vsel %vm16279_vm6, %v16266_v17, %v15870_v25  ;;  %v27069_v6 = vsel %vm16279_vm6, %v16265_v42, %v15868_v32  ;;  %v16267_v17 = vsel %vm36_vm3, %v885_v30, %v26649_v36  ;;  %v888_v42 = vmax.f32 %v824_v47, 0.0  ;;  %v29364_v32 = vld [vmem:[#allocation64_spill] sm:$0xff] }
 0x844   :  { %29359 = vst [vmem:[#allocation49_spill] sm:$0xff] %v27064_v15  ;;  %29361 = vst [vmem:[#allocation50_spill] sm:$0xff] %v27069_v6  ;;  %v826_v13 = vadd.f32 %v29364_v32, %v26837_v5  ;;  %v27093_v6 = vld [vmem:[#allocation4 + $0x2f0] sm:$0xff]  ;;  %v825_v15 = vadd.f32 %v26837_v5, %v29366_v46  ;;  %v27099_v36 = vld [vmem:[#allocation4 + $0x300] sm:$0xff] }
 0x845   :  { %20758 = vmatmul.mubr.msk.f32.gmra.mrb[118].mxu1 %vm36_vm3, %v27071_v45  ;;  %v16270_v47 = vsel %vm36_vm3, %v888_v42, %v26659_v53  ;;  %v29370_v42 = vld [vmem:[#allocation67_spill] sm:$0xff] }
 0x846   :  { %v15874_v16 = vpop.permute.xlu1 %15873  ;;  %20760 = vmatprep.mubr.msk.f32.mxu1 %vm36_vm3, %v27077_v61  ;;  %v15872_v25 = vpop.permute.xlu0 %15871  ;;  %v889_v53 = vmax.f32 %v825_v15, 0.0  ;;  %29385 = vst [vmem:[#allocation67_spill] sm:$0xff] %v27339_v49 }
 0x847   :  { %v27086_v29 = vsel %vm16279_vm6, %v16268_v3, %v15874_v16  ;;  %v27091_v26 = vsel %vm16279_vm6, %v16267_v17, %v15872_v25  ;;  %v16269_v3 = vsel %vm36_vm3, %v887_v20, %v26661_v28  ;;  %v890_v17 = vmax.f32 %v826_v13, 0.0  ;;  %v29368_v25 = vld [vmem:[#allocation66_spill] sm:$0xff]  ;;  %v27121_v28 = vld [vmem:[#allocation4 + $0x318] sm:$0xff] }
 0x848   :  { %29363 = vst [vmem:[#allocation51_spill] sm:$0xff] %v27086_v29  ;;  %29365 = vst [vmem:[#allocation52_spill] sm:$0xff] %v27091_v26  ;;  %v828_v32 = vadd.f32 %v29368_v25, %v26837_v5  ;;  %v27115_v26 = vld [vmem:[#allocation4 + $0x308] sm:$0xff]  ;;  %v827_v29 = vadd.f32 %v26837_v5, %v29370_v42 }
 0x849   :  { %20761 = vmatmul.mubr.msk.f32.gmra.mrb[120].mxu1 %vm36_vm3, %v27093_v6  ;;  %v16272_v13 = vsel %vm36_vm3, %v890_v17, %v26671_v27  ;;  %v29374_v17 = vld [vmem:[#allocation69_spill] sm:$0xff]  ;;  %29384 = vst [vmem:[#allocation66_spill] sm:$0xff] %v27335_v59 }
 0x84a   :  { %v15878_v30 = vpop.permute.xlu1 %15877  ;;  %20763 = vmatprep.mubr.msk.f32.mxu1 %vm36_vm3, %v27099_v36  ;;  %v15876_v16 = vpop.permute.xlu0 %15875  ;;  %v891_v27 = vmax.f32 %v827_v29, 0.0  ;;  %29387 = vst [vmem:[#allocation69_spill] sm:$0xff] %v27347_v24 }
 0x84b   :  { %v27108_v19 = vsel %vm16279_vm6, %v16270_v47, %v15878_v30  ;;  %v27113_v46 = vsel %vm16279_vm6, %v16269_v3, %v15876_v16  ;;  %v16271_v47 = vsel %vm36_vm3, %v889_v53, %v26673_v44  ;;  %v892_v3 = vmax.f32 %v828_v32, 0.0  ;;  %v29372_v16 = vld [vmem:[#allocation68_spill] sm:$0xff]  ;;  %v27143_v44 = vld [vmem:[#allocation4 + $0x330] sm:$0xff] }
 0x84c   :  { %29367 = vst [vmem:[#allocation53_spill] sm:$0xff] %v27108_v19  ;;  %29369 = vst [vmem:[#allocation54_spill] sm:$0xff] %v27113_v46  ;;  %v830_v25 = vadd.f32 %v29372_v16, %v26837_v5  ;;  %v27137_v46 = vld [vmem:[#allocation4 + $0x320] sm:$0xff]  ;;  %v829_v19 = vadd.f32 %v26837_v5, %v29374_v17 }
 0x84d   :  { %20764 = vmatmul.mubr.msk.f32.gmra.mrb[122].mxu1 %vm36_vm3, %v27115_v26  ;;  %v16274_v32 = vsel %vm36_vm3, %v892_v3, %v26683_v34  ;;  %v17455_v34 = vld [vmem:[%s28495_s4 + $0xb0] sm:$0xff]  ;;  %v17456_v3 = vld [vmem:[%s28495_s4 + $0xb8] sm:$0xff]  ;;  %29386 = vst [vmem:[#allocation68_spill] sm:$0xff] %v27343_v14 }
 0x84e   :  { %v15882_v20 = vpop.permute.xlu1 %15881  ;;  %20766 = vmatprep.mubr.msk.f32.mxu1 %vm36_vm3, %v27121_v28  ;;  %v15880_v30 = vpop.permute.xlu0 %15879  ;;  %v894_v5 = vmax.f32 %v830_v25, 0.0  ;;  %v893_v16 = vmax.f32 %v829_v19, 0.0 }
 0x84f   :  { %v27130_v15 = vsel %vm16279_vm6, %v16272_v13, %v15882_v20  ;;  %v27135_v42 = vsel %vm16279_vm6, %v16271_v47, %v15880_v30  ;;  %v16273_v13 = vsel %vm36_vm3, %v891_v27, %v26685_v0  ;;  %v27157_v30 = vld [vmem:[#allocation4 + $0x338] sm:$0xff] }
 0x850   :  { %29371 = vst [vmem:[#allocation55_spill] sm:$0xff] %v27130_v15  ;;  %29373 = vst [vmem:[#allocation56_spill] sm:$0xff] %v27135_v42  ;;  %v11825_v0 = vld [vmem:[#allocation4 + $0x19] sm:$0xff]  ;;  %v16276_v25 = vsel %vm36_vm3, %v894_v5, %v26701_v9  ;;  %v16275_v17 = vsel %vm36_vm3, %v893_v16, %v26704_v31  ;;  %v17522_v9 = vld [vmem:[%s28495_s4 + $0xc8] sm:$0xff] }
 0x851   :  { %20767 = vmatmul.mubr.msk.f32.gmra.mrb[124].mxu1 %vm36_vm3, %v27137_v46  ;;  %v27185_v31 = vld [vmem:[#allocation4 + $0x31] sm:$0xff]  ;;  %v27209_v16 = vld [vmem:[#allocation4 + $0x69] sm:$0xff]  ;;  %v27257_v42 = vld [vmem:[#allocation4 + $0xf9] sm:$0xff] }
 0x852   :  { %v15886_v53 = vpop.permute.xlu1 %15885  ;;  %20769 = vmatprep.mubr.msk.f32.mxu1 %vm36_vm3, %v27143_v44  ;;  %v15884_v20 = vpop.permute.xlu0 %15883  ;;  %v27261_v15 = vld [vmem:[#allocation4 + $0x109] sm:$0xff] }
 0x853   :  { %v27152_v29 = vsel %vm16279_vm6, %v16274_v32, %v15886_v53  ;;  %v27155_v47 = vsel %vm16279_vm6, %v16273_v13, %v15884_v20  ;;  %v21508_v13 = vpack.c.bf16 %v17456_v3, %v17455_v34  ;;  %v11826_v20 = vld [vmem:[#allocation4 + $0x21] sm:$0xff]  ;;  %v27192_v34 = vld [vmem:[#allocation4 + $0x39] sm:$0xff]  ;;  %v27196_v3 = vld [vmem:[#allocation4 + $0x49] sm:$0xff] }
 0x854   :  { %29375 = vst [vmem:[#allocation57_spill] sm:$0xff] %v27152_v29  ;;  %29376 = vst [vmem:[#allocation58_spill] sm:$0xff] %v27155_v47  ;;  %v17521_v47 = vld [vmem:[%s28495_s4 + $0xc0] sm:$0xff]  ;;  %v27253_v29 = vld [vmem:[#allocation4 + $0xf1] sm:$0xff] }
 0x855   :  { %20770 = vmatmul.mubr.msk.f32.gmra.mrb[126].mxu1 %vm36_vm3, %v27157_v30  ;;  %v27190_v5 = vpack.c.bf16 %v17522_v9, %v17521_v47  ;;  %v27205_v47 = vld [vmem:[#allocation4 + $0x61] sm:$0xff]  ;;  %v27241_v9 = vld [vmem:[#allocation4 + $0xc9] sm:$0xff] }
 0x856   :  { %v15890_v27 = vpop.permute.xlu1 %15889  ;;  %20780 = vmatprep.mubr.msk.f32.mxu1 %vm36_vm3, %v11825_v0  ;;  %v15888_v53 = vpop.permute.xlu0 %15887  ;;  %v27213_v0 = vld [vmem:[#allocation4 + $0x79] sm:$0xff] }
 0x857   :  { %v27173_v32 = vsel %vm16279_vm6, %v16276_v25, %v15890_v27  ;;  %v27176_v19 = vsel %vm16279_vm6, %v16275_v17, %v15888_v53  ;;  %v27217_v25 = vld [vmem:[#allocation4 + $0x81] sm:$0xff]  ;;  %v27221_v27 = vld [vmem:[#allocation4 + $0x91] sm:$0xff]  ;;  %v27225_v17 = vld [vmem:[#allocation4 + $0x99] sm:$0xff] }
 0x858   :  { %29377 = vst [vmem:[#allocation59_spill] sm:$0xff] %v27173_v32  ;;  %29378 = vst [vmem:[#allocation60_spill] sm:$0xff] %v27176_v19  ;;  %v27229_v53 = vld [vmem:[#allocation4 + $0xa9] sm:$0xff]  ;;  %v27245_v19 = vld [vmem:[#allocation4 + $0xd9] sm:$0xff] }
 0x859   :  { %20781 = vmatmul.mubr.msk.f32.vlgmr.msra.gmra.mrb[64].mxu1 %vm36_vm3, %v11826_v20  ;;  %v27237_v20 = vld [vmem:[#allocation4 + $0xc1] sm:$0xff] }
 0x85a   :  { %21507 = vmatpush3.bf16.msra.mxu1 %v26725_v4  ;;  %20783 = vmatprep.mubr.msk.f32.mxu1 %vm36_vm3, %v27185_v31  ;;  %v27201_v4 = vld [vmem:[#allocation4 + $0x51] sm:$0xff]  ;;  %v27249_v32 = vld [vmem:[#allocation4 + $0xe1] sm:$0xff] }
 0x85b   :  { %21509 = vmatprep.subr.bf16.mxu1 %v21508_v13 }
 0x85d   :  { %20784 = vmatmul.mubr.msk.f32.gmra.mrb[66].mxu1 %vm36_vm3, %v27192_v34 }
 0x85e   :  { %20786 = vmatprep.mubr.msk.f32.mxu1 %vm36_vm3, %v27196_v3  ;;  %21511 = vmatpush3.bf16.msra.mxu1 %v21508_v13  ;;  %v27233_v13 = vld [vmem:[#allocation4 + $0xb1] sm:$0xff] }
 0x85f   :  { %21513 = vmatprep.subr.bf16.mxu1 %v27190_v5 }
 0x861   :  { %20787 = vmatmul.mubr.msk.f32.gmra.mrb[68].mxu1 %vm36_vm3, %v27201_v4 }
 0x862   :  { %20789 = vmatprep.mubr.msk.f32.mxu1 %vm36_vm3, %v27205_v47 }
 0x865   :  { %20790 = vmatmul.mubr.msk.f32.gmra.mrb[70].mxu1 %vm36_vm3, %v27209_v16 }
 0x866   :  { %20792 = vmatprep.mubr.msk.f32.mxu1 %vm36_vm3, %v27213_v0 }
 0x869   :  { %20793 = vmatmul.mubr.msk.f32.gmra.mrb[72].mxu1 %vm36_vm3, %v27217_v25 }
 0x86a   :  { %20795 = vmatprep.mubr.msk.f32.mxu1 %vm36_vm3, %v27221_v27 }
 0x86d   :  { %20796 = vmatmul.mubr.msk.f32.gmra.mrb[74].mxu1 %vm36_vm3, %v27225_v17 }
 0x86e   :  { %20798 = vmatprep.mubr.msk.f32.mxu1 %vm36_vm3, %v27229_v53 }
 0x871   :  { %20799 = vmatmul.mubr.msk.f32.gmra.mrb[76].mxu1 %vm36_vm3, %v27233_v13 }
 0x872   :  { %20801 = vmatprep.mubr.msk.f32.mxu1 %vm36_vm3, %v27237_v20 }
 0x875   :  { %20802 = vmatmul.mubr.msk.f32.gmra.mrb[78].mxu1 %vm36_vm3, %v27241_v9 }
 0x876   :  { %20804 = vmatprep.mubr.msk.f32.mxu1 %vm36_vm3, %v27245_v19 }
 0x879   :  { %20805 = vmatmul.mubr.msk.f32.gmra.mrb[80].mxu1 %vm36_vm3, %v27249_v32 }
 0x87a   :  { %20807 = vmatprep.mubr.msk.f32.mxu1 %vm36_vm3, %v27253_v29 }
 0x87d   :  { %20808 = vmatmul.mubr.msk.f32.gmra.mrb[82].mxu1 %vm36_vm3, %v27257_v42 }
 0x87e   :  { %20810 = vmatprep.mubr.msk.f32.mxu1 %vm36_vm3, %v27261_v15 }
 0x881   :  { %20811 = vmatmul.mubr.msk.f32.gmra.mrb[84].mxu1 %vm36_vm3, %v27265_v18 }
 0x882   :  { %20813 = vmatprep.mubr.msk.f32.mxu1 %vm36_vm3, %v27269_v10 }
 0x885   :  { %20814 = vmatmul.mubr.msk.f32.gmra.mrb[86].mxu1 %vm36_vm3, %v27273_v62 }
 0x886   :  { %20816 = vmatprep.mubr.msk.f32.mxu1 %vm36_vm3, %v27277_v60 }
 0x889   :  { %20817 = vmatmul.mubr.msk.f32.gmra.mrb[88].mxu1 %vm36_vm3, %v27281_v8 }
 0x88a   :  { %20819 = vmatprep.mubr.msk.f32.mxu1 %vm36_vm3, %v27285_v12 }
 0x88d   :  { %20820 = vmatmul.mubr.msk.f32.gmra.mrb[90].mxu1 %vm36_vm3, %v27289_v51 }
 0x88e   :  { %20822 = vmatprep.mubr.msk.f32.mxu1 %vm36_vm3, %v27293_v21 }
 0x891   :  { %20823 = vmatmul.mubr.msk.f32.gmra.mrb[92].mxu1 %vm36_vm3, %v27297_v58 }
 0x892   :  { %20825 = vmatprep.mubr.msk.f32.mxu1 %vm36_vm3, %v27301_v11 }
 0x895   :  { %20826 = vmatmul.mubr.msk.f32.gmra.mrb[94].mxu1 %vm36_vm3, %v27305_v56 }
 0x896   :  { %20828 = vmatprep.mubr.msk.f32.mxu1 %vm36_vm3, %v11857_v40  ;;  %v27331_v40 = vld [vmem:[#allocation4 + $0x219] sm:$0xff] }
 0x897   :  { %29383 = vst [vmem:[#allocation65_spill] sm:$0xff] %v27331_v40 }
 0x899   :  { %20829 = vmatmul.mubr.msk.f32.gmra.mrb[96].mxu1 %vm36_vm3, %v11858_v22  ;;  %v27327_v22 = vld [vmem:[#allocation4 + $0x211] sm:$0xff] }
 0x89a   :  { %20831 = vmatprep.mubr.msk.f32.mxu1 %vm36_vm3, %v27311_v63  ;;  %29382 = vst [vmem:[#allocation64_spill] sm:$0xff] %v27327_v22 }
 0x89d   :  { %20832 = vmatmul.mubr.msk.f32.gmra.mrb[98].mxu1 %vm36_vm3, %v27315_v54  ;;  %v27445_v54 = vld [vmem:[#allocation4 + $0x32] sm:$0xff] }
 0x89e   :  { %20834 = vmatprep.mubr.msk.f32.mxu1 %vm36_vm3, %v27319_v48  ;;  %v17590_v48 = vld [vmem:[%s28495_s4 + $0xe8] sm:$0xff]  ;;  %29408 = vst [vmem:[#allocation163_spill] sm:$0xff] %v27445_v54 }
 0x8a1   :  { %20835 = vmatmul.mubr.msk.f32.gmra.mrb[100].mxu1 %vm36_vm3, %v27323_v7  ;;  %v12536_v7 = vld [vmem:[#allocation4 + $0x22] sm:$0xff] }
 0x8a2   :  { %20837 = vmatprep.mubr.msk.f32.mxu1 %vm36_vm3, %v27327_v22  ;;  %v12535_v22 = vld [vmem:[#allocation4 + $0x1a] sm:$0xff] }
 0x8a5   :  { %20838 = vmatmul.mubr.msk.f32.gmra.mrb[102].mxu1 %vm36_vm3, %v27331_v40  ;;  %v27351_v40 = vld [vmem:[#allocation4 + $0x259] sm:$0xff] }
 0x8a6   :  { %20840 = vmatprep.mubr.msk.f32.mxu1 %vm36_vm3, %v27335_v59  ;;  %29388 = vst [vmem:[#allocation143_spill] sm:$0xff] %v27351_v40  ;;  %v27355_v59 = vld [vmem:[#allocation4 + $0x261] sm:$0xff] }
 0x8a7   :  { %29389 = vst [vmem:[#allocation144_spill] sm:$0xff] %v27355_v59 }
 0x8a9   :  { %20841 = vmatmul.mubr.msk.f32.gmra.mrb[104].mxu1 %vm36_vm3, %v27339_v49  ;;  %v27359_v49 = vld [vmem:[#allocation4 + $0x271] sm:$0xff] }
 0x8aa   :  { %20843 = vmatprep.mubr.msk.f32.mxu1 %vm36_vm3, %v27343_v14  ;;  %29390 = vst [vmem:[#allocation145_spill] sm:$0xff] %v27359_v49  ;;  %v27363_v14 = vld [vmem:[#allocation4 + $0x279] sm:$0xff] }
 0x8ab   :  { %29391 = vst [vmem:[#allocation146_spill] sm:$0xff] %v27363_v14 }
 0x8ad   :  { %20844 = vmatmul.mubr.msk.f32.gmra.mrb[106].mxu1 %vm36_vm3, %v27347_v24  ;;  %v27367_v24 = vld [vmem:[#allocation4 + $0x289] sm:$0xff] }
 0x8ae   :  { %20846 = vmatprep.mubr.msk.f32.mxu1 %vm36_vm3, %v27351_v40  ;;  %29392 = vst [vmem:[#allocation147_spill] sm:$0xff] %v27367_v24  ;;  %v27371_v40 = vld [vmem:[#allocation4 + $0x291] sm:$0xff] }
 0x8af   :  { %29393 = vst [vmem:[#allocation148_spill] sm:$0xff] %v27371_v40 }
 0x8b1   :  { %20847 = vmatmul.mubr.msk.f32.gmra.mrb[108].mxu1 %vm36_vm3, %v27355_v59  ;;  %v27375_v59 = vld [vmem:[#allocation4 + $0x2a1] sm:$0xff] }
 0x8b2   :  { %20849 = vmatprep.mubr.msk.f32.mxu1 %vm36_vm3, %v27359_v49  ;;  %29394 = vst [vmem:[#allocation149_spill] sm:$0xff] %v27375_v59  ;;  %v27379_v49 = vld [vmem:[#allocation4 + $0x2a9] sm:$0xff] }
 0x8b3   :  { %29395 = vst [vmem:[#allocation150_spill] sm:$0xff] %v27379_v49 }
 0x8b5   :  { %20850 = vmatmul.mubr.msk.f32.gmra.mrb[110].mxu1 %vm36_vm3, %v27363_v14  ;;  %v27383_v14 = vld [vmem:[#allocation4 + $0x2b9] sm:$0xff] }
 0x8b6   :  { %20852 = vmatprep.mubr.msk.f32.mxu1 %vm36_vm3, %v27367_v24  ;;  %29396 = vst [vmem:[#allocation151_spill] sm:$0xff] %v27383_v14  ;;  %v27387_v24 = vld [vmem:[#allocation4 + $0x2c1] sm:$0xff] }
 0x8b7   :  { %29397 = vst [vmem:[#allocation152_spill] sm:$0xff] %v27387_v24 }
 0x8b9   :  { %20853 = vmatmul.mubr.msk.f32.gmra.mrb[112].mxu1 %vm36_vm3, %v27371_v40  ;;  %v27391_v40 = vld [vmem:[#allocation4 + $0x2d1] sm:$0xff] }
 0x8ba   :  { %20855 = vmatprep.mubr.msk.f32.mxu1 %vm36_vm3, %v27375_v59  ;;  %29398 = vst [vmem:[#allocation153_spill] sm:$0xff] %v27391_v40  ;;  %v27395_v59 = vld [vmem:[#allocation4 + $0x2d9] sm:$0xff] }
 0x8bb   :  { %29399 = vst [vmem:[#allocation154_spill] sm:$0xff] %v27395_v59 }
 0x8bd   :  { %20856 = vmatmul.mubr.msk.f32.gmra.mrb[114].mxu1 %vm36_vm3, %v27379_v49  ;;  %v27399_v49 = vld [vmem:[#allocation4 + $0x2e9] sm:$0xff] }
 0x8be   :  { %20858 = vmatprep.mubr.msk.f32.mxu1 %vm36_vm3, %v27383_v14  ;;  %29400 = vst [vmem:[#allocation155_spill] sm:$0xff] %v27399_v49  ;;  %v27403_v14 = vld [vmem:[#allocation4 + $0x2f1] sm:$0xff] }
 0x8bf   :  { %29401 = vst [vmem:[#allocation156_spill] sm:$0xff] %v27403_v14 }
 0x8c1   :  { %20859 = vmatmul.mubr.msk.f32.gmra.mrb[116].mxu1 %vm36_vm3, %v27387_v24  ;;  %v27407_v24 = vld [vmem:[#allocation4 + $0x301] sm:$0xff] }
 0x8c2   :  { %20861 = vmatprep.mubr.msk.f32.mxu1 %vm36_vm3, %v27391_v40  ;;  %29402 = vst [vmem:[#allocation157_spill] sm:$0xff] %v27407_v24  ;;  %v27411_v40 = vld [vmem:[#allocation4 + $0x309] sm:$0xff] }
 0x8c3   :  { %29403 = vst [vmem:[#allocation158_spill] sm:$0xff] %v27411_v40 }
 0x8c5   :  { %20862 = vmatmul.mubr.msk.f32.gmra.mrb[118].mxu1 %vm36_vm3, %v27395_v59  ;;  %v27415_v59 = vld [vmem:[#allocation4 + $0x319] sm:$0xff] }
 0x8c6   :  { %20864 = vmatprep.mubr.msk.f32.mxu1 %vm36_vm3, %v27399_v49  ;;  %29404 = vst [vmem:[#allocation159_spill] sm:$0xff] %v27415_v59  ;;  %v27419_v49 = vld [vmem:[#allocation4 + $0x321] sm:$0xff] }
 0x8c7   :  { %29405 = vst [vmem:[#allocation160_spill] sm:$0xff] %v27419_v49 }
 0x8c9   :  { %20865 = vmatmul.mubr.msk.f32.gmra.mrb[120].mxu1 %vm36_vm3, %v27403_v14  ;;  %v27423_v14 = vld [vmem:[#allocation4 + $0x331] sm:$0xff] }
 0x8ca   :  { %20867 = vmatprep.mubr.msk.f32.mxu1 %vm36_vm3, %v27407_v24  ;;  %29406 = vst [vmem:[#allocation161_spill] sm:$0xff] %v27423_v14  ;;  %v27427_v24 = vld [vmem:[#allocation4 + $0x339] sm:$0xff] }
 0x8cb   :  { %29407 = vst [vmem:[#allocation162_spill] sm:$0xff] %v27427_v24 }
 0x8cd   :  { %20868 = vmatmul.mubr.msk.f32.gmra.mrb[122].mxu1 %vm36_vm3, %v27411_v40  ;;  %v17523_v40 = vld [vmem:[%s28495_s4 + $0xd0] sm:$0xff] }
 0x8ce   :  { %20870 = vmatprep.mubr.msk.f32.mxu1 %vm36_vm3, %v27415_v59  ;;  %v17524_v59 = vld [vmem:[%s28495_s4 + $0xd8] sm:$0xff] }
 0x8d1   :  { %20871 = vmatmul.mubr.msk.f32.gmra.mrb[124].mxu1 %vm36_vm3, %v27419_v49  ;;  %v21516_v49 = vpack.c.bf16 %v17524_v59, %v17523_v40  ;;  %v27456_v40 = vld [vmem:[#allocation4 + $0x4a] sm:$0xff] }
 0x8d2   :  { %20873 = vmatprep.mubr.msk.f32.mxu1 %vm36_vm3, %v27423_v14  ;;  %v17589_v14 = vld [vmem:[%s28495_s4 + $0xe0] sm:$0xff]  ;;  %29410 = vst [vmem:[#allocation165_spill] sm:$0xff] %v27456_v40 }
 0x8d3   :  { %v27450_v59 = vpack.c.bf16 %v17590_v48, %v17589_v14  ;;  %v27465_v14 = vld [vmem:[#allocation4 + $0x62] sm:$0xff]  ;;  %v27469_v48 = vld [vmem:[#allocation4 + $0x6a] sm:$0xff] }
 0x8d4   :  { %29412 = vst [vmem:[#allocation167_spill] sm:$0xff] %v27465_v14  ;;  %29413 = vst [vmem:[#allocation168_spill] sm:$0xff] %v27469_v48 }
 0x8d5   :  { %20874 = vmatmul.mubr.msk.f32.gmra.mrb[126].mxu1 %vm36_vm3, %v27427_v24  ;;  %v13248_v24 = vld [vmem:[#allocation4 + $0x48] sm:$0xff] }
 0x8d6   :  { %20884 = vmatprep.mubr.msk.f32.mxu1 %vm36_vm3, %v12535_v22  ;;  %v27452_v22 = vld [vmem:[#allocation4 + $0x3a] sm:$0xff] }
 0x8d7   :  { %29409 = vst [vmem:[#allocation164_spill] sm:$0xff] %v27452_v22 }
 0x8d9   :  { %20885 = vmatmul.mubr.msk.f32.vlgmr.msra.gmra.mrb[64].mxu1 %vm36_vm3, %v12536_v7  ;;  %v27461_v7 = vld [vmem:[#allocation4 + $0x52] sm:$0xff] }
 0x8da   :  { %21515 = vmatpush3.bf16.msra.mxu1 %v27190_v5  ;;  %20887 = vmatprep.mubr.msk.f32.mxu1 %vm36_vm3, %v27445_v54  ;;  %29411 = vst [vmem:[#allocation166_spill] sm:$0xff] %v27461_v7  ;;  %v27473_v5 = vld [vmem:[#allocation4 + $0x7a] sm:$0xff]  ;;  %v17658_v54 = vld [vmem:[%s28495_s4 + $0x108] sm:$0xff] }
 0x8db   :  { %21517 = vmatprep.subr.bf16.mxu1 %v21516_v49  ;;  %29414 = vst [vmem:[#allocation169_spill] sm:$0xff] %v27473_v5 }
 0x8dd   :  { %20888 = vmatmul.mubr.msk.f32.gmra.mrb[66].mxu1 %vm36_vm3, %v27452_v22  ;;  %v13247_v22 = vld [vmem:[#allocation4 + $0x38] sm:$0xff] }
 0x8de   :  { %20890 = vmatprep.mubr.msk.f32.mxu1 %vm36_vm3, %v27456_v40  ;;  %21519 = vmatpush3.bf16.msra.mxu1 %v21516_v49  ;;  %v27477_v49 = vld [vmem:[#allocation4 + $0x82] sm:$0xff]  ;;  %v12568_v40 = vld [vmem:[#allocation4 + $0x1d2] sm:$0xff] }
 0x8df   :  { %21521 = vmatprep.subr.bf16.mxu1 %v27450_v59  ;;  %29415 = vst [vmem:[#allocation170_spill] sm:$0xff] %v27477_v49 }
 0x8e1   :  { %20891 = vmatmul.mubr.msk.f32.gmra.mrb[68].mxu1 %vm36_vm3, %v27461_v7  ;;  %v27481_v7 = vld [vmem:[#allocation4 + $0x92] sm:$0xff] }
 0x8e2   :  { %20893 = vmatprep.mubr.msk.f32.mxu1 %vm36_vm3, %v27465_v14  ;;  %29416 = vst [vmem:[#allocation171_spill] sm:$0xff] %v27481_v7  ;;  %v27485_v14 = vld [vmem:[#allocation4 + $0x9a] sm:$0xff] }
 0x8e3   :  { %29417 = vst [vmem:[#allocation172_spill] sm:$0xff] %v27485_v14 }
 0x8e5   :  { %20894 = vmatmul.mubr.msk.f32.gmra.mrb[70].mxu1 %vm36_vm3, %v27469_v48  ;;  %v27489_v48 = vld [vmem:[#allocation4 + $0xaa] sm:$0xff] }
 0x8e6   :  { %20896 = vmatprep.mubr.msk.f32.mxu1 %vm36_vm3, %v27473_v5  ;;  %29418 = vst [vmem:[#allocation173_spill] sm:$0xff] %v27489_v48  ;;  %v27493_v5 = vld [vmem:[#allocation4 + $0xb2] sm:$0xff] }
 0x8e7   :  { %29419 = vst [vmem:[#allocation174_spill] sm:$0xff] %v27493_v5 }
 0x8e9   :  { %20897 = vmatmul.mubr.msk.f32.gmra.mrb[72].mxu1 %vm36_vm3, %v27477_v49  ;;  %v27497_v49 = vld [vmem:[#allocation4 + $0xc2] sm:$0xff] }
 0x8ea   :  { %20899 = vmatprep.mubr.msk.f32.mxu1 %vm36_vm3, %v27481_v7  ;;  %29420 = vst [vmem:[#allocation175_spill] sm:$0xff] %v27497_v49  ;;  %v27501_v7 = vld [vmem:[#allocation4 + $0xca] sm:$0xff] }
 0x8eb   :  { %29421 = vst [vmem:[#allocation176_spill] sm:$0xff] %v27501_v7 }
 0x8ed   :  { %20900 = vmatmul.mubr.msk.f32.gmra.mrb[74].mxu1 %vm36_vm3, %v27485_v14  ;;  %v27505_v14 = vld [vmem:[#allocation4 + $0xda] sm:$0xff] }
 0x8ee   :  { %20902 = vmatprep.mubr.msk.f32.mxu1 %vm36_vm3, %v27489_v48  ;;  %29422 = vst [vmem:[#allocation177_spill] sm:$0xff] %v27505_v14  ;;  %v27509_v48 = vld [vmem:[#allocation4 + $0xe2] sm:$0xff] }
 0x8ef   :  { %29423 = vst [vmem:[#allocation178_spill] sm:$0xff] %v27509_v48 }
 0x8f1   :  { %20903 = vmatmul.mubr.msk.f32.gmra.mrb[76].mxu1 %vm36_vm3, %v27493_v5  ;;  %v27513_v5 = vld [vmem:[#allocation4 + $0xf2] sm:$0xff] }
 0x8f2   :  { %20905 = vmatprep.mubr.msk.f32.mxu1 %vm36_vm3, %v27497_v49  ;;  %29424 = vst [vmem:[#allocation179_spill] sm:$0xff] %v27513_v5  ;;  %v27517_v49 = vld [vmem:[#allocation4 + $0xfa] sm:$0xff] }
 0x8f3   :  { %29425 = vst [vmem:[#allocation180_spill] sm:$0xff] %v27517_v49 }
 0x8f5   :  { %20906 = vmatmul.mubr.msk.f32.gmra.mrb[78].mxu1 %vm36_vm3, %v27501_v7  ;;  %v27521_v7 = vld [vmem:[#allocation4 + $0x10a] sm:$0xff] }
 0x8f6   :  { %20908 = vmatprep.mubr.msk.f32.mxu1 %vm36_vm3, %v27505_v14  ;;  %29426 = vst [vmem:[#allocation181_spill] sm:$0xff] %v27521_v7  ;;  %v27525_v14 = vld [vmem:[#allocation4 + $0x112] sm:$0xff] }
 0x8f7   :  { %29427 = vst [vmem:[#allocation182_spill] sm:$0xff] %v27525_v14 }
 0x8f9   :  { %20909 = vmatmul.mubr.msk.f32.gmra.mrb[80].mxu1 %vm36_vm3, %v27509_v48  ;;  %v27529_v48 = vld [vmem:[#allocation4 + $0x122] sm:$0xff] }
 0x8fa   :  { %20911 = vmatprep.mubr.msk.f32.mxu1 %vm36_vm3, %v27513_v5  ;;  %29428 = vst [vmem:[#allocation183_spill] sm:$0xff] %v27529_v48  ;;  %v27533_v5 = vld [vmem:[#allocation4 + $0x12a] sm:$0xff] }
 0x8fb   :  { %29429 = vst [vmem:[#allocation184_spill] sm:$0xff] %v27533_v5 }
 0x8fd   :  { %20912 = vmatmul.mubr.msk.f32.gmra.mrb[82].mxu1 %vm36_vm3, %v27517_v49  ;;  %v27537_v49 = vld [vmem:[#allocation4 + $0x13a] sm:$0xff] }
 0x8fe   :  { %20914 = vmatprep.mubr.msk.f32.mxu1 %vm36_vm3, %v27521_v7  ;;  %29430 = vst [vmem:[#allocation185_spill] sm:$0xff] %v27537_v49  ;;  %v27541_v7 = vld [vmem:[#allocation4 + $0x142] sm:$0xff] }
 0x8ff   :  { %29431 = vst [vmem:[#allocation186_spill] sm:$0xff] %v27541_v7 }
 0x901   :  { %20915 = vmatmul.mubr.msk.f32.gmra.mrb[84].mxu1 %vm36_vm3, %v27525_v14  ;;  %v27545_v14 = vld [vmem:[#allocation4 + $0x152] sm:$0xff] }
 0x902   :  { %20917 = vmatprep.mubr.msk.f32.mxu1 %vm36_vm3, %v27529_v48  ;;  %29432 = vst [vmem:[#allocation187_spill] sm:$0xff] %v27545_v14  ;;  %v27549_v48 = vld [vmem:[#allocation4 + $0x15a] sm:$0xff] }
 0x903   :  { %29433 = vst [vmem:[#allocation188_spill] sm:$0xff] %v27549_v48 }
 0x905   :  { %20918 = vmatmul.mubr.msk.f32.gmra.mrb[86].mxu1 %vm36_vm3, %v27533_v5  ;;  %v27553_v5 = vld [vmem:[#allocation4 + $0x16a] sm:$0xff] }
 0x906   :  { %20920 = vmatprep.mubr.msk.f32.mxu1 %vm36_vm3, %v27537_v49  ;;  %29434 = vst [vmem:[#allocation189_spill] sm:$0xff] %v27553_v5  ;;  %v27557_v49 = vld [vmem:[#allocation4 + $0x172] sm:$0xff] }
 0x907   :  { %29435 = vst [vmem:[#allocation190_spill] sm:$0xff] %v27557_v49 }
 0x909   :  { %20921 = vmatmul.mubr.msk.f32.gmra.mrb[88].mxu1 %vm36_vm3, %v27541_v7  ;;  %v27561_v7 = vld [vmem:[#allocation4 + $0x182] sm:$0xff] }
 0x90a   :  { %20923 = vmatprep.mubr.msk.f32.mxu1 %vm36_vm3, %v27545_v14  ;;  %29436 = vst [vmem:[#allocation191_spill] sm:$0xff] %v27561_v7  ;;  %v27565_v14 = vld [vmem:[#allocation4 + $0x18a] sm:$0xff] }
 0x90b   :  { %29437 = vst [vmem:[#allocation192_spill] sm:$0xff] %v27565_v14 }
 0x90d   :  { %20924 = vmatmul.mubr.msk.f32.gmra.mrb[90].mxu1 %vm36_vm3, %v27549_v48  ;;  %v12567_v48 = vld [vmem:[#allocation4 + $0x1ca] sm:$0xff] }
 0x90e   :  { %20926 = vmatprep.mubr.msk.f32.mxu1 %vm36_vm3, %v27553_v5  ;;  %v27571_v5 = vld [vmem:[#allocation4 + $0x1e2] sm:$0xff] }
 0x90f   :  { %29438 = vst [vmem:[#allocation193_spill] sm:$0xff] %v27571_v5 }
 0x911   :  { %20927 = vmatmul.mubr.msk.f32.gmra.mrb[92].mxu1 %vm36_vm3, %v27557_v49  ;;  %v27575_v49 = vld [vmem:[#allocation4 + $0x1ea] sm:$0xff] }
 0x912   :  { %20929 = vmatprep.mubr.msk.f32.mxu1 %vm36_vm3, %v27561_v7  ;;  %29439 = vst [vmem:[#allocation194_spill] sm:$0xff] %v27575_v49  ;;  %v27579_v7 = vld [vmem:[#allocation4 + $0x1fa] sm:$0xff] }
 0x913   :  { %29440 = vst [vmem:[#allocation195_spill] sm:$0xff] %v27579_v7 }
 0x915   :  { %20930 = vmatmul.mubr.msk.f32.gmra.mrb[94].mxu1 %vm36_vm3, %v27565_v14  ;;  %v27583_v14 = vld [vmem:[#allocation4 + $0x202] sm:$0xff] }
 0x916   :  { %20932 = vmatprep.mubr.msk.f32.mxu1 %vm36_vm3, %v12567_v48  ;;  %29441 = vst [vmem:[#allocation196_spill] sm:$0xff] %v27583_v14  ;;  %v27591_v48 = vld [vmem:[#allocation4 + $0x21a] sm:$0xff] }
 0x917   :  { %29443 = vst [vmem:[#allocation198_spill] sm:$0xff] %v27591_v48 }
 0x919   :  { %20933 = vmatmul.mubr.msk.f32.gmra.mrb[96].mxu1 %vm36_vm3, %v12568_v40  ;;  %v27587_v40 = vld [vmem:[#allocation4 + $0x212] sm:$0xff] }
 0x91a   :  { %20935 = vmatprep.mubr.msk.f32.mxu1 %vm36_vm3, %v27571_v5  ;;  %29442 = vst [vmem:[#allocation197_spill] sm:$0xff] %v27587_v40  ;;  %v13246_v5 = vld [vmem:[#allocation4 + $0x30] sm:$0xff] }
 0x91d   :  { %20936 = vmatmul.mubr.msk.f32.gmra.mrb[98].mxu1 %vm36_vm3, %v27575_v49  ;;  %v27595_v49 = vld [vmem:[#allocation4 + $0x22a] sm:$0xff] }
 0x91e   :  { %20938 = vmatprep.mubr.msk.f32.mxu1 %vm36_vm3, %v27579_v7  ;;  %29444 = vst [vmem:[#allocation199_spill] sm:$0xff] %v27595_v49  ;;  %v27599_v7 = vld [vmem:[#allocation4 + $0x232] sm:$0xff] }
 0x91f   :  { %29445 = vst [vmem:[#allocation200_spill] sm:$0xff] %v27599_v7 }
 0x921   :  { %20939 = vmatmul.mubr.msk.f32.gmra.mrb[100].mxu1 %vm36_vm3, %v27583_v14  ;;  %v27603_v14 = vld [vmem:[#allocation4 + $0x242] sm:$0xff] }
 0x922   :  { %20941 = vmatprep.mubr.msk.f32.mxu1 %vm36_vm3, %v27587_v40  ;;  %29446 = vst [vmem:[#allocation201_spill] sm:$0xff] %v27603_v14  ;;  %v27607_v40 = vld [vmem:[#allocation4 + $0x24a] sm:$0xff] }
 0x923   :  { %29447 = vst [vmem:[#allocation202_spill] sm:$0xff] %v27607_v40 }
 0x925   :  { %20942 = vmatmul.mubr.msk.f32.gmra.mrb[102].mxu1 %vm36_vm3, %v27591_v48  ;;  %v27611_v48 = vld [vmem:[#allocation4 + $0x25a] sm:$0xff] }
 0x926   :  { %20944 = vmatprep.mubr.msk.f32.mxu1 %vm36_vm3, %v27595_v49  ;;  %29448 = vst [vmem:[#allocation203_spill] sm:$0xff] %v27611_v48  ;;  %v27615_v49 = vld [vmem:[#allocation4 + $0x262] sm:$0xff] }
 0x927   :  { %29449 = vst [vmem:[#allocation204_spill] sm:$0xff] %v27615_v49 }
 0x929   :  { %20945 = vmatmul.mubr.msk.f32.gmra.mrb[104].mxu1 %vm36_vm3, %v27599_v7  ;;  %v27619_v7 = vld [vmem:[#allocation4 + $0x272] sm:$0xff] }
 0x92a   :  { %20947 = vmatprep.mubr.msk.f32.mxu1 %vm36_vm3, %v27603_v14  ;;  %29450 = vst [vmem:[#allocation205_spill] sm:$0xff] %v27619_v7  ;;  %v27623_v14 = vld [vmem:[#allocation4 + $0x27a] sm:$0xff] }
 0x92b   :  { %29451 = vst [vmem:[#allocation206_spill] sm:$0xff] %v27623_v14 }
 0x92d   :  { %20948 = vmatmul.mubr.msk.f32.gmra.mrb[106].mxu1 %vm36_vm3, %v27607_v40  ;;  %v27627_v40 = vld [vmem:[#allocation4 + $0x28a] sm:$0xff] }
 0x92e   :  { %20950 = vmatprep.mubr.msk.f32.mxu1 %vm36_vm3, %v27611_v48  ;;  %29452 = vst [vmem:[#allocation207_spill] sm:$0xff] %v27627_v40  ;;  %v27631_v48 = vld [vmem:[#allocation4 + $0x292] sm:$0xff] }
 0x92f   :  { %29453 = vst [vmem:[#allocation208_spill] sm:$0xff] %v27631_v48 }
 0x931   :  { %20951 = vmatmul.mubr.msk.f32.gmra.mrb[108].mxu1 %vm36_vm3, %v27615_v49  ;;  %v27635_v49 = vld [vmem:[#allocation4 + $0x2a2] sm:$0xff] }
 0x932   :  { %20953 = vmatprep.mubr.msk.f32.mxu1 %vm36_vm3, %v27619_v7  ;;  %29454 = vst [vmem:[#allocation209_spill] sm:$0xff] %v27635_v49  ;;  %v27639_v7 = vld [vmem:[#allocation4 + $0x2aa] sm:$0xff] }
 0x933   :  { %29455 = vst [vmem:[#allocation210_spill] sm:$0xff] %v27639_v7 }
 0x935   :  { %20954 = vmatmul.mubr.msk.f32.gmra.mrb[110].mxu1 %vm36_vm3, %v27623_v14  ;;  %v27643_v14 = vld [vmem:[#allocation4 + $0x2ba] sm:$0xff] }
 0x936   :  { %20956 = vmatprep.mubr.msk.f32.mxu1 %vm36_vm3, %v27627_v40  ;;  %29456 = vst [vmem:[#allocation211_spill] sm:$0xff] %v27643_v14  ;;  %v27647_v40 = vld [vmem:[#allocation4 + $0x2c2] sm:$0xff] }
 0x937   :  { %29457 = vst [vmem:[#allocation212_spill] sm:$0xff] %v27647_v40 }
 0x939   :  { %20957 = vmatmul.mubr.msk.f32.gmra.mrb[112].mxu1 %vm36_vm3, %v27631_v48  ;;  %v27651_v48 = vld [vmem:[#allocation4 + $0x2d2] sm:$0xff] }
 0x93a   :  { %20959 = vmatprep.mubr.msk.f32.mxu1 %vm36_vm3, %v27635_v49  ;;  %29458 = vst [vmem:[#allocation213_spill] sm:$0xff] %v27651_v48  ;;  %v27655_v49 = vld [vmem:[#allocation4 + $0x2da] sm:$0xff] }
 0x93b   :  { %29459 = vst [vmem:[#allocation214_spill] sm:$0xff] %v27655_v49 }
 0x93d   :  { %20960 = vmatmul.mubr.msk.f32.gmra.mrb[114].mxu1 %vm36_vm3, %v27639_v7  ;;  %v27659_v7 = vld [vmem:[#allocation4 + $0x2ea] sm:$0xff] }
 0x93e   :  { %20962 = vmatprep.mubr.msk.f32.mxu1 %vm36_vm3, %v27643_v14  ;;  %29460 = vst [vmem:[#allocation215_spill] sm:$0xff] %v27659_v7  ;;  %v27663_v14 = vld [vmem:[#allocation4 + $0x2f2] sm:$0xff] }
 0x93f   :  { %29461 = vst [vmem:[#allocation216_spill] sm:$0xff] %v27663_v14 }
 0x941   :  { %20963 = vmatmul.mubr.msk.f32.gmra.mrb[116].mxu1 %vm36_vm3, %v27647_v40  ;;  %v27667_v40 = vld [vmem:[#allocation4 + $0x302] sm:$0xff] }
 0x942   :  { %20965 = vmatprep.mubr.msk.f32.mxu1 %vm36_vm3, %v27651_v48  ;;  %29462 = vst [vmem:[#allocation217_spill] sm:$0xff] %v27667_v40  ;;  %v27671_v48 = vld [vmem:[#allocation4 + $0x30a] sm:$0xff] }
 0x943   :  { %29463 = vst [vmem:[#allocation218_spill] sm:$0xff] %v27671_v48 }
 0x945   :  { %20966 = vmatmul.mubr.msk.f32.gmra.mrb[118].mxu1 %vm36_vm3, %v27655_v49  ;;  %v27675_v49 = vld [vmem:[#allocation4 + $0x31a] sm:$0xff] }
 0x946   :  { %20968 = vmatprep.mubr.msk.f32.mxu1 %vm36_vm3, %v27659_v7  ;;  %29464 = vst [vmem:[#allocation219_spill] sm:$0xff] %v27675_v49  ;;  %v27679_v7 = vld [vmem:[#allocation4 + $0x322] sm:$0xff] }
 0x947   :  { %29465 = vst [vmem:[#allocation220_spill] sm:$0xff] %v27679_v7 }
 0x949   :  { %20969 = vmatmul.mubr.msk.f32.gmra.mrb[120].mxu1 %vm36_vm3, %v27663_v14  ;;  %v27683_v14 = vld [vmem:[#allocation4 + $0x332] sm:$0xff] }
 0x94a   :  { %20971 = vmatprep.mubr.msk.f32.mxu1 %vm36_vm3, %v27667_v40  ;;  %29466 = vst [vmem:[#allocation221_spill] sm:$0xff] %v27683_v14  ;;  %v27687_v40 = vld [vmem:[#allocation4 + $0x33a] sm:$0xff] }
 0x94b   :  { %29467 = vst [vmem:[#allocation222_spill] sm:$0xff] %v27687_v40 }
 0x94d   :  { %20972 = vmatmul.mubr.msk.f32.gmra.mrb[122].mxu1 %vm36_vm3, %v27671_v48  ;;  %v17591_v48 = vld [vmem:[%s28495_s4 + $0xf0] sm:$0xff] }
 0x94e   :  { %20974 = vmatprep.mubr.msk.f32.mxu1 %vm36_vm3, %v27675_v49  ;;  %v17592_v49 = vld [vmem:[%s28495_s4 + $0xf8] sm:$0xff] }
 0x951   :  { %20975 = vmatmul.mubr.msk.f32.gmra.mrb[124].mxu1 %vm36_vm3, %v27679_v7  ;;  %v21524_v7 = vpack.c.bf16 %v17592_v49, %v17591_v48  ;;  %v13250_v49 = vld [vmem:[#allocation4 + $0x60] sm:$0xff]  ;;  %v13251_v48 = vld [vmem:[#allocation4 + $0x68] sm:$0xff] }
 0x952   :  { %20977 = vmatprep.mubr.msk.f32.mxu1 %vm36_vm3, %v27683_v14  ;;  %v17657_v14 = vld [vmem:[%s28495_s4 + $0x100] sm:$0xff] }
 0x955   :  { %20978 = vmatmul.mubr.msk.f32.gmra.mrb[126].mxu1 %vm36_vm3, %v27687_v40  ;;  %v27707_v40 = vpack.c.bf16 %v17658_v54, %v17657_v14  ;;  %v13255_v54 = vld [vmem:[#allocation4 + $0x98] sm:$0xff]  ;;  %v13256_v14 = vld [vmem:[#allocation4 + $0xa8] sm:$0xff] }
 0x956   :  { %20988 = vmatprep.mubr.msk.f32.mxu1 %vm36_vm3, %v13246_v5  ;;  %v13249_v5 = vld [vmem:[#allocation4 + $0x50] sm:$0xff] }
 0x959   :  { %20989 = vmatmul.mubr.msk.f32.vlgmr.msra.gmra.mrb[64].mxu1 %vm36_vm3, %v13247_v22  ;;  %v13252_v22 = vld [vmem:[#allocation4 + $0x78] sm:$0xff] }
 0x95a   :  { %21523 = vmatpush3.bf16.msra.mxu1 %v27450_v59  ;;  %20991 = vmatprep.mubr.msk.f32.mxu1 %vm36_vm3, %v13248_v24  ;;  %v13253_v59 = vld [vmem:[#allocation4 + $0x80] sm:$0xff]  ;;  %v13254_v24 = vld [vmem:[#allocation4 + $0x90] sm:$0xff] }
 0x95b   :  { %21525 = vmatprep.subr.bf16.mxu1 %v21524_v7 }
 0x95d   :  { %20992 = vmatmul.mubr.msk.f32.gmra.mrb[66].mxu1 %vm36_vm3, %v13249_v5  ;;  %v13258_v5 = vld [vmem:[#allocation4 + $0xc0] sm:$0xff] }
 0x95e   :  { %20994 = vmatprep.mubr.msk.f32.mxu1 %vm36_vm3, %v13250_v49  ;;  %21527 = vmatpush3.bf16.msra.mxu1 %v21524_v7  ;;  %v13257_v7 = vld [vmem:[#allocation4 + $0xb0] sm:$0xff]  ;;  %v13259_v49 = vld [vmem:[#allocation4 + $0xc8] sm:$0xff] }
 0x95f   :  { %21529 = vmatprep.subr.bf16.mxu1 %v27707_v40 }
 0x961   :  { %20995 = vmatmul.mubr.msk.f32.gmra.mrb[68].mxu1 %vm36_vm3, %v13251_v48  ;;  %v22569_v48 = vld [vmem:[#allocation4 + $0xd8] sm:$0xff] }
 0x962   :  { %20997 = vmatprep.mubr.msk.f32.mxu1 %vm36_vm3, %v13252_v22  ;;  %v22570_v22 = vld [vmem:[#allocation4 + $0xe0] sm:$0xff] }
 0x965   :  { %20998 = vmatmul.mubr.msk.f32.gmra.mrb[70].mxu1 %vm36_vm3, %v13253_v59  ;;  %v22571_v59 = vld [vmem:[#allocation4 + $0xf0] sm:$0xff] }
 0x966   :  { %21000 = vmatprep.mubr.msk.f32.mxu1 %vm36_vm3, %v13254_v24  ;;  %v22572_v24 = vld [vmem:[#allocation4 + $0xf8] sm:$0xff] }
 0x969   :  { %21001 = vmatmul.mubr.msk.f32.gmra.mrb[72].mxu1 %vm36_vm3, %v13255_v54  ;;  %v22573_v54 = vld [vmem:[#allocation4 + $0x108] sm:$0xff] }
 0x96a   :  { %21003 = vmatprep.mubr.msk.f32.mxu1 %vm36_vm3, %v13256_v14  ;;  %v22574_v14 = vld [vmem:[#allocation4 + $0x110] sm:$0xff] }
 0x96d   :  { %21004 = vmatmul.mubr.msk.f32.gmra.mrb[74].mxu1 %vm36_vm3, %v13257_v7  ;;  %v22575_v7 = vld [vmem:[#allocation4 + $0x120] sm:$0xff] }
 0x96e   :  { %21006 = vmatprep.mubr.msk.f32.mxu1 %vm36_vm3, %v13258_v5  ;;  %v22576_v5 = vld [vmem:[#allocation4 + $0x128] sm:$0xff] }
 0x971   :  { %21007 = vmatmul.mubr.msk.f32.gmra.mrb[76].mxu1 %vm36_vm3, %v13259_v49  ;;  %v22577_v49 = vld [vmem:[#allocation4 + $0x138] sm:$0xff] }
 0x972   :  { %21009 = vmatprep.mubr.msk.f32.mxu1 %vm36_vm3, %v22569_v48  ;;  %v22578_v48 = vld [vmem:[#allocation4 + $0x140] sm:$0xff] }
 0x975   :  { %21010 = vmatmul.mubr.msk.f32.gmra.mrb[78].mxu1 %vm36_vm3, %v22570_v22  ;;  %v22579_v22 = vld [vmem:[#allocation4 + $0x150] sm:$0xff] }
 0x976   :  { %21012 = vmatprep.mubr.msk.f32.mxu1 %vm36_vm3, %v22571_v59  ;;  %v22580_v59 = vld [vmem:[#allocation4 + $0x158] sm:$0xff] }
 0x979   :  { %21013 = vmatmul.mubr.msk.f32.gmra.mrb[80].mxu1 %vm36_vm3, %v22572_v24  ;;  %v22581_v24 = vld [vmem:[#allocation4 + $0x168] sm:$0xff] }
 0x97a   :  { %21015 = vmatprep.mubr.msk.f32.mxu1 %vm36_vm3, %v22573_v54  ;;  %v22582_v54 = vld [vmem:[#allocation4 + $0x170] sm:$0xff] }
 0x97d   :  { %21016 = vmatmul.mubr.msk.f32.gmra.mrb[82].mxu1 %vm36_vm3, %v22574_v14  ;;  %v22583_v14 = vld [vmem:[#allocation4 + $0x180] sm:$0xff] }
 0x97e   :  { %21018 = vmatprep.mubr.msk.f32.mxu1 %vm36_vm3, %v22575_v7  ;;  %v13276_v7 = vld [vmem:[#allocation4 + $0x198] sm:$0xff] }
 0x981   :  { %21019 = vmatmul.mubr.msk.f32.gmra.mrb[84].mxu1 %vm36_vm3, %v22576_v5  ;;  %v22584_v5 = vld [vmem:[#allocation4 + $0x188] sm:$0xff] }
 0x982   :  { %21021 = vmatprep.mubr.msk.f32.mxu1 %vm36_vm3, %v22577_v49  ;;  %v13277_v49 = vld [vmem:[#allocation4 + $0x1a0] sm:$0xff] }
 0x985   :  { %21022 = vmatmul.mubr.msk.f32.gmra.mrb[86].mxu1 %vm36_vm3, %v22578_v48  ;;  %v22585_v48 = vld [vmem:[#allocation4 + $0x1e0] sm:$0xff] }
 0x986   :  { %21024 = vmatprep.mubr.msk.f32.mxu1 %vm36_vm3, %v22579_v22  ;;  %v22586_v22 = vld [vmem:[#allocation4 + $0x1e8] sm:$0xff] }
 0x989   :  { %21025 = vmatmul.mubr.msk.f32.gmra.mrb[88].mxu1 %vm36_vm3, %v22580_v59  ;;  %v22587_v59 = vld [vmem:[#allocation4 + $0x1f8] sm:$0xff] }
 0x98a   :  { %21027 = vmatprep.mubr.msk.f32.mxu1 %vm36_vm3, %v22581_v24  ;;  %v22588_v24 = vld [vmem:[#allocation4 + $0x200] sm:$0xff] }
 0x98d   :  { %21028 = vmatmul.mubr.msk.f32.gmra.mrb[90].mxu1 %vm36_vm3, %v22582_v54  ;;  %v22589_v54 = vld [vmem:[#allocation4 + $0x210] sm:$0xff] }
 0x98e   :  { %21030 = vmatprep.mubr.msk.f32.mxu1 %vm36_vm3, %v22583_v14  ;;  %v22590_v14 = vld [vmem:[#allocation4 + $0x218] sm:$0xff] }
 0x991   :  { %21031 = vmatmul.mubr.msk.f32.gmra.mrb[92].mxu1 %vm36_vm3, %v22584_v5  ;;  %v29514_v5 = vld [vmem:[#allocation180_spill] sm:$0xff] }
 0x992   :  { %21033 = vmatprep.mubr.msk.f32.mxu1 %vm36_vm3, %v13276_v7  ;;  %v22591_v7 = vld [vmem:[#allocation4 + $0x228] sm:$0xff] }
 0x995   :  { %21034 = vmatmul.mubr.msk.f32.gmra.mrb[94].mxu1 %vm36_vm3, %v13277_v49  ;;  %v29515_v49 = vld [vmem:[#allocation181_spill] sm:$0xff] }
 0x996   :  { %21036 = vmatprep.mubr.msk.f32.mxu1 %vm36_vm3, %v22585_v48  ;;  %v29516_v48 = vld [vmem:[#allocation182_spill] sm:$0xff] }
 0x999   :  { %21037 = vmatmul.mubr.msk.f32.gmra.mrb[96].mxu1 %vm36_vm3, %v22586_v22  ;;  %v29517_v22 = vld [vmem:[#allocation183_spill] sm:$0xff] }
 0x99a   :  { %21039 = vmatprep.mubr.msk.f32.mxu1 %vm36_vm3, %v22587_v59  ;;  %v29518_v59 = vld [vmem:[#allocation184_spill] sm:$0xff] }
 0x99d   :  { %21040 = vmatmul.mubr.msk.f32.gmra.mrb[98].mxu1 %vm36_vm3, %v22588_v24  ;;  %v29519_v24 = vld [vmem:[#allocation185_spill] sm:$0xff] }
 0x99e   :  { %21042 = vmatprep.mubr.msk.f32.mxu1 %vm36_vm3, %v22589_v54  ;;  %v29520_v54 = vld [vmem:[#allocation186_spill] sm:$0xff] }
 0x9a1   :  { %21043 = vmatmul.mubr.msk.f32.gmra.mrb[100].mxu1 %vm36_vm3, %v22590_v14  ;;  %v29521_v14 = vld [vmem:[#allocation187_spill] sm:$0xff] }
 0x9a2   :  { %21045 = vmatprep.mubr.msk.f32.mxu1 %vm36_vm3, %v22591_v7  ;;  %v29522_v7 = vld [vmem:[#allocation188_spill] sm:$0xff] }
 0x9a5   :  { %21046 = vmatmul.mubr.msk.f32.gmra.mrb[102].mxu1 %vm36_vm3, %v26917_v37  ;;  %v13308_v37 = vld [vmem:[#allocation4 + $0x348] sm:$0xff] }
 0x9a6   :  { %21048 = vmatprep.mubr.msk.f32.mxu1 %vm36_vm3, %v26923_v38  ;;  %v13309_v38 = vld [vmem:[#allocation4 + $0x350] sm:$0xff] }
 0x9a9   :  { %21049 = vmatmul.mubr.msk.f32.gmra.mrb[104].mxu1 %vm36_vm3, %v26939_v1  ;;  %v17660_v1 = vld [vmem:[%s28495_s4 + $0x118] sm:$0xff] }
 0x9aa   :  { %21051 = vmatprep.mubr.msk.f32.mxu1 %vm36_vm3, %v26945_v39 }
 0x9ad   :  { %21052 = vmatmul.mubr.msk.f32.gmra.mrb[106].mxu1 %vm36_vm3, %v26961_v23  ;;  %v17659_v23 = vld [vmem:[%s28495_s4 + $0x110] sm:$0xff] }
 0x9ae   :  { %21054 = vmatprep.mubr.msk.f32.mxu1 %vm36_vm3, %v26967_v57  ;;  %v21532_v39 = vpack.c.bf16 %v17660_v1, %v17659_v23  ;;  %v29479_v57 = vld [vmem:[#allocation145_spill] sm:$0xff]  ;;  %v29525_v23 = vld [vmem:[#allocation191_spill] sm:$0xff] }
 0x9af   :  { %v14696_v1 = vld [vmem:[#allocation4 + $0x19a] sm:$0xff] }
 0x9b1   :  { %21055 = vmatmul.mubr.msk.f32.gmra.mrb[108].mxu1 %vm36_vm3, %v26983_v35  ;;  %v29478_v35 = vld [vmem:[#allocation144_spill] sm:$0xff] }
 0x9b2   :  { %21057 = vmatprep.mubr.msk.f32.mxu1 %vm36_vm3, %v26989_v2  ;;  %v29481_v2 = vld [vmem:[#allocation147_spill] sm:$0xff] }
 0x9b5   :  { %21058 = vmatmul.mubr.msk.f32.gmra.mrb[110].mxu1 %vm36_vm3, %v27005_v50  ;;  %v29480_v50 = vld [vmem:[#allocation146_spill] sm:$0xff] }
 0x9b6   :  { %21060 = vmatprep.mubr.msk.f32.mxu1 %vm36_vm3, %v27011_v33  ;;  %v29483_v33 = vld [vmem:[#allocation149_spill] sm:$0xff] }
 0x9b9   :  { %21061 = vmatmul.mubr.msk.f32.gmra.mrb[112].mxu1 %vm36_vm3, %v27027_v43  ;;  %v29482_v43 = vld [vmem:[#allocation148_spill] sm:$0xff] }
 0x9ba   :  { %21063 = vmatprep.mubr.msk.f32.mxu1 %vm36_vm3, %v27033_v52  ;;  %v29485_v52 = vld [vmem:[#allocation151_spill] sm:$0xff] }
 0x9bd   :  { %21064 = vmatmul.mubr.msk.f32.gmra.mrb[114].mxu1 %vm36_vm3, %v27049_v41  ;;  %v29484_v41 = vld [vmem:[#allocation150_spill] sm:$0xff] }
 0x9be   :  { %21066 = vmatprep.mubr.msk.f32.mxu1 %vm36_vm3, %v27055_v55  ;;  %v29487_v55 = vld [vmem:[#allocation153_spill] sm:$0xff] }
 0x9c1   :  { %21067 = vmatmul.mubr.msk.f32.gmra.mrb[116].mxu1 %vm36_vm3, %v27071_v45  ;;  %v29486_v45 = vld [vmem:[#allocation152_spill] sm:$0xff] }
 0x9c2   :  { %21069 = vmatprep.mubr.msk.f32.mxu1 %vm36_vm3, %v27077_v61  ;;  %v29489_v61 = vld [vmem:[#allocation155_spill] sm:$0xff] }
 0x9c5   :  { %21070 = vmatmul.mubr.msk.f32.gmra.mrb[118].mxu1 %vm36_vm3, %v27093_v6  ;;  %v29488_v6 = vld [vmem:[#allocation154_spill] sm:$0xff] }
 0x9c6   :  { %21072 = vmatprep.mubr.msk.f32.mxu1 %vm36_vm3, %v27099_v36  ;;  %v29491_v36 = vld [vmem:[#allocation157_spill] sm:$0xff] }
 0x9c9   :  { %21073 = vmatmul.mubr.msk.f32.gmra.mrb[120].mxu1 %vm36_vm3, %v27115_v26  ;;  %v29490_v26 = vld [vmem:[#allocation156_spill] sm:$0xff] }
 0x9ca   :  { %21075 = vmatprep.mubr.msk.f32.mxu1 %vm36_vm3, %v27121_v28  ;;  %v29493_v28 = vld [vmem:[#allocation159_spill] sm:$0xff] }
 0x9cd   :  { %21076 = vmatmul.mubr.msk.f32.gmra.mrb[122].mxu1 %vm36_vm3, %v27137_v46  ;;  %v29492_v46 = vld [vmem:[#allocation158_spill] sm:$0xff] }
 0x9ce   :  { %21078 = vmatprep.mubr.msk.f32.mxu1 %vm36_vm3, %v27143_v44  ;;  %v14018_v44 = vld [vmem:[#allocation4 + $0x349] sm:$0xff] }
 0x9d1   :  { %21079 = vmatmul.mubr.msk.f32.gmra.mrb[124].mxu1 %vm36_vm3, %v27157_v30  ;;  %v14019_v30 = vld [vmem:[#allocation4 + $0x351] sm:$0xff] }
 0x9d2   :  { %21081 = vmatprep.mubr.msk.f32.mxu1 %vm36_vm3, %v13308_v37  ;;  %v29523_v37 = vld [vmem:[#allocation189_spill] sm:$0xff] }
 0x9d5   :  { %21082 = vmatmul.mubr.msk.f32.gmra.mrb[126].mxu1 %vm36_vm3, %v13309_v38  ;;  %v29524_v38 = vld [vmem:[#allocation190_spill] sm:$0xff] }
 0x9d6   :  { %21092 = vmatprep.mubr.msk.f32.mxu1 %vm36_vm3, %v27185_v31  ;;  %v29499_v31 = vld [vmem:[#allocation165_spill] sm:$0xff] }
 0x9d9   :  { %21093 = vmatmul.mubr.msk.f32.vlgmr.msra.gmra.mrb[64].mxu1 %vm36_vm3, %v27192_v34  ;;  %v29500_v34 = vld [vmem:[#allocation166_spill] sm:$0xff] }
 0x9da   :  { %21531 = vmatpush3.bf16.msra.mxu1 %v27707_v40  ;;  %21095 = vmatprep.mubr.msk.f32.mxu1 %vm36_vm3, %v27196_v3  ;;  %v29501_v3 = vld [vmem:[#allocation167_spill] sm:$0xff] }
 0x9db   :  { %21533 = vmatprep.subr.bf16.mxu1 %v21532_v39  ;;  %v29513_v40 = vld [vmem:[#allocation179_spill] sm:$0xff] }
 0x9dd   :  { %21096 = vmatmul.mubr.msk.f32.gmra.mrb[66].mxu1 %vm36_vm3, %v27201_v4  ;;  %v29502_v4 = vld [vmem:[#allocation168_spill] sm:$0xff] }
 0x9de   :  { %21098 = vmatprep.mubr.msk.f32.mxu1 %vm36_vm3, %v27205_v47  ;;  %21535 = vmatpush3.bf16.msra.mxu1 %v21532_v39  ;;  %v29503_v47 = vld [vmem:[#allocation169_spill] sm:$0xff]  ;;  %v29526_v39 = vld [vmem:[#allocation192_spill] sm:$0xff] }
 0x9e1   :  { %21099 = vmatmul.mubr.msk.f32.gmra.mrb[68].mxu1 %vm36_vm3, %v27209_v16  ;;  %v29504_v16 = vld [vmem:[#allocation170_spill] sm:$0xff] }
 0x9e2   :  { %21101 = vmatprep.mubr.msk.f32.mxu1 %vm36_vm3, %v27213_v0  ;;  %v29505_v0 = vld [vmem:[#allocation171_spill] sm:$0xff] }
 0x9e5   :  { %21102 = vmatmul.mubr.msk.f32.gmra.mrb[70].mxu1 %vm36_vm3, %v27217_v25  ;;  %v29506_v25 = vld [vmem:[#allocation172_spill] sm:$0xff] }
 0x9e6   :  { %21104 = vmatprep.mubr.msk.f32.mxu1 %vm36_vm3, %v27221_v27  ;;  %v29507_v27 = vld [vmem:[#allocation173_spill] sm:$0xff] }
 0x9e9   :  { %21105 = vmatmul.mubr.msk.f32.gmra.mrb[72].mxu1 %vm36_vm3, %v27225_v17  ;;  %v29508_v17 = vld [vmem:[#allocation174_spill] sm:$0xff] }
 0x9ea   :  { %21107 = vmatprep.mubr.msk.f32.mxu1 %vm36_vm3, %v27229_v53  ;;  %v29509_v53 = vld [vmem:[#allocation175_spill] sm:$0xff] }
 0x9ed   :  { %21108 = vmatmul.mubr.msk.f32.gmra.mrb[74].mxu1 %vm36_vm3, %v27233_v13  ;;  %v29510_v13 = vld [vmem:[#allocation176_spill] sm:$0xff] }
 0x9ee   :  { %21110 = vmatprep.mubr.msk.f32.mxu1 %vm36_vm3, %v27237_v20  ;;  %v29511_v20 = vld [vmem:[#allocation177_spill] sm:$0xff] }
 0x9f1   :  { %21111 = vmatmul.mubr.msk.f32.gmra.mrb[76].mxu1 %vm36_vm3, %v27241_v9  ;;  %v29512_v9 = vld [vmem:[#allocation178_spill] sm:$0xff] }
 0x9f2   :  { %21113 = vmatprep.mubr.msk.f32.mxu1 %vm36_vm3, %v27245_v19  ;;  %v29498_v19 = vld [vmem:[#allocation164_spill] sm:$0xff] }
 0x9f5   :  { %21114 = vmatmul.mubr.msk.f32.gmra.mrb[78].mxu1 %vm36_vm3, %v27249_v32  ;;  %v29497_v32 = vld [vmem:[#allocation163_spill] sm:$0xff] }
 0x9f6   :  { %21116 = vmatprep.mubr.msk.f32.mxu1 %vm36_vm3, %v27253_v29  ;;  %v29496_v29 = vld [vmem:[#allocation162_spill] sm:$0xff] }
 0x9f9   :  { %21117 = vmatmul.mubr.msk.f32.gmra.mrb[80].mxu1 %vm36_vm3, %v27257_v42  ;;  %v29495_v42 = vld [vmem:[#allocation161_spill] sm:$0xff] }
 0x9fa   :  { %21119 = vmatprep.mubr.msk.f32.mxu1 %vm36_vm3, %v27261_v15  ;;  %v29494_v15 = vld [vmem:[#allocation160_spill] sm:$0xff] }
 0x9fd   :  { %21120 = vmatmul.mubr.msk.f32.gmra.mrb[82].mxu1 %vm36_vm3, %v27265_v18  ;;  %v29477_v18 = vld [vmem:[#allocation143_spill] sm:$0xff] }
 0x9fe   :  { %21122 = vmatprep.mubr.msk.f32.mxu1 %vm36_vm3, %v27269_v10  ;;  %v29476_v10 = vld [vmem:[#allocation69_spill] sm:$0xff] }
 0xa01   :  { %21123 = vmatmul.mubr.msk.f32.gmra.mrb[84].mxu1 %vm36_vm3, %v27273_v62  ;;  %v13986_v62 = vld [vmem:[#allocation4 + $0x199] sm:$0xff] }
 0xa02   :  { %21125 = vmatprep.mubr.msk.f32.mxu1 %vm36_vm3, %v27277_v60  ;;  %v29474_v60 = vld [vmem:[#allocation67_spill] sm:$0xff] }
 0xa05   :  { %21126 = vmatmul.mubr.msk.f32.gmra.mrb[86].mxu1 %vm36_vm3, %v27281_v8  ;;  %v13987_v8 = vld [vmem:[#allocation4 + $0x1a1] sm:$0xff] }
 0xa06   :  { %21128 = vmatprep.mubr.msk.f32.mxu1 %vm36_vm3, %v27285_v12  ;;  %v29473_v12 = vld [vmem:[#allocation66_spill] sm:$0xff] }
 0xa09   :  { %21129 = vmatmul.mubr.msk.f32.gmra.mrb[88].mxu1 %vm36_vm3, %v27289_v51  ;;  %v29468_v51 = vld [vmem:[#allocation61_spill] sm:$0xff] }
 0xa0a   :  { %21131 = vmatprep.mubr.msk.f32.mxu1 %vm36_vm3, %v27293_v21  ;;  %v29469_v21 = vld [vmem:[#allocation62_spill] sm:$0xff] }
 0xa0d   :  { %21132 = vmatmul.mubr.msk.f32.gmra.mrb[90].mxu1 %vm36_vm3, %v27297_v58  ;;  %v29470_v58 = vld [vmem:[#allocation63_spill] sm:$0xff] }
 0xa0e   :  { %21134 = vmatprep.mubr.msk.f32.mxu1 %vm36_vm3, %v27301_v11  ;;  %v29471_v11 = vld [vmem:[#allocation64_spill] sm:$0xff] }
 0xa11   :  { %21135 = vmatmul.mubr.msk.f32.gmra.mrb[92].mxu1 %vm36_vm3, %v27305_v56  ;;  %v29472_v56 = vld [vmem:[#allocation65_spill] sm:$0xff] }
 0xa12   :  { %21137 = vmatprep.mubr.msk.f32.mxu1 %vm36_vm3, %v13986_v62  ;;  %v14697_v62 = vld [vmem:[#allocation4 + $0x1a2] sm:$0xff] }
 0xa15   :  { %21138 = vmatmul.mubr.msk.f32.gmra.mrb[94].mxu1 %vm36_vm3, %v13987_v8  ;;  %v29527_v8 = vld [vmem:[#allocation193_spill] sm:$0xff] }
 0xa16   :  { %21140 = vmatprep.mubr.msk.f32.mxu1 %vm36_vm3, %v27311_v63  ;;  %v29475_v63 = vld [vmem:[#allocation68_spill] sm:$0xff] }
 0xa19   :  { %21141 = vmatmul.mubr.msk.f32.gmra.mrb[96].mxu1 %vm36_vm3, %v29468_v51  ;;  %v29528_v51 = vld [vmem:[#allocation194_spill] sm:$0xff] }
 0xa1a   :  { %21143 = vmatprep.mubr.msk.f32.mxu1 %vm36_vm3, %v29469_v21  ;;  %v29529_v21 = vld [vmem:[#allocation195_spill] sm:$0xff] }
 0xa1d   :  { %21144 = vmatmul.mubr.msk.f32.gmra.mrb[98].mxu1 %vm36_vm3, %v29470_v58  ;;  %v29530_v58 = vld [vmem:[#allocation196_spill] sm:$0xff] }
 0xa1e   :  { %21146 = vmatprep.mubr.msk.f32.mxu1 %vm36_vm3, %v29471_v11  ;;  %v29531_v11 = vld [vmem:[#allocation197_spill] sm:$0xff] }
 0xa21   :  { %21147 = vmatmul.mubr.msk.f32.gmra.mrb[100].mxu1 %vm36_vm3, %v29472_v56  ;;  %v29532_v56 = vld [vmem:[#allocation198_spill] sm:$0xff] }
 0xa22   :  { %21149 = vmatprep.mubr.msk.f32.mxu1 %vm36_vm3, %v29473_v12  ;;  %v29533_v12 = vld [vmem:[#allocation199_spill] sm:$0xff] }
 0xa25   :  { %21150 = vmatmul.mubr.msk.f32.gmra.mrb[102].mxu1 %vm36_vm3, %v29474_v60  ;;  %v29534_v60 = vld [vmem:[#allocation200_spill] sm:$0xff] }
 0xa26   :  { %21152 = vmatprep.mubr.msk.f32.mxu1 %vm36_vm3, %v29475_v63  ;;  %v29535_v63 = vld [vmem:[#allocation201_spill] sm:$0xff] }
 0xa29   :  { %21153 = vmatmul.mubr.msk.f32.gmra.mrb[104].mxu1 %vm36_vm3, %v29476_v10  ;;  %v29536_v10 = vld [vmem:[#allocation202_spill] sm:$0xff] }
 0xa2a   :  { %21155 = vmatprep.mubr.msk.f32.mxu1 %vm36_vm3, %v29477_v18  ;;  %v29537_v18 = vld [vmem:[#allocation203_spill] sm:$0xff] }
 0xa2d   :  { %21156 = vmatmul.mubr.msk.f32.gmra.mrb[106].mxu1 %vm36_vm3, %v29478_v35  ;;  %v29538_v35 = vld [vmem:[#allocation204_spill] sm:$0xff] }
 0xa2e   :  { %21158 = vmatprep.mubr.msk.f32.mxu1 %vm36_vm3, %v29479_v57  ;;  %v29539_v57 = vld [vmem:[#allocation205_spill] sm:$0xff] }
 0xa31   :  { %21159 = vmatmul.mubr.msk.f32.gmra.mrb[108].mxu1 %vm36_vm3, %v29480_v50  ;;  %v29540_v50 = vld [vmem:[#allocation206_spill] sm:$0xff] }
 0xa32   :  { %21161 = vmatprep.mubr.msk.f32.mxu1 %vm36_vm3, %v29481_v2  ;;  %v29541_v2 = vld [vmem:[#allocation207_spill] sm:$0xff] }
 0xa35   :  { %21162 = vmatmul.mubr.msk.f32.gmra.mrb[110].mxu1 %vm36_vm3, %v29482_v43  ;;  %v29542_v43 = vld [vmem:[#allocation208_spill] sm:$0xff] }
 0xa36   :  { %21164 = vmatprep.mubr.msk.f32.mxu1 %vm36_vm3, %v29483_v33  ;;  %v29543_v33 = vld [vmem:[#allocation209_spill] sm:$0xff] }
 0xa39   :  { %21165 = vmatmul.mubr.msk.f32.gmra.mrb[112].mxu1 %vm36_vm3, %v29484_v41  ;;  %v29544_v41 = vld [vmem:[#allocation210_spill] sm:$0xff] }
 0xa3a   :  { %21167 = vmatprep.mubr.msk.f32.mxu1 %vm36_vm3, %v29485_v52  ;;  %v29545_v52 = vld [vmem:[#allocation211_spill] sm:$0xff] }
 0xa3d   :  { %21168 = vmatmul.mubr.msk.f32.gmra.mrb[114].mxu1 %vm36_vm3, %v29486_v45  ;;  %v29546_v45 = vld [vmem:[#allocation212_spill] sm:$0xff] }
 0xa3e   :  { %21170 = vmatprep.mubr.msk.f32.mxu1 %vm36_vm3, %v29487_v55  ;;  %v29547_v55 = vld [vmem:[#allocation213_spill] sm:$0xff] }
 0xa41   :  { %21171 = vmatmul.mubr.msk.f32.gmra.mrb[116].mxu1 %vm36_vm3, %v29488_v6  ;;  %v29548_v6 = vld [vmem:[#allocation214_spill] sm:$0xff] }
 0xa42   :  { %21173 = vmatprep.mubr.msk.f32.mxu1 %vm36_vm3, %v29489_v61  ;;  %v29549_v61 = vld [vmem:[#allocation215_spill] sm:$0xff] }
 0xa45   :  { %21174 = vmatmul.mubr.msk.f32.gmra.mrb[118].mxu1 %vm36_vm3, %v29490_v26  ;;  %v29550_v26 = vld [vmem:[#allocation216_spill] sm:$0xff] }
 0xa46   :  { %21176 = vmatprep.mubr.msk.f32.mxu1 %vm36_vm3, %v29491_v36  ;;  %v29551_v36 = vld [vmem:[#allocation217_spill] sm:$0xff] }
 0xa49   :  { %21177 = vmatmul.mubr.msk.f32.gmra.mrb[120].mxu1 %vm36_vm3, %v29492_v46  ;;  %v29552_v46 = vld [vmem:[#allocation218_spill] sm:$0xff] }
 0xa4a   :  { %21179 = vmatprep.mubr.msk.f32.mxu1 %vm36_vm3, %v29493_v28  ;;  %v29553_v28 = vld [vmem:[#allocation219_spill] sm:$0xff] }
 0xa4d   :  { %21180 = vmatmul.mubr.msk.f32.gmra.mrb[122].mxu1 %vm36_vm3, %v29494_v15  ;;  %v29554_v15 = vld [vmem:[#allocation220_spill] sm:$0xff] }
 0xa4e   :  { %21182 = vmatprep.mubr.msk.f32.mxu1 %vm36_vm3, %v29495_v42  ;;  %v29555_v42 = vld [vmem:[#allocation221_spill] sm:$0xff] }
 0xa51   :  { %21183 = vmatmul.mubr.msk.f32.gmra.mrb[124].mxu1 %vm36_vm3, %v29496_v29  ;;  %v29556_v29 = vld [vmem:[#allocation222_spill] sm:$0xff] }
 0xa52   :  { %21185 = vmatprep.mubr.msk.f32.mxu1 %vm36_vm3, %v14018_v44  ;;  %v14728_v44 = vld [vmem:[#allocation4 + $0x34a] sm:$0xff] }
 0xa55   :  { %21186 = vmatmul.mubr.msk.f32.gmra.mrb[126].mxu1 %vm36_vm3, %v14019_v30  ;;  %v14729_v30 = vld [vmem:[#allocation4 + $0x352] sm:$0xff] }
 0xa56   :  { %21196 = vmatprep.mubr.msk.f32.mxu1 %vm36_vm3, %v29497_v32  ;;  %v28052_v32 = vld [vmem:[%s28500_s9] ss:$0 sm:$0xff] }
 0xa59   :  { %21197 = vmatmul.mubr.msk.f32.vlgmr.msra.gmra.mrb[64].mxu1 %vm36_vm3, %v29498_v19 }
 0xa5a   :  { %21199 = vmatprep.mubr.msk.f32.mxu1 %vm36_vm3, %v29499_v31 }
 0xa5d   :  { %21200 = vmatmul.mubr.msk.f32.gmra.mrb[66].mxu1 %vm36_vm3, %v29500_v34 }
 0xa5e   :  { %21202 = vmatprep.mubr.msk.f32.mxu1 %vm36_vm3, %v29501_v3 }
 0xa61   :  { %21203 = vmatmul.mubr.msk.f32.gmra.mrb[68].mxu1 %vm36_vm3, %v29502_v4 }
 0xa62   :  { %21205 = vmatprep.mubr.msk.f32.mxu1 %vm36_vm3, %v29503_v47 }
 0xa65   :  { %21206 = vmatmul.mubr.msk.f32.gmra.mrb[70].mxu1 %vm36_vm3, %v29504_v16 }
 0xa66   :  { %21208 = vmatprep.mubr.msk.f32.mxu1 %vm36_vm3, %v29505_v0 }
 0xa69   :  { %21209 = vmatmul.mubr.msk.f32.gmra.mrb[72].mxu1 %vm36_vm3, %v29506_v25 }
 0xa6a   :  { %21211 = vmatprep.mubr.msk.f32.mxu1 %vm36_vm3, %v29507_v27 }
 0xa6d   :  { %21212 = vmatmul.mubr.msk.f32.gmra.mrb[74].mxu1 %vm36_vm3, %v29508_v17 }
 0xa6e   :  { %21214 = vmatprep.mubr.msk.f32.mxu1 %vm36_vm3, %v29509_v53 }
 0xa71   :  { %21215 = vmatmul.mubr.msk.f32.gmra.mrb[76].mxu1 %vm36_vm3, %v29510_v13 }
 0xa72   :  { %21217 = vmatprep.mubr.msk.f32.mxu1 %vm36_vm3, %v29511_v20 }
 0xa75   :  { %21218 = vmatmul.mubr.msk.f32.gmra.mrb[78].mxu1 %vm36_vm3, %v29512_v9 }
 0xa76   :  { %21220 = vmatprep.mubr.msk.f32.mxu1 %vm36_vm3, %v29513_v40 }
 0xa79   :  { %21221 = vmatmul.mubr.msk.f32.gmra.mrb[80].mxu1 %vm36_vm3, %v29514_v5 }
 0xa7a   :  { %21223 = vmatprep.mubr.msk.f32.mxu1 %vm36_vm3, %v29515_v49 }
 0xa7d   :  { %21224 = vmatmul.mubr.msk.f32.gmra.mrb[82].mxu1 %vm36_vm3, %v29516_v48 }
 0xa7e   :  { %21226 = vmatprep.mubr.msk.f32.mxu1 %vm36_vm3, %v29517_v22 }
 0xa81   :  { %21227 = vmatmul.mubr.msk.f32.gmra.mrb[84].mxu1 %vm36_vm3, %v29518_v59 }
 0xa82   :  { %21229 = vmatprep.mubr.msk.f32.mxu1 %vm36_vm3, %v29519_v24 }
 0xa85   :  { %21230 = vmatmul.mubr.msk.f32.gmra.mrb[86].mxu1 %vm36_vm3, %v29520_v54 }
 0xa86   :  { %21232 = vmatprep.mubr.msk.f32.mxu1 %vm36_vm3, %v29521_v14 }
 0xa89   :  { %21233 = vmatmul.mubr.msk.f32.gmra.mrb[88].mxu1 %vm36_vm3, %v29522_v7 }
 0xa8a   :  { %21235 = vmatprep.mubr.msk.f32.mxu1 %vm36_vm3, %v29523_v37 }
 0xa8d   :  { %21236 = vmatmul.mubr.msk.f32.gmra.mrb[90].mxu1 %vm36_vm3, %v29524_v38 }
 0xa8e   :  { %21238 = vmatprep.mubr.msk.f32.mxu1 %vm36_vm3, %v29525_v23 }
 0xa91   :  { %21239 = vmatmul.mubr.msk.f32.gmra.mrb[92].mxu1 %vm36_vm3, %v29526_v39 }
 0xa92   :  { %21241 = vmatprep.mubr.msk.f32.mxu1 %vm36_vm3, %v14696_v1 }
 0xa95   :  { %21242 = vmatmul.mubr.msk.f32.gmra.mrb[94].mxu1 %vm36_vm3, %v14697_v62 }
 0xa96   :  { %21244 = vmatprep.mubr.msk.f32.mxu1 %vm36_vm3, %v29527_v8 }
 0xa99   :  { %21245 = vmatmul.mubr.msk.f32.gmra.mrb[96].mxu1 %vm36_vm3, %v29528_v51 }
 0xa9a   :  { %21247 = vmatprep.mubr.msk.f32.mxu1 %vm36_vm3, %v29529_v21 }
 0xa9d   :  { %21248 = vmatmul.mubr.msk.f32.gmra.mrb[98].mxu1 %vm36_vm3, %v29530_v58 }
 0xa9e   :  { %21250 = vmatprep.mubr.msk.f32.mxu1 %vm36_vm3, %v29531_v11 }
 0xaa1   :  { %21251 = vmatmul.mubr.msk.f32.gmra.mrb[100].mxu1 %vm36_vm3, %v29532_v56 }
 0xaa2   :  { %21253 = vmatprep.mubr.msk.f32.mxu1 %vm36_vm3, %v29533_v12 }
 0xaa5   :  { %21254 = vmatmul.mubr.msk.f32.gmra.mrb[102].mxu1 %vm36_vm3, %v29534_v60 }
 0xaa6   :  { %21256 = vmatprep.mubr.msk.f32.mxu1 %vm36_vm3, %v29535_v63 }
 0xaa9   :  { %21257 = vmatmul.mubr.msk.f32.gmra.mrb[104].mxu1 %vm36_vm3, %v29536_v10 }
 0xaaa   :  { %21259 = vmatprep.mubr.msk.f32.mxu1 %vm36_vm3, %v29537_v18 }
 0xaad   :  { %21260 = vmatmul.mubr.msk.f32.gmra.mrb[106].mxu1 %vm36_vm3, %v29538_v35 }
 0xaae   :  { %21262 = vmatprep.mubr.msk.f32.mxu1 %vm36_vm3, %v29539_v57 }
 0xab1   :  { %21263 = vmatmul.mubr.msk.f32.gmra.mrb[108].mxu1 %vm36_vm3, %v29540_v50 }
 0xab2   :  { %21265 = vmatprep.mubr.msk.f32.mxu1 %vm36_vm3, %v29541_v2 }
 0xab5   :  { %21266 = vmatmul.mubr.msk.f32.gmra.mrb[110].mxu1 %vm36_vm3, %v29542_v43 }
 0xab6   :  { %21268 = vmatprep.mubr.msk.f32.mxu1 %vm36_vm3, %v29543_v33 }
 0xab9   :  { %21269 = vmatmul.mubr.msk.f32.gmra.mrb[112].mxu1 %vm36_vm3, %v29544_v41 }
 0xaba   :  { %21271 = vmatprep.mubr.msk.f32.mxu1 %vm36_vm3, %v29545_v52 }
 0xabd   :  { %21272 = vmatmul.mubr.msk.f32.gmra.mrb[114].mxu1 %vm36_vm3, %v29546_v45 }
 0xabe   :  { %21274 = vmatprep.mubr.msk.f32.mxu1 %vm36_vm3, %v29547_v55 }
 0xac1   :  { %21275 = vmatmul.mubr.msk.f32.gmra.mrb[116].mxu1 %vm36_vm3, %v29548_v6 }
 0xac2   :  { %21277 = vmatprep.mubr.msk.f32.mxu1 %vm36_vm3, %v29549_v61 }
 0xac5   :  { %21278 = vmatmul.mubr.msk.f32.gmra.mrb[118].mxu1 %vm36_vm3, %v29550_v26 }
 0xac6   :  { %21280 = vmatprep.mubr.msk.f32.mxu1 %vm36_vm3, %v29551_v36 }
 0xac9   :  { %21281 = vmatmul.mubr.msk.f32.gmra.mrb[120].mxu1 %vm36_vm3, %v29552_v46 }
 0xaca   :  { %21283 = vmatprep.mubr.msk.f32.mxu1 %vm36_vm3, %v29553_v28 }
 0xacd   :  { %21284 = vmatmul.mubr.msk.f32.gmra.mrb[122].mxu1 %vm36_vm3, %v29554_v15 }
 0xace   :  { %21286 = vmatprep.mubr.msk.f32.mxu1 %vm36_vm3, %v29555_v42 }
 0xad1   :  { %21287 = vmatmul.mubr.msk.f32.gmra.mrb[124].mxu1 %vm36_vm3, %v29556_v29 }
 0xad2   :  { %21289 = vmatprep.mubr.msk.f32.mxu1 %vm36_vm3, %v14728_v44 }
 0xad5   :  { %21290 = vmatmul.mubr.msk.f32.gmra.mrb[126].mxu1 %vm36_vm3, %v14729_v30 }
 0xb2c   :  { %v21198_v19 = vpop.f32.mrb[64].mxu1 }
 0xb2d   :  { %v15384_v31 = vadd.f32 %v21198_v19, %v28052_v32  ;;  %v14993_v34 = vpop.f32.mrb[65].mxu1 }
 0xb2e   :  { %v15383_v3 = vadd.f32 %v28052_v32, %v14993_v34 }
 0xb2f   :  { %v15448_v4 = vmax.f32 %v15384_v31, 0.0 }
 0xb30   :  { %v15447_v47 = vmax.f32 %v15383_v3, 0.0  ;;  %v21201_v16 = vpop.f32.mrb[66].mxu1 }
 0xb31   :  { %v15386_v0 = vadd.f32 %v21201_v16, %v28052_v32  ;;  %v15003_v25 = vpop.f32.mrb[67].mxu1  ;;  %16025 = vrot.lane.b32.xlu1 %v15448_v4, %s22618_s8 }
 0xb32   :  { %v15385_v27 = vadd.f32 %v28052_v32, %v15003_v25  ;;  %16023 = vrot.lane.b32.xlu0 %v15447_v47, %s22618_s8 }
 0xb33   :  { %v15450_v17 = vmax.f32 %v15386_v0, 0.0 }
 0xb34   :  { %v15449_v53 = vmax.f32 %v15385_v27, 0.0  ;;  %v21204_v13 = vpop.f32.mrb[68].mxu1 }
 0xb35   :  { %v15388_v20 = vadd.f32 %v21204_v13, %v28052_v32  ;;  %v15013_v9 = vpop.f32.mrb[69].mxu1  ;;  %16029 = vrot.lane.b32.xlu1 %v15450_v17, %s22618_s8 }
 0xb36   :  { %v15387_v40 = vadd.f32 %v28052_v32, %v15013_v9  ;;  %16027 = vrot.lane.b32.xlu0 %v15449_v53, %s22618_s8 }
 0xb37   :  { %v15452_v5 = vmax.f32 %v15388_v20, 0.0 }
 0xb38   :  { %v15451_v49 = vmax.f32 %v15387_v40, 0.0  ;;  %v21207_v48 = vpop.f32.mrb[70].mxu1 }
 0xb39   :  { %v15390_v22 = vadd.f32 %v21207_v48, %v28052_v32  ;;  %v15023_v59 = vpop.f32.mrb[71].mxu1  ;;  %16033 = vrot.lane.b32.xlu1 %v15452_v5, %s22618_s8 }
 0xb3a   :  { %v15389_v24 = vadd.f32 %v28052_v32, %v15023_v59  ;;  %16031 = vrot.lane.b32.xlu0 %v15451_v49, %s22618_s8 }
 0xb3b   :  { %v15454_v54 = vmax.f32 %v15390_v22, 0.0 }
 0xb3c   :  { %v15453_v14 = vmax.f32 %v15389_v24, 0.0  ;;  %v21210_v7 = vpop.f32.mrb[72].mxu1 }
 0xb3d   :  { %v15392_v37 = vadd.f32 %v21210_v7, %v28052_v32  ;;  %v15033_v38 = vpop.f32.mrb[73].mxu1  ;;  %16037 = vrot.lane.b32.xlu1 %v15454_v54, %s22618_s8 }
 0xb3e   :  { %v15391_v23 = vadd.f32 %v28052_v32, %v15033_v38  ;;  %16035 = vrot.lane.b32.xlu0 %v15453_v14, %s22618_s8 }
 0xb3f   :  { %v15456_v1 = vmax.f32 %v15392_v37, 0.0 }
 0xb40   :  { %v15455_v39 = vmax.f32 %v15391_v23, 0.0  ;;  %v21213_v62 = vpop.f32.mrb[74].mxu1 }
 0xb41   :  { %v15394_v8 = vadd.f32 %v21213_v62, %v28052_v32  ;;  %v15043_v51 = vpop.f32.mrb[75].mxu1  ;;  %16041 = vrot.lane.b32.xlu1 %v15456_v1, %s22618_s8 }
 0xb42   :  { %v15393_v21 = vadd.f32 %v28052_v32, %v15043_v51  ;;  %16039 = vrot.lane.b32.xlu0 %v15455_v39, %s22618_s8 }
 0xb43   :  { %v15458_v58 = vmax.f32 %v15394_v8, 0.0 }
 0xb44   :  { %v15457_v11 = vmax.f32 %v15393_v21, 0.0  ;;  %v21216_v56 = vpop.f32.mrb[76].mxu1 }
 0xb45   :  { %v15396_v12 = vadd.f32 %v21216_v56, %v28052_v32  ;;  %v15053_v60 = vpop.f32.mrb[77].mxu1  ;;  %16045 = vrot.lane.b32.xlu1 %v15458_v58, %s22618_s8 }
 0xb46   :  { %v15395_v63 = vadd.f32 %v28052_v32, %v15053_v60  ;;  %16043 = vrot.lane.b32.xlu0 %v15457_v11, %s22618_s8 }
 0xb47   :  { %v15460_v10 = vmax.f32 %v15396_v12, 0.0 }
 0xb48   :  { %v15459_v18 = vmax.f32 %v15395_v63, 0.0  ;;  %v21219_v35 = vpop.f32.mrb[78].mxu1 }
 0xb49   :  { %v15398_v57 = vadd.f32 %v21219_v35, %v28052_v32  ;;  %v15063_v50 = vpop.f32.mrb[79].mxu1  ;;  %16049 = vrot.lane.b32.xlu1 %v15460_v10, %s22618_s8 }
 0xb4a   :  { %v15397_v2 = vadd.f32 %v28052_v32, %v15063_v50  ;;  %16047 = vrot.lane.b32.xlu0 %v15459_v18, %s22618_s8 }
 0xb4b   :  { %v15462_v43 = vmax.f32 %v15398_v57, 0.0 }
 0xb4c   :  { %v15461_v33 = vmax.f32 %v15397_v2, 0.0  ;;  %v21222_v41 = vpop.f32.mrb[80].mxu1 }
 0xb4d   :  { %v15400_v52 = vadd.f32 %v21222_v41, %v28052_v32  ;;  %v15073_v45 = vpop.f32.mrb[81].mxu1  ;;  %16053 = vrot.lane.b32.xlu1 %v15462_v43, %s22618_s8 }
 0xb4e   :  { %v15399_v55 = vadd.f32 %v28052_v32, %v15073_v45  ;;  %16051 = vrot.lane.b32.xlu0 %v15461_v33, %s22618_s8 }
 0xb4f   :  { %v15464_v6 = vmax.f32 %v15400_v52, 0.0 }
 0xb50   :  { %v15463_v61 = vmax.f32 %v15399_v55, 0.0  ;;  %v21225_v26 = vpop.f32.mrb[82].mxu1 }
 0xb51   :  { %v15402_v36 = vadd.f32 %v21225_v26, %v28052_v32  ;;  %v15083_v46 = vpop.f32.mrb[83].mxu1  ;;  %16057 = vrot.lane.b32.xlu1 %v15464_v6, %s22618_s8 }
 0xb52   :  { %v15401_v28 = vadd.f32 %v28052_v32, %v15083_v46  ;;  %16055 = vrot.lane.b32.xlu0 %v15463_v61, %s22618_s8 }
 0xb53   :  { %v15466_v15 = vmax.f32 %v15402_v36, 0.0 }
 0xb54   :  { %v15465_v42 = vmax.f32 %v15401_v28, 0.0  ;;  %v21228_v44 = vpop.f32.mrb[84].mxu1 }
 0xb55   :  { %v15404_v29 = vadd.f32 %v21228_v44, %v28052_v32  ;;  %v15093_v30 = vpop.f32.mrb[85].mxu1  ;;  %16061 = vrot.lane.b32.xlu1 %v15466_v15, %s22618_s8 }
 0xb56   :  { %v15403_v19 = vadd.f32 %v28052_v32, %v15093_v30  ;;  %16059 = vrot.lane.b32.xlu0 %v15465_v42, %s22618_s8 }
 0xb57   :  { %v15468_v31 = vmax.f32 %v15404_v29, 0.0 }
 0xb58   :  { %v15467_v34 = vmax.f32 %v15403_v19, 0.0  ;;  %v21231_v3 = vpop.f32.mrb[86].mxu1 }
 0xb59   :  { %v15406_v4 = vadd.f32 %v21231_v3, %v28052_v32  ;;  %v15103_v47 = vpop.f32.mrb[87].mxu1  ;;  %16065 = vrot.lane.b32.xlu1 %v15468_v31, %s22618_s8 }
 0xb5a   :  { %v15405_v16 = vadd.f32 %v28052_v32, %v15103_v47  ;;  %16063 = vrot.lane.b32.xlu0 %v15467_v34, %s22618_s8 }
 0xb5b   :  { %v15470_v0 = vmax.f32 %v15406_v4, 0.0 }
 0xb5c   :  { %v15469_v25 = vmax.f32 %v15405_v16, 0.0  ;;  %v21234_v27 = vpop.f32.mrb[88].mxu1 }
 0xb5d   :  { %v15408_v17 = vadd.f32 %v21234_v27, %v28052_v32  ;;  %v15113_v53 = vpop.f32.mrb[89].mxu1  ;;  %16069 = vrot.lane.b32.xlu1 %v15470_v0, %s22618_s8 }
 0xb5e   :  { %v15407_v13 = vadd.f32 %v28052_v32, %v15113_v53  ;;  %16067 = vrot.lane.b32.xlu0 %v15469_v25, %s22618_s8 }
 0xb5f   :  { %v15472_v20 = vmax.f32 %v15408_v17, 0.0 }
 0xb60   :  { %v15471_v9 = vmax.f32 %v15407_v13, 0.0  ;;  %v21237_v40 = vpop.f32.mrb[90].mxu1 }
 0xb61   :  { %v15410_v5 = vadd.f32 %v21237_v40, %v28052_v32  ;;  %v15123_v49 = vpop.f32.mrb[91].mxu1  ;;  %16073 = vrot.lane.b32.xlu1 %v15472_v20, %s22618_s8 }
 0xb62   :  { %v15409_v48 = vadd.f32 %v28052_v32, %v15123_v49  ;;  %16071 = vrot.lane.b32.xlu0 %v15471_v9, %s22618_s8 }
 0xb63   :  { %v15474_v22 = vmax.f32 %v15410_v5, 0.0 }
 0xb64   :  { %v15473_v59 = vmax.f32 %v15409_v48, 0.0  ;;  %v21240_v24 = vpop.f32.mrb[92].mxu1 }
 0xb65   :  { %v15412_v54 = vadd.f32 %v21240_v24, %v28052_v32  ;;  %v15133_v14 = vpop.f32.mrb[93].mxu1  ;;  %16077 = vrot.lane.b32.xlu1 %v15474_v22, %s22618_s8 }
 0xb66   :  { %v15411_v7 = vadd.f32 %v28052_v32, %v15133_v14  ;;  %16075 = vrot.lane.b32.xlu0 %v15473_v59, %s22618_s8 }
 0xb67   :  { %v15476_v37 = vmax.f32 %v15412_v54, 0.0 }
 0xb68   :  { %v15475_v38 = vmax.f32 %v15411_v7, 0.0  ;;  %v21243_v23 = vpop.f32.mrb[94].mxu1 }
 0xb69   :  { %v15414_v1 = vadd.f32 %v21243_v23, %v28052_v32  ;;  %v15143_v39 = vpop.f32.mrb[95].mxu1  ;;  %16081 = vrot.lane.b32.xlu1 %v15476_v37, %s22618_s8 }
 0xb6a   :  { %v15413_v62 = vadd.f32 %v28052_v32, %v15143_v39  ;;  %16079 = vrot.lane.b32.xlu0 %v15475_v38, %s22618_s8 }
 0xb6b   :  { %v15478_v8 = vmax.f32 %v15414_v1, 0.0 }
 0xb6c   :  { %v15477_v51 = vmax.f32 %v15413_v62, 0.0  ;;  %v21246_v21 = vpop.f32.mrb[96].mxu1 }
 0xb6d   :  { %v15416_v58 = vadd.f32 %v21246_v21, %v28052_v32  ;;  %v15153_v11 = vpop.f32.mrb[97].mxu1  ;;  %16085 = vrot.lane.b32.xlu1 %v15478_v8, %s22618_s8 }
 0xb6e   :  { %v15415_v56 = vadd.f32 %v28052_v32, %v15153_v11  ;;  %16083 = vrot.lane.b32.xlu0 %v15477_v51, %s22618_s8 }
 0xb6f   :  { %v15480_v12 = vmax.f32 %v15416_v58, 0.0 }
 0xb70   :  { %v15479_v60 = vmax.f32 %v15415_v56, 0.0  ;;  %v21249_v63 = vpop.f32.mrb[98].mxu1 }
 0xb71   :  { %v15418_v10 = vadd.f32 %v21249_v63, %v28052_v32  ;;  %v15163_v18 = vpop.f32.mrb[99].mxu1  ;;  %16089 = vrot.lane.b32.xlu1 %v15480_v12, %s22618_s8 }
 0xb72   :  { %v15417_v35 = vadd.f32 %v28052_v32, %v15163_v18  ;;  %16087 = vrot.lane.b32.xlu0 %v15479_v60, %s22618_s8  ;;  %v28167_v18 = vld [vmem:[%s28496_s5] ss:$0 sm:$0xff]  ;;  %s22621_s5 = smov [#allocation5]  }
 0xb73   :  { %v15482_v57 = vmax.f32 %v15418_v10, 0.0 }
 0xb74   :  { %v15481_v50 = vmax.f32 %v15417_v35, 0.0  ;;  %v21252_v2 = vpop.f32.mrb[100].mxu1  ;;  %v29557_v35 = vld [vmem:[#allocation8_spill] sm:$0xff] }
 0xb75   :  { %v15420_v43 = vadd.f32 %v21252_v2, %v28052_v32  ;;  %v15173_v33 = vpop.f32.mrb[101].mxu1  ;;  %16093 = vrot.lane.b32.xlu1 %v15482_v57, %s22618_s8  ;;  %v770_v57 = vadd.f32 %v28167_v18, %v29557_v35 }
 0xb76   :  { %v15419_v41 = vadd.f32 %v28052_v32, %v15173_v33  ;;  %16091 = vrot.lane.b32.xlu0 %v15481_v50, %s22618_s8 }
 0xb77   :  { %v15484_v52 = vmax.f32 %v15420_v43, 0.0  ;;  %v29558_v43 = vld [vmem:[#allocation9_spill] sm:$0xff] }
 0xb78   :  { %v15483_v45 = vmax.f32 %v15419_v41, 0.0  ;;  %v21255_v55 = vpop.f32.mrb[102].mxu1  ;;  %v769_v33 = vadd.f32 %v28167_v18, %v29558_v43 }
 0xb79   :  { %v15422_v6 = vadd.f32 %v21255_v55, %v28052_v32  ;;  %v15183_v61 = vpop.f32.mrb[103].mxu1  ;;  %16097 = vrot.lane.b32.xlu1 %v15484_v52, %s22618_s8  ;;  %v29559_v55 = vld [vmem:[#allocation10_spill] sm:$0xff] }
 0xb7a   :  { %v15421_v26 = vadd.f32 %v28052_v32, %v15183_v61  ;;  %16095 = vrot.lane.b32.xlu0 %v15483_v45, %s22618_s8  ;;  %v28179_v61 = vpop.permute.xlu1 %15893 }
 0xb7b   :  { %v15486_v36 = vmax.f32 %v15422_v6, 0.0  ;;  %v772_v6 = vadd.f32 %v28167_v18, %v29559_v55 }
 0xb7c   :  { %v15485_v46 = vmax.f32 %v15421_v26, 0.0  ;;  %v21258_v28 = vpop.f32.mrb[104].mxu1 }
 0xb7d   :  { %v15424_v15 = vadd.f32 %v21258_v28, %v28052_v32  ;;  %v15193_v42 = vpop.f32.mrb[105].mxu1  ;;  %16101 = vrot.lane.b32.xlu1 %v15486_v36, %s22618_s8  ;;  %v834_v36 = vmax.f32 %v770_v57, 0.0 }
 0xb7e   :  { %v15423_v44 = vadd.f32 %v28052_v32, %v15193_v42  ;;  %16099 = vrot.lane.b32.xlu0 %v15485_v46, %s22618_s8  ;;  %v28181_v46 = vpop.permute.xlu0 %15891  ;;  %v833_v42 = vmax.f32 %v769_v33, 0.0 }
 0xb7f   :  { %v15488_v29 = vmax.f32 %v15424_v15, 0.0 }
 0xb80   :  { %v15487_v30 = vmax.f32 %v15423_v44, 0.0  ;;  %v21261_v19 = vpop.f32.mrb[106].mxu1  ;;  %v29560_v44 = vld [vmem:[#allocation11_spill] sm:$0xff] }
 0xb81   :  { %v15426_v31 = vadd.f32 %v21261_v19, %v28052_v32  ;;  %v15203_v34 = vpop.f32.mrb[107].mxu1  ;;  %16105 = vrot.lane.b32.xlu1 %v15488_v29, %s22618_s8  ;;  %v771_v29 = vadd.f32 %v28167_v18, %v29560_v44 }
 0xb82   :  { %v15425_v3 = vadd.f32 %v28052_v32, %v15203_v34  ;;  %16103 = vrot.lane.b32.xlu0 %v15487_v30, %s22618_s8 }
 0xb83   :  { %v15490_v4 = vmax.f32 %v15426_v31, 0.0  ;;  %v29561_v31 = vld [vmem:[#allocation114_spill] sm:$0xff] }
 0xb84   :  { %v15489_v47 = vmax.f32 %v15425_v3, 0.0  ;;  %v21264_v16 = vpop.f32.mrb[108].mxu1  ;;  %v16216_v34 = vsel %vm36_vm3, %v834_v36, %v29561_v31  ;;  %v29574_v36 = vld [vmem:[#allocation119_spill] sm:$0xff]  ;;  %v29577_v31 = vld [vmem:[#allocation110_spill] sm:$0xff] }
 0xb85   :  { %v15428_v0 = vadd.f32 %v21264_v16, %v28052_v32  ;;  %v15213_v25 = vpop.f32.mrb[109].mxu1  ;;  %16109 = vrot.lane.b32.xlu1 %v15490_v4, %s22618_s8  ;;  %v836_v4 = vmax.f32 %v772_v6, 0.0 }
 0xb86   :  { %v15427_v27 = vadd.f32 %v28052_v32, %v15213_v25  ;;  %16107 = vrot.lane.b32.xlu0 %v15489_v47, %s22618_s8  ;;  %v29562_v47 = vld [vmem:[#allocation115_spill] sm:$0xff] }
 0xb87   :  { %v15492_v17 = vmax.f32 %v15428_v0, 0.0  ;;  %v16215_v16 = vsel %vm36_vm3, %v833_v42, %v29562_v47  ;;  %v29563_v0 = vld [vmem:[#allocation139_spill] sm:$0xff] }
 0xb88   :  { %v15491_v53 = vmax.f32 %v15427_v27, 0.0  ;;  %v21267_v13 = vpop.f32.mrb[110].mxu1  ;;  %v16281_v25 = vsel %vm16279_vm6, %v16216_v34, %v29563_v0 }
 0xb89   :  { %v15430_v20 = vadd.f32 %v21267_v13, %v28052_v32  ;;  %v15223_v9 = vpop.f32.mrb[111].mxu1  ;;  %16113 = vrot.lane.b32.xlu1 %v15492_v17, %s22618_s8 }
 0xb8a   :  { %v15429_v40 = vadd.f32 %v28052_v32, %v15223_v9  ;;  %16111 = vrot.lane.b32.xlu0 %v15491_v53, %s22618_s8  ;;  %v29564_v53 = vld [vmem:[#allocation12_spill] sm:$0xff] }
 0xb8b   :  { %v15494_v5 = vmax.f32 %v15430_v20, 0.0  ;;  %v774_v13 = vadd.f32 %v28167_v18, %v29564_v53  ;;  %v29565_v20 = vld [vmem:[#allocation140_spill] sm:$0xff]  ;;  %v29580_v53 = vld [vmem:[#allocation121_spill] sm:$0xff] }
 0xb8c   :  { %v15493_v49 = vmax.f32 %v15429_v40, 0.0  ;;  %v21270_v48 = vpop.f32.mrb[112].mxu1  ;;  %v16280_v9 = vsel %vm16279_vm6, %v16215_v16, %v29565_v20  ;;  %v29578_v16 = vld [vmem:[#allocation17_spill] sm:$0xff]  ;;  %v29581_v20 = vld [vmem:[#allocation111_spill] sm:$0xff] }
 0xb8d   :  { %v15432_v22 = vadd.f32 %v21270_v48, %v28052_v32  ;;  %v15233_v59 = vpop.f32.mrb[113].mxu1  ;;  %16117 = vrot.lane.b32.xlu1 %v15494_v5, %s22618_s8  ;;  %v777_v0 = vadd.f32 %v28167_v18, %v29578_v16  ;;  %v29599_v16 = vld [vmem:[#allocation85_spill] sm:$0xff] }
 0xb8e   :  { %v15431_v24 = vadd.f32 %v28052_v32, %v15233_v59  ;;  %16115 = vrot.lane.b32.xlu0 %v15493_v49, %s22618_s8  ;;  %v29566_v59 = vld [vmem:[#allocation13_spill] sm:$0xff] }
 0xb8f   :  { %v15496_v54 = vmax.f32 %v15432_v22, 0.0  ;;  %v835_v22 = vmax.f32 %v771_v29, 0.0 }
 0xb90   :  { %v15495_v14 = vmax.f32 %v15431_v24, 0.0  ;;  %v21273_v7 = vpop.f32.mrb[114].mxu1  ;;  %v773_v24 = vadd.f32 %v28167_v18, %v29566_v59 }
 0xb91   :  { %v15434_v37 = vadd.f32 %v21273_v7, %v28052_v32  ;;  %v15243_v38 = vpop.f32.mrb[115].mxu1  ;;  %16121 = vrot.lane.b32.xlu1 %v15496_v54, %s22618_s8 }
 0xb92   :  { %v15433_v23 = vadd.f32 %v28052_v32, %v15243_v38  ;;  %16119 = vrot.lane.b32.xlu0 %v15495_v14, %s22618_s8 }
 0xb93   :  { %v15498_v1 = vmax.f32 %v15434_v37, 0.0  ;;  %v29567_v37 = vld [vmem:[#allocation116_spill] sm:$0xff] }
 0xb94   :  { %v15497_v39 = vmax.f32 %v15433_v23, 0.0  ;;  %v21276_v62 = vpop.f32.mrb[116].mxu1  ;;  %v16218_v38 = vsel %vm36_vm3, %v836_v4, %v29567_v37 }
 0xb95   :  { %v15436_v8 = vadd.f32 %v21276_v62, %v28052_v32  ;;  %v15253_v51 = vpop.f32.mrb[117].mxu1  ;;  %16125 = vrot.lane.b32.xlu1 %v15498_v1, %s22618_s8  ;;  %v29568_v1 = vld [vmem:[#allocation14_spill] sm:$0xff]  ;;  %v29569_v62 = vld [vmem:[#allocation117_spill] sm:$0xff] }
 0xb96   :  { %v15435_v21 = vadd.f32 %v28052_v32, %v15253_v51  ;;  %16123 = vrot.lane.b32.xlu0 %v15497_v39, %s22618_s8  ;;  %v776_v39 = vadd.f32 %v28167_v18, %v29568_v1  ;;  %v29570_v51 = vld [vmem:[#allocation141_spill] sm:$0xff] }
 0xb97   :  { %v15500_v58 = vmax.f32 %v15436_v8, 0.0  ;;  %v16217_v8 = vsel %vm36_vm3, %v835_v22, %v29569_v62  ;;  %v29583_v22 = vld [vmem:[#allocation80_spill] sm:$0xff] }
 0xb98   :  { %v15499_v11 = vmax.f32 %v15435_v21, 0.0  ;;  %v21279_v56 = vpop.f32.mrb[118].mxu1  ;;  %v16283_v21 = vsel %vm16279_vm6, %v16218_v38, %v29570_v51 }
 0xb99   :  { %v15438_v12 = vadd.f32 %v21279_v56, %v28052_v32  ;;  %v15263_v60 = vpop.f32.mrb[119].mxu1  ;;  %16129 = vrot.lane.b32.xlu1 %v15500_v58, %s22618_s8  ;;  %v838_v56 = vmax.f32 %v774_v13, 0.0 }
 0xb9a   :  { %v15437_v63 = vadd.f32 %v28052_v32, %v15263_v60  ;;  %16127 = vrot.lane.b32.xlu0 %v15499_v11, %s22618_s8 }
 0xb9b   :  { %v15502_v10 = vmax.f32 %v15438_v12, 0.0  ;;  %v29571_v12 = vld [vmem:[#allocation142_spill] sm:$0xff] }
 0xb9c   :  { %v15501_v50 = vmax.f32 %v15437_v63, 0.0  ;;  %v21282_v2 = vpop.f32.mrb[120].mxu1  ;;  %v16282_v60 = vsel %vm16279_vm6, %v16217_v8, %v29571_v12  ;;  %v29587_v8 = vld [vmem:[#allocation81_spill] sm:$0xff]  ;;  %v29589_v12 = vld [vmem:[#allocation82_spill] sm:$0xff] }
 0xb9d   :  { %v15440_v41 = vadd.f32 %v21282_v2, %v28052_v32  ;;  %v15273_v52 = vpop.f32.mrb[121].mxu1  ;;  %16133 = vrot.lane.b32.xlu1 %v15502_v10, %s22618_s8  ;;  %v29572_v2 = vld [vmem:[#allocation15_spill] sm:$0xff] }
 0xb9e   :  { %v15439_v45 = vadd.f32 %v28052_v32, %v15273_v52  ;;  %16131 = vrot.lane.b32.xlu0 %v15501_v50, %s22618_s8  ;;  %v837_v50 = vmax.f32 %v773_v24, 0.0  ;;  %v775_v43 = vadd.f32 %v28167_v18, %v29572_v2 }
 0xb9f   :  { %v15504_v26 = vmax.f32 %v15440_v41, 0.0 }
 0xba0   :  { %v15503_v28 = vmax.f32 %v15439_v45, 0.0  ;;  %v21285_v15 = vpop.f32.mrb[122].mxu1  ;;  %v29573_v45 = vld [vmem:[#allocation118_spill] sm:$0xff]  ;;  %v839_v47 = vmax.f32 %v775_v43, 0.0  ;;  %v29591_v43 = vld [vmem:[#allocation124_spill] sm:$0xff] }
 0xba1   :  { %v15442_v30 = vadd.f32 %v21285_v15, %v28052_v32  ;;  %v15283_v19 = vpop.f32.mrb[123].mxu1  ;;  %16137 = vrot.lane.b32.xlu1 %v15504_v26, %s22618_s8  ;;  %v16220_v55 = vsel %vm36_vm3, %v838_v56, %v29573_v45  ;;  %v840_v26 = vmax.f32 %v776_v39, 0.0  ;;  %v29575_v15 = vld [vmem:[#allocation79_spill] sm:$0xff] }
 0xba2   :  { %v15441_v3 = vadd.f32 %v28052_v32, %v15283_v19  ;;  %16135 = vrot.lane.b32.xlu0 %v15503_v28, %s22618_s8  ;;  %v16219_v28 = vsel %vm36_vm3, %v837_v50, %v29574_v36  ;;  %v16285_v42 = vsel %vm16279_vm6, %v16220_v55, %v29575_v15  ;;  %v16221_v13 = vsel %vm36_vm3, %v839_v47, %v29580_v53  ;;  %v29586_v39 = vld [vmem:[#allocation123_spill] sm:$0xff]  ;;  %v29594_v36 = vld [vmem:[#allocation22_spill] sm:$0xff]  ;;  %v29595_v15 = vld [vmem:[#allocation84_spill] sm:$0xff] }
 0xba3   :  { %v15506_v27 = vmax.f32 %v15442_v30, 0.0  ;;  %v16026_v17 = vpop.permute.xlu1 %16025  ;;  %v29576_v30 = vld [vmem:[#allocation16_spill] sm:$0xff]  ;;  %v16284_v34 = vsel %vm16279_vm6, %v16219_v28, %v29577_v31  ;;  %v16286_v59 = vsel %vm16279_vm6, %v16221_v13, %v29583_v22  ;;  %v29593_v45 = vld [vmem:[#allocation83_spill] sm:$0xff]  ;;  %v784_v28 = vadd.f32 %v28167_v18, %v29594_v36  ;;  %v29601_v13 = vld [vmem:[#allocation86_spill] sm:$0xff] }
 0xba4   :  { %v15505_v40 = vmax.f32 %v15441_v3, 0.0  ;;  %v16346_v5 = vsel %vm16344_vm7, %v16281_v25, %v16026_v17  ;;  %v21288_v49 = vpop.f32.mrb[124].mxu1  ;;  %v16024_v48 = vpop.permute.xlu0 %16023  ;;  %v778_v19 = vadd.f32 %v28167_v18, %v29576_v30  ;;  %v29614_v36 = vld [vmem:[#allocation29_spill] sm:$0xff] }
 0xba5   :  { %16410 = vst [vmem:[#allocation5 + $0x8] sm:$0xff] %v16346_v5  ;;  %v15444_v54 = vadd.f32 %v21288_v49, %v28052_v32  ;;  %v16345_v14 = vsel %vm16344_vm7, %v16280_v9, %v16024_v48  ;;  %v15293_v7 = vpop.f32.mrb[125].mxu1  ;;  %16141 = vrot.lane.b32.xlu1 %v15506_v27, %s22618_s8  ;;  %v29579_v27 = vld [vmem:[#allocation120_spill] sm:$0xff]  ;;  %v29582_v49 = vld [vmem:[#allocation18_spill] sm:$0xff] }
 0xba6   :  { %16409 = vst [vmem:[#allocation5] sm:$0xff] %v16345_v14  ;;  %v15443_v23 = vadd.f32 %v28052_v32, %v15293_v7  ;;  %16139 = vrot.lane.b32.xlu0 %v15505_v40, %s22618_s8  ;;  %v16222_v17 = vsel %vm36_vm3, %v840_v26, %v29579_v27  ;;  %v842_v5 = vmax.f32 %v778_v19, 0.0  ;;  %v780_v48 = vadd.f32 %v28167_v18, %v29582_v49  ;;  %v29584_v7 = vld [vmem:[#allocation19_spill] sm:$0xff]  ;;  %v29602_v49 = vld [vmem:[#allocation25_spill] sm:$0xff] }
 0xba7   :  { %v15508_v58 = vmax.f32 %v15444_v54, 0.0  ;;  %v16030_v11 = vpop.permute.xlu1 %16029  ;;  %v16287_v9 = vsel %vm16279_vm6, %v16222_v17, %v29581_v20  ;;  %v841_v14 = vmax.f32 %v777_v0, 0.0  ;;  %v779_v37 = vadd.f32 %v28167_v18, %v29584_v7  ;;  %v29596_v19 = vld [vmem:[#allocation23_spill] sm:$0xff]  ;;  %v29600_v17 = vld [vmem:[#allocation24_spill] sm:$0xff] }
 0xba8   :  { %v15507_v63 = vmax.f32 %v15443_v23, 0.0  ;;  %v16348_v10 = vsel %vm16344_vm7, %v16283_v21, %v16030_v11  ;;  %v21291_v35 = vpop.f32.mrb[126].mxu1  ;;  %v16028_v57 = vpop.permute.xlu0 %16027  ;;  %v29585_v23 = vld [vmem:[#allocation122_spill] sm:$0xff]  ;;  %v29588_v11 = vld [vmem:[#allocation20_spill] sm:$0xff]  ;;  %v783_v31 = vadd.f32 %v28167_v18, %v29596_v19  ;;  %v848_v27 = vmax.f32 %v784_v28, 0.0  ;;  %v29605_v7 = vld [vmem:[#allocation87_spill] sm:$0xff] }
 0xba9   :  { %16412 = vst [vmem:[#allocation5 + $0x18] sm:$0xff] %v16348_v10  ;;  %v15446_v33 = vadd.f32 %v21291_v35, %v28052_v32  ;;  %v16347_v41 = vsel %vm16344_vm7, %v16282_v60, %v16028_v57  ;;  %v15303_v52 = vpop.f32.mrb[127].mxu1  ;;  %16145 = vrot.lane.b32.xlu1 %v15508_v58, %s22618_s8  ;;  %v16224_v1 = vsel %vm36_vm3, %v842_v5, %v29585_v23  ;;  %v844_v58 = vmax.f32 %v780_v48, 0.0  ;;  %v29590_v57 = vld [vmem:[#allocation21_spill] sm:$0xff]  ;;  %v29617_v19 = vld [vmem:[#allocation91_spill] sm:$0xff] }
 0xbaa   :  { %16411 = vst [vmem:[#allocation5 + $0x10] sm:$0xff] %v16347_v41  ;;  %v15445_v6 = vadd.f32 %v28052_v32, %v15303_v52  ;;  %16143 = vrot.lane.b32.xlu0 %v15507_v63, %s22618_s8  ;;  %v16223_v62 = vsel %vm36_vm3, %v841_v14, %v29586_v39  ;;  %v16289_v51 = vsel %vm16279_vm6, %v16224_v1, %v29587_v8  ;;  %v843_v35 = vmax.f32 %v779_v37, 0.0  ;;  %v29592_v41 = vld [vmem:[#allocation125_spill] sm:$0xff]  ;;  %v29606_v1 = vld [vmem:[#allocation26_spill] sm:$0xff] }
 0xbab   :  { %v15510_v44 = vmax.f32 %v15446_v33, 0.0  ;;  %v16034_v29 = vpop.permute.xlu1 %16033  ;;  %v782_v56 = vadd.f32 %v28167_v18, %v29588_v11  ;;  %v16288_v60 = vsel %vm16279_vm6, %v16223_v62, %v29589_v12  ;;  %v781_v50 = vadd.f32 %v28167_v18, %v29590_v57  ;;  %v29607_v62 = vld [vmem:[#allocation88_spill] sm:$0xff]  ;;  %v29608_v11 = vld [vmem:[#allocation27_spill] sm:$0xff]  ;;  %v29611_v57 = vld [vmem:[#allocation89_spill] sm:$0xff] }
 0xbac   :  { %v15509_v3 = vmax.f32 %v15445_v6, 0.0  ;;  %v16350_v32 = vsel %vm16344_vm7, %v16285_v42, %v16034_v29  ;;  %v16032_v4 = vpop.permute.xlu0 %16031  ;;  %v16226_v33 = vsel %vm36_vm3, %v844_v58, %v29591_v43  ;;  %v16225_v52 = vsel %vm36_vm3, %v843_v35, %v29592_v41 }
 0xbad   :  { %16414 = vst [vmem:[#allocation5 + $0x28] sm:$0xff] %v16350_v32  ;;  %v16349_v25 = vsel %vm16344_vm7, %v16284_v34, %v16032_v4  ;;  %16149 = vrot.lane.b32.xlu1 %v15510_v44, %s22618_s8  ;;  %v16291_v55 = vsel %vm16279_vm6, %v16226_v33, %v29593_v45  ;;  %v846_v26 = vmax.f32 %v782_v56, 0.0  ;;  %v16290_v42 = vsel %vm16279_vm6, %v16225_v52, %v29595_v15  ;;  %v29598_v4 = vld [vmem:[#allocation127_spill] sm:$0xff]  ;;  %v29612_v33 = vld [vmem:[#allocation28_spill] sm:$0xff]  ;;  %v29613_v52 = vld [vmem:[#allocation90_spill] sm:$0xff] }
 0xbae   :  { %16413 = vst [vmem:[#allocation5 + $0x20] sm:$0xff] %v16349_v25  ;;  %16147 = vrot.lane.b32.xlu0 %v15509_v3, %s22618_s8  ;;  %v845_v30 = vmax.f32 %v781_v50, 0.0  ;;  %v29597_v3 = vld [vmem:[#allocation126_spill] sm:$0xff]  ;;  %v786_v53 = vadd.f32 %v28167_v18, %v29600_v17  ;;  %v847_v5 = vmax.f32 %v783_v31, 0.0  ;;  %v785_v48 = vadd.f32 %v28167_v18, %v29602_v49  ;;  %v29620_v17 = vld [vmem:[#allocation31_spill] sm:$0xff]  ;;  %v29623_v49 = vld [vmem:[#allocation93_spill] sm:$0xff] }
 0xbaf   :  { %v16038_v40 = vpop.permute.xlu1 %16037  ;;  %v16228_v32 = vsel %vm36_vm3, %v846_v26, %v29597_v3  ;;  %v788_v39 = vadd.f32 %v28167_v18, %v29606_v1  ;;  %v787_v56 = vadd.f32 %v28167_v18, %v29608_v11  ;;  %v790_v41 = vadd.f32 %v28167_v18, %v29612_v33  ;;  %v29626_v1 = vld [vmem:[#allocation33_spill] sm:$0xff]  ;;  %v29629_v11 = vld [vmem:[#allocation95_spill] sm:$0xff]  ;;  %s16478_s8 = sshll.u32 %s22621_s5, 4  ;;  %s16479_s8 = int_to_ptr.vmem [resolvable:$true] %s16478_s8 }
 0xbb0   :  { %v16352_v24 = vsel %vm16344_vm7, %v16287_v9, %v16038_v40  ;;  %v16036_v54 = vpop.permute.xlu0 %16035  ;;  %v16227_v47 = vsel %vm36_vm3, %v845_v30, %v29598_v4  ;;  %v16293_v0 = vsel %vm16279_vm6, %v16228_v32, %v29599_v16  ;;  %v850_v23 = vmax.f32 %v786_v53, 0.0  ;;  %v29618_v32 = vld [vmem:[#allocation30_spill] sm:$0xff]  ;;  %v29632_v33 = vld [vmem:[#allocation35_spill] sm:$0xff]  ;;  %s22593_s1 = scalar_lea.vmem %s16479_s8, 8192  ;;  %p22598_p1 = scmp.lt.s32.totalorder %s16479_s8, %s16479_s8 }
 0xbb1   :  { %16416 = vst [vmem:[#allocation5 + $0x38] sm:$0xff] %v16352_v24  ;;  %v16351_v38 = vsel %vm16344_vm7, %v16286_v59, %v16036_v54  ;;  %v16292_v20 = vsel %vm16279_vm6, %v16227_v47, %v29601_v13  ;;  %v29603_v59 = vld [vmem:[#allocation128_spill] sm:$0xff]  ;;  %v29604_v54 = vld [vmem:[#allocation129_spill] sm:$0xff]  ;;  %v849_v58 = vmax.f32 %v785_v48, 0.0  ;;  %v852_v43 = vmax.f32 %v788_v39, 0.0  ;;  %p22594_p0 = scmp.ne.s32.totalorder %s16479_s8, %s22593_s1  ;;  %p22599_p2 = scmp.lt.s32.totalorder %s22593_s1, %s22593_s1 }
 0xbb2   :  { %16415 = vst [vmem:[#allocation5 + $0x30] sm:$0xff] %v16351_v38  ;;  %v16230_v24 = vsel %vm36_vm3, %v848_v27, %v29603_v59  ;;  %v16229_v14 = vsel %vm36_vm3, %v847_v5, %v29604_v54  ;;  %v851_v26 = vmax.f32 %v787_v56, 0.0  ;;  %v789_v28 = vadd.f32 %v28167_v18, %v29614_v36  ;;  %v29619_v47 = vld [vmem:[#allocation92_spill] sm:$0xff]  ;;  %v29635_v36 = vld [vmem:[#allocation97_spill] sm:$0xff] }
 0xbb3   :  { %v16042_v21 = vpop.permute.xlu1 %16041  ;;  %v16295_v37 = vsel %vm16279_vm6, %v16230_v24, %v29605_v7  ;;  %v16294_v8 = vsel %vm16279_vm6, %v16229_v14, %v29607_v62  ;;  %v854_v3 = vmax.f32 %v790_v41, 0.0  ;;  %v792_v4 = vadd.f32 %v28167_v18, %v29618_v32  ;;  %v29624_v24 = vld [vmem:[#allocation32_spill] sm:$0xff]  ;;  %v29625_v14 = vld [vmem:[#allocation94_spill] sm:$0xff]  ;;  %v29638_v32 = vld [vmem:[#allocation37_spill] sm:$0xff]  ;;  %p22600_p3 = por %p22599_p2, %p22598_p1 }
 0xbb4   :  { %v16354_v63 = vsel %vm16344_vm7, %v16289_v51, %v16042_v21  ;;  %v16040_v10 = vpop.permute.xlu0 %16039  ;;  %v853_v27 = vmax.f32 %v789_v28, 0.0  ;;  %v791_v53 = vadd.f32 %v28167_v18, %v29620_v17  ;;  %v794_v54 = vadd.f32 %v28167_v18, %v29624_v24  ;;  %v29641_v17 = vld [vmem:[#allocation99_spill] sm:$0xff] }
 0xbb5   :  { %16418 = vst [vmem:[#allocation5 + $0x48] sm:$0xff] %v16354_v63  ;;  %v16353_v2 = vsel %vm16344_vm7, %v16288_v60, %v16040_v10  ;;  %v29609_v60 = vld [vmem:[#allocation130_spill] sm:$0xff]  ;;  %v29610_v10 = vld [vmem:[#allocation131_spill] sm:$0xff]  ;;  %v856_v59 = vmax.f32 %v792_v4, 0.0  ;;  %v793_v39 = vadd.f32 %v28167_v18, %v29626_v1  ;;  %v795_v41 = vadd.f32 %v28167_v18, %v29632_v33  ;;  %p22601_p4 = pnand %p22600_p3, %p22594_p0 }
 0xbb6   :  { %16417 = vst [vmem:[#allocation5 + $0x40] sm:$0xff] %v16353_v2  ;;  %v16232_v63 = vsel %vm36_vm3, %v850_v23, %v29609_v60  ;;  %v16231_v35 = vsel %vm36_vm3, %v849_v58, %v29610_v10  ;;  %v855_v23 = vmax.f32 %v791_v53, 0.0  ;;  %v858_v60 = vmax.f32 %v794_v54, 0.0  ;;  %v29644_v54 = vld [vmem:[#allocation136_spill] sm:$0xff] }
 0xbb7   :  { %v16046_v6 = vpop.permute.xlu1 %16045  ;;  %v16297_v50 = vsel %vm16279_vm6, %v16232_v63, %v29611_v57  ;;  %v16296_v45 = vsel %vm16279_vm6, %v16231_v35, %v29613_v52  ;;  %v29630_v63 = vld [vmem:[#allocation34_spill] sm:$0xff]  ;;  %v29631_v35 = vld [vmem:[#allocation96_spill] sm:$0xff]  ;;  %v797_v4 = vadd.f32 %v28167_v18, %v29638_v32 }
 0xbb8   :  { %v16356_v44 = vsel %vm16344_vm7, %v16291_v55, %v16046_v6  ;;  %v16044_v29 = vpop.permute.xlu0 %16043  ;;  %v796_v10 = vadd.f32 %v28167_v18, %v29630_v63  ;;  %v29649_v63 = vld [vmem:[#allocation105_spill] sm:$0xff] }
 0xbb9   :  { %16420 = vst [vmem:[#allocation5 + $0x58] sm:$0xff] %v16356_v44  ;;  %v16355_v34 = vsel %vm16344_vm7, %v16290_v42, %v16044_v29  ;;  %v29615_v42 = vld [vmem:[#allocation132_spill] sm:$0xff]  ;;  %v29616_v29 = vld [vmem:[#allocation133_spill] sm:$0xff] }
 0xbba   :  { %16419 = vst [vmem:[#allocation5 + $0x50] sm:$0xff] %v16355_v34  ;;  %v16234_v44 = vsel %vm36_vm3, %v852_v43, %v29615_v42  ;;  %v16233_v30 = vsel %vm36_vm3, %v851_v26, %v29616_v29  ;;  %v857_v43 = vmax.f32 %v793_v39, 0.0  ;;  %v860_v42 = vmax.f32 %v796_v10, 0.0 }
 0xbbb   :  { %v16050_v25 = vpop.permute.xlu1 %16049  ;;  %v16299_v31 = vsel %vm16279_vm6, %v16234_v44, %v29617_v19  ;;  %v16298_v16 = vsel %vm16279_vm6, %v16233_v30, %v29619_v47  ;;  %v29636_v44 = vld [vmem:[#allocation36_spill] sm:$0xff]  ;;  %v29637_v30 = vld [vmem:[#allocation98_spill] sm:$0xff] }
 0xbbc   :  { %v16358_v9 = vsel %vm16344_vm7, %v16293_v0, %v16050_v25  ;;  %v16048_v40 = vpop.permute.xlu0 %16047  ;;  %v798_v29 = vadd.f32 %v28167_v18, %v29636_v44  ;;  %v29655_v44 = vld [vmem:[#allocation113_spill] sm:$0xff] }
 0xbbd   :  { %16422 = vst [vmem:[#allocation5 + $0x68] sm:$0xff] %v16358_v9  ;;  %v16357_v22 = vsel %vm16344_vm7, %v16292_v20, %v16048_v40  ;;  %v29621_v20 = vld [vmem:[#allocation134_spill] sm:$0xff]  ;;  %v29622_v40 = vld [vmem:[#allocation72_spill] sm:$0xff] }
 0xbbe   :  { %16421 = vst [vmem:[#allocation5 + $0x60] sm:$0xff] %v16357_v22  ;;  %v16236_v9 = vsel %vm36_vm3, %v854_v3, %v29621_v20  ;;  %v16235_v5 = vsel %vm36_vm3, %v853_v27, %v29622_v40  ;;  %v859_v3 = vmax.f32 %v795_v41, 0.0  ;;  %v862_v20 = vmax.f32 %v798_v29, 0.0 }
 0xbbf   :  { %v16054_v38 = vpop.permute.xlu1 %16053  ;;  %v16301_v48 = vsel %vm16279_vm6, %v16236_v9, %v29623_v49  ;;  %v16300_v7 = vsel %vm16279_vm6, %v16235_v5, %v29625_v14  ;;  %v29642_v9 = vld [vmem:[#allocation100_spill] sm:$0xff] }
 0xbc0   :  { %v16360_v51 = vsel %vm16344_vm7, %v16295_v37, %v16054_v38  ;;  %v16052_v21 = vpop.permute.xlu0 %16051 }
 0xbc1   :  { %16424 = vst [vmem:[#allocation5 + $0x78] sm:$0xff] %v16360_v51  ;;  %v16359_v12 = vsel %vm16344_vm7, %v16294_v8, %v16052_v21  ;;  %v29627_v8 = vld [vmem:[#allocation73_spill] sm:$0xff]  ;;  %v29628_v21 = vld [vmem:[#allocation74_spill] sm:$0xff] }
 0xbc2   :  { %16423 = vst [vmem:[#allocation5 + $0x70] sm:$0xff] %v16359_v12  ;;  %v16238_v51 = vsel %vm36_vm3, %v856_v59, %v29627_v8  ;;  %v16237_v58 = vsel %vm36_vm3, %v855_v23, %v29628_v21  ;;  %v29643_v59 = vld [vmem:[#allocation135_spill] sm:$0xff]  ;;  %v29646_v23 = vld [vmem:[#allocation102_spill] sm:$0xff] }
 0xbc3   :  { %v16058_v2 = vpop.permute.xlu1 %16057  ;;  %v16303_v56 = vsel %vm16279_vm6, %v16238_v51, %v29629_v11  ;;  %v16302_v57 = vsel %vm16279_vm6, %v16237_v58, %v29631_v35  ;;  %v16244_v24 = vsel %vm36_vm3, %v862_v20, %v29643_v59  ;;  %v29647_v21 = vld [vmem:[#allocation103_spill] sm:$0xff]  ;;  %v29663_v59 = vld [vmem:[#allocation45_spill] sm:$0xff] }
 0xbc4   :  { %v16362_v55 = vsel %vm16344_vm7, %v16297_v50, %v16058_v2  ;;  %v16056_v6 = vpop.permute.xlu0 %16055 }
 0xbc5   :  { %16426 = vst [vmem:[#allocation5 + $0x88] sm:$0xff] %v16362_v55  ;;  %v16361_v15 = vsel %vm16344_vm7, %v16296_v45, %v16056_v6  ;;  %v29633_v45 = vld [vmem:[#allocation75_spill] sm:$0xff]  ;;  %v29634_v6 = vld [vmem:[#allocation76_spill] sm:$0xff] }
 0xbc6   :  { %16425 = vst [vmem:[#allocation5 + $0x80] sm:$0xff] %v16361_v15  ;;  %v16240_v55 = vsel %vm36_vm3, %v858_v60, %v29633_v45  ;;  %v16239_v26 = vsel %vm36_vm3, %v857_v43, %v29634_v6  ;;  %v29651_v43 = vld [vmem:[#allocation107_spill] sm:$0xff]  ;;  %v29653_v6 = vld [vmem:[#allocation109_spill] sm:$0xff] }
 0xbc7   :  { %v16062_v34 = vpop.permute.xlu1 %16061  ;;  %v16305_v28 = vsel %vm16279_vm6, %v16240_v55, %v29635_v36  ;;  %v16304_v19 = vsel %vm16279_vm6, %v16239_v26, %v29637_v30 }
 0xbc8   :  { %v16364_v0 = vsel %vm16344_vm7, %v16299_v31, %v16062_v34  ;;  %v16060_v25 = vpop.permute.xlu0 %16059 }
 0xbc9   :  { %16428 = vst [vmem:[#allocation5 + $0x98] sm:$0xff] %v16364_v0  ;;  %v16363_v13 = vsel %vm16344_vm7, %v16298_v16, %v16060_v25  ;;  %v29639_v16 = vld [vmem:[#allocation77_spill] sm:$0xff]  ;;  %v29640_v25 = vld [vmem:[#allocation78_spill] sm:$0xff] }
 0xbca   :  { %16427 = vst [vmem:[#allocation5 + $0x90] sm:$0xff] %v16363_v13  ;;  %v16242_v0 = vsel %vm36_vm3, %v860_v42, %v29639_v16  ;;  %v16241_v27 = vsel %vm36_vm3, %v859_v3, %v29640_v25  ;;  %v29657_v3 = vld [vmem:[#allocation39_spill] sm:$0xff]  ;;  %v29659_v25 = vld [vmem:[#allocation41_spill] sm:$0xff] }
 0xbcb   :  { %v16066_v22 = vpop.permute.xlu1 %16065  ;;  %v16307_v53 = vsel %vm16279_vm6, %v16242_v0, %v29641_v17  ;;  %v16306_v40 = vsel %vm16279_vm6, %v16241_v27, %v29642_v9  ;;  %v29661_v9 = vld [vmem:[#allocation43_spill] sm:$0xff] }
 0xbcc   :  { %v16366_v37 = vsel %vm16344_vm7, %v16301_v48, %v16066_v22  ;;  %v16064_v38 = vpop.permute.xlu0 %16063  ;;  %v861_v48 = vmax.f32 %v797_v4, 0.0 }
 0xbcd   :  { %16430 = vst [vmem:[#allocation5 + $0xa8] sm:$0xff] %v16366_v37  ;;  %v16365_v62 = vsel %vm16344_vm7, %v16300_v7, %v16064_v38  ;;  %v29645_v7 = vld [vmem:[#allocation101_spill] sm:$0xff] }
 0xbce   :  { %16429 = vst [vmem:[#allocation5 + $0xa0] sm:$0xff] %v16365_v62  ;;  %v16243_v14 = vsel %vm36_vm3, %v861_v48, %v29644_v54  ;;  %v16309_v37 = vsel %vm16279_vm6, %v16244_v24, %v29645_v7 }
 0xbcf   :  { %v16070_v12 = vpop.permute.xlu1 %16069  ;;  %v16308_v1 = vsel %vm16279_vm6, %v16243_v14, %v29646_v23  ;;  %v29664_v14 = vld [vmem:[#allocation46_spill] sm:$0xff] }
 0xbd0   :  { %v16368_v50 = vsel %vm16344_vm7, %v16303_v56, %v16070_v12  ;;  %v16068_v2 = vpop.permute.xlu0 %16067  ;;  %v29648_v56 = vld [vmem:[#allocation104_spill] sm:$0xff] }
 0xbd1   :  { %16432 = vst [vmem:[#allocation5 + $0xb8] sm:$0xff] %v16368_v50  ;;  %v16367_v52 = vsel %vm16344_vm7, %v16302_v57, %v16068_v2  ;;  %v29650_v57 = vld [vmem:[#allocation106_spill] sm:$0xff] }
 0xbd2   :  { %16431 = vst [vmem:[#allocation5 + $0xb0] sm:$0xff] %v16367_v52  ;;  %v29652_v52 = vld [vmem:[#allocation108_spill] sm:$0xff] }
 0xbd3   :  { %v16074_v15 = vpop.permute.xlu1 %16073 }
 0xbd4   :  { %v16370_v31 = vsel %vm16344_vm7, %v16305_v28, %v16074_v15  ;;  %v16072_v34 = vpop.permute.xlu0 %16071  ;;  %v29654_v28 = vld [vmem:[#allocation112_spill] sm:$0xff] }
 0xbd5   :  { %16434 = vst [vmem:[#allocation5 + $0xc8] sm:$0xff] %v16370_v31  ;;  %v16369_v47 = vsel %vm16344_vm7, %v16304_v19, %v16072_v34  ;;  %v29656_v19 = vld [vmem:[#allocation38_spill] sm:$0xff] }
 0xbd6   :  { %16433 = vst [vmem:[#allocation5 + $0xc0] sm:$0xff] %v16369_v47  ;;  %v29658_v47 = vld [vmem:[#allocation40_spill] sm:$0xff] }
 0xbd7   :  { %v16078_v13 = vpop.permute.xlu1 %16077 }
 0xbd8   :  { %v16372_v5 = vsel %vm16344_vm7, %v16307_v53, %v16078_v13  ;;  %v16076_v49 = vpop.permute.xlu0 %16075  ;;  %v29660_v53 = vld [vmem:[#allocation42_spill] sm:$0xff] }
 0xbd9   :  { %16436 = vst [vmem:[#allocation5 + $0xd8] sm:$0xff] %v16372_v5  ;;  %v16371_v22 = vsel %vm16344_vm7, %v16306_v40, %v16076_v49  ;;  %v29662_v49 = vld [vmem:[#allocation44_spill] sm:$0xff] }
 0xbda   :  { %16435 = vst [vmem:[#allocation5 + $0xd0] sm:$0xff] %v16371_v22 }
 0xbdb   :  { %v16082_v38 = vpop.permute.xlu1 %16081 }
 0xbdc   :  { %v16374_v39 = vsel %vm16344_vm7, %v16309_v37, %v16082_v38  ;;  %v16080_v62 = vpop.permute.xlu0 %16079  ;;  %v29665_v38 = vld [vmem:[#allocation47_spill] sm:$0xff] }
 0xbdd   :  { %16438 = vst [vmem:[#allocation5 + $0xe8] sm:$0xff] %v16374_v39  ;;  %v16373_v8 = vsel %vm16344_vm7, %v16308_v1, %v16080_v62  ;;  %v29666_v39 = vld [vmem:[#allocation48_spill] sm:$0xff] }
 0xbde   :  { %16437 = vst [vmem:[#allocation5 + $0xe0] sm:$0xff] %v16373_v8 }
 0xbdf   :  { %v16086_v51 = vpop.permute.xlu1 %16085 }
 0xbe0   :  { %v16376_v58 = vsel %vm16344_vm7, %v29647_v21, %v16086_v51  ;;  %v16084_v11 = vpop.permute.xlu0 %16083  ;;  %v29667_v51 = vld [vmem:[#allocation49_spill] sm:$0xff] }
 0xbe1   :  { %16440 = vst [vmem:[#allocation5 + $0xf8] sm:$0xff] %v16376_v58  ;;  %v16375_v12 = vsel %vm16344_vm7, %v29648_v56, %v16084_v11  ;;  %v29668_v11 = vld [vmem:[#allocation50_spill] sm:$0xff] }
 0xbe2   :  { %16439 = vst [vmem:[#allocation5 + $0xf0] sm:$0xff] %v16375_v12 }
 0xbe3   :  { %v16090_v60 = vpop.permute.xlu1 %16089 }
 0xbe4   :  { %v16378_v10 = vsel %vm16344_vm7, %v29649_v63, %v16090_v60  ;;  %v16088_v35 = vpop.permute.xlu0 %16087  ;;  %v29669_v60 = vld [vmem:[#allocation51_spill] sm:$0xff] }
 0xbe5   :  { %16442 = vst [vmem:[#allocation5 + $0x108] sm:$0xff] %v16378_v10  ;;  %v16377_v50 = vsel %vm16344_vm7, %v29650_v57, %v16088_v35  ;;  %v29670_v35 = vld [vmem:[#allocation52_spill] sm:$0xff] }
 0xbe6   :  { %16441 = vst [vmem:[#allocation5 + $0x100] sm:$0xff] %v16377_v50 }
 0xbe7   :  { %v16094_v2 = vpop.permute.xlu1 %16093 }
 0xbe8   :  { %v16380_v33 = vsel %vm16344_vm7, %v29651_v43, %v16094_v2  ;;  %v16092_v41 = vpop.permute.xlu0 %16091  ;;  %v29671_v2 = vld [vmem:[#allocation53_spill] sm:$0xff] }
 0xbe9   :  { %16444 = vst [vmem:[#allocation5 + $0x118] sm:$0xff] %v16380_v33  ;;  %v16379_v45 = vsel %vm16344_vm7, %v29652_v52, %v16092_v41  ;;  %v29672_v41 = vld [vmem:[#allocation54_spill] sm:$0xff] }
 0xbea   :  { %16443 = vst [vmem:[#allocation5 + $0x110] sm:$0xff] %v16379_v45 }
 0xbeb   :  { %v16098_v55 = vpop.permute.xlu1 %16097 }
 0xbec   :  { %v16382_v26 = vsel %vm16344_vm7, %v29653_v6, %v16098_v55  ;;  %v16096_v36 = vpop.permute.xlu0 %16095  ;;  %v29673_v55 = vld [vmem:[#allocation55_spill] sm:$0xff] }
 0xbed   :  { %16446 = vst [vmem:[#allocation5 + $0x128] sm:$0xff] %v16382_v26  ;;  %v16381_v15 = vsel %vm16344_vm7, %v29654_v28, %v16096_v36  ;;  %v29674_v36 = vld [vmem:[#allocation56_spill] sm:$0xff] }
 0xbee   :  { %16445 = vst [vmem:[#allocation5 + $0x120] sm:$0xff] %v16381_v15 }
 0xbef   :  { %v16102_v42 = vpop.permute.xlu1 %16101 }
 0xbf0   :  { %v16384_v29 = vsel %vm16344_vm7, %v29655_v44, %v16102_v42  ;;  %v16100_v30 = vpop.permute.xlu0 %16099  ;;  %v29675_v42 = vld [vmem:[#allocation70_spill] sm:$0xff] }
 0xbf1   :  { %16448 = vst [vmem:[#allocation5 + $0x138] sm:$0xff] %v16384_v29  ;;  %v16383_v31 = vsel %vm16344_vm7, %v29656_v19, %v16100_v30  ;;  %v832_v44 = vadd.f32 %v28167_v18, %v29675_v42  ;;  %v29676_v29 = vld [vmem:[#allocation57_spill] sm:$0xff] }
 0xbf2   :  { %16447 = vst [vmem:[#allocation5 + $0x130] sm:$0xff] %v16383_v31  ;;  %v29677_v31 = vld [vmem:[#allocation71_spill] sm:$0xff] }
 0xbf3   :  { %v16106_v34 = vpop.permute.xlu1 %16105 }
 0xbf4   :  { %v16386_v32 = vsel %vm16344_vm7, %v29657_v3, %v16106_v34  ;;  %v16104_v4 = vpop.permute.xlu0 %16103  ;;  %v831_v34 = vadd.f32 %v28167_v18, %v29677_v31  ;;  %v29678_v3 = vld [vmem:[#allocation58_spill] sm:$0xff] }
 0xbf5   :  { %16450 = vst [vmem:[#allocation5 + $0x148] sm:$0xff] %v16386_v32  ;;  %v16385_v16 = vsel %vm16344_vm7, %v29658_v47, %v16104_v4  ;;  %v896_v47 = vmax.f32 %v832_v44, 0.0 }
 0xbf6   :  { %16449 = vst [vmem:[#allocation5 + $0x140] sm:$0xff] %v16385_v16  ;;  %v29679_v16 = vld [vmem:[#allocation59_spill] sm:$0xff] }
 0xbf7   :  { %v16110_v0 = vpop.permute.xlu1 %16109 }
 0xbf8   :  { %v16388_v27 = vsel %vm16344_vm7, %v29659_v25, %v16110_v0  ;;  %v16108_v17 = vpop.permute.xlu0 %16107 }
 0xbf9   :  { %16452 = vst [vmem:[#allocation5 + $0x158] sm:$0xff] %v16388_v27  ;;  %v16387_v13 = vsel %vm16344_vm7, %v29660_v53, %v16108_v17  ;;  %v895_v27 = vmax.f32 %v831_v34, 0.0  ;;  %v29680_v17 = vld [vmem:[#allocation60_spill] sm:$0xff] }
 0xbfa   :  { %16451 = vst [vmem:[#allocation5 + $0x150] sm:$0xff] %v16387_v13  ;;  %v29681_v13 = vld [vmem:[#allocation137_spill] sm:$0xff] }
 0xbfb   :  { %v16114_v20 = vpop.permute.xlu1 %16113  ;;  %v16278_v18 = vsel %vm36_vm3, %v896_v47, %v29681_v13 }
 0xbfc   :  { %v16390_v40 = vsel %vm16344_vm7, %v29661_v9, %v16114_v20  ;;  %v16112_v5 = vpop.permute.xlu0 %16111  ;;  %v29682_v20 = vld [vmem:[#allocation138_spill] sm:$0xff] }
 0xbfd   :  { %16454 = vst [vmem:[#allocation5 + $0x168] sm:$0xff] %v16390_v40  ;;  %v16389_v48 = vsel %vm16344_vm7, %v29662_v49, %v16112_v5  ;;  %v16277_v9 = vsel %vm36_vm3, %v895_v27, %v29682_v20  ;;  %v16343_v40 = vsel %vm16279_vm6, %v16278_v18, %v28179_v61 }
 0xbfe   :  { %16453 = vst [vmem:[#allocation5 + $0x160] sm:$0xff] %v16389_v48  ;;  %v16342_v49 = vsel %vm16279_vm6, %v16277_v9, %v28181_v46 }
 0xbff   :  { %v16118_v22 = vpop.permute.xlu1 %16117 }
 0xc00   :  { %v16392_v24 = vsel %vm16344_vm7, %v29663_v59, %v16118_v22  ;;  %v16116_v54 = vpop.permute.xlu0 %16115 }
 0xc01   :  { %16456 = vst [vmem:[#allocation5 + $0x178] sm:$0xff] %v16392_v24  ;;  %v16391_v7 = vsel %vm16344_vm7, %v29664_v14, %v16116_v54 }
 0xc02   :  { %16455 = vst [vmem:[#allocation5 + $0x170] sm:$0xff] %v16391_v7 }
 0xc03   :  { %v16122_v37 = vpop.permute.xlu1 %16121 }
 0xc04   :  { %v16394_v23 = vsel %vm16344_vm7, %v29665_v38, %v16122_v37  ;;  %v16120_v1 = vpop.permute.xlu0 %16119 }
 0xc05   :  { %16458 = vst [vmem:[#allocation5 + $0x188] sm:$0xff] %v16394_v23  ;;  %v16393_v62 = vsel %vm16344_vm7, %v29666_v39, %v16120_v1 }
 0xc06   :  { %16457 = vst [vmem:[#allocation5 + $0x180] sm:$0xff] %v16393_v62 }
 0xc07   :  { %v16126_v8 = vpop.permute.xlu1 %16125 }
 0xc08   :  { %v16396_v21 = vsel %vm16344_vm7, %v29667_v51, %v16126_v8  ;;  %v16124_v58 = vpop.permute.xlu0 %16123 }
 0xc09   :  { %16460 = vst [vmem:[#allocation5 + $0x198] sm:$0xff] %v16396_v21  ;;  %v16395_v56 = vsel %vm16344_vm7, %v29668_v11, %v16124_v58 }
 0xc0a   :  { %16459 = vst [vmem:[#allocation5 + $0x190] sm:$0xff] %v16395_v56 }
 0xc0b   :  { %v16130_v12 = vpop.permute.xlu1 %16129 }
 0xc0c   :  { %v16398_v63 = vsel %vm16344_vm7, %v29669_v60, %v16130_v12  ;;  %v16128_v10 = vpop.permute.xlu0 %16127 }
 0xc0d   :  { %16462 = vst [vmem:[#allocation5 + $0x1a8] sm:$0xff] %v16398_v63  ;;  %v16397_v57 = vsel %vm16344_vm7, %v29670_v35, %v16128_v10 }
 0xc0e   :  { %16461 = vst [vmem:[#allocation5 + $0x1a0] sm:$0xff] %v16397_v57 }
 0xc0f   :  { %v16134_v50 = vpop.permute.xlu1 %16133 }
 0xc10   :  { %v16400_v43 = vsel %vm16344_vm7, %v29671_v2, %v16134_v50  ;;  %v16132_v33 = vpop.permute.xlu0 %16131 }
 0xc11   :  { %16464 = vst [vmem:[#allocation5 + $0x1b8] sm:$0xff] %v16400_v43  ;;  %v16399_v52 = vsel %vm16344_vm7, %v29672_v41, %v16132_v33 }
 0xc12   :  { %16463 = vst [vmem:[#allocation5 + $0x1b0] sm:$0xff] %v16399_v52 }
 0xc13   :  { %v16138_v45 = vpop.permute.xlu1 %16137 }
 0xc14   :  { %v16402_v6 = vsel %vm16344_vm7, %v29673_v55, %v16138_v45  ;;  %v16136_v26 = vpop.permute.xlu0 %16135 }
 0xc15   :  { %16466 = vst [vmem:[#allocation5 + $0x1c8] sm:$0xff] %v16402_v6  ;;  %v16401_v28 = vsel %vm16344_vm7, %v29674_v36, %v16136_v26 }
 0xc16   :  { %16465 = vst [vmem:[#allocation5 + $0x1c0] sm:$0xff] %v16401_v28 }
 0xc17   :  { %v16142_v15 = vpop.permute.xlu1 %16141 }
 0xc18   :  { %v16404_v30 = vsel %vm16344_vm7, %v29676_v29, %v16142_v15  ;;  %v16140_v19 = vpop.permute.xlu0 %16139 }
 0xc19   :  { %16468 = vst [vmem:[#allocation5 + $0x1d8] sm:$0xff] %v16404_v30  ;;  %v16403_v32 = vsel %vm16344_vm7, %v29678_v3, %v16140_v19 }
 0xc1a   :  { %16467 = vst [vmem:[#allocation5 + $0x1d0] sm:$0xff] %v16403_v32 }
 0xc1b   :  { %v16146_v4 = vpop.permute.xlu1 %16145 }
 0xc1c   :  { %v16406_v0 = vsel %vm16344_vm7, %v29679_v16, %v16146_v4  ;;  %v16144_v25 = vpop.permute.xlu0 %16143 }
 0xc1d   :  { %16470 = vst [vmem:[#allocation5 + $0x1e8] sm:$0xff] %v16406_v0  ;;  %v16405_v53 = vsel %vm16344_vm7, %v29680_v17, %v16144_v25 }
 0xc1e   :  { %16469 = vst [vmem:[#allocation5 + $0x1e0] sm:$0xff] %v16405_v53 }
 0xc1f   :  { %v16150_v5 = vpop.permute.xlu1 %16149 }
 0xc20   :  { %v16408_v48 = vsel %vm16344_vm7, %v16343_v40, %v16150_v5  ;;  %v16148_v22 = vpop.permute.xlu0 %16147 }
 0xc21   :  { %16472 = vst [vmem:[#allocation5 + $0x1f8] sm:$0xff] %v16408_v48  ;;  %v16407_v59 = vsel %vm16344_vm7, %v16342_v49, %v16148_v22 }
 0xc22   :  { %16471 = vst [vmem:[#allocation5 + $0x1f0] sm:$0xff] %v16407_v59 }
 0xc23   :  { %22604 = shalt.err (!%p22601_p4)
}
 0xc24   :  { %s22605_s6 = scalar_lea.hbm %s28501_s10, 8192 }
 0xc25   :  { %p22606_p5 = scmp.ne.s32.totalorder %s28501_s10, %s22605_s6  ;;  %p22609_p6 = scmp.lt.u32.totalorder %s22605_s6, %s28501_s10 }
 0xc27   :  { %p22611_p7 = pnand %p22609_p6, %p22606_p5 }
 0xc29   :  { %22614 = shalt.err (!%p22611_p7)
}
 0xc2a   :  { %s22622_s19 = smov 128   ;;  %s22623_s20 = smov 8  }
 0xc2b   :  { %16484 = dma.vmem_to_hbm [thread:$0]  %s16479_s8, 8192, %s28501_s10, [#allocation6], %s22622_s19, %s22622_s19, %s22623_s20  }
 0xc2c   :  { %22615 = dma.done.wait [#allocation6], 8192  }
 0xc2d   :  { %22616 = vsyncadd [#allocation6], 4294959104 }
 0xc2e   :  { %16488 = vsyncpa [#allocation6], 1 }

</bundles_post_ra>
